<compile_context>
chip_gen: v7x
topology: tpu7x:2x2x1
jax: 0.10.0
libtpu: 0.0.40
codegen_flags: <defaults>
</compile_context>

<pallas_src>
import functools

import numpy as np
import jax
import jax.numpy as jnp
from jax.experimental import pallas as pl
from jax.experimental.pallas import tpu as pltpu

LANE = 128  # TPU vreg lane width; only weight OUTPUT dims are padded to this.


def _round_up(x, m):
    return ((x + m - 1) // m) * m


def _pad_cols(w, cols):
    return jnp.pad(w, ((0, 0), (0, cols - w.shape[1])))


# ----------------------------------------------------------------------------
# Fused attention kernel (one batch-tile of `bt` sequences per grid step)
# ----------------------------------------------------------------------------

def _attention_kernel(q_ref, k_ref, wq_ref, bq_ref, wkv_ref, bkv_ref, *rest,
                      hp, proj_values, mask_mode, with_alphas):
    """q_ref: (bt, Lq, din)  k_ref: (bt, Lk, din)   (din = input_dim, unpadded)
       wq: (din, hp) with 1/sqrt(d_k) folded in, bq: (1, hp)
       wkv: (din, hp) or (din, 2*hp) (K|V fused), bkv matching.
       outputs: ctx (bt, Lq, hp or din) [+ alphas (bt, Lq, Lk)]."""
    if mask_mode == "explicit":
        mask_ref, rest = rest[0], rest[1:]
    if with_alphas:
        ctx_ref, alphas_ref = rest
    else:
        (ctx_ref,) = rest

    bt, lq, din = q_ref.shape
    _, lk, _ = k_ref.shape

    # Flatten (batch, seq) to rows -> one fat (bt*L, din) @ (din, hp·k) MXU
    # matmul per operand.  Only major dims are merged -> layout no-op.
    q2 = q_ref[...].reshape(bt * lq, din)
    k2 = k_ref[...].reshape(bt * lk, din)

    # 1/sqrt(d_k) is already folded into wq/bq (free inside the MXU).
    proj_q = (jnp.dot(q2, wq_ref[...], preferred_element_type=jnp.float32)
              + bq_ref[...]).reshape(bt, lq, hp)
    kv = (jnp.dot(k2, wkv_ref[...], preferred_element_type=jnp.float32)
          + bkv_ref[...])
    if proj_values:
        proj_k = kv[:, :hp].reshape(bt, lk, hp)
        values = kv[:, hp:].reshape(bt, lk, hp)
    else:
        proj_k = kv.reshape(bt, lk, hp)
        values = k_ref[...]                      # proj_values=False: values = keys

    # scores = (Q / sqrt(d_k)) K^T  (contract last dims; no transpose copy).
    scores = jnp.einsum("bqh,bkh->bqk", proj_q, proj_k,
                        preferred_element_type=jnp.float32)

    if mask_mode == "causal":
        # Single 2-D comparison, broadcast over batch in the where.
        row = jax.lax.broadcasted_iota(jnp.int32, (lq, lk), 0)
        col = jax.lax.broadcasted_iota(jnp.int32, (lq, lk), 1)
        scores = jnp.where((col <= row)[None, :, :], scores, -1e9)
    elif mask_mode == "explicit":
        scores = jnp.where(mask_ref[...] == 0.0, -1e9, scores)  # broadcasts over bt

    # Softmax with f32 stats.  Exact division: alphas mirrors the module's
    # user-visible self.alphas (approx reciprocal would drift ~1e-3).
    m = jnp.max(scores, axis=-1, keepdims=True)
    p = jnp.exp(scores - m)
    l = jnp.sum(p, axis=-1, keepdims=True)
    alphas = p / l

    if with_alphas:
        alphas_ref[...] = alphas
    ctx_ref[...] = jnp.einsum("bqk,bkh->bqh", alphas.astype(values.dtype),
                              values, preferred_element_type=jnp.float32
                              ).astype(ctx_ref.dtype)


# ----------------------------------------------------------------------------
# Batch-tile selection
# ----------------------------------------------------------------------------

def _choose_batch_tile(B, Lq, Lk, hp, din, itemsize):
    """Largest batch tile that fits a conservative VMEM budget, preferring an
    even grid count >= 2 so both v7x TensorCores get equal work (the extra
    grid step is ~0.35us noise on single-TC v5e/v6e)."""
    cands = [d for d in range(1, B + 1) if B % d == 0]

    def est_bytes(bt):
        rows = bt * max(Lq, Lk)
        return (4 * bt * Lq * Lk * 3                 # scores + exp + alphas (f32)
                + 4 * rows * hp * 3                  # proj_q + proj_k(+values)
                + itemsize * bt * (Lq + Lk) * din    # activation tiles
                ) * 2                                # double-buffering headroom

    budget = 10 * 1024 * 1024
    fitting = [d for d in cands if est_bytes(d) <= budget] or [1]
    even = [d for d in fitting if (B // d) >= 2 and (B // d) % 2 == 0]
    return max(even) if even else max(fitting)


# ----------------------------------------------------------------------------
# Wrapper (init_keys + forward of the PyTorch module, fused)
# ----------------------------------------------------------------------------

def attention_pallas(query, keys, params, *, mask=None, causal=False,
                     return_alphas=True):
    """query: (B, Lq, input_dim), keys: (B, Lk, input_dim).
    mask: optional array broadcastable to (B, Lq, Lk); entries == 0 are filled
    with -1e9 before the softmax (PyTorch masked_fill).  causal=True generates
    the lower-triangular mask in-kernel (no mask DMA; needs Lq==Lk).
    Returns (context, alphas) (or just context if return_alphas=False)."""
    assert not (causal and mask is not None), "pass either causal=True or a mask"
    B, Lq, din = query.shape
    Bk, Lk, dink = keys.shape
    assert Bk == B and din == params["input_dim"] and dink == din
    if causal:
        assert Lq == Lk

    hp = params["hp"]
    pv = params["proj_values"]
    cdt = params["compute_dtype"]
    ctx_w = hp if pv else din
    out_dim = params["hidden_dim"] if pv else din

    # Activations stay UNPADDED (a block last-dim equal to the array dim is
    # legal): no zero-pad HBM write + re-read for tiny input_dim.
    q = query.astype(cdt)
    k = keys.astype(cdt)

    bt = _choose_batch_tile(B, Lq, Lk, hp, din, np.dtype(cdt).itemsize)
    grid = (B // bt,)

    mask_mode = "causal" if causal else ("explicit" if mask is not None else "none")

    def _rep(shape):
        n = len(shape)
        return pl.BlockSpec(shape, lambda b: (0,) * n)   # grid-invariant operand

    in_specs = [
        pl.BlockSpec((bt, Lq, din), lambda b: (b, 0, 0)),
        pl.BlockSpec((bt, Lk, din), lambda b: (b, 0, 0)),
        _rep(params["wq"].shape), _rep(params["bq"].shape),
        _rep(params["wkv"].shape), _rep(params["bkv"].shape),
    ]
    operands = [q, k, params["wq"], params["bq"], params["wkv"], params["bkv"]]

    if mask_mode == "explicit":
        m = jnp.asarray(mask)
        if m.ndim == 2:
            m = m[None]
        mb = m.shape[0]
        assert mb in (1, B)
        # Keep the mask at its natural batch extent (usually 1): no B-times
        # broadcast materialized in HBM; jnp.where broadcasts in-kernel.
        m = jnp.broadcast_to(m, (mb, Lq, Lk)).astype(jnp.float32)
        if mb == 1:
            in_specs.append(pl.BlockSpec((1, Lq, Lk), lambda b: (0, 0, 0)))
        else:
            in_specs.append(pl.BlockSpec((bt, Lq, Lk), lambda b: (b, 0, 0)))
        operands.append(m)

    out_shapes = [jax.ShapeDtypeStruct((B, Lq, ctx_w), jnp.float32)]
    out_specs = [pl.BlockSpec((bt, Lq, ctx_w), lambda b: (b, 0, 0))]
    if return_alphas:
        # Lane-dense alphas stores when Lk % 128 == 0 (demo uses L=128).
        # TODO(synk): for Lk % 128 != 0, store alphas flattened to (bt, Lq*Lk).
        out_shapes.append(jax.ShapeDtypeStruct((B, Lq, Lk), jnp.float32))
        out_specs.append(pl.BlockSpec((bt, Lq, Lk), lambda b: (b, 0, 0)))

    kernel = functools.partial(_attention_kernel, hp=hp, proj_values=pv,
                               mask_mode=mask_mode, with_alphas=return_alphas)

    outs = pl.pallas_call(
        kernel,
        out_shape=tuple(out_shapes),
        grid=grid,
        in_specs=in_specs,
        out_specs=tuple(out_specs),
        compiler_params=pltpu.CompilerParams(
            dimension_semantics=("parallel",),
            vmem_limit_bytes=32 * 1024 * 1024,   # raises v5e's 16 MiB default
        ),
    )(*operands)

    ctx = outs[0][:, :, :out_dim] if pv else outs[0]
    if return_alphas:
        return ctx, outs[1]
    return ctx


# ----------------------------------------------------------------------------
# Parameters: the module's hard-coded nn.Linear weights, pre-transposed,
# output-dim lane-padded, K|V fused, 1/sqrt(d_k) folded into Q.
# ----------------------------------------------------------------------------

def make_attention_params(hidden_dim=2, input_dim=2, proj_values=False,
                          compute_dtype=jnp.float32):
    Wq = jnp.array([[0.0798, 0.4151], [-0.0994, 0.1561]], jnp.float32)   # (out, in)
    bq = jnp.array([-0.2548, 0.3911], jnp.float32)
    Wk = jnp.array([[-0.3068, -0.4800], [-0.4578, -0.1488]], jnp.float32)
    bk = jnp.array([0.3407, 0.4099], jnp.float32)
    Wv = jnp.array([[-0.2710, -0.6198], [0.4265, -0.3488]], jnp.float32)
    bv = jnp.array([-0.3975, -0.1983], jnp.float32)
    assert Wq.shape == (hidden_dim, input_dim)

    hp = _round_up(hidden_dim, LANE)
    scale = 1.0 / np.sqrt(hidden_dim)

    wq = _pad_cols(Wq.T * scale, hp)               # (din, hp), softmax scale folded in
    bqp = _pad_cols((bq * scale)[None, :], hp)     # (1, hp)
    wk = _pad_cols(Wk.T, hp)
    bkp = _pad_cols(bk[None, :], hp)
    if proj_values:
        wkv = jnp.concatenate([wk, _pad_cols(Wv.T, hp)], axis=1)          # (din, 2*hp)
        bkv = jnp.concatenate([bkp, _pad_cols(bv[None, :], hp)], axis=1)
    else:
        wkv, bkv = wk, bkp

    cast = lambda a: a.astype(compute_dtype)
    return {
        "wq": cast(wq), "bq": cast(bqp), "wkv": cast(wkv), "bkv": cast(bkv),
        "raw": {"Wq": Wq, "bq": bq, "Wk": Wk, "bk": bk, "Wv": Wv, "bv": bv},
        "hidden_dim": hidden_dim, "input_dim": input_dim,
        "proj_values": proj_values, "hp": hp, "compute_dtype": compute_dtype,
    }


# ----------------------------------------------------------------------------
# Pure-JAX reference (mirrors the PyTorch module exactly, unscaled weights)
# ----------------------------------------------------------------------------

def attention_ref(query, keys, params, mask=None):
    raw = params["raw"]
    proj_q = query @ raw["Wq"].T + raw["bq"]
    proj_k = keys @ raw["Wk"].T + raw["bk"]
    values = (keys @ raw["Wv"].T + raw["bv"]) if params["proj_values"] else keys
    scores = jnp.einsum("bqh,bkh->bqk", proj_q, proj_k) / np.sqrt(params["hidden_dim"])
    if mask is not None:
        scores = jnp.where(mask == 0, -1e9, scores)
    alphas = jax.nn.softmax(scores, axis=-1)
    return jnp.einsum("bqk,bkh->bqh", alphas, values), alphas


# ----------------------------------------------------------------------------

if __name__ == "__main__":
    hidden_dim = input_dim = 2          # fixed by the module's hard-coded weights
    B, L = 16, 128                      # bt=8 -> 2 "parallel" steps (even v7x split),
                                        # bt*L=1024-row projection matmuls, Lk=128 lane-dense

    key = jax.random.PRNGKey(0)
    kq, kk = jax.random.split(key)
    query = jax.random.normal(kq, (B, L, input_dim), jnp.float32)
    keys_seq = jax.random.normal(kk, (B, L, input_dim), jnp.float32)

    tol = dict(rtol=2e-3, atol=2e-3)

    # 1) module defaults: proj_values=False, mask=None
    p0 = make_attention_params(hidden_dim, input_dim, proj_values=False)
    ctx0, al0 = attention_pallas(query, keys_seq, p0)
    ctx0 = jax.block_until_ready(ctx0)
    rctx0, ral0 = attention_ref(query, keys_seq, p0)
    np.testing.assert_allclose(np.asarray(ctx0), np.asarray(rctx0), **tol)
    np.testing.assert_allclose(np.asarray(al0), np.asarray(ral0), **tol)
    assert ctx0.shape == (B, L, input_dim) and al0.shape == (B, L, L)

    # 2) decoder-style usage: proj_values=True, causal mask generated in-kernel
    p1 = make_attention_params(hidden_dim, input_dim, proj_values=True)
    ctx1, al1 = attention_pallas(query, query, p1, causal=True)
    ctx1 = jax.block_until_ready(ctx1)
    tril = jnp.tril(jnp.ones((1, L, L), jnp.float32))
    rctx1, ral1 = attention_ref(query, query, p1, mask=tril)
    np.testing.assert_allclose(np.asarray(ctx1), np.asarray(rctx1), **tol)
    np.testing.assert_allclose(np.asarray(al1), np.asarray(ral1), **tol)

    # 3) same mask supplied explicitly (PyTorch forward(query, mask) path);
    #    mask stays at its natural (1, L, L) shape -> no B-times HBM broadcast.
    ctx2, al2 = attention_pallas(query, query, p1, mask=tril)
    ctx2 = jax.block_until_ready(ctx2)
    np.testing.assert_allclose(np.asarray(ctx2), np.asarray(rctx1), **tol)
    np.testing.assert_allclose(np.asarray(al2), np.asarray(ral1), **tol)

    # 4) context-only path: skips the dominant O(B*L^2) alphas HBM stream
    ctx3 = attention_pallas(query, keys_seq, p0, return_alphas=False)
    ctx3 = jax.block_until_ready(ctx3)
    np.testing.assert_allclose(np.asarray(ctx3), np.asarray(rctx0), **tol)

    # 5) bf16 operands/weights for v6e/v7x MXU; f32 accumulation + softmax stats
    pb = make_attention_params(hidden_dim, input_dim, proj_values=False,
                               compute_dtype=jnp.bfloat16)
    ctxb, alb = attention_pallas(query, keys_seq, pb)
    ctxb = jax.block_until_ready(ctxb)
    np.testing.assert_allclose(np.asarray(ctxb), np.asarray(rctx0), rtol=5e-2, atol=5e-2)
    np.testing.assert_allclose(np.asarray(alb), np.asarray(ral0), rtol=5e-2, atol=5e-2)

    print("KERNEL_OK")
</pallas_src>

<mosaic_0001>
module attributes {stable_mosaic.version = 11 : i64} {
  func.func @_attention_kernel(%arg0: i32, %arg1: memref<8x128x2xf32, #tpu.memory_space<vmem>>, %arg2: memref<8x128x2xf32, #tpu.memory_space<vmem>>, %arg3: memref<2x128xf32, #tpu.memory_space<vmem>>, %arg4: memref<1x128xf32, #tpu.memory_space<vmem>>, %arg5: memref<2x128xf32, #tpu.memory_space<vmem>>, %arg6: memref<1x128xf32, #tpu.memory_space<vmem>>, %arg7: memref<8x128x2xf32, #tpu.memory_space<vmem>>, %arg8: memref<8x128x128xf32, #tpu.memory_space<vmem>>) attributes {dimension_semantics = [#tpu.dimension_semantics<parallel>], iteration_bounds = array<i64: 2>, scalar_prefetch = 0 : i64, scratch_operands = 0 : i64, tpu.core_type = #tpu.core_type<tc>, window_params = [{transform_indices = @transform_0, window_bounds = array<i64: 8, 128, 2>}, {transform_indices = @transform_1, window_bounds = array<i64: 8, 128, 2>}, {pipeline_mode = #tpu.pipeline_mode<synchronous>, transform_indices = @transform_2, window_bounds = array<i64: 2, 128>}, {pipeline_mode = #tpu.pipeline_mode<synchronous>, transform_indices = @transform_3, window_bounds = array<i64: 1, 128>}, {pipeline_mode = #tpu.pipeline_mode<synchronous>, transform_indices = @transform_4, window_bounds = array<i64: 2, 128>}, {pipeline_mode = #tpu.pipeline_mode<synchronous>, transform_indices = @transform_5, window_bounds = array<i64: 1, 128>}, {transform_indices = @transform_6, window_bounds = array<i64: 8, 128, 2>}, {transform_indices = @transform_7, window_bounds = array<i64: 8, 128, 128>}]} {
    %c0 = arith.constant 0 : index
    %c0_0 = arith.constant 0 : index
    %c0_1 = arith.constant 0 : index
    %0 = vector.load %arg1[%c0, %c0_0, %c0_1] : memref<8x128x2xf32, #tpu.memory_space<vmem>>, vector<8x128x2xf32>
    %1 = vector.shape_cast %0 : vector<8x128x2xf32> to vector<1024x2xf32>
    %c0_2 = arith.constant 0 : index
    %c0_3 = arith.constant 0 : index
    %c0_4 = arith.constant 0 : index
    %2 = vector.load %arg2[%c0_2, %c0_3, %c0_4] : memref<8x128x2xf32, #tpu.memory_space<vmem>>, vector<8x128x2xf32>
    %3 = vector.shape_cast %2 : vector<8x128x2xf32> to vector<1024x2xf32>
    %c0_5 = arith.constant 0 : index
    %c0_6 = arith.constant 0 : index
    %4 = vector.load %arg3[%c0_5, %c0_6] : memref<2x128xf32, #tpu.memory_space<vmem>>, vector<2x128xf32>
    %cst = arith.constant dense<0.000000e+00> : vector<1024x128xf32>
    %5 = tpu.matmul %1, %4, %cst {dimension_numbers = #tpu.dot_dimension_numbers<[1], [0], [0], [1], [0, 0, 1, 1], [], []>} : vector<1024x2xf32>, vector<2x128xf32>, vector<1024x128xf32> -> vector<1024x128xf32>
    %c0_7 = arith.constant 0 : index
    %c0_8 = arith.constant 0 : index
    %6 = vector.load %arg4[%c0_7, %c0_8] : memref<1x128xf32, #tpu.memory_space<vmem>>, vector<1x128xf32>
    %7 = vector.broadcast %6 : vector<1x128xf32> to vector<1024x128xf32>
    %8 = arith.addf %5, %7 : vector<1024x128xf32>
    %9 = vector.shape_cast %8 : vector<1024x128xf32> to vector<8x128x128xf32>
    %c0_9 = arith.constant 0 : index
    %c0_10 = arith.constant 0 : index
    %10 = vector.load %arg5[%c0_9, %c0_10] : memref<2x128xf32, #tpu.memory_space<vmem>>, vector<2x128xf32>
    %cst_11 = arith.constant dense<0.000000e+00> : vector<1024x128xf32>
    %11 = tpu.matmul %3, %10, %cst_11 {dimension_numbers = #tpu.dot_dimension_numbers<[1], [0], [0], [1], [0, 0, 1, 1], [], []>} : vector<1024x2xf32>, vector<2x128xf32>, vector<1024x128xf32> -> vector<1024x128xf32>
    %c0_12 = arith.constant 0 : index
    %c0_13 = arith.constant 0 : index
    %12 = vector.load %arg6[%c0_12, %c0_13] : memref<1x128xf32, #tpu.memory_space<vmem>>, vector<1x128xf32>
    %13 = vector.broadcast %12 : vector<1x128xf32> to vector<1024x128xf32>
    %14 = arith.addf %11, %13 : vector<1024x128xf32>
    %15 = vector.shape_cast %14 : vector<1024x128xf32> to vector<8x128x128xf32>
    %c0_14 = arith.constant 0 : index
    %c0_15 = arith.constant 0 : index
    %c0_16 = arith.constant 0 : index
    %16 = vector.load %arg2[%c0_14, %c0_15, %c0_16] : memref<8x128x2xf32, #tpu.memory_space<vmem>>, vector<8x128x2xf32>
    "tpu.trace_start"() <{level = 10 : i32, message = "bqh,bkh->bqk"}> : () -> ()
    %cst_17 = arith.constant dense<0.000000e+00> : vector<8x128x128xf32>
    %17 = tpu.matmul %9, %15, %cst_17 {dimension_numbers = #tpu.dot_dimension_numbers<[2], [2], [1], [1], [0, 0, 0, 1, 1, 1], [0], [0]>} : vector<8x128x128xf32>, vector<8x128x128xf32>, vector<8x128x128xf32> -> vector<8x128x128xf32>
    "tpu.trace_stop"() : () -> ()
    %cst_18 = arith.constant dense<0xFF800000> : vector<8x128xf32>
    %18 = vector.multi_reduction <maximumf>, %17, %cst_18 [2] : vector<8x128x128xf32> to vector<8x128xf32>
    %19 = vector.shape_cast %18 : vector<8x128xf32> to vector<8x128x1xf32>
    %20 = vector.broadcast %19 : vector<8x128x1xf32> to vector<8x128x128xf32>
    %21 = arith.subf %17, %20 : vector<8x128x128xf32>
    %22 = math.exp %21 : vector<8x128x128xf32>
    %cst_19 = arith.constant dense<0.000000e+00> : vector<8x128xf32>
    %23 = vector.multi_reduction <add>, %22, %cst_19 [2] : vector<8x128x128xf32> to vector<8x128xf32>
    %24 = vector.shape_cast %23 : vector<8x128xf32> to vector<8x128x1xf32>
    %25 = vector.broadcast %24 : vector<8x128x1xf32> to vector<8x128x128xf32>
    %26 = arith.divf %22, %25 : vector<8x128x128xf32>
    %c0_20 = arith.constant 0 : index
    %c0_21 = arith.constant 0 : index
    %c0_22 = arith.constant 0 : index
    %27 = vector.load %arg8[%c0_20, %c0_21, %c0_22] : memref<8x128x128xf32, #tpu.memory_space<vmem>>, vector<8x128x128xf32>
    tpu.vector_store %arg8[%c0_20, %c0_21, %c0_22], %26 {strides = array<i32>} : memref<8x128x128xf32, #tpu.memory_space<vmem>>, vector<8x128x128xf32>,
    "tpu.trace_start"() <{level = 10 : i32, message = "bqk,bkh->bqh"}> : () -> ()
    %cst_23 = arith.constant dense<0.000000e+00> : vector<8x128x2xf32>
    %28 = tpu.matmul %26, %16, %cst_23 {dimension_numbers = #tpu.dot_dimension_numbers<[2], [1], [1], [2], [0, 0, 0, 1, 1, 2], [0], [0]>} : vector<8x128x128xf32>, vector<8x128x2xf32>, vector<8x128x2xf32> -> vector<8x128x2xf32>
    "tpu.trace_stop"() : () -> ()
    %c0_24 = arith.constant 0 : index
    %c0_25 = arith.constant 0 : index
    %c0_26 = arith.constant 0 : index
    %29 = vector.load %arg7[%c0_24, %c0_25, %c0_26] : memref<8x128x2xf32, #tpu.memory_space<vmem>>, vector<8x128x2xf32>
    tpu.vector_store %arg7[%c0_24, %c0_25, %c0_26], %28 {strides = array<i32>} : memref<8x128x2xf32, #tpu.memory_space<vmem>>, vector<8x128x2xf32>,
    return
  }
  func.func @transform_0(%arg0: i32) -> (i32, i32, i32) {
    %c0_i32 = arith.constant 0 : i32
    %c0_i32_0 = arith.constant 0 : i32
    %c0_i32_1 = arith.constant 0 : i32
    return %arg0, %c0_i32, %c0_i32_0 : i32, i32, i32
  }
  func.func @transform_1(%arg0: i32) -> (i32, i32, i32) {
    %c0_i32 = arith.constant 0 : i32
    %c0_i32_0 = arith.constant 0 : i32
    %c0_i32_1 = arith.constant 0 : i32
    return %arg0, %c0_i32, %c0_i32_0 : i32, i32, i32
  }
  func.func @transform_2(%arg0: i32) -> (i32, i32) {
    %c0_i32 = arith.constant 0 : i32
    %c0_i32_0 = arith.constant 0 : i32
    %c0_i32_1 = arith.constant 0 : i32
    return %c0_i32, %c0_i32_0 : i32, i32
  }
  func.func @transform_3(%arg0: i32) -> (i32, i32) {
    %c0_i32 = arith.constant 0 : i32
    %c0_i32_0 = arith.constant 0 : i32
    %c0_i32_1 = arith.constant 0 : i32
    return %c0_i32, %c0_i32_0 : i32, i32
  }
  func.func @transform_4(%arg0: i32) -> (i32, i32) {
    %c0_i32 = arith.constant 0 : i32
    %c0_i32_0 = arith.constant 0 : i32
    %c0_i32_1 = arith.constant 0 : i32
    return %c0_i32, %c0_i32_0 : i32, i32
  }
  func.func @transform_5(%arg0: i32) -> (i32, i32) {
    %c0_i32 = arith.constant 0 : i32
    %c0_i32_0 = arith.constant 0 : i32
    %c0_i32_1 = arith.constant 0 : i32
    return %c0_i32, %c0_i32_0 : i32, i32
  }
  func.func @transform_6(%arg0: i32) -> (i32, i32, i32) {
    %c0_i32 = arith.constant 0 : i32
    %c0_i32_0 = arith.constant 0 : i32
    %c0_i32_1 = arith.constant 0 : i32
    return %arg0, %c0_i32, %c0_i32_0 : i32, i32, i32
  }
  func.func @transform_7(%arg0: i32) -> (i32, i32, i32) {
    %c0_i32 = arith.constant 0 : i32
    %c0_i32_0 = arith.constant 0 : i32
    %c0_i32_1 = arith.constant 0 : i32
    return %arg0, %c0_i32, %c0_i32_0 : i32, i32, i32
  }
}

</mosaic_0001>

<bundles_post_ra>
// kernel: tpu_custom_call.1
= control target key start
LH: loop header
LB: loop body
LE: loop exit
PB: predicated region body
PF: predicated region fallthrough
CT: control target
= control target key end

     0   :  { %13 = vsyncpa [#allocation3], 0  ;;  %s13793_s0 = inlined_call_operand.vmem [shape: f32[16,128,2], index: 0, kind: input, shape index: {}]   ;;  %s13794_s1 = inlined_call_operand.vmem [shape: f32[16,128,2], index: 1, kind: input, shape index: {}]   ;;  %s13795_s2 = inlined_call_operand.vmem [shape: f32[2,128], index: 2, kind: input, shape index: {}]   ;;  %s13796_s3 = inlined_call_operand.vmem [shape: f32[1,128], index: 3, kind: input, shape index: {}]   ;;  %s13797_s4 = inlined_call_operand.vmem [shape: f32[2,128], index: 4, kind: input, shape index: {}]   ;;  %s13798_s5 = inlined_call_operand.vmem [shape: f32[1,128], index: 5, kind: input, shape index: {}]   ;;  %s13799_s6 = inlined_call_operand.vmem [shape: f32[16,128,2], index: 6, kind: output, shape index: {0}]   ;;  %s13800_s7 = inlined_call_operand.hbm [shape: f32[16,128,128], index: 7, kind: output, shape index: {1}]  }
   0x1   :  { %15 = vsyncpa [#allocation3 + $0x1], 0  ;;  %s10274_s24 = smov 0   ;;  %s10276_s25 = smov 0  }
   0x2   :  { %s10278_s26 = smov 0   ;;  %s10280_s27 = smov 0  }
   0x3 LB: > { %s10295_s28 = sadd.s32 4294967295, %s10229_s27   ;;  %s6635_s29 = sadd.s32 4294967294, %s10229_s27   ;;  %s10229_s27 = sphi %s10280_s27, %s14578_s27   ;;  %s10225_s26 = sphi %s10278_s26, %s14577_s26   ;;  %s10221_s25 = sphi %s10276_s25, %s14576_s25   ;;  %s10217_s24 = sphi %s10274_s24, %s14575_s24  }
   0x4   : > { %s10299_s30 = sadd.s32 1, %s10229_s27   ;;  %s190_s8 = sadd.s32 1, %s10225_s26 }
   0x5   : > { %s187_s9 = ssub.s32 %s10229_s27, %s10299_s30  ;;  %p200_p0 = scmp.ne.s32.totalorder %s10225_s26, %s10221_s25 }
   0x6   : > { %p188_p1 = scmp.eq.s32.totalorder %s187_s9, 0  ;;  %p201_p2 = scmp.eq.s32.totalorder %s10295_s28, 1 }
   0x7   : > { %p206_p3 = scmp.ne.s32.totalorder %s10221_s25, %s10217_s24  ;;  %p207_p4 = scmp.eq.s32.totalorder %s6635_s29, 1 }
   0x8   : > { %s10310_s10 = scalar_select %p188_p1, %s10225_s26, %s190_s8  }
   0x9   : > { %p10312_p5 = por %p201_p2, %p200_p0  ;;  %p10316_p6 = por %p207_p4, %p206_p3 }
   0xa   : > { %p6638_p7 = scmp.ge.s32.totalorder %s10229_s27, 1  ;;  %p257_p8 = scmp.lt.s32.totalorder %s10229_s27, 3 }
   0xc   : > { %p258_p9 = pnand %p6638_p7, %p257_p8 }
   0xe   : > { %261 = sbr.rel (%p258_p9) target bundleno = 1433 (0x599), region = 44 }
  0x15   : > { %vm973_vm0 = vcmask 1041408   ;;  %v1682_v0 = vld [vmem:[%s13797_s4] sm:$0x3]  ;;  %s6640_s15 = sshll.u32 %s10295_s28, 3  ;;  %vm588_vm1 = vcmask 15360   ;;  %s299_s20 = sand.u32 1, %s10221_s25  }
  0x16   : > { %7884 = vmatprep.subr.msk.mxu1 %vm973_vm0, %v1682_v0  ;;  %p303_p10 = scmp.lt.s32.totalorder %s6640_s15, 15  ;;  %v580_v1 = vld [vmem:[%s13795_s2] sm:$0x3]  ;;  %s6639_s22 = sshll.u32 %s299_s20, 10 }
  0x17   : > { %7885 = vmatpush3.msk.msra.mxu1 %vm973_vm0, %v1682_v0  ;;  %7690 = vmatprep.subr.msk.mxu0 %vm973_vm0, %v580_v1  ;;  %s12536_s23 = scalar_lea.vmem [#allocation2], %s6639_s22  ;;  %s13640_s16 = scalar_lea.sflag [#allocation3], %s299_s20 }
  0x18   : > { %s14580_s15 = smov (!%p303_p10, %s6640_s15), 15  ;;  %7691 = vmatpush3.msk.msra.mxu0 %vm973_vm0, %v580_v1  ;;  %s10231_s17 = smov [#allocation2]  }
  0x19   : > { %s10329_s18 = sshll.u32 %s14580_s15, 7  ;;  %s6535_s15 = sshll.u32 %s12536_s23, 4  ;;  %s13636_s15 = int_to_ptr.vmem [resolvable:$true] %s6535_s15 }
  0x1a   : > { %s10335_s21 = scalar_lea.vmem %s13794_s1, %s10329_s18  ;;  %s10347_s29 = scalar_lea.vmem %s13793_s0, %s10329_s18 }
  0x1b   : > { %v452_v2 = vld [vmem:[%s10335_s21] sm:$0xff]  ;;  %v453_v3 = vld [vmem:[%s10335_s21 + $0x8] sm:$0xff]  ;;  %v454_v4 = vld [vmem:[%s10335_s21 + $0x10] sm:$0xff]  ;;  %s13345_s9 = scalar_lea.vmem %s13799_s6, %s10329_s18  ;;  %s6919_s18 = sshll.u32 %s10295_s28, 14 }
  0x1c   : > { %7886 = vmatprep.mubr.msk.f32.mxu1 %vm588_vm1, %v452_v2  ;;  %v10341_v5 = vpack.c.bf16 %v453_v3, %v452_v2  ;;  %v455_v6 = vld [vmem:[%s10335_s21 + $0x18] sm:$0xff]  ;;  %v456_v7 = vld [vmem:[%s10335_s21 + $0x20] sm:$0xff]  ;;  %v325_v9 = vld [vmem:[%s10347_s29 + $0x8] sm:$0xff]  ;;  %s13631_s14 = scalar_lea.hbm %s13800_s7, %s6919_s18  ;;  %s10167_s28 = scalar_lea.vmem %s13636_s15, 16384 }
  0x1d   : > { %7887 = vmatmul.mubr.msk.f32.vlgmr.msra.gmra.mrb[0].mxu1 %vm588_vm1, %v453_v3  ;;  %v324_v8 = vld [vmem:[%s10347_s29] sm:$0xff]  ;;  %v326_v10 = vld [vmem:[%s10347_s29 + $0x10] sm:$0xff]  ;;  %v457_v11 = vld [vmem:[%s10335_s21 + $0x28] sm:$0xff]  ;;  %p10168_p11 = scmp.ne.s32.totalorder %s13636_s15, %s10167_s28  ;;  %s10171_s19 = sshll.u32 %s10231_s17, 4  ;;  %s10172_s19 = int_to_ptr.vmem [resolvable:$false] %s10171_s19 }
  0x1e   : > { %7889 = vmatprep.mubr.msk.f32.mxu1 %vm588_vm1, %v454_v4  ;;  %7692 = vmatprep.mubr.msk.f32.mxu0 %vm588_vm1, %v324_v8  ;;  %v327_v12 = vld [vmem:[%s10347_s29 + $0x18] sm:$0xff]  ;;  %v458_v13 = vld [vmem:[%s10335_s21 + $0x30] sm:$0xff]  ;;  %v328_v14 = vld [vmem:[%s10347_s29 + $0x20] sm:$0xff]  ;;  %s10173_s22 = scalar_lea.vmem %s10172_s19, 32768  ;;  %p10174_p0 = scmp.lt.s32.totalorder %s13636_s15, %s10172_s19 }
  0x1f   : > { %7693 = vmatmul.mubr.msk.f32.vlgmr.msra.gmra.mrb[0].mxu0 %vm588_vm1, %v325_v9  ;;  %v459_v15 = vld [vmem:[%s10335_s21 + $0x38] sm:$0xff]  ;;  %v329_v16 = vld [vmem:[%s10347_s29 + $0x28] sm:$0xff]  ;;  %v460_v17 = vld [vmem:[%s10335_s21 + $0x40] sm:$0xff]  ;;  %p10169_p12 = pnand %p10168_p11, %p10312_p5  ;;  %p10175_p1 = scmp.lt.s32.totalorder %s10173_s22, %s10167_s28 }
  0x20   : > { %7695 = vmatprep.mubr.msk.f32.mxu0 %vm588_vm1, %v326_v10  ;;  %v330_v18 = vld [vmem:[%s10347_s29 + $0x30] sm:$0xff]  ;;  %v461_v19 = vld [vmem:[%s10335_s21 + $0x48] sm:$0xff]  ;;  %v331_v20 = vld [vmem:[%s10347_s29 + $0x38] sm:$0xff] }
  0x21   : > { %7890 = vmatmul.mubr.msk.f32.gmra.mrb[2].mxu1 %vm588_vm1, %v455_v6  ;;  %v462_v21 = vld [vmem:[%s10335_s21 + $0x50] sm:$0xff]  ;;  %v332_v22 = vld [vmem:[%s10347_s29 + $0x40] sm:$0xff]  ;;  %v463_v23 = vld [vmem:[%s10335_s21 + $0x58] sm:$0xff]  ;;  %p10170_p13 = pneg %p10169_p12  ;;  %p10176_p2 = por %p10175_p1, %p10174_p0 }
  0x22   : > { %7892 = vmatprep.mubr.msk.f32.mxu1 %vm588_vm1, %v456_v7  ;;  %v333_v24 = vld [vmem:[%s10347_s29 + $0x48] sm:$0xff]  ;;  %v464_v25 = vld [vmem:[%s10335_s21 + $0x60] sm:$0xff]  ;;  %v334_v26 = vld [vmem:[%s10347_s29 + $0x50] sm:$0xff] }
  0x23   : > { %7696 = vmatmul.mubr.msk.f32.gmra.mrb[2].mxu0 %vm588_vm1, %v327_v12  ;;  %v465_v27 = vld [vmem:[%s10335_s21 + $0x68] sm:$0xff]  ;;  %v335_v28 = vld [vmem:[%s10347_s29 + $0x58] sm:$0xff]  ;;  %v466_v29 = vld [vmem:[%s10335_s21 + $0x70] sm:$0xff]  ;;  %p10177_p3 = pnand %p10176_p2, %p10170_p13 }
  0x24   : > { %7698 = vmatprep.mubr.msk.f32.mxu0 %vm588_vm1, %v328_v14  ;;  %v336_v30 = vld [vmem:[%s10347_s29 + $0x60] sm:$0xff]  ;;  %v467_v31 = vld [vmem:[%s10335_s21 + $0x78] sm:$0xff]  ;;  %v337_v32 = vld [vmem:[%s10347_s29 + $0x68] sm:$0xff] }
  0x25   : > { %7893 = vmatmul.mubr.msk.f32.gmra.mrb[4].mxu1 %vm588_vm1, %v457_v11  ;;  %v468_v33 = vld [vmem:[%s10335_s21 + $0x80] sm:$0xff]  ;;  %v338_v34 = vld [vmem:[%s10347_s29 + $0x70] sm:$0xff]  ;;  %v469_v35 = vld [vmem:[%s10335_s21 + $0x88] sm:$0xff] }
  0x26   : > { %7895 = vmatprep.mubr.msk.f32.mxu1 %vm588_vm1, %v458_v13  ;;  %v339_v36 = vld [vmem:[%s10347_s29 + $0x78] sm:$0xff]  ;;  %v470_v37 = vld [vmem:[%s10335_s21 + $0x90] sm:$0xff]  ;;  %v340_v38 = vld [vmem:[%s10347_s29 + $0x80] sm:$0xff] }
  0x27   : > { %7699 = vmatmul.mubr.msk.f32.gmra.mrb[4].mxu0 %vm588_vm1, %v329_v16  ;;  %v471_v39 = vld [vmem:[%s10335_s21 + $0x98] sm:$0xff]  ;;  %v341_v40 = vld [vmem:[%s10347_s29 + $0x88] sm:$0xff]  ;;  %v472_v41 = vld [vmem:[%s10335_s21 + $0xa0] sm:$0xff] }
  0x28   : > { %7701 = vmatprep.mubr.msk.f32.mxu0 %vm588_vm1, %v330_v18  ;;  %v342_v42 = vld [vmem:[%s10347_s29 + $0x90] sm:$0xff]  ;;  %v473_v43 = vld [vmem:[%s10335_s21 + $0xa8] sm:$0xff]  ;;  %v343_v44 = vld [vmem:[%s10347_s29 + $0x98] sm:$0xff] }
  0x29   : > { %7896 = vmatmul.mubr.msk.f32.gmra.mrb[6].mxu1 %vm588_vm1, %v459_v15  ;;  %v474_v45 = vld [vmem:[%s10335_s21 + $0xb0] sm:$0xff]  ;;  %v344_v46 = vld [vmem:[%s10347_s29 + $0xa0] sm:$0xff]  ;;  %v475_v47 = vld [vmem:[%s10335_s21 + $0xb8] sm:$0xff] }
  0x2a   : > { %7898 = vmatprep.mubr.msk.f32.mxu1 %vm588_vm1, %v460_v17  ;;  %v345_v48 = vld [vmem:[%s10347_s29 + $0xa8] sm:$0xff]  ;;  %v476_v49 = vld [vmem:[%s10335_s21 + $0xc0] sm:$0xff]  ;;  %v346_v50 = vld [vmem:[%s10347_s29 + $0xb0] sm:$0xff] }
  0x2b   : > { %7702 = vmatmul.mubr.msk.f32.gmra.mrb[6].mxu0 %vm588_vm1, %v331_v20  ;;  %v477_v51 = vld [vmem:[%s10335_s21 + $0xc8] sm:$0xff]  ;;  %v347_v52 = vld [vmem:[%s10347_s29 + $0xb8] sm:$0xff]  ;;  %v478_v53 = vld [vmem:[%s10335_s21 + $0xd0] sm:$0xff] }
  0x2c   : > { %7704 = vmatprep.mubr.msk.f32.mxu0 %vm588_vm1, %v332_v22  ;;  %v348_v54 = vld [vmem:[%s10347_s29 + $0xc0] sm:$0xff]  ;;  %v479_v55 = vld [vmem:[%s10335_s21 + $0xd8] sm:$0xff]  ;;  %v349_v56 = vld [vmem:[%s10347_s29 + $0xc8] sm:$0xff] }
  0x2d   : > { %7899 = vmatmul.mubr.msk.f32.gmra.mrb[8].mxu1 %vm588_vm1, %v461_v19  ;;  %v480_v57 = vld [vmem:[%s10335_s21 + $0xe0] sm:$0xff]  ;;  %v350_v58 = vld [vmem:[%s10347_s29 + $0xd0] sm:$0xff]  ;;  %v481_v59 = vld [vmem:[%s10335_s21 + $0xe8] sm:$0xff] }
  0x2e   : > { %7901 = vmatprep.mubr.msk.f32.mxu1 %vm588_vm1, %v462_v21  ;;  %v351_v60 = vld [vmem:[%s10347_s29 + $0xd8] sm:$0xff]  ;;  %v482_v61 = vld [vmem:[%s10335_s21 + $0xf0] sm:$0xff]  ;;  %v352_v62 = vld [vmem:[%s10347_s29 + $0xe0] sm:$0xff] }
  0x2f   : > { %7705 = vmatmul.mubr.msk.f32.gmra.mrb[8].mxu0 %vm588_vm1, %v333_v24  ;;  %v483_v63 = vld [vmem:[%s10335_s21 + $0xf8] sm:$0xff]  ;;  %v353_v0 = vld [vmem:[%s10347_s29 + $0xe8] sm:$0xff]  ;;  %v484_v1 = vld [vmem:[%s10335_s21 + $0x100] sm:$0xff] }
  0x30   : > { %7707 = vmatprep.mubr.msk.f32.mxu0 %vm588_vm1, %v334_v26  ;;  %v354_v2 = vld [vmem:[%s10347_s29 + $0xf0] sm:$0xff]  ;;  %v485_v3 = vld [vmem:[%s10335_s21 + $0x108] sm:$0xff]  ;;  %v355_v4 = vld [vmem:[%s10347_s29 + $0xf8] sm:$0xff] }
  0x31   : > { %7902 = vmatmul.mubr.msk.f32.gmra.mrb[10].mxu1 %vm588_vm1, %v463_v23  ;;  %v486_v6 = vld [vmem:[%s10335_s21 + $0x110] sm:$0xff]  ;;  %v356_v7 = vld [vmem:[%s10347_s29 + $0x100] sm:$0xff]  ;;  %v487_v8 = vld [vmem:[%s10335_s21 + $0x118] sm:$0xff] }
  0x32   : > { %7904 = vmatprep.mubr.msk.f32.mxu1 %vm588_vm1, %v464_v25  ;;  %v357_v9 = vld [vmem:[%s10347_s29 + $0x108] sm:$0xff]  ;;  %v488_v10 = vld [vmem:[%s10335_s21 + $0x120] sm:$0xff]  ;;  %v358_v11 = vld [vmem:[%s10347_s29 + $0x110] sm:$0xff] }
  0x33   : > { %7708 = vmatmul.mubr.msk.f32.gmra.mrb[10].mxu0 %vm588_vm1, %v335_v28  ;;  %v489_v12 = vld [vmem:[%s10335_s21 + $0x128] sm:$0xff]  ;;  %v359_v13 = vld [vmem:[%s10347_s29 + $0x118] sm:$0xff]  ;;  %v490_v14 = vld [vmem:[%s10335_s21 + $0x130] sm:$0xff] }
  0x34   : > { %7710 = vmatprep.mubr.msk.f32.mxu0 %vm588_vm1, %v336_v30  ;;  %v360_v15 = vld [vmem:[%s10347_s29 + $0x120] sm:$0xff]  ;;  %v491_v16 = vld [vmem:[%s10335_s21 + $0x138] sm:$0xff]  ;;  %v361_v17 = vld [vmem:[%s10347_s29 + $0x128] sm:$0xff] }
  0x35   : > { %7905 = vmatmul.mubr.msk.f32.gmra.mrb[12].mxu1 %vm588_vm1, %v465_v27  ;;  %v492_v18 = vld [vmem:[%s10335_s21 + $0x140] sm:$0xff]  ;;  %v362_v19 = vld [vmem:[%s10347_s29 + $0x130] sm:$0xff]  ;;  %v493_v20 = vld [vmem:[%s10335_s21 + $0x148] sm:$0xff] }
  0x36   : > { %7907 = vmatprep.mubr.msk.f32.mxu1 %vm588_vm1, %v466_v29  ;;  %v363_v21 = vld [vmem:[%s10347_s29 + $0x138] sm:$0xff]  ;;  %v494_v22 = vld [vmem:[%s10335_s21 + $0x150] sm:$0xff]  ;;  %v364_v23 = vld [vmem:[%s10347_s29 + $0x140] sm:$0xff] }
  0x37   : > { %7711 = vmatmul.mubr.msk.f32.gmra.mrb[12].mxu0 %vm588_vm1, %v337_v32  ;;  %v495_v24 = vld [vmem:[%s10335_s21 + $0x158] sm:$0xff]  ;;  %v365_v25 = vld [vmem:[%s10347_s29 + $0x148] sm:$0xff]  ;;  %v496_v26 = vld [vmem:[%s10335_s21 + $0x160] sm:$0xff] }
  0x38   : > { %7713 = vmatprep.mubr.msk.f32.mxu0 %vm588_vm1, %v338_v34  ;;  %v366_v27 = vld [vmem:[%s10347_s29 + $0x150] sm:$0xff]  ;;  %v497_v28 = vld [vmem:[%s10335_s21 + $0x168] sm:$0xff]  ;;  %v367_v29 = vld [vmem:[%s10347_s29 + $0x158] sm:$0xff] }
  0x39   : > { %7908 = vmatmul.mubr.msk.f32.gmra.mrb[14].mxu1 %vm588_vm1, %v467_v31  ;;  %v498_v30 = vld [vmem:[%s10335_s21 + $0x170] sm:$0xff]  ;;  %v368_v31 = vld [vmem:[%s10347_s29 + $0x160] sm:$0xff]  ;;  %v499_v32 = vld [vmem:[%s10335_s21 + $0x178] sm:$0xff] }
  0x3a   : > { %7910 = vmatprep.mubr.msk.f32.mxu1 %vm588_vm1, %v468_v33  ;;  %v369_v33 = vld [vmem:[%s10347_s29 + $0x168] sm:$0xff]  ;;  %v500_v34 = vld [vmem:[%s10335_s21 + $0x180] sm:$0xff] }
  0x3b   : > { %7714 = vmatmul.mubr.msk.f32.gmra.mrb[14].mxu0 %vm588_vm1, %v339_v36  ;;  %v501_v36 = vld [vmem:[%s10335_s21 + $0x188] sm:$0xff] }
  0x3c   : > { %7716 = vmatprep.mubr.msk.f32.mxu0 %vm588_vm1, %v340_v38  ;;  %v502_v38 = vld [vmem:[%s10335_s21 + $0x190] sm:$0xff] }
  0x3d   : > { %7911 = vmatmul.mubr.msk.f32.gmra.mrb[16].mxu1 %vm588_vm1, %v469_v35  ;;  %v370_v35 = vld [vmem:[%s10347_s29 + $0x170] sm:$0xff] }
  0x3e   : > { %7913 = vmatprep.mubr.msk.f32.mxu1 %vm588_vm1, %v470_v37  ;;  %v371_v37 = vld [vmem:[%s10347_s29 + $0x178] sm:$0xff] }
  0x3f   : > { %7717 = vmatmul.mubr.msk.f32.gmra.mrb[16].mxu0 %vm588_vm1, %v341_v40  ;;  %v503_v40 = vld [vmem:[%s10335_s21 + $0x198] sm:$0xff] }
  0x40   : > { %7719 = vmatprep.mubr.msk.f32.mxu0 %vm588_vm1, %v342_v42  ;;  %v504_v42 = vld [vmem:[%s10335_s21 + $0x1a0] sm:$0xff] }
  0x41   : > { %7914 = vmatmul.mubr.msk.f32.gmra.mrb[18].mxu1 %vm588_vm1, %v471_v39  ;;  %v372_v39 = vld [vmem:[%s10347_s29 + $0x180] sm:$0xff] }
  0x42   : > { %7916 = vmatprep.mubr.msk.f32.mxu1 %vm588_vm1, %v472_v41  ;;  %v373_v41 = vld [vmem:[%s10347_s29 + $0x188] sm:$0xff] }
  0x43   : > { %7720 = vmatmul.mubr.msk.f32.gmra.mrb[18].mxu0 %vm588_vm1, %v343_v44  ;;  %v505_v44 = vld [vmem:[%s10335_s21 + $0x1a8] sm:$0xff] }
  0x44   : > { %7722 = vmatprep.mubr.msk.f32.mxu0 %vm588_vm1, %v344_v46  ;;  %v506_v46 = vld [vmem:[%s10335_s21 + $0x1b0] sm:$0xff] }
  0x45   : > { %7917 = vmatmul.mubr.msk.f32.gmra.mrb[20].mxu1 %vm588_vm1, %v473_v43  ;;  %v374_v43 = vld [vmem:[%s10347_s29 + $0x190] sm:$0xff] }
  0x46   : > { %7919 = vmatprep.mubr.msk.f32.mxu1 %vm588_vm1, %v474_v45  ;;  %v375_v45 = vld [vmem:[%s10347_s29 + $0x198] sm:$0xff] }
  0x47   : > { %7723 = vmatmul.mubr.msk.f32.gmra.mrb[20].mxu0 %vm588_vm1, %v345_v48  ;;  %v507_v48 = vld [vmem:[%s10335_s21 + $0x1b8] sm:$0xff] }
  0x48   : > { %7725 = vmatprep.mubr.msk.f32.mxu0 %vm588_vm1, %v346_v50  ;;  %v508_v50 = vld [vmem:[%s10335_s21 + $0x1c0] sm:$0xff] }
  0x49   : > { %7920 = vmatmul.mubr.msk.f32.gmra.mrb[22].mxu1 %vm588_vm1, %v475_v47  ;;  %v376_v47 = vld [vmem:[%s10347_s29 + $0x1a0] sm:$0xff] }
  0x4a   : > { %7922 = vmatprep.mubr.msk.f32.mxu1 %vm588_vm1, %v476_v49  ;;  %v377_v49 = vld [vmem:[%s10347_s29 + $0x1a8] sm:$0xff] }
  0x4b   : > { %7726 = vmatmul.mubr.msk.f32.gmra.mrb[22].mxu0 %vm588_vm1, %v347_v52  ;;  %v509_v52 = vld [vmem:[%s10335_s21 + $0x1c8] sm:$0xff] }
  0x4c   : > { %7728 = vmatprep.mubr.msk.f32.mxu0 %vm588_vm1, %v348_v54  ;;  %v510_v54 = vld [vmem:[%s10335_s21 + $0x1d0] sm:$0xff] }
  0x4d   : > { %7923 = vmatmul.mubr.msk.f32.gmra.mrb[24].mxu1 %vm588_vm1, %v477_v51  ;;  %v378_v51 = vld [vmem:[%s10347_s29 + $0x1b0] sm:$0xff] }
  0x4e   : > { %7925 = vmatprep.mubr.msk.f32.mxu1 %vm588_vm1, %v478_v53  ;;  %v379_v53 = vld [vmem:[%s10347_s29 + $0x1b8] sm:$0xff] }
  0x4f   : > { %7729 = vmatmul.mubr.msk.f32.gmra.mrb[24].mxu0 %vm588_vm1, %v349_v56  ;;  %v511_v56 = vld [vmem:[%s10335_s21 + $0x1d8] sm:$0xff] }
  0x50   : > { %7731 = vmatprep.mubr.msk.f32.mxu0 %vm588_vm1, %v350_v58  ;;  %v512_v58 = vld [vmem:[%s10335_s21 + $0x1e0] sm:$0xff] }
  0x51   : > { %7926 = vmatmul.mubr.msk.f32.gmra.mrb[26].mxu1 %vm588_vm1, %v479_v55  ;;  %v380_v55 = vld [vmem:[%s10347_s29 + $0x1c0] sm:$0xff] }
  0x52   : > { %7928 = vmatprep.mubr.msk.f32.mxu1 %vm588_vm1, %v480_v57  ;;  %v381_v57 = vld [vmem:[%s10347_s29 + $0x1c8] sm:$0xff] }
  0x53   : > { %7732 = vmatmul.mubr.msk.f32.gmra.mrb[26].mxu0 %vm588_vm1, %v351_v60  ;;  %v513_v60 = vld [vmem:[%s10335_s21 + $0x1e8] sm:$0xff] }
  0x54   : > { %7734 = vmatprep.mubr.msk.f32.mxu0 %vm588_vm1, %v352_v62  ;;  %v514_v62 = vld [vmem:[%s10335_s21 + $0x1f0] sm:$0xff] }
  0x55   : > { %7929 = vmatmul.mubr.msk.f32.gmra.mrb[28].mxu1 %vm588_vm1, %v481_v59  ;;  %v382_v59 = vld [vmem:[%s10347_s29 + $0x1d0] sm:$0xff] }
  0x56   : > { %7931 = vmatprep.mubr.msk.f32.mxu1 %vm588_vm1, %v482_v61  ;;  %v383_v61 = vld [vmem:[%s10347_s29 + $0x1d8] sm:$0xff] }
  0x57   : > { %7735 = vmatmul.mubr.msk.f32.gmra.mrb[28].mxu0 %vm588_vm1, %v353_v0  ;;  %v515_v0 = vld [vmem:[%s10335_s21 + $0x1f8] sm:$0xff] }
  0x58   : > { %7737 = vmatprep.mubr.msk.f32.mxu0 %vm588_vm1, %v354_v2  ;;  %v516_v2 = vld [vmem:[%s10335_s21 + $0x200] sm:$0xff] }
  0x59   : > { %7932 = vmatmul.mubr.msk.f32.gmra.mrb[30].mxu1 %vm588_vm1, %v483_v63  ;;  %v384_v63 = vld [vmem:[%s10347_s29 + $0x1e0] sm:$0xff] }
  0x5a   : > { %7934 = vmatprep.mubr.msk.f32.mxu1 %vm588_vm1, %v484_v1  ;;  %v385_v1 = vld [vmem:[%s10347_s29 + $0x1e8] sm:$0xff] }
  0x5b   : > { %7738 = vmatmul.mubr.msk.f32.gmra.mrb[30].mxu0 %vm588_vm1, %v355_v4  ;;  %v517_v4 = vld [vmem:[%s10335_s21 + $0x208] sm:$0xff] }
  0x5c   : > { %7740 = vmatprep.mubr.msk.f32.mxu0 %vm588_vm1, %v356_v7  ;;  %v518_v7 = vld [vmem:[%s10335_s21 + $0x210] sm:$0xff] }
  0x5d   : > { %7935 = vmatmul.mubr.msk.f32.gmra.mrb[32].mxu1 %vm588_vm1, %v485_v3  ;;  %v386_v3 = vld [vmem:[%s10347_s29 + $0x1f0] sm:$0xff] }
  0x5e   : > { %7937 = vmatprep.mubr.msk.f32.mxu1 %vm588_vm1, %v486_v6  ;;  %v387_v6 = vld [vmem:[%s10347_s29 + $0x1f8] sm:$0xff] }
  0x5f   : > { %7741 = vmatmul.mubr.msk.f32.gmra.mrb[32].mxu0 %vm588_vm1, %v357_v9  ;;  %v519_v9 = vld [vmem:[%s10335_s21 + $0x218] sm:$0xff] }
  0x60   : > { %7743 = vmatprep.mubr.msk.f32.mxu0 %vm588_vm1, %v358_v11  ;;  %v520_v11 = vld [vmem:[%s10335_s21 + $0x220] sm:$0xff] }
  0x61   : > { %7938 = vmatmul.mubr.msk.f32.gmra.mrb[34].mxu1 %vm588_vm1, %v487_v8  ;;  %v388_v8 = vld [vmem:[%s10347_s29 + $0x200] sm:$0xff] }
  0x62   : > { %7940 = vmatprep.mubr.msk.f32.mxu1 %vm588_vm1, %v488_v10  ;;  %v389_v10 = vld [vmem:[%s10347_s29 + $0x208] sm:$0xff] }
  0x63   : > { %7744 = vmatmul.mubr.msk.f32.gmra.mrb[34].mxu0 %vm588_vm1, %v359_v13  ;;  %v521_v13 = vld [vmem:[%s10335_s21 + $0x228] sm:$0xff] }
  0x64   : > { %7746 = vmatprep.mubr.msk.f32.mxu0 %vm588_vm1, %v360_v15  ;;  %v522_v15 = vld [vmem:[%s10335_s21 + $0x230] sm:$0xff] }
  0x65   : > { %7941 = vmatmul.mubr.msk.f32.gmra.mrb[36].mxu1 %vm588_vm1, %v489_v12  ;;  %v390_v12 = vld [vmem:[%s10347_s29 + $0x210] sm:$0xff] }
  0x66   : > { %7943 = vmatprep.mubr.msk.f32.mxu1 %vm588_vm1, %v490_v14  ;;  %v391_v14 = vld [vmem:[%s10347_s29 + $0x218] sm:$0xff] }
  0x67   : > { %7747 = vmatmul.mubr.msk.f32.gmra.mrb[36].mxu0 %vm588_vm1, %v361_v17  ;;  %v523_v17 = vld [vmem:[%s10335_s21 + $0x238] sm:$0xff] }
  0x68   : > { %7749 = vmatprep.mubr.msk.f32.mxu0 %vm588_vm1, %v362_v19  ;;  %v524_v19 = vld [vmem:[%s10335_s21 + $0x240] sm:$0xff] }
  0x69   : > { %7944 = vmatmul.mubr.msk.f32.gmra.mrb[38].mxu1 %vm588_vm1, %v491_v16  ;;  %v392_v16 = vld [vmem:[%s10347_s29 + $0x220] sm:$0xff] }
  0x6a   : > { %7946 = vmatprep.mubr.msk.f32.mxu1 %vm588_vm1, %v492_v18  ;;  %v393_v18 = vld [vmem:[%s10347_s29 + $0x228] sm:$0xff] }
  0x6b   : > { %7750 = vmatmul.mubr.msk.f32.gmra.mrb[38].mxu0 %vm588_vm1, %v363_v21  ;;  %v525_v21 = vld [vmem:[%s10335_s21 + $0x248] sm:$0xff] }
  0x6c   : > { %7752 = vmatprep.mubr.msk.f32.mxu0 %vm588_vm1, %v364_v23  ;;  %v526_v23 = vld [vmem:[%s10335_s21 + $0x250] sm:$0xff] }
  0x6d   : > { %7947 = vmatmul.mubr.msk.f32.gmra.mrb[40].mxu1 %vm588_vm1, %v493_v20  ;;  %v394_v20 = vld [vmem:[%s10347_s29 + $0x230] sm:$0xff] }
  0x6e   : > { %7949 = vmatprep.mubr.msk.f32.mxu1 %vm588_vm1, %v494_v22  ;;  %v395_v22 = vld [vmem:[%s10347_s29 + $0x238] sm:$0xff] }
  0x6f   : > { %7753 = vmatmul.mubr.msk.f32.gmra.mrb[40].mxu0 %vm588_vm1, %v365_v25  ;;  %v527_v25 = vld [vmem:[%s10335_s21 + $0x258] sm:$0xff] }
  0x70   : > { %7755 = vmatprep.mubr.msk.f32.mxu0 %vm588_vm1, %v366_v27  ;;  %v528_v27 = vld [vmem:[%s10335_s21 + $0x260] sm:$0xff] }
  0x71   : > { %7950 = vmatmul.mubr.msk.f32.gmra.mrb[42].mxu1 %vm588_vm1, %v495_v24  ;;  %v396_v24 = vld [vmem:[%s10347_s29 + $0x240] sm:$0xff] }
  0x72   : > { %7952 = vmatprep.mubr.msk.f32.mxu1 %vm588_vm1, %v496_v26  ;;  %v397_v26 = vld [vmem:[%s10347_s29 + $0x248] sm:$0xff] }
  0x73   : > { %7756 = vmatmul.mubr.msk.f32.gmra.mrb[42].mxu0 %vm588_vm1, %v367_v29  ;;  %v529_v29 = vld [vmem:[%s10335_s21 + $0x268] sm:$0xff] }
  0x74   : > { %7758 = vmatprep.mubr.msk.f32.mxu0 %vm588_vm1, %v368_v31  ;;  %v530_v31 = vld [vmem:[%s10335_s21 + $0x270] sm:$0xff] }
  0x75   : > { %7953 = vmatmul.mubr.msk.f32.gmra.mrb[44].mxu1 %vm588_vm1, %v497_v28  ;;  %v398_v28 = vld [vmem:[%s10347_s29 + $0x250] sm:$0xff] }
  0x76   : > { %7955 = vmatprep.mubr.msk.f32.mxu1 %vm588_vm1, %v498_v30  ;;  %v399_v30 = vld [vmem:[%s10347_s29 + $0x258] sm:$0xff] }
  0x77   : > { %7759 = vmatmul.mubr.msk.f32.gmra.mrb[44].mxu0 %vm588_vm1, %v369_v33  ;;  %v531_v33 = vld [vmem:[%s10335_s21 + $0x278] sm:$0xff] }
  0x78   : > { %7761 = vmatprep.mubr.msk.f32.mxu0 %vm588_vm1, %v370_v35  ;;  %v532_v35 = vld [vmem:[%s10335_s21 + $0x280] sm:$0xff] }
  0x79   : > { %7956 = vmatmul.mubr.msk.f32.gmra.mrb[46].mxu1 %vm588_vm1, %v499_v32  ;;  %v400_v32 = vld [vmem:[%s10347_s29 + $0x260] sm:$0xff] }
  0x7a   : > { %7958 = vmatprep.mubr.msk.f32.mxu1 %vm588_vm1, %v500_v34  ;;  %v401_v34 = vld [vmem:[%s10347_s29 + $0x268] sm:$0xff] }
  0x7b   : > { %7762 = vmatmul.mubr.msk.f32.gmra.mrb[46].mxu0 %vm588_vm1, %v371_v37  ;;  %v533_v37 = vld [vmem:[%s10335_s21 + $0x288] sm:$0xff] }
  0x7c   : > { %7764 = vmatprep.mubr.msk.f32.mxu0 %vm588_vm1, %v372_v39  ;;  %v534_v39 = vld [vmem:[%s10335_s21 + $0x290] sm:$0xff] }
  0x7d   : > { %7959 = vmatmul.mubr.msk.f32.gmra.mrb[48].mxu1 %vm588_vm1, %v501_v36  ;;  %v402_v36 = vld [vmem:[%s10347_s29 + $0x270] sm:$0xff] }
  0x7e   : > { %7961 = vmatprep.mubr.msk.f32.mxu1 %vm588_vm1, %v502_v38  ;;  %v403_v38 = vld [vmem:[%s10347_s29 + $0x278] sm:$0xff] }
  0x7f   : > { %7765 = vmatmul.mubr.msk.f32.gmra.mrb[48].mxu0 %vm588_vm1, %v373_v41  ;;  %v535_v41 = vld [vmem:[%s10335_s21 + $0x298] sm:$0xff] }
  0x80   : > { %7767 = vmatprep.mubr.msk.f32.mxu0 %vm588_vm1, %v374_v43  ;;  %v536_v43 = vld [vmem:[%s10335_s21 + $0x2a0] sm:$0xff] }
  0x81   : > { %7962 = vmatmul.mubr.msk.f32.gmra.mrb[50].mxu1 %vm588_vm1, %v503_v40  ;;  %v404_v40 = vld [vmem:[%s10347_s29 + $0x280] sm:$0xff] }
  0x82   : > { %7964 = vmatprep.mubr.msk.f32.mxu1 %vm588_vm1, %v504_v42  ;;  %v405_v42 = vld [vmem:[%s10347_s29 + $0x288] sm:$0xff] }
  0x83   : > { %7768 = vmatmul.mubr.msk.f32.gmra.mrb[50].mxu0 %vm588_vm1, %v375_v45  ;;  %v537_v45 = vld [vmem:[%s10335_s21 + $0x2a8] sm:$0xff] }
  0x84   : > { %7770 = vmatprep.mubr.msk.f32.mxu0 %vm588_vm1, %v376_v47  ;;  %v538_v47 = vld [vmem:[%s10335_s21 + $0x2b0] sm:$0xff] }
  0x85   : > { %7965 = vmatmul.mubr.msk.f32.gmra.mrb[52].mxu1 %vm588_vm1, %v505_v44  ;;  %v406_v44 = vld [vmem:[%s10347_s29 + $0x290] sm:$0xff] }
  0x86   : > { %7967 = vmatprep.mubr.msk.f32.mxu1 %vm588_vm1, %v506_v46  ;;  %v407_v46 = vld [vmem:[%s10347_s29 + $0x298] sm:$0xff] }
  0x87   : > { %7771 = vmatmul.mubr.msk.f32.gmra.mrb[52].mxu0 %vm588_vm1, %v377_v49  ;;  %v539_v49 = vld [vmem:[%s10335_s21 + $0x2b8] sm:$0xff] }
  0x88   : > { %7773 = vmatprep.mubr.msk.f32.mxu0 %vm588_vm1, %v378_v51  ;;  %v540_v51 = vld [vmem:[%s10335_s21 + $0x2c0] sm:$0xff] }
  0x89   : > { %7968 = vmatmul.mubr.msk.f32.gmra.mrb[54].mxu1 %vm588_vm1, %v507_v48  ;;  %v408_v48 = vld [vmem:[%s10347_s29 + $0x2a0] sm:$0xff] }
  0x8a   : > { %7970 = vmatprep.mubr.msk.f32.mxu1 %vm588_vm1, %v508_v50  ;;  %v409_v50 = vld [vmem:[%s10347_s29 + $0x2a8] sm:$0xff] }
  0x8b   : > { %7774 = vmatmul.mubr.msk.f32.gmra.mrb[54].mxu0 %vm588_vm1, %v379_v53  ;;  %v541_v53 = vld [vmem:[%s10335_s21 + $0x2c8] sm:$0xff] }
  0x8c   : > { %7776 = vmatprep.mubr.msk.f32.mxu0 %vm588_vm1, %v380_v55  ;;  %v542_v55 = vld [vmem:[%s10335_s21 + $0x2d0] sm:$0xff] }
  0x8d   : > { %7971 = vmatmul.mubr.msk.f32.gmra.mrb[56].mxu1 %vm588_vm1, %v509_v52  ;;  %v410_v52 = vld [vmem:[%s10347_s29 + $0x2b0] sm:$0xff] }
  0x8e   : > { %7973 = vmatprep.mubr.msk.f32.mxu1 %vm588_vm1, %v510_v54  ;;  %v411_v54 = vld [vmem:[%s10347_s29 + $0x2b8] sm:$0xff] }
  0x8f   : > { %7777 = vmatmul.mubr.msk.f32.gmra.mrb[56].mxu0 %vm588_vm1, %v381_v57  ;;  %v543_v57 = vld [vmem:[%s10335_s21 + $0x2d8] sm:$0xff] }
  0x90   : > { %7779 = vmatprep.mubr.msk.f32.mxu0 %vm588_vm1, %v382_v59  ;;  %v414_v59 = vld [vmem:[%s10347_s29 + $0x2d0] sm:$0xff] }
  0x91   : > { %7974 = vmatmul.mubr.msk.f32.gmra.mrb[58].mxu1 %vm588_vm1, %v511_v56  ;;  %v412_v56 = vld [vmem:[%s10347_s29 + $0x2c0] sm:$0xff] }
  0x92   : > { %7976 = vmatprep.mubr.msk.f32.mxu1 %vm588_vm1, %v512_v58  ;;  %v413_v58 = vld [vmem:[%s10347_s29 + $0x2c8] sm:$0xff] }
  0x93   : > { %7780 = vmatmul.mubr.msk.f32.gmra.mrb[58].mxu0 %vm588_vm1, %v383_v61  ;;  %v415_v61 = vld [vmem:[%s10347_s29 + $0x2d8] sm:$0xff] }
  0x94   : > { %7782 = vmatprep.mubr.msk.f32.mxu0 %vm588_vm1, %v384_v63  ;;  %v416_v63 = vld [vmem:[%s10347_s29 + $0x2e0] sm:$0xff] }
  0x95   : > { %7977 = vmatmul.mubr.msk.f32.gmra.mrb[60].mxu1 %vm588_vm1, %v513_v60  ;;  %v544_v60 = vld [vmem:[%s10335_s21 + $0x2e0] sm:$0xff] }
  0x96   : > { %7979 = vmatprep.mubr.msk.f32.mxu1 %vm588_vm1, %v514_v62  ;;  %v545_v62 = vld [vmem:[%s10335_s21 + $0x2e8] sm:$0xff] }
  0x97   : > { %7783 = vmatmul.mubr.msk.f32.gmra.mrb[60].mxu0 %vm588_vm1, %v385_v1  ;;  %v417_v1 = vld [vmem:[%s10347_s29 + $0x2e8] sm:$0xff] }
  0x98   : > { %7785 = vmatprep.mubr.msk.f32.mxu0 %vm588_vm1, %v386_v3  ;;  %v418_v3 = vld [vmem:[%s10347_s29 + $0x2f0] sm:$0xff] }
  0x99   : > { %7980 = vmatmul.mubr.msk.f32.gmra.mrb[62].mxu1 %vm588_vm1, %v515_v0  ;;  %v546_v0 = vld [vmem:[%s10335_s21 + $0x2f0] sm:$0xff] }
  0x9a   : > { %7982 = vmatprep.mubr.msk.f32.mxu1 %vm588_vm1, %v516_v2  ;;  %v547_v2 = vld [vmem:[%s10335_s21 + $0x2f8] sm:$0xff] }
  0x9b   : > { %7786 = vmatmul.mubr.msk.f32.gmra.mrb[62].mxu0 %vm588_vm1, %v387_v6  ;;  %v419_v6 = vld [vmem:[%s10347_s29 + $0x2f8] sm:$0xff] }
  0x9c   : > { %7788 = vmatprep.mubr.msk.f32.mxu0 %vm588_vm1, %v388_v8  ;;  %v420_v8 = vld [vmem:[%s10347_s29 + $0x300] sm:$0xff] }
  0x9d   : > { %7983 = vmatmul.mubr.msk.f32.gmra.mrb[64].mxu1 %vm588_vm1, %v517_v4  ;;  %v548_v4 = vld [vmem:[%s10335_s21 + $0x300] sm:$0xff] }
  0x9e   : > { %7985 = vmatprep.mubr.msk.f32.mxu1 %vm588_vm1, %v518_v7  ;;  %v549_v7 = vld [vmem:[%s10335_s21 + $0x308] sm:$0xff] }
  0x9f   : > { %7789 = vmatmul.mubr.msk.f32.gmra.mrb[64].mxu0 %vm588_vm1, %v389_v10  ;;  %v421_v10 = vld [vmem:[%s10347_s29 + $0x308] sm:$0xff] }
  0xa0   : > { %7791 = vmatprep.mubr.msk.f32.mxu0 %vm588_vm1, %v390_v12  ;;  %v422_v12 = vld [vmem:[%s10347_s29 + $0x310] sm:$0xff] }
  0xa1   : > { %7986 = vmatmul.mubr.msk.f32.gmra.mrb[66].mxu1 %vm588_vm1, %v519_v9  ;;  %v550_v9 = vld [vmem:[%s10335_s21 + $0x310] sm:$0xff] }
  0xa2   : > { %7988 = vmatprep.mubr.msk.f32.mxu1 %vm588_vm1, %v520_v11  ;;  %v551_v11 = vld [vmem:[%s10335_s21 + $0x318] sm:$0xff] }
  0xa3   : > { %7792 = vmatmul.mubr.msk.f32.gmra.mrb[66].mxu0 %vm588_vm1, %v391_v14  ;;  %v423_v14 = vld [vmem:[%s10347_s29 + $0x318] sm:$0xff] }
  0xa4   : > { %7794 = vmatprep.mubr.msk.f32.mxu0 %vm588_vm1, %v392_v16  ;;  %v424_v16 = vld [vmem:[%s10347_s29 + $0x320] sm:$0xff] }
  0xa5   : > { %7989 = vmatmul.mubr.msk.f32.gmra.mrb[68].mxu1 %vm588_vm1, %v521_v13  ;;  %v552_v13 = vld [vmem:[%s10335_s21 + $0x320] sm:$0xff] }
  0xa6   : > { %7991 = vmatprep.mubr.msk.f32.mxu1 %vm588_vm1, %v522_v15  ;;  %v553_v15 = vld [vmem:[%s10335_s21 + $0x328] sm:$0xff] }
  0xa7   : > { %7795 = vmatmul.mubr.msk.f32.gmra.mrb[68].mxu0 %vm588_vm1, %v393_v18  ;;  %v425_v18 = vld [vmem:[%s10347_s29 + $0x328] sm:$0xff] }
  0xa8   : > { %7797 = vmatprep.mubr.msk.f32.mxu0 %vm588_vm1, %v394_v20  ;;  %v426_v20 = vld [vmem:[%s10347_s29 + $0x330] sm:$0xff] }
  0xa9   : > { %7992 = vmatmul.mubr.msk.f32.gmra.mrb[70].mxu1 %vm588_vm1, %v523_v17  ;;  %v554_v17 = vld [vmem:[%s10335_s21 + $0x330] sm:$0xff] }
  0xaa   : > { %7994 = vmatprep.mubr.msk.f32.mxu1 %vm588_vm1, %v524_v19  ;;  %v555_v19 = vld [vmem:[%s10335_s21 + $0x338] sm:$0xff] }
  0xab   : > { %7798 = vmatmul.mubr.msk.f32.gmra.mrb[70].mxu0 %vm588_vm1, %v395_v22  ;;  %v427_v22 = vld [vmem:[%s10347_s29 + $0x338] sm:$0xff] }
  0xac   : > { %7800 = vmatprep.mubr.msk.f32.mxu0 %vm588_vm1, %v396_v24  ;;  %v428_v24 = vld [vmem:[%s10347_s29 + $0x340] sm:$0xff] }
  0xad   : > { %7995 = vmatmul.mubr.msk.f32.gmra.mrb[72].mxu1 %vm588_vm1, %v525_v21  ;;  %v556_v21 = vld [vmem:[%s10335_s21 + $0x340] sm:$0xff] }
  0xae   : > { %7997 = vmatprep.mubr.msk.f32.mxu1 %vm588_vm1, %v526_v23  ;;  %v557_v23 = vld [vmem:[%s10335_s21 + $0x348] sm:$0xff] }
  0xaf   : > { %7801 = vmatmul.mubr.msk.f32.gmra.mrb[72].mxu0 %vm588_vm1, %v397_v26  ;;  %v10770_v26 = vld [vmem:[%s13798_s5] ss:$0 sm:$0xff] }
  0xb0   : > { %7803 = vmatprep.mubr.msk.f32.mxu0 %vm588_vm1, %v398_v28  ;;  %v559_v28 = vld [vmem:[%s10335_s21 + $0x358] sm:$0xff] }
  0xb1   : > { %7998 = vmatmul.mubr.msk.f32.gmra.mrb[74].mxu1 %vm588_vm1, %v527_v25  ;;  %v558_v25 = vld [vmem:[%s10335_s21 + $0x350] sm:$0xff] }
  0xb2   : > { %8000 = vmatprep.mubr.msk.f32.mxu1 %vm588_vm1, %v528_v27  ;;  %v429_v27 = vld [vmem:[%s10347_s29 + $0x348] sm:$0xff] }
  0xb3   : > { %7804 = vmatmul.mubr.msk.f32.gmra.mrb[74].mxu0 %vm588_vm1, %v399_v30  ;;  %v560_v30 = vld [vmem:[%s10335_s21 + $0x360] sm:$0xff] }
  0xb4   : > { %7806 = vmatprep.mubr.msk.f32.mxu0 %vm588_vm1, %v400_v32 }
  0xb5   : > { %8001 = vmatmul.mubr.msk.f32.gmra.mrb[76].mxu1 %vm588_vm1, %v529_v29  ;;  %v430_v29 = vld [vmem:[%s10347_s29 + $0x350] sm:$0xff] }
  0xb6   : > { %8003 = vmatprep.mubr.msk.f32.mxu1 %vm588_vm1, %v530_v31 }
  0xb7   : > { %7807 = vmatmul.mubr.msk.f32.gmra.mrb[76].mxu0 %vm588_vm1, %v401_v34 }
  0xb8   : > { %7809 = vmatprep.mubr.msk.f32.mxu0 %vm588_vm1, %v402_v36  ;;  %v561_v36 = vld [vmem:[%s10335_s21 + $0x368] sm:$0xff] }
  0xb9   : > { %8004 = vmatmul.mubr.msk.f32.gmra.mrb[78].mxu1 %vm588_vm1, %v531_v33 }
  0xba   : > { %8006 = vmatprep.mubr.msk.f32.mxu1 %vm588_vm1, %v532_v35  ;;  %v431_v35 = vld [vmem:[%s10347_s29 + $0x358] sm:$0xff] }
  0xbb   : > { %7810 = vmatmul.mubr.msk.f32.gmra.mrb[78].mxu0 %vm588_vm1, %v403_v38 }
  0xbc   : > { %7812 = vmatprep.mubr.msk.f32.mxu0 %vm588_vm1, %v404_v40 }
  0xbd   : > { %8007 = vmatmul.mubr.msk.f32.gmra.mrb[80].mxu1 %vm588_vm1, %v533_v37  ;;  %v432_v37 = vld [vmem:[%s10347_s29 + $0x360] sm:$0xff] }
  0xbe   : > { %8009 = vmatprep.mubr.msk.f32.mxu1 %vm588_vm1, %v534_v39 }
  0xbf   : > { %7813 = vmatmul.mubr.msk.f32.gmra.mrb[80].mxu0 %vm588_vm1, %v405_v42 }
  0xc0   : > { %7815 = vmatprep.mubr.msk.f32.mxu0 %vm588_vm1, %v406_v44 }
  0xc1   : > { %8010 = vmatmul.mubr.msk.f32.gmra.mrb[82].mxu1 %vm588_vm1, %v535_v41  ;;  %v562_v41 = vld [vmem:[%s10335_s21 + $0x370] sm:$0xff] }
  0xc2   : > { %8012 = vmatprep.mubr.msk.f32.mxu1 %vm588_vm1, %v536_v43 }
  0xc3   : > { %7816 = vmatmul.mubr.msk.f32.gmra.mrb[82].mxu0 %vm588_vm1, %v407_v46  ;;  %v433_v46 = vld [vmem:[%s10347_s29 + $0x368] sm:$0xff] }
  0xc4   : > { %7818 = vmatprep.mubr.msk.f32.mxu0 %vm588_vm1, %v408_v48  ;;  %v434_v48 = vld [vmem:[%s10347_s29 + $0x370] sm:$0xff] }
  0xc5   : > { %8013 = vmatmul.mubr.msk.f32.gmra.mrb[84].mxu1 %vm588_vm1, %v537_v45 }
  0xc6   : > { %8015 = vmatprep.mubr.msk.f32.mxu1 %vm588_vm1, %v538_v47  ;;  %v563_v47 = vld [vmem:[%s10335_s21 + $0x378] sm:$0xff] }
  0xc7   : > { %7819 = vmatmul.mubr.msk.f32.gmra.mrb[84].mxu0 %vm588_vm1, %v409_v50 }
  0xc8   : > { %7821 = vmatprep.mubr.msk.f32.mxu0 %vm588_vm1, %v410_v52 }
  0xc9   : > { %8016 = vmatmul.mubr.msk.f32.gmra.mrb[86].mxu1 %vm588_vm1, %v539_v49 }
  0xca   : > { %8018 = vmatprep.mubr.msk.f32.mxu1 %vm588_vm1, %v540_v51  ;;  %v564_v51 = vld [vmem:[%s10335_s21 + $0x380] sm:$0xff] }
  0xcb   : > { %7822 = vmatmul.mubr.msk.f32.gmra.mrb[86].mxu0 %vm588_vm1, %v411_v54 }
  0xcc   : > { %7824 = vmatprep.mubr.msk.f32.mxu0 %vm588_vm1, %v412_v56 }
  0xcd   : > { %8019 = vmatmul.mubr.msk.f32.gmra.mrb[88].mxu1 %vm588_vm1, %v541_v53 }
  0xce   : > { %8021 = vmatprep.mubr.msk.f32.mxu1 %vm588_vm1, %v542_v55 }
  0xcf   : > { %7825 = vmatmul.mubr.msk.f32.gmra.mrb[88].mxu0 %vm588_vm1, %v413_v58  ;;  %v565_v58 = vld [vmem:[%s10335_s21 + $0x388] sm:$0xff] }
  0xd0   : > { %7827 = vmatprep.mubr.msk.f32.mxu0 %vm588_vm1, %v414_v59  ;;  %v436_v59 = vld [vmem:[%s10347_s29 + $0x380] sm:$0xff] }
  0xd1   : > { %8022 = vmatmul.mubr.msk.f32.gmra.mrb[90].mxu1 %vm588_vm1, %v543_v57  ;;  %v435_v57 = vld [vmem:[%s10347_s29 + $0x378] sm:$0xff] }
  0xd2   : > { %8024 = vmatprep.mubr.msk.f32.mxu1 %vm588_vm1, %v544_v60  ;;  %v566_v60 = vld [vmem:[%s10335_s21 + $0x390] sm:$0xff] }
  0xd3   : > { %7828 = vmatmul.mubr.msk.f32.gmra.mrb[90].mxu0 %vm588_vm1, %v415_v61 }
  0xd4   : > { %7830 = vmatprep.mubr.msk.f32.mxu0 %vm588_vm1, %v416_v63 }
  0xd5   : > { %8025 = vmatmul.mubr.msk.f32.gmra.mrb[92].mxu1 %vm588_vm1, %v545_v62 }
  0xd6   : > { %8027 = vmatprep.mubr.msk.f32.mxu1 %vm588_vm1, %v546_v0 }
  0xd7   : > { %7831 = vmatmul.mubr.msk.f32.gmra.mrb[92].mxu0 %vm588_vm1, %v417_v1 }
  0xd8   : > { %7833 = vmatprep.mubr.msk.f32.mxu0 %vm588_vm1, %v418_v3 }
  0xd9   : > { %8028 = vmatmul.mubr.msk.f32.gmra.mrb[94].mxu1 %vm588_vm1, %v547_v2 }
  0xda   : > { %8030 = vmatprep.mubr.msk.f32.mxu1 %vm588_vm1, %v548_v4  ;;  %v437_v4 = vld [vmem:[%s10347_s29 + $0x388] sm:$0xff] }
  0xdb   : > { %7834 = vmatmul.mubr.msk.f32.gmra.mrb[94].mxu0 %vm588_vm1, %v419_v6  ;;  %v567_v6 = vld [vmem:[%s10335_s21 + $0x398] sm:$0xff] }
  0xdc   : > { %7836 = vmatprep.mubr.msk.f32.mxu0 %vm588_vm1, %v420_v8  ;;  %v568_v8 = vld [vmem:[%s10335_s21 + $0x3a0] sm:$0xff] }
  0xdd   : > { %8031 = vmatmul.mubr.msk.f32.gmra.mrb[96].mxu1 %vm588_vm1, %v549_v7  ;;  %v438_v7 = vld [vmem:[%s10347_s29 + $0x390] sm:$0xff] }
  0xde   : > { %8033 = vmatprep.mubr.msk.f32.mxu1 %vm588_vm1, %v550_v9 }
  0xdf   : > { %7837 = vmatmul.mubr.msk.f32.gmra.mrb[96].mxu0 %vm588_vm1, %v421_v10 }
  0xe0   : > { %7839 = vmatprep.mubr.msk.f32.mxu0 %vm588_vm1, %v422_v12 }
  0xe1   : > { %8034 = vmatmul.mubr.msk.f32.gmra.mrb[98].mxu1 %vm588_vm1, %v551_v11 }
  0xe2   : > { %8036 = vmatprep.mubr.msk.f32.mxu1 %vm588_vm1, %v552_v13 }
  0xe3   : > { %7840 = vmatmul.mubr.msk.f32.gmra.mrb[98].mxu0 %vm588_vm1, %v423_v14 }
  0xe4   : > { %7842 = vmatprep.mubr.msk.f32.mxu0 %vm588_vm1, %v424_v16  ;;  %v439_v16 = vld [vmem:[%s10347_s29 + $0x398] sm:$0xff] }
  0xe5   : > { %8037 = vmatmul.mubr.msk.f32.gmra.mrb[100].mxu1 %vm588_vm1, %v553_v15 }
  0xe6   : > { %8039 = vmatprep.mubr.msk.f32.mxu1 %vm588_vm1, %v554_v17  ;;  %v569_v17 = vld [vmem:[%s10335_s21 + $0x3a8] sm:$0xff] }
  0xe7   : > { %7843 = vmatmul.mubr.msk.f32.gmra.mrb[100].mxu0 %vm588_vm1, %v425_v18  ;;  %v440_v18 = vld [vmem:[%s10347_s29 + $0x3a0] sm:$0xff] }
  0xe8   : > { %7845 = vmatprep.mubr.msk.f32.mxu0 %vm588_vm1, %v426_v20 }
  0xe9   : > { %8040 = vmatmul.mubr.msk.f32.gmra.mrb[102].mxu1 %vm588_vm1, %v555_v19  ;;  %v570_v19 = vld [vmem:[%s10335_s21 + $0x3b0] sm:$0xff] }
  0xea   : > { %8042 = vmatprep.mubr.msk.f32.mxu1 %vm588_vm1, %v556_v21 }
  0xeb   : > { %7846 = vmatmul.mubr.msk.f32.gmra.mrb[102].mxu0 %vm588_vm1, %v427_v22 }
  0xec   : > { %7848 = vmatprep.mubr.msk.f32.mxu0 %vm588_vm1, %v428_v24 }
  0xed   : > { %8043 = vmatmul.mubr.msk.f32.gmra.mrb[104].mxu1 %vm588_vm1, %v557_v23 }
  0xee   : > { %8045 = vmatprep.mubr.msk.f32.mxu1 %vm588_vm1, %v558_v25 }
  0xef   : > { %7849 = vmatmul.mubr.msk.f32.gmra.mrb[104].mxu0 %vm588_vm1, %v429_v27 }
  0xf0   : > { %v7888_v31 = vpop.f32.mrb[0].mxu1  ;;  %7851 = vmatprep.mubr.msk.f32.mxu0 %vm588_vm1, %v430_v29  ;;  %v571_v29 = vld [vmem:[%s10335_s21 + $0x3b8] sm:$0xff] }
  0xf1   : > { %v2149_v32 = vadd.f32 %v7888_v31, %v10770_v26  ;;  %v2143_v33 = vpop.f32.mrb[1].mxu1  ;;  %8046 = vmatmul.mubr.msk.f32.gmra.mrb[106].mxu1 %vm588_vm1, %v559_v28  ;;  %v441_v28 = vld [vmem:[%s10347_s29 + $0x3a8] sm:$0xff]  ;;  %v572_v31 = vld [vmem:[%s10335_s21 + $0x3c0] sm:$0xff] }
  0xf2   : > { %v2144_v34 = vadd.f32 %v10770_v26, %v2143_v33  ;;  %8048 = vmatprep.mubr.msk.f32.mxu1 %vm588_vm1, %v560_v30  ;;  %v10787_v40 = vpop.f32.mrb[0].mxu0  ;;  %v442_v30 = vld [vmem:[%s10347_s29 + $0x3b0] sm:$0xff] }
  0xf3   : > { %7852 = vmatmul.mubr.msk.f32.gmra.mrb[106].mxu0 %vm588_vm1, %v431_v35  ;;  %v10793_v44 = vpop.f32.mrb[1].mxu0 }
  0xf4   : > { %v8974_v38 = vpack.c.bf16 %v2149_v32, %v2144_v34  ;;  %v7891_v39 = vpop.f32.mrb[2].mxu1  ;;  %7854 = vmatprep.mubr.msk.f32.mxu0 %vm588_vm1, %v432_v37 }
  0xf5   : > { %v2159_v42 = vadd.f32 %v7891_v39, %v10770_v26  ;;  %v2153_v43 = vpop.f32.mrb[3].mxu1  ;;  %8049 = vmatmul.mubr.msk.f32.gmra.mrb[108].mxu1 %vm588_vm1, %v561_v36  ;;  %v443_v39 = vld [vmem:[%s10347_s29 + $0x3b8] sm:$0xff] }
  0xf6   : > { %v2154_v45 = vadd.f32 %v10770_v26, %v2153_v43  ;;  %8975 = vmatprep.subr.bf16.mxu0 %v8974_v38  ;;  %8051 = vmatprep.mubr.msk.f32.mxu1 %vm588_vm1, %v562_v41  ;;  %v10802_v52 = vpop.f32.mrb[2].mxu0  ;;  %v573_v41 = vld [vmem:[%s10335_s21 + $0x3c8] sm:$0xff]  ;;  %v574_v43 = vld [vmem:[%s10335_s21 + $0x3d0] sm:$0xff] }
  0xf7   : > { %8977 = vmatpush3.bf16.xpose.msra.mxu0 %v8974_v38  ;;  %v10807_v55 = vpop.f32.mrb[3].mxu0 }
  0xf8   : > { %v8978_v49 = vpack.c.bf16 %v2159_v42, %v2154_v45  ;;  %v7894_v50 = vpop.f32.mrb[4].mxu1  ;;  %7855 = vmatmul.mubr.msk.f32.gmra.mrb[108].mxu0 %vm588_vm1, %v433_v46  ;;  %v444_v42 = vld [vmem:[%s10347_s29 + $0x3c0] sm:$0xff] }
  0xf9   : > { %v2169_v53 = vadd.f32 %v7894_v50, %v10770_v26  ;;  %v2163_v54 = vpop.f32.mrb[5].mxu1  ;;  %8052 = vmatmul.mubr.msk.f32.gmra.mrb[110].mxu1 %vm588_vm1, %v563_v47  ;;  %7857 = vmatprep.mubr.msk.f32.mxu0 %vm588_vm1, %v434_v48 }
  0xfa   : > { %v2164_v56 = vadd.f32 %v10770_v26, %v2163_v54  ;;  %8979 = vmatprep.subr.bf16.mxu0 %v8978_v49  ;;  %8054 = vmatprep.mubr.msk.f32.mxu1 %vm588_vm1, %v564_v51  ;;  %v10816_v63 = vpop.f32.mrb[4].mxu0  ;;  %v575_v54 = vld [vmem:[%s10335_s21 + $0x3d8] sm:$0xff] }
  0xfb   : > { %v10821_v2 = vpop.f32.mrb[5].mxu0 }
  0xfc   : > { %v8982_v61 = vpack.c.bf16 %v2169_v53, %v2164_v56  ;;  %v7897_v62 = vpop.f32.mrb[6].mxu1  ;;  %7858 = vmatmul.mubr.msk.f32.gmra.mrb[110].mxu0 %vm588_vm1, %v435_v57  ;;  %v445_v53 = vld [vmem:[%s10347_s29 + $0x3c8] sm:$0xff]  ;;  %v446_v56 = vld [vmem:[%s10347_s29 + $0x3d0] sm:$0xff]  ;;  %v576_v57 = vld [vmem:[%s10335_s21 + $0x3e0] sm:$0xff] }
  0xfd   : > { %v2179_v0 = vadd.f32 %v7897_v62, %v10770_v26  ;;  %v2173_v1 = vpop.f32.mrb[7].mxu1  ;;  %8055 = vmatmul.mubr.msk.f32.gmra.mrb[112].mxu1 %vm588_vm1, %v565_v58  ;;  %7860 = vmatprep.mubr.msk.f32.mxu0 %vm588_vm1, %v436_v59 }
  0xfe   : > { %v2174_v3 = vadd.f32 %v10770_v26, %v2173_v1  ;;  %8057 = vmatprep.mubr.msk.f32.mxu1 %vm588_vm1, %v566_v60  ;;  %v10830_v11 = vpop.f32.mrb[6].mxu0 }
  0xff   : > { %8981 = vmatpush3.bf16.xpose.msra.mxu0 %v8978_v49  ;;  %v10835_v14 = vpop.f32.mrb[7].mxu0 }
 0x100   : > { %v8986_v9 = vpack.c.bf16 %v2179_v0, %v2174_v3  ;;  %v7900_v10 = vpop.f32.mrb[8].mxu1  ;;  %8983 = vmatprep.subr.bf16.mxu0 %v8982_v61  ;;  %7861 = vmatmul.mubr.msk.f32.gmra.mrb[112].mxu0 %vm588_vm1, %v437_v4  ;;  %v447_v3 = vld [vmem:[%s10347_s29 + $0x3d8] sm:$0xff]  ;;  %v577_v4 = vld [vmem:[%s10335_s21 + $0x3e8] sm:$0xff] }
 0x101   : > { %v2189_v12 = vadd.f32 %v7900_v10, %v10770_v26  ;;  %v2183_v13 = vpop.f32.mrb[9].mxu1  ;;  %8058 = vmatmul.mubr.msk.f32.gmra.mrb[114].mxu1 %vm588_vm1, %v567_v6  ;;  %7863 = vmatprep.mubr.msk.f32.mxu0 %vm588_vm1, %v438_v7  ;;  %v448_v6 = vld [vmem:[%s10347_s29 + $0x3e0] sm:$0xff] }
 0x102   : > { %v2184_v15 = vadd.f32 %v10770_v26, %v2183_v13  ;;  %8060 = vmatprep.mubr.msk.f32.mxu1 %vm588_vm1, %v568_v8  ;;  %v10846_v22 = vpop.f32.mrb[8].mxu0  ;;  %v578_v13 = vld [vmem:[%s10335_s21 + $0x3f0] sm:$0xff] }
 0x103   : > { %v10851_v25 = vpop.f32.mrb[9].mxu0 }
 0x104   : > { %v10844_v20 = vpack.c.bf16 %v2189_v12, %v2184_v15  ;;  %v7903_v21 = vpop.f32.mrb[10].mxu1  ;;  %7864 = vmatmul.mubr.msk.f32.gmra.mrb[114].mxu0 %vm588_vm1, %v439_v16 }
 0x105   : > { %v2199_v23 = vadd.f32 %v7903_v21, %v10770_v26  ;;  %v2193_v24 = vpop.f32.mrb[11].mxu1  ;;  %8061 = vmatmul.mubr.msk.f32.gmra.mrb[116].mxu1 %vm588_vm1, %v569_v17  ;;  %7866 = vmatprep.mubr.msk.f32.mxu0 %vm588_vm1, %v440_v18  ;;  %v449_v17 = vld [vmem:[%s10347_s29 + $0x3e8] sm:$0xff]  ;;  %v10920_v18 = vld [vmem:[%s13796_s3] ss:$0 sm:$0xff]  ;;  %v450_v21 = vld [vmem:[%s10347_s29 + $0x3f0] sm:$0xff] }
 0x106   : > { %v2194_v27 = vadd.f32 %v10770_v26, %v2193_v24  ;;  %8063 = vmatprep.mubr.msk.f32.mxu1 %vm588_vm1, %v570_v19  ;;  %v10862_v34 = vpop.f32.mrb[10].mxu0  ;;  %v579_v19 = vld [vmem:[%s10335_s21 + $0x3f8] sm:$0xff] }
 0x107   : > { %8985 = vmatpush3.bf16.xpose.msra.mxu0 %v8982_v61  ;;  %v10867_v37 = vpop.f32.mrb[11].mxu0 }
 0x108   : > { %v10860_v32 = vpack.c.bf16 %v2199_v23, %v2194_v27  ;;  %v7906_v33 = vpop.f32.mrb[12].mxu1  ;;  %8987 = vmatprep.subr.bf16.mxu0 %v8986_v9  ;;  %7867 = vmatmul.mubr.msk.f32.gmra.mrb[116].mxu0 %vm588_vm1, %v441_v28 }
 0x109   : > { %v2209_v35 = vadd.f32 %v7906_v33, %v10770_v26  ;;  %v2203_v36 = vpop.f32.mrb[13].mxu1  ;;  %8064 = vmatmul.mubr.msk.f32.gmra.mrb[118].mxu1 %vm588_vm1, %v571_v29  ;;  %7869 = vmatprep.mubr.msk.f32.mxu0 %vm588_vm1, %v442_v30  ;;  %v451_v33 = vld [vmem:[%s10347_s29 + $0x3f8] sm:$0xff] }
 0x10a   : > { %v2204_v38 = vadd.f32 %v10770_v26, %v2203_v36  ;;  %8066 = vmatprep.mubr.msk.f32.mxu1 %vm588_vm1, %v572_v31  ;;  %v10878_v47 = vpop.f32.mrb[12].mxu0 }
 0x10b   : > { %v10883_v50 = vpop.f32.mrb[13].mxu0 }
 0x10c   : > { %v10876_v45 = vpack.c.bf16 %v2209_v35, %v2204_v38  ;;  %v7909_v46 = vpop.f32.mrb[14].mxu1  ;;  %7870 = vmatmul.mubr.msk.f32.gmra.mrb[118].mxu0 %vm588_vm1, %v443_v39  ;;  %v1044_v38 = vadd.f32 %v10920_v18, %v10793_v44 }
 0x10d   : > { %v2219_v48 = vadd.f32 %v7909_v46, %v10770_v26  ;;  %v2213_v49 = vpop.f32.mrb[15].mxu1  ;;  %8067 = vmatmul.mubr.msk.f32.gmra.mrb[120].mxu1 %vm588_vm1, %v573_v41  ;;  %7872 = vmatprep.mubr.msk.f32.mxu0 %vm588_vm1, %v444_v42 }
 0x10e   : > { %v2214_v51 = vadd.f32 %v10770_v26, %v2213_v49  ;;  %8069 = vmatprep.mubr.msk.f32.mxu1 %vm588_vm1, %v574_v43  ;;  %v10895_v60 = vpop.f32.mrb[14].mxu0 }
 0x10f   : > { %8989 = vmatpush3.bf16.xpose.msra.mxu0 %v8986_v9  ;;  %v10900_v0 = vpop.f32.mrb[15].mxu0 }
 0x110   : > { %v10892_v58 = vpack.c.bf16 %v2219_v48, %v2214_v51  ;;  %v7912_v59 = vpop.f32.mrb[16].mxu1  ;;  %8991 = vmatprep.subr.bf16.mxu0 %v10844_v20  ;;  %7873 = vmatmul.mubr.msk.f32.gmra.mrb[120].mxu0 %vm588_vm1, %v445_v53 }
 0x111   : > { %v2229_v61 = vadd.f32 %v7912_v59, %v10770_v26  ;;  %v2223_v62 = vpop.f32.mrb[17].mxu1  ;;  %8070 = vmatmul.mubr.msk.f32.gmra.mrb[122].mxu1 %vm588_vm1, %v575_v54  ;;  %7875 = vmatprep.mubr.msk.f32.mxu0 %vm588_vm1, %v446_v56 }
 0x112   : > { %v2224_v1 = vadd.f32 %v10770_v26, %v2223_v62  ;;  %8072 = vmatprep.mubr.msk.f32.mxu1 %vm588_vm1, %v576_v57  ;;  %v10908_v9 = vpop.f32.mrb[16].mxu0 }
 0x113   : > { %v1123_v15 = vpop.f32.mrb[17].mxu0 }
 0x114   : > { %v9006_v7 = vpack.c.bf16 %v2229_v61, %v2224_v1  ;;  %v7915_v8 = vpop.f32.mrb[18].mxu1  ;;  %7876 = vmatmul.mubr.msk.f32.gmra.mrb[122].mxu0 %vm588_vm1, %v447_v3  ;;  %v1124_v23 = vadd.f32 %v10920_v18, %v1123_v15 }
 0x115   : > { %v2239_v10 = vadd.f32 %v7915_v8, %v10770_v26  ;;  %v2233_v12 = vpop.f32.mrb[19].mxu1  ;;  %8073 = vmatmul.mubr.msk.f32.gmra.mrb[124].mxu1 %vm588_vm1, %v577_v4  ;;  %7878 = vmatprep.mubr.msk.f32.mxu0 %vm588_vm1, %v448_v6 }
 0x116   : > { %9007 = vmatprep.subr.bf16.mxu1 %v9006_v7  ;;  %v2234_v16 = vadd.f32 %v10770_v26, %v2233_v12  ;;  %8075 = vmatprep.mubr.msk.f32.mxu1 %vm588_vm1, %v578_v13  ;;  %v10928_v28 = vpop.f32.mrb[18].mxu0 }
 0x117   : > { %8993 = vmatpush3.bf16.xpose.msra.mxu0 %v10844_v20  ;;  %9009 = vmatpush3.bf16.xpose.msra.mxu1 %v9006_v7  ;;  %v10933_v20 = vpop.f32.mrb[19].mxu0 }
 0x118   : > { %8995 = vmatprep.subr.bf16.mxu0 %v10860_v32  ;;  %v9010_v24 = vpack.c.bf16 %v2239_v10, %v2234_v16  ;;  %v7918_v27 = vpop.f32.mrb[20].mxu1  ;;  %7879 = vmatmul.mubr.msk.f32.gmra.mrb[124].mxu0 %vm588_vm1, %v449_v17 }
 0x119   : > { %v2249_v29 = vadd.f32 %v7918_v27, %v10770_v26  ;;  %v2243_v30 = vpop.f32.mrb[21].mxu1  ;;  %8076 = vmatmul.mubr.msk.f32.gmra.mrb[126].mxu1 %vm588_vm1, %v579_v19  ;;  %7881 = vmatprep.mubr.msk.f32.mxu0 %vm588_vm1, %v450_v21 }
 0x11a   : > { %9011 = vmatprep.subr.bf16.mxu1 %v9010_v24  ;;  %v2244_v31 = vadd.f32 %v10770_v26, %v2243_v30  ;;  %8166 = vmatprep.mubr.f32.mxu1 %v1124_v23  ;;  %v10940_v39 = vpop.f32.mrb[20].mxu0 }
 0x11b   : > { %v10944_v43 = vpop.f32.mrb[21].mxu0 }
 0x11c   : > { %v9014_v35 = vpack.c.bf16 %v2249_v29, %v2244_v31  ;;  %v7921_v36 = vpop.f32.mrb[22].mxu1  ;;  %7882 = vmatmul.mubr.msk.f32.gmra.mrb[126].mxu0 %vm588_vm1, %v451_v33 }
 0x11d   : > { %v2259_v41 = vadd.f32 %v7921_v36, %v10770_v26  ;;  %v2253_v42 = vpop.f32.mrb[23].mxu1  ;;  %8110 = vmatprep.mubr.f32.mxu0 %v1044_v38  ;;  %v1049_v36 = vadd.f32 %v10787_v40, %v10920_v18  ;;  %v1059_v40 = vadd.f32 %v10802_v52, %v10920_v18  ;;  %v1069_v52 = vadd.f32 %v10816_v63, %v10920_v18 }
 0x11e   : > { %v2254_v46 = vadd.f32 %v10770_v26, %v2253_v42  ;;  %v10949_v49 = vpop.f32.mrb[22].mxu0  ;;  %v1079_v63 = vadd.f32 %v10830_v11, %v10920_v18  ;;  %v1089_v11 = vadd.f32 %v10846_v22, %v10920_v18  ;;  %v1099_v22 = vadd.f32 %v10862_v34, %v10920_v18 }
 0x11f   : > { %8997 = vmatpush3.bf16.xpose.msra.mxu0 %v10860_v32  ;;  %9013 = vmatpush3.bf16.xpose.msra.mxu1 %v9010_v24  ;;  %v10952_v54 = vpop.f32.mrb[23].mxu0  ;;  %v1109_v34 = vadd.f32 %v10878_v47, %v10920_v18 }
 0x120   : > { %8999 = vmatprep.subr.bf16.mxu0 %v10876_v45  ;;  %9015 = vmatprep.subr.bf16.mxu1 %v9014_v35  ;;  %v9018_v48 = vpack.c.bf16 %v2259_v41, %v2254_v46  ;;  %v7924_v44 = vpop.f32.mrb[24].mxu1 }
 0x121   : > { %v2269_v51 = vadd.f32 %v7924_v44, %v10770_v26  ;;  %v2263_v53 = vpop.f32.mrb[25].mxu1  ;;  %v1054_v44 = vadd.f32 %v10920_v18, %v10807_v55 }
 0x122   : > { %v2264_v56 = vadd.f32 %v10770_v26, %v2263_v53  ;;  %v10955_v61 = vpop.f32.mrb[24].mxu0 }
 0x123   : > { %v10958_v1 = vpop.f32.mrb[25].mxu0 }
 0x124   : > { %v9022_v57 = vpack.c.bf16 %v2269_v51, %v2264_v56  ;;  %v7927_v59 = vpop.f32.mrb[26].mxu1 }
 0x125   : > { %v2279_v32 = vadd.f32 %v7927_v59, %v10770_v26  ;;  %v2273_v62 = vpop.f32.mrb[27].mxu1 }
 0x126   : > { %v2274_v3 = vadd.f32 %v10770_v26, %v2273_v62  ;;  %v10963_v7 = vpop.f32.mrb[26].mxu0 }
 0x127   : > { %9001 = vmatpush3.bf16.xpose.msra.mxu0 %v10876_v45  ;;  %9017 = vmatpush3.bf16.xpose.msra.mxu1 %v9014_v35  ;;  %v10966_v12 = vpop.f32.mrb[27].mxu0 }
 0x128   : > { %9003 = vmatprep.subr.bf16.mxu0 %v10892_v58  ;;  %v9026_v4 = vpack.c.bf16 %v2279_v32, %v2274_v3  ;;  %v7930_v6 = vpop.f32.mrb[28].mxu1  ;;  %9019 = vmatprep.subr.bf16.mxu1 %v9018_v48  ;;  %v1064_v32 = vadd.f32 %v10920_v18, %v10821_v2 }
 0x129   : > { %v2289_v8 = vadd.f32 %v7930_v6, %v10770_v26  ;;  %v2283_v10 = vpop.f32.mrb[29].mxu1 }
 0x12a   : > { %v2284_v13 = vadd.f32 %v10770_v26, %v2283_v10  ;;  %v10971_v17 = vpop.f32.mrb[28].mxu0 }
 0x12b   : > { %v10974_v21 = vpop.f32.mrb[29].mxu0 }
 0x12c   : > { %v10969_v15 = vpack.c.bf16 %v2289_v8, %v2284_v13  ;;  %v7933_v16 = vpop.f32.mrb[30].mxu1 }
 0x12d   : > { %v2299_v45 = vadd.f32 %v7933_v16, %v10770_v26  ;;  %v2293_v19 = vpop.f32.mrb[31].mxu1 }
 0x12e   : > { %v2294_v23 = vadd.f32 %v10770_v26, %v2293_v19  ;;  %v10980_v29 = vpop.f32.mrb[30].mxu0  ;;  %v1074_v19 = vadd.f32 %v10920_v18, %v10835_v14 }
 0x12f   : > { %9005 = vmatpush3.bf16.xpose.msra.mxu0 %v10892_v58  ;;  %9021 = vmatpush3.bf16.xpose.msra.mxu1 %v9018_v48  ;;  %v10983_v33 = vpop.f32.mrb[31].mxu0 }
 0x130   : > { %v10978_v24 = vpack.c.bf16 %v2299_v45, %v2294_v23  ;;  %v7936_v27 = vpop.f32.mrb[32].mxu1  ;;  %9023 = vmatprep.subr.bf16.mxu1 %v9022_v57 }
 0x131   : > { %v2309_v30 = vadd.f32 %v7936_v27, %v10770_v26  ;;  %v2303_v31 = vpop.f32.mrb[33].mxu1 }
 0x132   : > { %v2304_v35 = vadd.f32 %v10770_v26, %v2303_v31  ;;  %v10988_v58 = vpop.f32.mrb[32].mxu0 }
 0x133   : > { %v10991_v48 = vpop.f32.mrb[33].mxu0 }
 0x134   : > { %v9038_v38 = vpack.c.bf16 %v2309_v30, %v2304_v35  ;;  %v7939_v41 = vpop.f32.mrb[34].mxu1  ;;  %v1204_v47 = vadd.f32 %v10920_v18, %v10991_v48  ;;  %v1129_v48 = vadd.f32 %v10908_v9, %v10920_v18  ;;  %v1139_v9 = vadd.f32 %v10928_v28, %v10920_v18 }
 0x135   : > { %v2319_v42 = vadd.f32 %v7939_v41, %v10770_v26  ;;  %v2313_v46 = vpop.f32.mrb[35].mxu1  ;;  %v1149_v28 = vadd.f32 %v10940_v39, %v10920_v18  ;;  %v1159_v39 = vadd.f32 %v10949_v49, %v10920_v18  ;;  %v1169_v49 = vadd.f32 %v10955_v61, %v10920_v18 }
 0x136   : > { %8111 = vmatmul.mubr.f32.vlgmr.msra.gmra.mrb[128].mxu0 %v1049_v36  ;;  %9039 = vmatprep.subr.bf16.mxu0 %v9038_v38  ;;  %v2314_v51 = vadd.f32 %v10770_v26, %v2313_v46  ;;  %v10998_v59 = vpop.f32.mrb[34].mxu0  ;;  %v1179_v61 = vadd.f32 %v10963_v7, %v10920_v18  ;;  %v1189_v7 = vadd.f32 %v10971_v17, %v10920_v18 }
 0x137   : > { %9025 = vmatpush3.bf16.xpose.msra.mxu1 %v9022_v57  ;;  %9041 = vmatpush3.bf16.xpose.msra.mxu0 %v9038_v38  ;;  %v11003_v3 = vpop.f32.mrb[35].mxu0 }
 0x138   : > { %v9042_v53 = vpack.c.bf16 %v2319_v42, %v2314_v51  ;;  %8113 = vmatprep.mubr.f32.mxu0 %v1054_v44  ;;  %9027 = vmatprep.subr.bf16.mxu1 %v9026_v4  ;;  %v7942_v56 = vpop.f32.mrb[36].mxu1 }
 0x139   : > { %v2329_v62 = vadd.f32 %v7942_v56, %v10770_v26  ;;  %v2323_v55 = vpop.f32.mrb[37].mxu1 }
 0x13a   : > { %8114 = vmatmul.mubr.f32.gmra.mrb[130].mxu0 %v1059_v40  ;;  %9043 = vmatprep.subr.bf16.mxu0 %v9042_v53  ;;  %v2324_v57 = vadd.f32 %v10770_v26, %v2323_v55  ;;  %v11008_v10 = vpop.f32.mrb[36].mxu0  ;;  %v1094_v40 = vadd.f32 %v10920_v18, %v10867_v37 }
 0x13b   : > { %8116 = vmatprep.mubr.f32.mxu0 %v1064_v32  ;;  %v11011_v16 = vpop.f32.mrb[37].mxu0 }
 0x13c   : > { %v9046_v6 = vpack.c.bf16 %v2329_v62, %v2324_v57  ;;  %v7945_v8 = vpop.f32.mrb[38].mxu1 }
 0x13d   : > { %v2339_v13 = vadd.f32 %v7945_v8, %v10770_v26  ;;  %v2333_v2 = vpop.f32.mrb[39].mxu1 }
 0x13e   : > { %8117 = vmatmul.mubr.f32.gmra.mrb[132].mxu0 %v1069_v52  ;;  %v2334_v45 = vadd.f32 %v10770_v26, %v2333_v2  ;;  %v11019_v30 = vpop.f32.mrb[38].mxu0 }
 0x13f   : > { %9029 = vmatpush3.bf16.xpose.msra.mxu1 %v9026_v4  ;;  %9045 = vmatpush3.bf16.xpose.msra.mxu0 %v9042_v53  ;;  %v1084_v4 = vadd.f32 %v10920_v18, %v10851_v25  ;;  %v11024_v36 = vpop.f32.mrb[39].mxu0 }
 0x140   : > { %9031 = vmatprep.subr.bf16.mxu1 %v10969_v15  ;;  %v9050_v23 = vpack.c.bf16 %v2339_v13, %v2334_v45  ;;  %9047 = vmatprep.subr.bf16.mxu0 %v9046_v6  ;;  %v7948_v27 = vpop.f32.mrb[40].mxu1 }
 0x141   : > { %v2349_v31 = vadd.f32 %v7948_v27, %v10770_v26  ;;  %v2343_v35 = vpop.f32.mrb[41].mxu1  ;;  %8119 = vmatprep.mubr.f32.mxu0 %v1074_v19  ;;  %v1114_v19 = vadd.f32 %v10920_v18, %v10900_v0 }
 0x142   : > { %v2344_v14 = vadd.f32 %v10770_v26, %v2343_v35  ;;  %8120 = vmatmul.mubr.f32.gmra.mrb[134].mxu0 %v1079_v63  ;;  %v11029_v42 = vpop.f32.mrb[40].mxu0  ;;  %v1119_v63 = vadd.f32 %v10895_v60, %v10920_v18 }
 0x143   : > { %8122 = vmatprep.mubr.f32.mxu0 %v1084_v4  ;;  %v11032_v51 = vpop.f32.mrb[41].mxu0 }
 0x144   : > { %v9054_v38 = vpack.c.bf16 %v2349_v31, %v2344_v14  ;;  %v7951_v41 = vpop.f32.mrb[42].mxu1 }
 0x145   : > { %v2359_v46 = vadd.f32 %v7951_v41, %v10770_v26  ;;  %v2353_v44 = vpop.f32.mrb[43].mxu1 }
 0x146   : > { %v2354_v25 = vadd.f32 %v10770_v26, %v2353_v44  ;;  %8123 = vmatmul.mubr.f32.gmra.mrb[136].mxu0 %v1089_v11  ;;  %v11043_v32 = vpop.f32.mrb[42].mxu0 }
 0x147   : > { %9033 = vmatpush3.bf16.xpose.msra.mxu1 %v10969_v15  ;;  %9049 = vmatpush3.bf16.xpose.msra.mxu0 %v9046_v6  ;;  %v1104_v15 = vadd.f32 %v10920_v18, %v10883_v50  ;;  %v11048_v57 = vpop.f32.mrb[43].mxu0 }
 0x148   : > { %v11040_v53 = vpack.c.bf16 %v2359_v46, %v2354_v25  ;;  %v7954_v56 = vpop.f32.mrb[44].mxu1  ;;  %9035 = vmatprep.subr.bf16.mxu1 %v10978_v24  ;;  %9051 = vmatprep.subr.bf16.mxu0 %v9050_v23  ;;  %v1134_v25 = vadd.f32 %v10920_v18, %v10933_v20 }
 0x149   : > { %v2369_v62 = vadd.f32 %v7954_v56, %v10770_v26  ;;  %v2363_v55 = vpop.f32.mrb[45].mxu1  ;;  %8125 = vmatprep.mubr.f32.mxu0 %v1094_v40 }
 0x14a   : > { %v2364_v37 = vadd.f32 %v10770_v26, %v2363_v55  ;;  %8126 = vmatmul.mubr.f32.gmra.mrb[138].mxu0 %v1099_v22  ;;  %v11055_v8 = vpop.f32.mrb[44].mxu0  ;;  %v1144_v55 = vadd.f32 %v10920_v18, %v10944_v43 }
 0x14b   : > { %8128 = vmatprep.mubr.f32.mxu0 %v1104_v15  ;;  %v11058_v45 = vpop.f32.mrb[45].mxu0 }
 0x14c   : > { %v11053_v52 = vpack.c.bf16 %v2369_v62, %v2364_v37  ;;  %v7957_v6 = vpop.f32.mrb[46].mxu1 }
 0x14d   : > { %v2379_v13 = vadd.f32 %v7957_v6, %v10770_v26  ;;  %v2373_v2 = vpop.f32.mrb[47].mxu1 }
 0x14e   : > { %v2374_v50 = vadd.f32 %v10770_v26, %v2373_v2  ;;  %8129 = vmatmul.mubr.f32.gmra.mrb[140].mxu0 %v1109_v34  ;;  %v11070_v35 = vpop.f32.mrb[46].mxu0 }
 0x14f   : > { %9037 = vmatpush3.bf16.xpose.msra.mxu1 %v10978_v24  ;;  %9053 = vmatpush3.bf16.xpose.msra.mxu0 %v9050_v23  ;;  %v11073_v14 = vpop.f32.mrb[47].mxu0 }
 0x150   : > { %v11068_v27 = vpack.c.bf16 %v2379_v13, %v2374_v50  ;;  %v7960_v31 = vpop.f32.mrb[48].mxu1  ;;  %9055 = vmatprep.subr.bf16.mxu0 %v9054_v38  ;;  %8131 = vmatprep.mubr.f32.mxu0 %v1114_v19 }
 0x151   : > { %v2389_v4 = vadd.f32 %v7960_v31, %v10770_v26  ;;  %v2383_v0 = vpop.f32.mrb[49].mxu1 }
 0x152   : > { %v2384_v24 = vadd.f32 %v10770_v26, %v2383_v0  ;;  %8132 = vmatmul.mubr.f32.gmra.mrb[142].mxu0 %v1119_v63  ;;  %v11078_v11 = vpop.f32.mrb[48].mxu0 }
 0x153   : > { %8222 = vmatprep.mubr.f32.mxu0 %v1204_v47  ;;  %v11081_v44 = vpop.f32.mrb[49].mxu0  ;;  %v1154_v47 = vadd.f32 %v10920_v18, %v10952_v54 }
 0x154   : > { %v9070_v60 = vpack.c.bf16 %v2389_v4, %v2384_v24  ;;  %v7963_v23 = vpop.f32.mrb[50].mxu1  ;;  %v1284_v17 = vadd.f32 %v10920_v18, %v11081_v44  ;;  %v1209_v44 = vadd.f32 %v10988_v58, %v10920_v18  ;;  %v1219_v58 = vadd.f32 %v10998_v59, %v10920_v18 }
 0x155   : > { %v2399_v41 = vadd.f32 %v7963_v23, %v10770_v26  ;;  %v2393_v46 = vpop.f32.mrb[51].mxu1  ;;  %v1229_v59 = vadd.f32 %v11008_v10, %v10920_v18  ;;  %v1239_v10 = vadd.f32 %v11019_v30, %v10920_v18  ;;  %v1249_v30 = vadd.f32 %v11029_v42, %v10920_v18 }
 0x156   : > { %8167 = vmatmul.mubr.f32.vlgmr.msra.gmra.mrb[128].mxu1 %v1129_v48  ;;  %9071 = vmatprep.subr.bf16.mxu1 %v9070_v60  ;;  %v2394_v40 = vadd.f32 %v10770_v26, %v2393_v46  ;;  %v11089_v62 = vpop.f32.mrb[50].mxu0  ;;  %v1259_v42 = vadd.f32 %v11043_v32, %v10920_v18 }
 0x157   : > { %9073 = vmatpush3.bf16.xpose.msra.mxu1 %v9070_v60  ;;  %9057 = vmatpush3.bf16.xpose.msra.mxu0 %v9054_v38  ;;  %v11094_v37 = vpop.f32.mrb[51].mxu0 }
 0x158   : > { %v9074_v22 = vpack.c.bf16 %v2399_v41, %v2394_v40  ;;  %8169 = vmatprep.mubr.f32.mxu1 %v1134_v25  ;;  %9059 = vmatprep.subr.bf16.mxu0 %v11040_v53  ;;  %v7966_v56 = vpop.f32.mrb[52].mxu1 }
 0x159   : > { %v2409_v20 = vadd.f32 %v7966_v56, %v10770_v26  ;;  %v2403_v15 = vpop.f32.mrb[53].mxu1 }
 0x15a   : > { %8170 = vmatmul.mubr.f32.gmra.mrb[130].mxu1 %v1139_v9  ;;  %9075 = vmatprep.subr.bf16.mxu1 %v9074_v22  ;;  %v2404_v38 = vadd.f32 %v10770_v26, %v2403_v15  ;;  %v11099_v13 = vpop.f32.mrb[52].mxu0  ;;  %v1174_v9 = vadd.f32 %v10920_v18, %v10966_v12 }
 0x15b   : > { %8172 = vmatprep.mubr.f32.mxu1 %v1144_v55  ;;  %v11102_v50 = vpop.f32.mrb[53].mxu0 }
 0x15c   : > { %v9078_v34 = vpack.c.bf16 %v2409_v20, %v2404_v38  ;;  %v7969_v6 = vpop.f32.mrb[54].mxu1 }
 0x15d   : > { %v2419_v2 = vadd.f32 %v7969_v6, %v10770_v26  ;;  %v2413_v43 = vpop.f32.mrb[55].mxu1 }
 0x15e   : > { %8173 = vmatmul.mubr.f32.gmra.mrb[132].mxu1 %v1149_v28  ;;  %v2414_v19 = vadd.f32 %v10770_v26, %v2413_v43  ;;  %v11111_v4 = vpop.f32.mrb[54].mxu0 }
 0x15f   : > { %9077 = vmatpush3.bf16.xpose.msra.mxu1 %v9074_v22  ;;  %9061 = vmatpush3.bf16.xpose.msra.mxu0 %v11040_v53  ;;  %v1164_v53 = vadd.f32 %v10920_v18, %v10958_v1  ;;  %v11116_v48 = vpop.f32.mrb[55].mxu0 }
 0x160   : > { %9079 = vmatprep.subr.bf16.mxu1 %v9078_v34  ;;  %9063 = vmatprep.subr.bf16.mxu0 %v11053_v52  ;;  %v9082_v63 = vpack.c.bf16 %v2419_v2, %v2414_v19  ;;  %v7972_v31 = vpop.f32.mrb[56].mxu1 }
 0x161   : > { %v2429_v0 = vadd.f32 %v7972_v31, %v10770_v26  ;;  %8175 = vmatprep.mubr.f32.mxu1 %v1154_v47  ;;  %v2423_v24 = vpop.f32.mrb[57].mxu1  ;;  %v1194_v47 = vadd.f32 %v10920_v18, %v10983_v33 }
 0x162   : > { %v2424_v54 = vadd.f32 %v10770_v26, %v2423_v24  ;;  %8176 = vmatmul.mubr.f32.gmra.mrb[134].mxu1 %v1159_v39  ;;  %v11121_v41 = vpop.f32.mrb[56].mxu0  ;;  %v1199_v39 = vadd.f32 %v10980_v29, %v10920_v18 }
 0x163   : > { %8178 = vmatprep.mubr.f32.mxu1 %v1164_v53  ;;  %v11124_v40 = vpop.f32.mrb[57].mxu0 }
 0x164   : > { %v9086_v60 = vpack.c.bf16 %v2429_v0, %v2424_v54  ;;  %v7975_v23 = vpop.f32.mrb[58].mxu1 }
 0x165   : > { %v2439_v46 = vadd.f32 %v7975_v23, %v10770_v26  ;;  %v2433_v25 = vpop.f32.mrb[59].mxu1 }
 0x166   : > { %v2434_v1 = vadd.f32 %v10770_v26, %v2433_v25  ;;  %8179 = vmatmul.mubr.f32.gmra.mrb[136].mxu1 %v1169_v49  ;;  %v11135_v55 = vpop.f32.mrb[58].mxu0 }
 0x167   : > { %9081 = vmatpush3.bf16.xpose.msra.mxu1 %v9078_v34  ;;  %9065 = vmatpush3.bf16.xpose.msra.mxu0 %v11053_v52  ;;  %v1184_v52 = vadd.f32 %v10920_v18, %v10974_v21  ;;  %v11140_v38 = vpop.f32.mrb[59].mxu0 }
 0x168   : > { %v11132_v22 = vpack.c.bf16 %v2439_v46, %v2434_v1  ;;  %v7978_v56 = vpop.f32.mrb[60].mxu1  ;;  %9083 = vmatprep.subr.bf16.mxu1 %v9082_v63  ;;  %9067 = vmatprep.subr.bf16.mxu0 %v11068_v27 }
 0x169   : > { %v2449_v20 = vadd.f32 %v7978_v56, %v10770_v26  ;;  %v2443_v15 = vpop.f32.mrb[61].mxu1  ;;  %8181 = vmatprep.mubr.f32.mxu1 %v1174_v9  ;;  %v1214_v9 = vadd.f32 %v10920_v18, %v11003_v3 }
 0x16a   : > { %v2444_v12 = vadd.f32 %v10770_v26, %v2443_v15  ;;  %8182 = vmatmul.mubr.f32.gmra.mrb[138].mxu1 %v1179_v61  ;;  %v11147_v6 = vpop.f32.mrb[60].mxu0 }
 0x16b   : > { %8184 = vmatprep.mubr.f32.mxu1 %v1184_v52  ;;  %v11150_v19 = vpop.f32.mrb[61].mxu0 }
 0x16c   : > { %v11145_v28 = vpack.c.bf16 %v2449_v20, %v2444_v12  ;;  %v7981_v34 = vpop.f32.mrb[62].mxu1  ;;  %v1224_v12 = vadd.f32 %v10920_v18, %v11011_v16 }
 0x16d   : > { %v2459_v2 = vadd.f32 %v7981_v34, %v10770_v26  ;;  %v2453_v43 = vpop.f32.mrb[63].mxu1 }
 0x16e   : > { %v2454_v21 = vadd.f32 %v10770_v26, %v2453_v43  ;;  %8185 = vmatmul.mubr.f32.gmra.mrb[140].mxu1 %v1189_v7  ;;  %v11162_v24 = vpop.f32.mrb[62].mxu0 }
 0x16f   : > { %9085 = vmatpush3.bf16.xpose.msra.mxu1 %v9082_v63  ;;  %9069 = vmatpush3.bf16.xpose.msra.mxu0 %v11068_v27  ;;  %v11165_v54 = vpop.f32.mrb[63].mxu0 }
 0x170   : > { %v11160_v31 = vpack.c.bf16 %v2459_v2, %v2454_v21  ;;  %v7984_v0 = vpop.f32.mrb[64].mxu1  ;;  %9087 = vmatprep.subr.bf16.mxu1 %v9086_v60  ;;  %8187 = vmatprep.mubr.f32.mxu1 %v1194_v47 }
 0x171   : > { %v2469_v53 = vadd.f32 %v7984_v0, %v10770_v26  ;;  %v2463_v33 = vpop.f32.mrb[65].mxu1 }
 0x172   : > { %v2464_v27 = vadd.f32 %v10770_v26, %v2463_v33  ;;  %8188 = vmatmul.mubr.f32.gmra.mrb[142].mxu1 %v1199_v39  ;;  %v11170_v49 = vpop.f32.mrb[64].mxu0 }
 0x173   : > { %8278 = vmatprep.mubr.f32.mxu1 %v1284_v17  ;;  %v11173_v25 = vpop.f32.mrb[65].mxu0  ;;  %v1234_v17 = vadd.f32 %v10920_v18, %v11024_v36 }
 0x174   : > { %v9102_v29 = vpack.c.bf16 %v2469_v53, %v2464_v27  ;;  %v7987_v63 = vpop.f32.mrb[66].mxu1 }
 0x175   : > { %v2479_v23 = vadd.f32 %v7987_v63, %v10770_v26  ;;  %v2473_v46 = vpop.f32.mrb[67].mxu1 }
 0x176   : > { %8223 = vmatmul.mubr.f32.vlgmr.msra.gmra.mrb[144].mxu0 %v1209_v44  ;;  %9103 = vmatprep.subr.bf16.mxu0 %v9102_v29  ;;  %v2474_v1 = vadd.f32 %v10770_v26, %v2473_v46  ;;  %v11181_v20 = vpop.f32.mrb[66].mxu0 }
 0x177   : > { %9089 = vmatpush3.bf16.xpose.msra.mxu1 %v9086_v60  ;;  %9105 = vmatpush3.bf16.xpose.msra.mxu0 %v9102_v29  ;;  %v11186_v7 = vpop.f32.mrb[67].mxu0 }
 0x178   : > { %v9106_v61 = vpack.c.bf16 %v2479_v23, %v2474_v1  ;;  %8225 = vmatprep.mubr.f32.mxu0 %v1214_v9  ;;  %9091 = vmatprep.subr.bf16.mxu1 %v11132_v22  ;;  %v7990_v56 = vpop.f32.mrb[68].mxu1 }
 0x179   : > { %v2489_v15 = vadd.f32 %v7990_v56, %v10770_v26  ;;  %v2483_v52 = vpop.f32.mrb[69].mxu1 }
 0x17a   : > { %8226 = vmatmul.mubr.f32.gmra.mrb[146].mxu0 %v1219_v58  ;;  %9107 = vmatprep.subr.bf16.mxu0 %v9106_v61  ;;  %v2484_v3 = vadd.f32 %v10770_v26, %v2483_v52  ;;  %v11191_v2 = vpop.f32.mrb[68].mxu0  ;;  %v1254_v58 = vadd.f32 %v10920_v18, %v11048_v57  ;;  %v1264_v57 = vadd.f32 %v10920_v18, %v11058_v45 }
 0x17b   : > { %8228 = vmatprep.mubr.f32.mxu0 %v1224_v12  ;;  %v11194_v47 = vpop.f32.mrb[69].mxu0 }
 0x17c   : > { %v9110_v60 = vpack.c.bf16 %v2489_v15, %v2484_v3  ;;  %v7993_v34 = vpop.f32.mrb[70].mxu1  ;;  %v1269_v3 = vadd.f32 %v11055_v8, %v10920_v18  ;;  %v1364_v8 = vadd.f32 %v10920_v18, %v11173_v25  ;;  %v1289_v25 = vadd.f32 %v11078_v11, %v10920_v18 }
 0x17d   : > { %v2499_v43 = vadd.f32 %v7993_v34, %v10770_v26  ;;  %v2493_v21 = vpop.f32.mrb[71].mxu1  ;;  %v1299_v11 = vadd.f32 %v11089_v62, %v10920_v18  ;;  %v1309_v62 = vadd.f32 %v11099_v13, %v10920_v18  ;;  %v1319_v13 = vadd.f32 %v11111_v4, %v10920_v18 }
 0x17e   : > { %v2494_v16 = vadd.f32 %v10770_v26, %v2493_v21  ;;  %8229 = vmatmul.mubr.f32.gmra.mrb[148].mxu0 %v1229_v59  ;;  %v11203_v53 = vpop.f32.mrb[70].mxu0  ;;  %v1329_v4 = vadd.f32 %v11121_v41, %v10920_v18  ;;  %v1339_v41 = vadd.f32 %v11135_v55, %v10920_v18 }
 0x17f   : > { %9093 = vmatpush3.bf16.xpose.msra.mxu1 %v11132_v22  ;;  %9109 = vmatpush3.bf16.xpose.msra.mxu0 %v9106_v61  ;;  %v1244_v22 = vadd.f32 %v10920_v18, %v11032_v51  ;;  %v11208_v44 = vpop.f32.mrb[71].mxu0 }
 0x180   : > { %9095 = vmatprep.subr.bf16.mxu1 %v11145_v28  ;;  %v9114_v39 = vpack.c.bf16 %v2499_v43, %v2494_v16  ;;  %9111 = vmatprep.subr.bf16.mxu0 %v9110_v60  ;;  %v7996_v0 = vpop.f32.mrb[72].mxu1 }
 0x181   : > { %v2509_v33 = vadd.f32 %v7996_v0, %v10770_v26  ;;  %v2503_v27 = vpop.f32.mrb[73].mxu1  ;;  %8231 = vmatprep.mubr.f32.mxu0 %v1234_v17  ;;  %v1274_v17 = vadd.f32 %v10920_v18, %v11073_v14 }
 0x182   : > { %v2504_v36 = vadd.f32 %v10770_v26, %v2503_v27  ;;  %8232 = vmatmul.mubr.f32.gmra.mrb[150].mxu0 %v1239_v10  ;;  %v11213_v23 = vpop.f32.mrb[72].mxu0  ;;  %v1279_v10 = vadd.f32 %v11070_v35, %v10920_v18 }
 0x183   : > { %8234 = vmatprep.mubr.f32.mxu0 %v1244_v22  ;;  %v11216_v9 = vpop.f32.mrb[73].mxu0 }
 0x184   : > { %v9118_v29 = vpack.c.bf16 %v2509_v33, %v2504_v36  ;;  %v7999_v63 = vpop.f32.mrb[74].mxu1 }
 0x185   : > { %v2519_v46 = vadd.f32 %v7999_v63, %v10770_v26  ;;  %v2513_v1 = vpop.f32.mrb[75].mxu1 }
 0x186   : > { %v2514_v51 = vadd.f32 %v10770_v26, %v2513_v1  ;;  %8235 = vmatmul.mubr.f32.gmra.mrb[152].mxu0 %v1249_v30  ;;  %v11227_v15 = vpop.f32.mrb[74].mxu0  ;;  %v11232_v26 = vld [vmem:[%s13798_s5] ss:$0 sm:$0xff] }
 0x187   : > { %9097 = vmatpush3.bf16.xpose.msra.mxu1 %v11145_v28  ;;  %9113 = vmatpush3.bf16.xpose.msra.mxu0 %v9110_v60  ;;  %v11237_v32 = vpop.f32.mrb[75].mxu0 }
 0x188   : > { %v11224_v61 = vpack.c.bf16 %v2519_v46, %v2514_v51  ;;  %v8002_v56 = vpop.f32.mrb[76].mxu1  ;;  %9099 = vmatprep.subr.bf16.mxu1 %v11160_v31  ;;  %9115 = vmatprep.subr.bf16.mxu0 %v9114_v39 }
 0x189   : > { %v2529_v28 = vadd.f32 %v11232_v26, %v8002_v56  ;;  %v2523_v52 = vpop.f32.mrb[77].mxu1  ;;  %8237 = vmatprep.mubr.f32.mxu0 %v1254_v58  ;;  %v1294_v58 = vadd.f32 %v10920_v18, %v11094_v37 }
 0x18a   : > { %v2524_v12 = vadd.f32 %v11232_v26, %v2523_v52  ;;  %8238 = vmatmul.mubr.f32.gmra.mrb[154].mxu0 %v1259_v42  ;;  %v11244_v34 = vpop.f32.mrb[76].mxu0 }
 0x18b   : > { %8240 = vmatprep.mubr.f32.mxu0 %v1264_v57  ;;  %v11247_v16 = vpop.f32.mrb[77].mxu0 }
 0x18c   : > { %v11242_v59 = vpack.c.bf16 %v2529_v28, %v2524_v12  ;;  %v8005_v60 = vpop.f32.mrb[78].mxu1  ;;  %v1304_v12 = vadd.f32 %v10920_v18, %v11102_v50 }
 0x18d   : > { %v2539_v43 = vadd.f32 %v11232_v26, %v8005_v60  ;;  %v2533_v21 = vpop.f32.mrb[79].mxu1 }
 0x18e   : > { %v2534_v45 = vadd.f32 %v11232_v26, %v2533_v21  ;;  %8241 = vmatmul.mubr.f32.gmra.mrb[156].mxu0 %v1269_v3  ;;  %v11259_v27 = vpop.f32.mrb[78].mxu0 }
 0x18f   : > { %9101 = vmatpush3.bf16.xpose.msra.mxu1 %v11160_v31  ;;  %9117 = vmatpush3.bf16.xpose.msra.mxu0 %v9114_v39  ;;  %v11262_v36 = vpop.f32.mrb[79].mxu0 }
 0x190   : > { %v11257_v0 = vpack.c.bf16 %v2539_v43, %v2534_v45  ;;  %v8008_v33 = vpop.f32.mrb[80].mxu1  ;;  %9119 = vmatprep.subr.bf16.mxu0 %v9118_v29  ;;  %8243 = vmatprep.mubr.f32.mxu0 %v1274_v17 }
 0x191   : > { %v2549_v22 = vadd.f32 %v11232_v26, %v8008_v33  ;;  %v2543_v14 = vpop.f32.mrb[81].mxu1 }
 0x192   : > { %v2544_v31 = vadd.f32 %v11232_v26, %v2543_v14  ;;  %8244 = vmatmul.mubr.f32.gmra.mrb[158].mxu0 %v1279_v10  ;;  %v11267_v30 = vpop.f32.mrb[80].mxu0  ;;  %v1324_v14 = vadd.f32 %v10920_v18, %v11124_v40 }
 0x193   : > { %8334 = vmatprep.mubr.f32.mxu0 %v1364_v8  ;;  %v11270_v1 = vpop.f32.mrb[81].mxu0  ;;  %v1314_v8 = vadd.f32 %v10920_v18, %v11116_v48 }
 0x194   : > { %v9134_v35 = vpack.c.bf16 %v2549_v22, %v2544_v31  ;;  %v8011_v39 = vpop.f32.mrb[82].mxu1 }
 0x195   : > { %v2559_v63 = vadd.f32 %v11232_v26, %v8011_v39  ;;  %v2553_v46 = vpop.f32.mrb[83].mxu1 }
 0x196   : > { %8279 = vmatmul.mubr.f32.vlgmr.msra.gmra.mrb[144].mxu1 %v1289_v25  ;;  %9135 = vmatprep.subr.bf16.mxu1 %v9134_v35  ;;  %v2554_v51 = vadd.f32 %v11232_v26, %v2553_v46  ;;  %v11278_v28 = vpop.f32.mrb[82].mxu0 }
 0x197   : > { %9137 = vmatpush3.bf16.xpose.msra.mxu1 %v9134_v35  ;;  %9121 = vmatpush3.bf16.xpose.msra.mxu0 %v9118_v29  ;;  %v11283_v3 = vpop.f32.mrb[83].mxu0 }
 0x198   : > { %v9138_v42 = vpack.c.bf16 %v2559_v63, %v2554_v51  ;;  %8281 = vmatprep.mubr.f32.mxu1 %v1294_v58  ;;  %9123 = vmatprep.subr.bf16.mxu0 %v11224_v61  ;;  %v8014_v56 = vpop.f32.mrb[84].mxu1 }
 0x199   : > { %v2569_v52 = vadd.f32 %v11232_v26, %v8014_v56  ;;  %v2563_v57 = vpop.f32.mrb[85].mxu1 }
 0x19a   : > { %8282 = vmatmul.mubr.f32.gmra.mrb[146].mxu1 %v1299_v11  ;;  %9139 = vmatprep.subr.bf16.mxu1 %v9138_v42  ;;  %v2564_v37 = vadd.f32 %v11232_v26, %v2563_v57  ;;  %v11288_v43 = vpop.f32.mrb[84].mxu0  ;;  %v1334_v11 = vadd.f32 %v10920_v18, %v11140_v38  ;;  %v1344_v57 = vadd.f32 %v10920_v18, %v11150_v19 }
 0x19b   : > { %8284 = vmatprep.mubr.f32.mxu1 %v1304_v12  ;;  %v11291_v17 = vpop.f32.mrb[85].mxu0  ;;  %v1349_v38 = vadd.f32 %v11147_v6, %v10920_v18  ;;  %v1444_v6 = vadd.f32 %v10920_v18, %v11270_v1  ;;  %v1369_v1 = vadd.f32 %v11170_v49, %v10920_v18  ;;  %v1379_v49 = vadd.f32 %v11181_v20, %v10920_v18 }
 0x19c   : > { %v9142_v29 = vpack.c.bf16 %v2569_v52, %v2564_v37  ;;  %v8017_v60 = vpop.f32.mrb[86].mxu1 }
 0x19d   : > { %v2579_v21 = vadd.f32 %v11232_v26, %v8017_v60  ;;  %v2573_v45 = vpop.f32.mrb[87].mxu1 }
 0x19e   : > { %8285 = vmatmul.mubr.f32.gmra.mrb[148].mxu1 %v1309_v62  ;;  %v2574_v50 = vadd.f32 %v11232_v26, %v2573_v45  ;;  %v11300_v22 = vpop.f32.mrb[86].mxu0 }
 0x19f   : > { %9141 = vmatpush3.bf16.xpose.msra.mxu1 %v9138_v42  ;;  %9125 = vmatpush3.bf16.xpose.msra.mxu0 %v11224_v61  ;;  %v11305_v25 = vpop.f32.mrb[87].mxu0 }
 0x1a0   : > { %9143 = vmatprep.subr.bf16.mxu1 %v9142_v29  ;;  %9127 = vmatprep.subr.bf16.mxu0 %v11242_v59  ;;  %v9146_v10 = vpack.c.bf16 %v2579_v21, %v2574_v50  ;;  %v8020_v33 = vpop.f32.mrb[88].mxu1  ;;  %v1354_v50 = vadd.f32 %v10920_v18, %v11165_v54 }
 0x1a1   : > { %8287 = vmatprep.mubr.f32.mxu1 %v1314_v8  ;;  %v2589_v31 = vadd.f32 %v11232_v26, %v8020_v33  ;;  %v2583_v61 = vpop.f32.mrb[89].mxu1 }
 0x1a2   : > { %8288 = vmatmul.mubr.f32.gmra.mrb[150].mxu1 %v1319_v13  ;;  %v2584_v48 = vadd.f32 %v11232_v26, %v2583_v61  ;;  %v11310_v63 = vpop.f32.mrb[88].mxu0  ;;  %v1359_v13 = vadd.f32 %v11162_v24, %v10920_v18 }
 0x1a3   : > { %8290 = vmatprep.mubr.f32.mxu1 %v1324_v14  ;;  %v11313_v51 = vpop.f32.mrb[89].mxu0 }
 0x1a4   : > { %v9150_v35 = vpack.c.bf16 %v2589_v31, %v2584_v48  ;;  %v8023_v39 = vpop.f32.mrb[90].mxu1 }
 0x1a5   : > { %v2599_v46 = vadd.f32 %v11232_v26, %v8023_v39  ;;  %v2593_v40 = vpop.f32.mrb[91].mxu1  ;;  %v1374_v39 = vadd.f32 %v10920_v18, %v11186_v7 }
 0x1a6   : > { %8291 = vmatmul.mubr.f32.gmra.mrb[152].mxu1 %v1329_v4  ;;  %v2594_v58 = vadd.f32 %v11232_v26, %v2593_v40  ;;  %v11324_v52 = vpop.f32.mrb[90].mxu0 }
 0x1a7   : > { %9145 = vmatpush3.bf16.xpose.msra.mxu1 %v9142_v29  ;;  %9129 = vmatpush3.bf16.xpose.msra.mxu0 %v11242_v59  ;;  %v11329_v37 = vpop.f32.mrb[91].mxu0 }
 0x1a8   : > { %9147 = vmatprep.subr.bf16.mxu1 %v9146_v10  ;;  %9131 = vmatprep.subr.bf16.mxu0 %v11257_v0  ;;  %v11322_v42 = vpack.c.bf16 %v2599_v46, %v2594_v58  ;;  %v8026_v56 = vpop.f32.mrb[92].mxu1 }
 0x1a9   : > { %8293 = vmatprep.mubr.f32.mxu1 %v1334_v11  ;;  %v2609_v59 = vadd.f32 %v11232_v26, %v8026_v56  ;;  %v2603_v12 = vpop.f32.mrb[93].mxu1 }
 0x1aa   : > { %8294 = vmatmul.mubr.f32.gmra.mrb[154].mxu1 %v1339_v41  ;;  %v2604_v55 = vadd.f32 %v11232_v26, %v2603_v12  ;;  %v11336_v60 = vpop.f32.mrb[92].mxu0 }
 0x1ab   : > { %8296 = vmatprep.mubr.f32.mxu1 %v1344_v57  ;;  %v11339_v45 = vpop.f32.mrb[93].mxu0  ;;  %v11375_v57 = vld [vmem:[%s13796_s3] ss:$0 sm:$0xff] }
 0x1ac   : > { %v11334_v62 = vpack.c.bf16 %v2609_v59, %v2604_v55  ;;  %v8029_v29 = vpop.f32.mrb[94].mxu1  ;;  %v1384_v59 = vadd.f32 %v11375_v57, %v11194_v47  ;;  %v1389_v55 = vadd.f32 %v11375_v57, %v11191_v2  ;;  %v1394_v47 = vadd.f32 %v11375_v57, %v11208_v44 }
 0x1ad   : > { %v2619_v19 = vadd.f32 %v11232_v26, %v8029_v29  ;;  %v2613_v21 = vpop.f32.mrb[95].mxu1  ;;  %v1399_v2 = vadd.f32 %v11375_v57, %v11203_v53  ;;  %v1409_v53 = vadd.f32 %v11375_v57, %v11213_v23  ;;  %v1419_v23 = vadd.f32 %v11375_v57, %v11227_v15 }
 0x1ae   : > { %8297 = vmatmul.mubr.f32.gmra.mrb[156].mxu1 %v1349_v38  ;;  %v2614_v8 = vadd.f32 %v11232_v26, %v2613_v21  ;;  %v11351_v14 = vpop.f32.mrb[94].mxu0 }
 0x1af   : > { %9149 = vmatpush3.bf16.xpose.msra.mxu1 %v9146_v10  ;;  %9133 = vmatpush3.bf16.xpose.msra.mxu0 %v11257_v0  ;;  %v11353_v54 = vpop.f32.mrb[95].mxu0 }
 0x1b0   : > { %9151 = vmatprep.subr.bf16.mxu1 %v9150_v35  ;;  %v11349_v33 = vpack.c.bf16 %v2619_v19, %v2614_v8  ;;  %8299 = vmatprep.mubr.f32.mxu1 %v1354_v50  ;;  %v8032_v31 = vpop.f32.mrb[96].mxu1 }
 0x1b1   : > { %v2629_v61 = vadd.f32 %v11232_v26, %v8032_v31  ;;  %v2623_v10 = vpop.f32.mrb[97].mxu1 }
 0x1b2   : > { %8300 = vmatmul.mubr.f32.gmra.mrb[158].mxu1 %v1359_v13  ;;  %v2624_v0 = vadd.f32 %v11232_v26, %v2623_v10  ;;  %v11359_v24 = vpop.f32.mrb[96].mxu0 }
 0x1b3   : > { %8390 = vmatprep.mubr.f32.mxu1 %v1444_v6  ;;  %v11363_v46 = vpop.f32.mrb[97].mxu0 }
 0x1b4   : > { %v9166_v48 = vpack.c.bf16 %v2629_v61, %v2624_v0  ;;  %v8035_v4 = vpop.f32.mrb[98].mxu1  ;;  %v1404_v61 = vadd.f32 %v11375_v57, %v11216_v9  ;;  %v1414_v9 = vadd.f32 %v11375_v57, %v11237_v32 }
 0x1b5   : > { %v2639_v40 = vadd.f32 %v11232_v26, %v8035_v4  ;;  %v2633_v58 = vpop.f32.mrb[99].mxu1 }
 0x1b6   : > { %8335 = vmatmul.mubr.f32.vlgmr.msra.gmra.mrb[160].mxu0 %v1369_v1  ;;  %9167 = vmatprep.subr.bf16.mxu0 %v9166_v48  ;;  %v2634_v11 = vadd.f32 %v11232_v26, %v2633_v58  ;;  %v11370_v41 = vpop.f32.mrb[98].mxu0 }
 0x1b7   : > { %9153 = vmatpush3.bf16.xpose.msra.mxu1 %v9150_v35  ;;  %8337 = vmatprep.mubr.f32.mxu0 %v1374_v39  ;;  %v11379_v35 = vpop.f32.mrb[99].mxu0 }
 0x1b8   : > { %9155 = vmatprep.subr.bf16.mxu1 %v11322_v42  ;;  %9169 = vmatpush3.bf16.xpose.msra.mxu0 %v9166_v48  ;;  %v9170_v7 = vpack.c.bf16 %v2639_v40, %v2634_v11  ;;  %v8038_v56 = vpop.f32.mrb[100].mxu1 }
 0x1b9   : > { %v2649_v12 = vadd.f32 %v11232_v26, %v8038_v56  ;;  %v2643_v18 = vpop.f32.mrb[101].mxu1 }
 0x1ba   : > { %8338 = vmatmul.mubr.f32.gmra.mrb[162].mxu0 %v1379_v49  ;;  %9171 = vmatprep.subr.bf16.mxu0 %v9170_v7  ;;  %v2644_v20 = vadd.f32 %v11232_v26, %v2643_v18  ;;  %v11385_v38 = vpop.f32.mrb[100].mxu0 }
 0x1bb   : > { %8340 = vmatprep.mubr.f32.mxu0 %v1384_v59  ;;  %v11389_v21 = vpop.f32.mrb[101].mxu0  ;;  %v1424_v59 = vadd.f32 %v11375_v57, %v11247_v16  ;;  %v1434_v16 = vadd.f32 %v11375_v57, %v11262_v36 }
 0x1bc   : > { %v9174_v29 = vpack.c.bf16 %v2649_v12, %v2644_v20  ;;  %v8041_v19 = vpop.f32.mrb[102].mxu1  ;;  %v1429_v20 = vadd.f32 %v11375_v57, %v11244_v34  ;;  %v1524_v34 = vadd.f32 %v11375_v57, %v11363_v46 }
 0x1bd   : > { %v2659_v50 = vadd.f32 %v11232_v26, %v8041_v19  ;;  %v2653_v8 = vpop.f32.mrb[103].mxu1 }
 0x1be   : > { %8341 = vmatmul.mubr.f32.gmra.mrb[164].mxu0 %v1389_v55  ;;  %v2654_v6 = vadd.f32 %v11232_v26, %v2653_v8  ;;  %v11397_v13 = vpop.f32.mrb[102].mxu0 }
 0x1bf   : > { %9157 = vmatpush3.bf16.xpose.msra.mxu1 %v11322_v42  ;;  %8343 = vmatprep.mubr.f32.mxu0 %v1394_v47  ;;  %v11401_v10 = vpop.f32.mrb[103].mxu0 }
 0x1c0   : > { %9159 = vmatprep.subr.bf16.mxu1 %v11334_v62  ;;  %9173 = vmatpush3.bf16.xpose.msra.mxu0 %v9170_v7  ;;  %v9178_v44 = vpack.c.bf16 %v2659_v50, %v2654_v6  ;;  %v8044_v31 = vpop.f32.mrb[104].mxu1 }
 0x1c1   : > { %9175 = vmatprep.subr.bf16.mxu0 %v9174_v29  ;;  %v2669_v0 = vadd.f32 %v11232_v26, %v8044_v31  ;;  %v2663_v42 = vpop.f32.mrb[105].mxu1 }
 0x1c2   : > { %8344 = vmatmul.mubr.f32.gmra.mrb[166].mxu0 %v1399_v2  ;;  %v2664_v1 = vadd.f32 %v11232_v26, %v2663_v42  ;;  %v11407_v48 = vpop.f32.mrb[104].mxu0  ;;  %v1439_v2 = vadd.f32 %v11375_v57, %v11259_v27  ;;  %v1449_v27 = vadd.f32 %v11375_v57, %v11267_v30  ;;  %v1459_v30 = vadd.f32 %v11375_v57, %v11278_v28 }
 0x1c3   : > { %8346 = vmatprep.mubr.f32.mxu0 %v1404_v61  ;;  %v11413_v40 = vpop.f32.mrb[105].mxu0  ;;  %v1469_v28 = vadd.f32 %v11375_v57, %v11288_v43  ;;  %v1479_v43 = vadd.f32 %v11375_v57, %v11300_v22 }
 0x1c4   : > { %v11409_v4 = vpack.c.bf16 %v2669_v0, %v2664_v1  ;;  %v8047_v39 = vpop.f32.mrb[106].mxu1 }
 0x1c5   : > { %v2679_v58 = vadd.f32 %v11232_v26, %v8047_v39  ;;  %v2673_v11 = vpop.f32.mrb[107].mxu1 }
 0x1c6   : > { %8347 = vmatmul.mubr.f32.gmra.mrb[168].mxu0 %v1409_v53  ;;  %v2674_v49 = vadd.f32 %v11232_v26, %v2673_v11  ;;  %v11421_v7 = vpop.f32.mrb[106].mxu0 }
 0x1c7   : > { %9161 = vmatpush3.bf16.xpose.msra.mxu1 %v11334_v62  ;;  %8349 = vmatprep.mubr.f32.mxu0 %v1414_v9  ;;  %v11427_v12 = vpop.f32.mrb[107].mxu0 }
 0x1c8   : > { %9163 = vmatprep.subr.bf16.mxu1 %v11349_v33  ;;  %9177 = vmatpush3.bf16.xpose.msra.mxu0 %v9174_v29  ;;  %v11423_v32 = vpack.c.bf16 %v2679_v58, %v2674_v49  ;;  %v8050_v56 = vpop.f32.mrb[108].mxu1 }
 0x1c9   : > { %v2689_v18 = vadd.f32 %v11232_v26, %v8050_v56  ;;  %v2683_v62 = vpop.f32.mrb[109].mxu1  ;;  %9179 = vmatprep.subr.bf16.mxu0 %v9178_v44 }
 0x1ca   : > { %8350 = vmatmul.mubr.f32.gmra.mrb[170].mxu0 %v1419_v23  ;;  %v2684_v15 = vadd.f32 %v11232_v26, %v2683_v62 }
 0x1cb   : > { %8352 = vmatprep.mubr.f32.mxu0 %v1424_v59  ;;  %v11433_v55 = vpop.f32.mrb[108].mxu0  ;;  %v1464_v59 = vadd.f32 %v11375_v57, %v11291_v17  ;;  %v1474_v17 = vadd.f32 %v11375_v57, %v11305_v25  ;;  %v1484_v25 = vadd.f32 %v11375_v57, %v11313_v51  ;;  %v1494_v51 = vadd.f32 %v11375_v57, %v11329_v37 }
 0x1cc   : > { %v11435_v29 = vpack.c.bf16 %v2689_v18, %v2684_v15  ;;  %v8053_v19 = vpop.f32.mrb[110].mxu1  ;;  %v11439_v47 = vpop.f32.mrb[109].mxu0  ;;  %v1504_v37 = vadd.f32 %v11375_v57, %v11339_v45  ;;  %v1514_v45 = vadd.f32 %v11375_v57, %v11353_v54 }
 0x1cd   : > { %v2699_v50 = vadd.f32 %v11232_v26, %v8053_v19  ;;  %v2693_v8 = vpop.f32.mrb[111].mxu1 }
 0x1ce   : > { %8353 = vmatmul.mubr.f32.gmra.mrb[172].mxu0 %v1429_v20  ;;  %v2694_v6 = vadd.f32 %v11232_v26, %v2693_v8 }
 0x1cf   : > { %9165 = vmatpush3.bf16.xpose.msra.mxu1 %v11349_v33  ;;  %8355 = vmatprep.mubr.f32.mxu0 %v1434_v16  ;;  %v11448_v31 = vpop.f32.mrb[110].mxu0 }
 0x1d0   : > { %v11450_v36 = vpack.c.bf16 %v2699_v50, %v2694_v6  ;;  %v8056_v61 = vpop.f32.mrb[112].mxu1  ;;  %9181 = vmatpush3.bf16.xpose.msra.mxu0 %v9178_v44  ;;  %v11452_v0 = vpop.f32.mrb[111].mxu0  ;;  %v1454_v44 = vadd.f32 %v11375_v57, %v11283_v3 }
 0x1d1   : > { %v2709_v42 = vadd.f32 %v11232_v26, %v8056_v61  ;;  %v2703_v1 = vpop.f32.mrb[113].mxu1  ;;  %9183 = vmatprep.subr.bf16.mxu0 %v11409_v4 }
 0x1d2   : > { %8356 = vmatmul.mubr.f32.gmra.mrb[174].mxu0 %v1439_v2  ;;  %v2704_v33 = vadd.f32 %v11232_v26, %v2703_v1 }
 0x1d3   : > { %8446 = vmatprep.mubr.f32.mxu0 %v1524_v34  ;;  %v11459_v46 = vpop.f32.mrb[112].mxu0 }
 0x1d4   : > { %v9198_v53 = vpack.c.bf16 %v2709_v42, %v2704_v33  ;;  %v8059_v39 = vpop.f32.mrb[114].mxu1  ;;  %v11463_v9 = vpop.f32.mrb[113].mxu0 }
 0x1d5   : > { %v2719_v58 = vadd.f32 %v11232_v26, %v8059_v39  ;;  %v2713_v11 = vpop.f32.mrb[115].mxu1 }
 0x1d6   : > { %8391 = vmatmul.mubr.f32.vlgmr.msra.gmra.mrb[160].mxu1 %v1449_v27  ;;  %9199 = vmatprep.subr.bf16.mxu1 %v9198_v53  ;;  %v2714_v49 = vadd.f32 %v11232_v26, %v2713_v11 }
 0x1d7   : > { %8393 = vmatprep.mubr.f32.mxu1 %v1454_v44  ;;  %9201 = vmatpush3.bf16.xpose.msra.mxu1 %v9198_v53  ;;  %v11469_v23 = vpop.f32.mrb[114].mxu0  ;;  %v1489_v53 = vadd.f32 %v11375_v57, %v11310_v63  ;;  %v1499_v63 = vadd.f32 %v11375_v57, %v11324_v52 }
 0x1d8   : > { %9185 = vmatpush3.bf16.xpose.msra.mxu0 %v11409_v4  ;;  %v9202_v56 = vpack.c.bf16 %v2719_v58, %v2714_v49  ;;  %v8062_v3 = vpop.f32.mrb[116].mxu1  ;;  %v11474_v18 = vpop.f32.mrb[115].mxu0 }
 0x1d9   : > { %v2729_v62 = vadd.f32 %v11232_v26, %v8062_v3  ;;  %v2723_v15 = vpop.f32.mrb[117].mxu1  ;;  %9187 = vmatprep.subr.bf16.mxu0 %v11423_v32 }
 0x1da   : > { %8394 = vmatmul.mubr.f32.gmra.mrb[162].mxu1 %v1459_v30  ;;  %v2724_v20 = vadd.f32 %v11232_v26, %v2723_v15  ;;  %9203 = vmatprep.subr.bf16.mxu1 %v9202_v56 }
 0x1db   : > { %8396 = vmatprep.mubr.f32.mxu1 %v1464_v59  ;;  %v11481_v4 = vpop.f32.mrb[116].mxu0 }
 0x1dc   : > { %v9206_v19 = vpack.c.bf16 %v2729_v62, %v2724_v20  ;;  %v8065_v16 = vpop.f32.mrb[118].mxu1  ;;  %v11485_v50 = vpop.f32.mrb[117].mxu0 }
 0x1dd   : > { %v2739_v8 = vadd.f32 %v11232_v26, %v8065_v16  ;;  %v2733_v6 = vpop.f32.mrb[119].mxu1 }
 0x1de   : > { %8397 = vmatmul.mubr.f32.gmra.mrb[164].mxu1 %v1469_v28  ;;  %v2734_v34 = vadd.f32 %v11232_v26, %v2733_v6  ;;  %v1509_v28 = vadd.f32 %v11375_v57, %v11336_v60  ;;  %v1519_v60 = vadd.f32 %v11375_v57, %v11351_v14  ;;  %v1539_v14 = vadd.f32 %v11375_v57, %v11370_v41 }
 0x1df   : > { %8399 = vmatprep.mubr.f32.mxu1 %v1474_v17  ;;  %9205 = vmatpush3.bf16.xpose.msra.mxu1 %v9202_v56  ;;  %v11491_v2 = vpop.f32.mrb[118].mxu0  ;;  %v1559_v41 = vadd.f32 %v11375_v57, %v11397_v13  ;;  %v1584_v13 = vadd.f32 %v11375_v57, %v11439_v47 }
 0x1e0   : > { %v9210_v61 = vpack.c.bf16 %v2739_v8, %v2734_v34  ;;  %9189 = vmatpush3.bf16.xpose.msra.mxu0 %v11423_v32  ;;  %v8068_v42 = vpop.f32.mrb[120].mxu1  ;;  %9207 = vmatprep.subr.bf16.mxu1 %v9206_v19  ;;  %v11496_v1 = vpop.f32.mrb[119].mxu0 }
 0x1e1   : > { %v2749_v33 = vadd.f32 %v11232_v26, %v8068_v42  ;;  %v2743_v27 = vpop.f32.mrb[121].mxu1  ;;  %9191 = vmatprep.subr.bf16.mxu0 %v11435_v29 }
 0x1e2   : > { %8400 = vmatmul.mubr.f32.gmra.mrb[166].mxu1 %v1479_v43  ;;  %v2744_v22 = vadd.f32 %v11232_v26, %v2743_v27  ;;  %v1604_v43 = vadd.f32 %v11375_v57, %v11463_v9  ;;  %v1534_v9 = vadd.f32 %v11375_v57, %v11379_v35  ;;  %v1554_v35 = vadd.f32 %v11375_v57, %v11401_v10 }
 0x1e3   : > { %8402 = vmatprep.mubr.f32.mxu1 %v1484_v25  ;;  %v11503_v32 = vpop.f32.mrb[120].mxu0  ;;  %v1579_v10 = vadd.f32 %v11375_v57, %v11421_v7  ;;  %v1594_v7 = vadd.f32 %v11375_v57, %v11452_v0  ;;  %v1599_v27 = vadd.f32 %v11375_v57, %v11448_v31  ;;  %v1614_v0 = vadd.f32 %v11375_v57, %v11474_v18 }
 0x1e4   : > { %v9214_v39 = vpack.c.bf16 %v2749_v33, %v2744_v22  ;;  %v8071_v44 = vpop.f32.mrb[122].mxu1  ;;  %v11507_v58 = vpop.f32.mrb[121].mxu0  ;;  %v1619_v31 = vadd.f32 %v11375_v57, %v11469_v23  ;;  %v1629_v18 = vadd.f32 %v11375_v57, %v11481_v4 }
 0x1e5   : > { %v2759_v11 = vadd.f32 %v11232_v26, %v8071_v44  ;;  %v2753_v49 = vpop.f32.mrb[123].mxu1  ;;  %v1624_v44 = vadd.f32 %v11375_v57, %v11485_v50  ;;  %v1639_v50 = vadd.f32 %v11375_v57, %v11491_v2 }
 0x1e6   : > { %8403 = vmatmul.mubr.f32.gmra.mrb[168].mxu1 %v1489_v53  ;;  %v2754_v30 = vadd.f32 %v11232_v26, %v2753_v49 }
 0x1e7   : > { %8405 = vmatprep.mubr.f32.mxu1 %v1494_v51  ;;  %9209 = vmatpush3.bf16.xpose.msra.mxu1 %v9206_v19  ;;  %v11513_v56 = vpop.f32.mrb[122].mxu0 }
 0x1e8   : > { %v9218_v3 = vpack.c.bf16 %v2759_v11, %v2754_v30  ;;  %v8074_v59 = vpop.f32.mrb[124].mxu1  ;;  %9193 = vmatpush3.bf16.xpose.msra.mxu0 %v11435_v29  ;;  %9211 = vmatprep.subr.bf16.mxu1 %v9210_v61  ;;  %v11518_v62 = vpop.f32.mrb[123].mxu0  ;;  %v1634_v11 = vadd.f32 %v11375_v57, %v11496_v1  ;;  %v1644_v30 = vadd.f32 %v11375_v57, %v11507_v58 }
 0x1e9   : > { %v2769_v15 = vadd.f32 %v11232_v26, %v8074_v59  ;;  %v2763_v20 = vpop.f32.mrb[125].mxu1  ;;  %9195 = vmatprep.subr.bf16.mxu0 %v11450_v36  ;;  %v1649_v1 = vadd.f32 %v11375_v57, %v11503_v32  ;;  %v1659_v58 = vadd.f32 %v11375_v57, %v11513_v56 }
 0x1ea   : > { %8406 = vmatmul.mubr.f32.gmra.mrb[170].mxu1 %v1499_v63  ;;  %v2764_v52 = vadd.f32 %v11232_v26, %v2763_v20 }
 0x1eb   : > { %8408 = vmatprep.mubr.f32.mxu1 %v1504_v37  ;;  %v11525_v19 = vpop.f32.mrb[124].mxu0 }
 0x1ec   : > { %v9222_v29 = vpack.c.bf16 %v2769_v15, %v2764_v52  ;;  %v8077_v16 = vpop.f32.mrb[126].mxu1  ;;  %v11529_v17 = vpop.f32.mrb[125].mxu0 }
 0x1ed   : > { %v2779_v8 = vadd.f32 %v11232_v26, %v8077_v16  ;;  %v2773_v6 = vpop.f32.mrb[127].mxu1  ;;  %v1664_v37 = vadd.f32 %v11375_v57, %v11529_v17 }
 0x1ee   : > { %8409 = vmatmul.mubr.f32.gmra.mrb[172].mxu1 %v1509_v28  ;;  %v2774_v34 = vadd.f32 %v11232_v26, %v2773_v6  ;;  %v1529_v26 = vadd.f32 %v11375_v57, %v11359_v24  ;;  %v1549_v24 = vadd.f32 %v11375_v57, %v11385_v38  ;;  %v1574_v38 = vadd.f32 %v11375_v57, %v11427_v12 }
 0x1ef   : > { %8411 = vmatprep.mubr.f32.mxu1 %v1514_v45  ;;  %9213 = vmatpush3.bf16.xpose.msra.mxu1 %v9210_v61  ;;  %v11537_v42 = vpop.f32.mrb[126].mxu0  ;;  %v1589_v12 = vadd.f32 %v11375_v57, %v11433_v55  ;;  %v1609_v55 = vadd.f32 %v11375_v57, %v11459_v46 }
 0x1f0   : > { %v9226_v25 = vpack.c.bf16 %v2779_v8, %v2774_v34  ;;  %9197 = vmatpush3.bf16.xpose.msra.mxu0 %v11450_v36  ;;  %9215 = vmatprep.subr.bf16.mxu1 %v9214_v39  ;;  %v11540_v54 = vpop.f32.mrb[127].mxu0  ;;  %v1544_v36 = vadd.f32 %v11375_v57, %v11389_v21  ;;  %v1569_v21 = vadd.f32 %v11375_v57, %v11407_v48 }
 0x1f1   : > { %9231 = vmatprep.subr.bf16.mxu0 %v10341_v5  ;;  %v1674_v20 = vadd.f32 %v11375_v57, %v11540_v54  ;;  %v1679_v28 = vadd.f32 %v11375_v57, %v11537_v42 }
 0x1f2   : > { %8412 = vmatmul.mubr.f32.gmra.mrb[174].mxu1 %v1519_v60 }
 0x1f3   : > { %8502 = vmatprep.mubr.f32.mxu1 %v1604_v43 }
 0x1f7   : > { %8447 = vmatmul.mubr.f32.vlgmr.msra.gmra.mrb[176].mxu0 %v1529_v26  ;;  %9217 = vmatpush3.bf16.xpose.msra.mxu1 %v9214_v39 }
 0x1f8   : > { %8449 = vmatprep.mubr.f32.mxu0 %v1534_v9  ;;  %9219 = vmatprep.subr.bf16.mxu1 %v9218_v3 }
 0x1f9   : > { %9233 = vmatpush3.bf16.msra.mxu0 %v10341_v5  ;;  %v1564_v5 = vadd.f32 %v11375_v57, %v11413_v40 }
 0x1fb   : > { %8450 = vmatmul.mubr.f32.gmra.mrb[178].mxu0 %v1539_v14 }
 0x1fc   : > { %8452 = vmatprep.mubr.f32.mxu0 %v1544_v36 }
 0x1ff   : > { %9221 = vmatpush3.bf16.xpose.msra.mxu1 %v9218_v3  ;;  %8453 = vmatmul.mubr.f32.gmra.mrb[180].mxu0 %v1549_v24  ;;  %v1654_v3 = vadd.f32 %v11375_v57, %v11518_v62  ;;  %v1669_v62 = vadd.f32 %v11375_v57, %v11525_v19 }
 0x200   : > { %9223 = vmatprep.subr.bf16.mxu1 %v9222_v29  ;;  %8455 = vmatprep.mubr.f32.mxu0 %v1554_v35 }
 0x203   : > { %8456 = vmatmul.mubr.f32.gmra.mrb[182].mxu0 %v1559_v41 }
 0x204   : > { %8458 = vmatprep.mubr.f32.mxu0 %v1564_v5 }
 0x207   : > { %9225 = vmatpush3.bf16.xpose.msra.mxu1 %v9222_v29  ;;  %8459 = vmatmul.mubr.f32.gmra.mrb[184].mxu0 %v1569_v21 }
 0x208   : > { %9227 = vmatprep.subr.bf16.mxu1 %v9226_v25  ;;  %8461 = vmatprep.mubr.f32.mxu0 %v1574_v38 }
 0x209   : > { %v11566_v61 = vpop.f32.mrb[128].mxu0 }
 0x20a   : > { %v11570_v40 = vpop.f32.mrb[129].mxu0  ;;  %3944 = vmax.xlane.f32.xlu1 %v11566_v61 }
 0x20b   : > { %3942 = vmax.xlane.f32.xlu0 %v11570_v40  ;;  %8462 = vmatmul.mubr.f32.gmra.mrb[186].mxu0 %v1579_v10 }
 0x20c   : > { %8464 = vmatprep.mubr.f32.mxu0 %v1584_v13 }
 0x20d   : > { %v11574_v48 = vpop.f32.mrb[130].mxu0 }
 0x20e   : > { %v11578_v33 = vpop.f32.mrb[131].mxu0 }
 0x20f   : > { %3948 = vmax.xlane.f32.xlu0 %v11574_v48  ;;  %9229 = vmatpush3.bf16.xpose.msra.mxu1 %v9226_v25 }
 0x210   : > { %8465 = vmatmul.mubr.f32.gmra.mrb[188].mxu0 %v1589_v12 }
 0x211   : > { %v11583_v47 = vpop.f32.mrb[132].mxu0  ;;  %8467 = vmatprep.mubr.f32.mxu0 %v1594_v7 }
 0x212   : > { %v11587_v22 = vpop.f32.mrb[133].mxu0 }
 0x213   : > { %3946 = vmax.xlane.f32.xlu0 %v11578_v33 }
 0x214   : > { %8468 = vmatmul.mubr.f32.gmra.mrb[190].mxu0 %v1599_v27 }
 0x215   : > { %v11594_v53 = vpop.f32.mrb[134].mxu0 }
 0x216   : > { %v11596_v39 = vpop.f32.mrb[135].mxu0  ;;  %8503 = vmatmul.mubr.f32.vlgmr.msra.gmra.mrb[176].mxu1 %v1609_v55 }
 0x217   : > { %3952 = vmax.xlane.f32.xlu0 %v11583_v47  ;;  %8505 = vmatprep.mubr.f32.mxu1 %v1614_v0 }
 0x219   : > { %v11603_v51 = vpop.f32.mrb[136].mxu0 }
 0x21a   : > { %v11605_v46 = vpop.f32.mrb[137].mxu0  ;;  %8506 = vmatmul.mubr.f32.gmra.mrb[178].mxu1 %v1619_v31 }
 0x21b   : > { %3950 = vmax.xlane.f32.xlu0 %v11587_v22  ;;  %8508 = vmatprep.mubr.f32.mxu1 %v1624_v44 }
 0x21d   : > { %v11612_v49 = vpop.f32.mrb[138].mxu0 }
 0x21e   : > { %v11614_v23 = vpop.f32.mrb[139].mxu0  ;;  %8509 = vmatmul.mubr.f32.gmra.mrb[180].mxu1 %v1629_v18 }
 0x21f   : > { %3956 = vmax.xlane.f32.xlu0 %v11594_v53  ;;  %8511 = vmatprep.mubr.f32.mxu1 %v1634_v11 }
 0x221   : > { %v11621_v63 = vpop.f32.mrb[140].mxu0 }
 0x222   : > { %v11623_v4 = vpop.f32.mrb[141].mxu0  ;;  %8512 = vmatmul.mubr.f32.gmra.mrb[182].mxu1 %v1639_v50 }
 0x223   : > { %3954 = vmax.xlane.f32.xlu0 %v11596_v39  ;;  %8514 = vmatprep.mubr.f32.mxu1 %v1644_v30 }
 0x225   : > { %v11630_v59 = vpop.f32.mrb[142].mxu0 }
 0x226   : > { %v11632_v2 = vpop.f32.mrb[143].mxu0  ;;  %8515 = vmatmul.mubr.f32.gmra.mrb[184].mxu1 %v1649_v1 }
 0x227   : > { %3960 = vmax.xlane.f32.xlu0 %v11603_v51  ;;  %8517 = vmatprep.mubr.f32.mxu1 %v1654_v3 }
 0x229   : > { %v11639_v15 = vpop.f32.mrb[128].mxu1 }
 0x22a   : > { %3976 = vmax.xlane.f32.xlu1 %v11639_v15  ;;  %v11642_v32 = vpop.f32.mrb[129].mxu1  ;;  %8518 = vmatmul.mubr.f32.gmra.mrb[186].mxu1 %v1659_v58 }
 0x22b   : > { %3958 = vmax.xlane.f32.xlu0 %v11605_v46  ;;  %8520 = vmatprep.mubr.f32.mxu1 %v1664_v37 }
 0x22d   : > { %v11649_v56 = vpop.f32.mrb[130].mxu1 }
 0x22e   : > { %3980 = vmax.xlane.f32.xlu1 %v11649_v56  ;;  %v11652_v52 = vpop.f32.mrb[131].mxu1  ;;  %8521 = vmatmul.mubr.f32.gmra.mrb[188].mxu1 %v1669_v62 }
 0x22f   : > { %3964 = vmax.xlane.f32.xlu0 %v11612_v49  ;;  %8523 = vmatprep.mubr.f32.mxu1 %v1674_v20 }
 0x231   : > { %v11657_v29 = vpop.f32.mrb[132].mxu1 }
 0x232   : > { %3978 = vmax.xlane.f32.xlu1 %v11652_v52  ;;  %v11660_v19 = vpop.f32.mrb[133].mxu1  ;;  %8524 = vmatmul.mubr.f32.gmra.mrb[190].mxu1 %v1679_v28 }
 0x233   : > { %3962 = vmax.xlane.f32.xlu0 %v11614_v23 }
 0x235   : > { %v11663_v16 = vpop.f32.mrb[134].mxu1 }
 0x236   : > { %3984 = vmax.xlane.f32.xlu1 %v11657_v29  ;;  %v11666_v45 = vpop.f32.mrb[135].mxu1 }
 0x237   : > { %3968 = vmax.xlane.f32.xlu0 %v11621_v63 }
 0x239   : > { %v11669_v17 = vpop.f32.mrb[136].mxu1 }
 0x23a   : > { %3982 = vmax.xlane.f32.xlu1 %v11660_v19  ;;  %v11672_v57 = vpop.f32.mrb[137].mxu1 }
 0x23b   : > { %3966 = vmax.xlane.f32.xlu0 %v11623_v4 }
 0x23d   : > { %v11675_v8 = vpop.f32.mrb[138].mxu1 }
 0x23e   : > { %14065 = vst [vmem:[#allocation5_spill] sm:$0xff] %v11675_v8  ;;  %3988 = vmax.xlane.f32.xlu1 %v11663_v16  ;;  %v11678_v6 = vpop.f32.mrb[139].mxu1 }
 0x23f   : > { %14066 = vst [vmem:[#allocation6_spill] sm:$0xff] %v11678_v6  ;;  %3972 = vmax.xlane.f32.xlu0 %v11630_v59 }
 0x241   : > { %v11681_v34 = vpop.f32.mrb[140].mxu1 }
 0x242   : > { %14067 = vst [vmem:[#allocation7_spill] sm:$0xff] %v11681_v34  ;;  %3986 = vmax.xlane.f32.xlu1 %v11666_v45  ;;  %v11684_v43 = vpop.f32.mrb[141].mxu1 }
 0x243   : > { %14068 = vst [vmem:[#allocation8_spill] sm:$0xff] %v11684_v43  ;;  %3970 = vmax.xlane.f32.xlu0 %v11632_v2 }
 0x245   : > { %v11687_v60 = vpop.f32.mrb[142].mxu1 }
 0x246   : > { %14069 = vst [vmem:[#allocation9_spill] sm:$0xff] %v11687_v60  ;;  %3992 = vmax.xlane.f32.xlu1 %v11669_v17  ;;  %v11690_v42 = vpop.f32.mrb[143].mxu1 }
 0x247   : > { %14070 = vst [vmem:[#allocation10_spill] sm:$0xff] %v11690_v42  ;;  %3974 = vmax.xlane.f32.xlu0 %v11642_v32 }
 0x249   : > { %v11693_v25 = vpop.f32.mrb[144].mxu0 }
 0x24a   : > { %3990 = vmax.xlane.f32.xlu1 %v11672_v57  ;;  %v11696_v54 = vpop.f32.mrb[145].mxu0 }
 0x24b   : > { %4008 = vmax.xlane.f32.xlu0 %v11693_v25 }
 0x24d   : > { %v11699_v26 = vpop.f32.mrb[146].mxu0 }
 0x24e   : > { %3996 = vmax.xlane.f32.xlu1 %v11675_v8  ;;  %v11702_v9 = vpop.f32.mrb[147].mxu0 }
 0x24f   : > { %4006 = vmax.xlane.f32.xlu0 %v11696_v54 }
 0x251   : > { %v11705_v14 = vpop.f32.mrb[148].mxu0 }
 0x252   : > { %3994 = vmax.xlane.f32.xlu1 %v11678_v6  ;;  %v11708_v36 = vpop.f32.mrb[149].mxu0 }
 0x253   : > { %4012 = vmax.xlane.f32.xlu0 %v11699_v26 }
 0x255   : > { %v11711_v24 = vpop.f32.mrb[150].mxu0 }
 0x256   : > { %4000 = vmax.xlane.f32.xlu1 %v11681_v34  ;;  %v11714_v35 = vpop.f32.mrb[151].mxu0 }
 0x257   : > { %4010 = vmax.xlane.f32.xlu0 %v11702_v9 }
 0x259   : > { %v11717_v41 = vpop.f32.mrb[152].mxu0 }
 0x25a   : > { %3998 = vmax.xlane.f32.xlu1 %v11684_v43  ;;  %v11720_v5 = vpop.f32.mrb[153].mxu0 }
 0x25b   : > { %14071 = vst [vmem:[#allocation11_spill] sm:$0xff] %v11720_v5  ;;  %4016 = vmax.xlane.f32.xlu0 %v11705_v14 }
 0x25d   : > { %v11723_v21 = vpop.f32.mrb[154].mxu0 }
 0x25e   : > { %14072 = vst [vmem:[#allocation12_spill] sm:$0xff] %v11723_v21  ;;  %4004 = vmax.xlane.f32.xlu1 %v11687_v60  ;;  %v11726_v38 = vpop.f32.mrb[155].mxu0 }
 0x25f   : > { %14073 = vst [vmem:[#allocation13_spill] sm:$0xff] %v11726_v38  ;;  %4014 = vmax.xlane.f32.xlu0 %v11708_v36 }
 0x261   : > { %v11729_v10 = vpop.f32.mrb[156].mxu0 }
 0x262   : > { %14074 = vst [vmem:[#allocation14_spill] sm:$0xff] %v11729_v10  ;;  %4002 = vmax.xlane.f32.xlu1 %v11690_v42  ;;  %v11732_v13 = vpop.f32.mrb[157].mxu0 }
 0x263   : > { %14075 = vst [vmem:[#allocation15_spill] sm:$0xff] %v11732_v13  ;;  %4020 = vmax.xlane.f32.xlu0 %v11711_v24 }
 0x265   : > { %v11735_v12 = vpop.f32.mrb[158].mxu0 }
 0x266   : > { %14076 = vst [vmem:[#allocation16_spill] sm:$0xff] %v11735_v12  ;;  %v11737_v7 = vpop.f32.mrb[159].mxu0 }
 0x267   : > { %14077 = vst [vmem:[#allocation17_spill] sm:$0xff] %v11737_v7  ;;  %4018 = vmax.xlane.f32.xlu0 %v11714_v35 }
 0x269   : > { %v11740_v27 = vpop.f32.mrb[144].mxu1 }
 0x26a   : > { %4040 = vmax.xlane.f32.xlu1 %v11740_v27  ;;  %v11743_v55 = vpop.f32.mrb[145].mxu1 }
 0x26b   : > { %14078 = vst [vmem:[#allocation18_spill] sm:$0xff] %v11743_v55  ;;  %4024 = vmax.xlane.f32.xlu0 %v11717_v41 }
 0x26d   : > { %v11746_v0 = vpop.f32.mrb[146].mxu1 }
 0x26e   : > { %14079 = vst [vmem:[#allocation19_spill] sm:$0xff] %v11746_v0  ;;  %4038 = vmax.xlane.f32.xlu1 %v11743_v55  ;;  %v11749_v31 = vpop.f32.mrb[147].mxu1 }
 0x26f   : > { %14080 = vst [vmem:[#allocation20_spill] sm:$0xff] %v11749_v31  ;;  %4022 = vmax.xlane.f32.xlu0 %v11720_v5 }
 0x271   : > { %v11752_v44 = vpop.f32.mrb[148].mxu1 }
 0x272   : > { %14081 = vst [vmem:[#allocation21_spill] sm:$0xff] %v11752_v44  ;;  %4044 = vmax.xlane.f32.xlu1 %v11746_v0  ;;  %v11755_v18 = vpop.f32.mrb[149].mxu1 }
 0x273   : > { %14082 = vst [vmem:[#allocation22_spill] sm:$0xff] %v11755_v18  ;;  %4028 = vmax.xlane.f32.xlu0 %v11723_v21 }
 0x275   : > { %v11758_v11 = vpop.f32.mrb[150].mxu1 }
 0x276   : > { %14083 = vst [vmem:[#allocation23_spill] sm:$0xff] %v11758_v11  ;;  %4042 = vmax.xlane.f32.xlu1 %v11749_v31  ;;  %v11761_v50 = vpop.f32.mrb[151].mxu1 }
 0x277   : > { %14084 = vst [vmem:[#allocation24_spill] sm:$0xff] %v11761_v50  ;;  %4026 = vmax.xlane.f32.xlu0 %v11726_v38 }
 0x279   : > { %v11764_v30 = vpop.f32.mrb[152].mxu1 }
 0x27a   : > { %14085 = vst [vmem:[#allocation25_spill] sm:$0xff] %v11764_v30  ;;  %4048 = vmax.xlane.f32.xlu1 %v11752_v44  ;;  %v11767_v1 = vpop.f32.mrb[153].mxu1 }
 0x27b   : > { %14086 = vst [vmem:[#allocation26_spill] sm:$0xff] %v11767_v1  ;;  %4032 = vmax.xlane.f32.xlu0 %v11729_v10 }
 0x27d   : > { %v11770_v3 = vpop.f32.mrb[154].mxu1 }
 0x27e   : > { %14087 = vst [vmem:[#allocation27_spill] sm:$0xff] %v11770_v3  ;;  %4046 = vmax.xlane.f32.xlu1 %v11755_v18  ;;  %v11773_v58 = vpop.f32.mrb[155].mxu1 }
 0x27f   : > { %14088 = vst [vmem:[#allocation28_spill] sm:$0xff] %v11773_v58  ;;  %4030 = vmax.xlane.f32.xlu0 %v11732_v13 }
 0x281   : > { %v11776_v37 = vpop.f32.mrb[156].mxu1 }
 0x282   : > { %14089 = vst [vmem:[#allocation29_spill] sm:$0xff] %v11776_v37  ;;  %4052 = vmax.xlane.f32.xlu1 %v11758_v11  ;;  %v11779_v62 = vpop.f32.mrb[157].mxu1 }
 0x283   : > { %14090 = vst [vmem:[#allocation30_spill] sm:$0xff] %v11779_v62  ;;  %4036 = vmax.xlane.f32.xlu0 %v11735_v12 }
 0x285   : > { %v11782_v20 = vpop.f32.mrb[158].mxu1 }
 0x286   : > { %14091 = vst [vmem:[#allocation31_spill] sm:$0xff] %v11782_v20  ;;  %4050 = vmax.xlane.f32.xlu1 %v11761_v50  ;;  %v11785_v28 = vpop.f32.mrb[159].mxu1 }
 0x287   : > { %14092 = vst [vmem:[#allocation32_spill] sm:$0xff] %v11785_v28  ;;  %4034 = vmax.xlane.f32.xlu0 %v11737_v7 }
 0x289   : > { %v11788_v42 = vpop.f32.mrb[160].mxu0 }
 0x28a   : > { %14093 = vst [vmem:[#allocation33_spill] sm:$0xff] %v11788_v42  ;;  %4056 = vmax.xlane.f32.xlu1 %v11764_v30  ;;  %v11791_v60 = vpop.f32.mrb[161].mxu0 }
 0x28b   : > { %14094 = vst [vmem:[#allocation34_spill] sm:$0xff] %v11791_v60  ;;  %4072 = vmax.xlane.f32.xlu0 %v11788_v42 }
 0x28d   : > { %v11794_v11 = vpop.f32.mrb[162].mxu0 }
 0x28e   : > { %14095 = vst [vmem:[#allocation35_spill] sm:$0xff] %v11794_v11  ;;  %4054 = vmax.xlane.f32.xlu1 %v11767_v1  ;;  %v11797_v12 = vpop.f32.mrb[163].mxu0 }
 0x28f   : > { %14096 = vst [vmem:[#allocation36_spill] sm:$0xff] %v11797_v12  ;;  %4070 = vmax.xlane.f32.xlu0 %v11791_v60 }
 0x291   : > { %v11800_v50 = vpop.f32.mrb[164].mxu0 }
 0x292   : > { %14097 = vst [vmem:[#allocation37_spill] sm:$0xff] %v11800_v50  ;;  %4060 = vmax.xlane.f32.xlu1 %v11770_v3  ;;  %v11803_v7 = vpop.f32.mrb[165].mxu0 }
 0x293   : > { %14098 = vst [vmem:[#allocation38_spill] sm:$0xff] %v11803_v7  ;;  %4076 = vmax.xlane.f32.xlu0 %v11794_v11 }
 0x295   : > { %v11806_v30 = vpop.f32.mrb[166].mxu0 }
 0x296   : > { %14099 = vst [vmem:[#allocation39_spill] sm:$0xff] %v11806_v30  ;;  %4058 = vmax.xlane.f32.xlu1 %v11773_v58  ;;  %v11809_v42 = vpop.f32.mrb[167].mxu0 }
 0x297   : > { %14100 = vst [vmem:[#allocation40_spill] sm:$0xff] %v11809_v42  ;;  %4074 = vmax.xlane.f32.xlu0 %v11797_v12  ;;  %v3945_v34 = vpop.xlane.xlu1 %3944 }
 0x298   : > { %v3943_v1 = vpop.xlane.xlu0 %3942 }
 0x299   : > { %v11812_v13 = vpop.f32.mrb[168].mxu0 }
 0x29a   : > { %14101 = vst [vmem:[#allocation41_spill] sm:$0xff] %v11812_v13  ;;  %4064 = vmax.xlane.f32.xlu1 %v11776_v37  ;;  %v11815_v60 = vpop.f32.mrb[169].mxu0 }
 0x29b   : > { %14102 = vst [vmem:[#allocation42_spill] sm:$0xff] %v11815_v60  ;;  %4080 = vmax.xlane.f32.xlu0 %v11800_v50 }
 0x29c   : > { %v3949_v3 = vpop.xlane.xlu0 %3948 }
 0x29d   : > { %v11818_v18 = vpop.f32.mrb[170].mxu0  ;;  %v4201_v5 = vsub.f32 %v11574_v48, %v3949_v3 }
 0x29e   : > { %14103 = vst [vmem:[#allocation43_spill] sm:$0xff] %v11818_v18  ;;  %4062 = vmax.xlane.f32.xlu1 %v11779_v62  ;;  %v11821_v11 = vpop.f32.mrb[171].mxu0 }
 0x29f   : > { %14104 = vst [vmem:[#allocation44_spill] sm:$0xff] %v11821_v11  ;;  %4078 = vmax.xlane.f32.xlu0 %v11803_v7 }
 0x2a0   : > { %v11824_v58 = vpop.xlane.xlu0 %3946 }
 0x2a1   : > { %v11826_v12 = vpop.f32.mrb[172].mxu0 }
 0x2a2   : > { %14105 = vst [vmem:[#allocation45_spill] sm:$0xff] %v11826_v12  ;;  %4068 = vmax.xlane.f32.xlu1 %v11782_v20  ;;  %v11829_v37 = vpop.f32.mrb[173].mxu0 }
 0x2a3   : > { %14106 = vst [vmem:[#allocation46_spill] sm:$0xff] %v11829_v37  ;;  %4084 = vmax.xlane.f32.xlu0 %v11806_v30 }
 0x2a4   : > { %v11832_v50 = vpop.xlane.xlu0 %3952 }
 0x2a5   : > { %v11834_v43 = vpop.f32.mrb[174].mxu0 }
 0x2a6   : > { %14107 = vst [vmem:[#allocation47_spill] sm:$0xff] %v11834_v43  ;;  %4066 = vmax.xlane.f32.xlu1 %v11785_v28  ;;  %v11837_v62 = vpop.f32.mrb[175].mxu0 }
 0x2a7   : > { %14108 = vst [vmem:[#allocation48_spill] sm:$0xff] %v11837_v62  ;;  %4082 = vmax.xlane.f32.xlu0 %v11809_v42 }
 0x2a8   : > { %v11840_v7 = vpop.xlane.xlu0 %3950 }
 0x2a9   : > { %v11842_v10 = vpop.f32.mrb[160].mxu1 }
 0x2aa   : > { %14109 = vst [vmem:[#allocation49_spill] sm:$0xff] %v11842_v10  ;;  %4104 = vmax.xlane.f32.xlu1 %v11842_v10  ;;  %v11845_v20 = vpop.f32.mrb[161].mxu1 }
 0x2ab   : > { %14110 = vst [vmem:[#allocation50_spill] sm:$0xff] %v11845_v20  ;;  %4088 = vmax.xlane.f32.xlu0 %v11812_v13  ;;  %v4199_v13 = vsub.f32 %v11566_v61, %v3945_v34 }
 0x2ac   : > { %v11848_v30 = vpop.xlane.xlu0 %3956 }
 0x2ad   : > { %v11850_v44 = vpop.f32.mrb[162].mxu1  ;;  %v4328_v21 = vmul.f32 1.442695, %v4199_v13 }
 0x2ae   : > { %14111 = vst [vmem:[#allocation51_spill] sm:$0xff] %v11850_v44  ;;  %4102 = vmax.xlane.f32.xlu1 %v11845_v20  ;;  %v11853_v28 = vpop.f32.mrb[163].mxu1 }
 0x2af   : > { %14112 = vst [vmem:[#allocation52_spill] sm:$0xff] %v11853_v28  ;;  %4086 = vmax.xlane.f32.xlu0 %v11815_v60  ;;  %9527 = vpow2.f32 %v4328_v21 }
 0x2b0   : > { %v11856_v42 = vpop.xlane.xlu0 %3954 }
 0x2b1   : > { %v11858_v38 = vpop.f32.mrb[164].mxu1 }
 0x2b2   : > { %14113 = vst [vmem:[#allocation53_spill] sm:$0xff] %v11858_v38  ;;  %4108 = vmax.xlane.f32.xlu1 %v11850_v44  ;;  %v11861_v10 = vpop.f32.mrb[165].mxu1 }
 0x2b3   : > { %14114 = vst [vmem:[#allocation54_spill] sm:$0xff] %v11861_v10  ;;  %4092 = vmax.xlane.f32.xlu0 %v11818_v18 }
 0x2b4   : > { %v11865_v31 = vpop.xlane.xlu0 %3960 }
 0x2b5   : > { %v11867_v20 = vpop.f32.mrb[166].mxu1 }
 0x2b6   : > { %14115 = vst [vmem:[#allocation55_spill] sm:$0xff] %v11867_v20  ;;  %4106 = vmax.xlane.f32.xlu1 %v11853_v28  ;;  %v11870_v60 = vpop.f32.mrb[167].mxu1  ;;  %v4198_v28 = vsub.f32 %v11570_v40, %v3943_v1  ;;  %v4332_v1 = vmul.f32 1.442695, %v4201_v5  ;;  %v4203_v5 = vsub.f32 %v11583_v47, %v11832_v50 }
 0x2b7   : > { %14116 = vst [vmem:[#allocation56_spill] sm:$0xff] %v11870_v60  ;;  %v11872_v6 = vpop.xlane.xlu1 %3976  ;;  %4090 = vmax.xlane.f32.xlu0 %v11821_v11 }
 0x2b8   : > { %v11875_v44 = vpop.xlane.xlu0 %3958 }
 0x2b9   : > { %v11877_v0 = vpop.f32.mrb[168].mxu1  ;;  %v11913_v3 = vpop.eup %9527 }
 0x2ba   : > { %14117 = vst [vmem:[#allocation57_spill] sm:$0xff] %v11877_v0  ;;  %4112 = vmax.xlane.f32.xlu1 %v11858_v38  ;;  %v11880_v61 = vpop.f32.mrb[169].mxu1  ;;  %v4326_v38 = vmul.f32 1.442695, %v4198_v28  ;;  %14124 = vst [vmem:[#allocation64_spill] sm:$0xff] %v11913_v3 }
 0x2bb   : > { %14118 = vst [vmem:[#allocation58_spill] sm:$0xff] %v11880_v61  ;;  %v11882_v34 = vpop.xlane.xlu1 %3980  ;;  %4096 = vmax.xlane.f32.xlu0 %v11826_v12 }
 0x2bc   : > { %v11886_v18 = vpop.xlane.xlu0 %3964  ;;  %9529 = vpow2.f32 %v4326_v38 }
 0x2bd   : > { %v11888_v8 = vpop.f32.mrb[170].mxu1  ;;  %9531 = vpow2.f32 %v4332_v1  ;;  %v4336_v1 = vmul.f32 1.442695, %v4203_v5  ;;  %v4205_v5 = vsub.f32 %v11594_v53, %v11848_v30 }
 0x2be   : > { %14119 = vst [vmem:[#allocation59_spill] sm:$0xff] %v11888_v8  ;;  %4110 = vmax.xlane.f32.xlu1 %v11861_v10  ;;  %v11891_v13 = vpop.f32.mrb[171].mxu1 }
 0x2bf   : > { %14120 = vst [vmem:[#allocation60_spill] sm:$0xff] %v11891_v13  ;;  %v11893_v11 = vpop.xlane.xlu1 %3978  ;;  %4094 = vmax.xlane.f32.xlu0 %v11829_v37  ;;  %v4200_v37 = vsub.f32 %v11578_v33, %v11824_v58  ;;  %v4340_v30 = vmul.f32 1.442695, %v4205_v5 }
 0x2c0   : > { %v11897_v55 = vpop.xlane.xlu0 %3962 }
 0x2c1   : > { %v11899_v12 = vpop.f32.mrb[172].mxu1  ;;  %v4330_v38 = vmul.f32 1.442695, %v4200_v37  ;;  %v4202_v37 = vsub.f32 %v11587_v22, %v11840_v7  ;;  %v10041_v7 = vld [vmem:[%s10335_s21 + $0x10] sm:$0xff] }
 0x2c2   : > { %14121 = vst [vmem:[#allocation61_spill] sm:$0xff] %v11899_v12  ;;  %4116 = vmax.xlane.f32.xlu1 %v11867_v20  ;;  %v11902_v40 = vpop.f32.mrb[173].mxu1 }
 0x2c3   : > { %14122 = vst [vmem:[#allocation62_spill] sm:$0xff] %v11902_v40  ;;  %v11904_v21 = vpop.xlane.xlu1 %3984  ;;  %4100 = vmax.xlane.f32.xlu0 %v11834_v43  ;;  %9533 = vpow2.f32 %v4330_v38  ;;  %v4334_v38 = vmul.f32 1.442695, %v4202_v37 }
 0x2c4   : > { %v11909_v28 = vpop.xlane.xlu0 %3968  ;;  %9535 = vpow2.f32 %v4336_v1  ;;  %v4215_v1 = vsub.f32 %v11639_v15, %v11872_v6 }
 0x2c5   : > { %v11911_v48 = vpop.f32.mrb[174].mxu1  ;;  %9537 = vpow2.f32 %v4334_v38 }
 0x2c6   : > { %14123 = vst [vmem:[#allocation63_spill] sm:$0xff] %v11911_v48  ;;  %4114 = vmax.xlane.f32.xlu1 %v11870_v60  ;;  %v11916_v20 = vpop.f32.mrb[175].mxu1  ;;  %v11937_v50 = vpop.eup %9529  ;;  %9539 = vpow2.f32 %v4340_v30 }
 0x2c7   : > { %14125 = vst [vmem:[#allocation65_spill] sm:$0xff] %v11916_v20  ;;  %v11918_v10 = vpop.xlane.xlu1 %3982  ;;  %4584 = vadd.xlane.f32.xlu0 %v11913_v3  ;;  %14128 = vst [vmem:[#allocation68_spill] sm:$0xff] %v11937_v50 }
 0x2c8   : > { %v11923_v33 = vpop.xlane.xlu0 %3966 }
 0x2ca   : > { %4120 = vmax.xlane.f32.xlu1 %v11877_v0  ;;  %v11926_v58 = vpop.f32.mrb[176].mxu0 }
 0x2cb   : > { %14126 = vst [vmem:[#allocation66_spill] sm:$0xff] %v11926_v58  ;;  %v11928_v43 = vpop.xlane.xlu1 %3988  ;;  %4098 = vmax.xlane.f32.xlu0 %v11837_v62  ;;  %v11931_v60 = vpop.f32.mrb[177].mxu0 }
 0x2cc   : > { %14127 = vst [vmem:[#allocation67_spill] sm:$0xff] %v11931_v60  ;;  %v11935_v47 = vpop.xlane.xlu0 %3972  ;;  %v10042_v60 = vld [vmem:[%s10335_s21 + $0x18] sm:$0xff]  ;;  %v11953_v58 = vpop.eup %9531 }
 0x2cd   : > { %14131 = vst [vmem:[#allocation71_spill] sm:$0xff] %v11953_v58  ;;  %v11969_v15 = vpop.eup %9533 }
 0x2ce   : > { %4118 = vmax.xlane.f32.xlu1 %v11880_v61  ;;  %v11940_v3 = vpop.f32.mrb[178].mxu0  ;;  %v9234_v61 = vpack.c.bf16 %v10042_v60, %v10041_v7  ;;  %v4204_v60 = vsub.f32 %v11596_v39, %v11856_v42  ;;  %14134 = vst [vmem:[#allocation74_spill] sm:$0xff] %v11969_v15  ;;  %v4207_v42 = vsub.f32 %v11603_v51, %v11865_v31 }
 0x2cf   : > { %14129 = vst [vmem:[#allocation69_spill] sm:$0xff] %v11940_v3  ;;  %v11942_v0 = vpop.xlane.xlu1 %3986  ;;  %4582 = vadd.xlane.f32.xlu0 %v11937_v50  ;;  %v11945_v62 = vpop.f32.mrb[179].mxu0  ;;  %v10043_v50 = vld [vmem:[%s10335_s21 + $0x20] sm:$0xff] }
 0x2d0   : > { %14130 = vst [vmem:[#allocation70_spill] sm:$0xff] %v11945_v62  ;;  %v11949_v22 = vpop.xlane.xlu0 %3970  ;;  %9235 = vmatprep.subr.bf16.mxu0 %v9234_v61  ;;  %v4338_v39 = vmul.f32 1.442695, %v4204_v60  ;;  %v4344_v60 = vmul.f32 1.442695, %v4207_v42 }
 0x2d1   : > { %9237 = vmatpush3.bf16.msra.mxu0 %v9234_v61  ;;  %v10045_v61 = vld [vmem:[%s10335_s21 + $0x30] sm:$0xff] }
 0x2d2   : > { %4124 = vmax.xlane.f32.xlu1 %v11888_v8  ;;  %v11956_v3 = vpop.f32.mrb[180].mxu0  ;;  %v10044_v8 = vld [vmem:[%s10335_s21 + $0x28] sm:$0xff] }
 0x2d3   : > { %14132 = vst [vmem:[#allocation72_spill] sm:$0xff] %v11956_v3  ;;  %v11960_v37 = vpop.xlane.xlu1 %3992  ;;  %4588 = vadd.xlane.f32.xlu0 %v11953_v58  ;;  %v11963_v53 = vpop.f32.mrb[181].mxu0  ;;  %v9238_v3 = vpack.c.bf16 %v10044_v8, %v10043_v50  ;;  %v4360_v58 = vmul.f32 1.442695, %v4215_v1  ;;  %v10046_v50 = vld [vmem:[%s10335_s21 + $0x38] sm:$0xff] }
 0x2d4   : > { %14133 = vst [vmem:[#allocation73_spill] sm:$0xff] %v11963_v53  ;;  %v3975_v7 = vpop.xlane.xlu0 %3974  ;;  %v9242_v5 = vpack.c.bf16 %v10046_v50, %v10045_v61  ;;  %v4206_v61 = vsub.f32 %v11605_v46, %v11875_v44  ;;  %v4217_v46 = vsub.f32 %v11649_v56, %v11882_v34  ;;  %v10052_v56 = vld [vmem:[%s10335_s21 + $0x68] sm:$0xff] }
 0x2d5   : > { %9239 = vmatprep.subr.bf16.mxu0 %v9238_v3  ;;  %9541 = vpow2.f32 %v4360_v58  ;;  %v4214_v51 = vsub.f32 %v11642_v32, %v3975_v7  ;;  %v10047_v58 = vld [vmem:[%s10335_s21 + $0x40] sm:$0xff] }
 0x2d6   : > { %4122 = vmax.xlane.f32.xlu1 %v11891_v13  ;;  %v11972_v6 = vpop.f32.mrb[182].mxu0  ;;  %9241 = vmatpush3.bf16.msra.mxu0 %v9238_v3  ;;  %v11987_v13 = vpop.eup %9535  ;;  %9543 = vpow2.f32 %v4338_v39 }
 0x2d7   : > { %14135 = vst [vmem:[#allocation75_spill] sm:$0xff] %v11972_v6  ;;  %v11974_v53 = vpop.xlane.xlu1 %3990  ;;  %4586 = vadd.xlane.f32.xlu0 %v11969_v15  ;;  %v11977_v38 = vpop.f32.mrb[183].mxu0  ;;  %14137 = vst [vmem:[#allocation77_spill] sm:$0xff] %v11987_v13  ;;  %9243 = vmatprep.subr.bf16.mxu0 %v9242_v5  ;;  %v10048_v15 = vld [vmem:[%s10335_s21 + $0x48] sm:$0xff]  ;;  %v4358_v44 = vmul.f32 1.442695, %v4214_v51  ;;  %9545 = vpow2.f32 %v4344_v60  ;;  %v4208_v60 = vsub.f32 %v11614_v23, %v11897_v55 }
 0x2d8   : > { %14136 = vst [vmem:[#allocation76_spill] sm:$0xff] %v11977_v38  ;;  %v11981_v8 = vpop.xlane.xlu0 %4008  ;;  %v9246_v32 = vpack.c.bf16 %v10048_v15, %v10047_v58  ;;  %v12006_v7 = vpop.eup %9537  ;;  %v4342_v15 = vmul.f32 1.442695, %v4206_v61  ;;  %v4209_v58 = vsub.f32 %v11612_v49, %v11886_v18  ;;  %v4364_v51 = vmul.f32 1.442695, %v4217_v46  ;;  %v10051_v46 = vld [vmem:[%s10335_s21 + $0x60] sm:$0xff] }
 0x2d9   : > { %14140 = vst [vmem:[#allocation80_spill] sm:$0xff] %v12006_v7  ;;  %v12026_v34 = vpop.eup %9539  ;;  %v4216_v49 = vsub.f32 %v11652_v52, %v11893_v11  ;;  %9547 = vpow2.f32 %v4358_v44  ;;  %v9254_v52 = vpack.c.bf16 %v10052_v56, %v10051_v46  ;;  %v4211_v56 = vsub.f32 %v11621_v63, %v11909_v28 }
 0x2da   : > { %4128 = vmax.xlane.f32.xlu1 %v11899_v12  ;;  %v11990_v30 = vpop.f32.mrb[184].mxu0  ;;  %9245 = vmatpush3.bf16.msra.mxu0 %v9242_v5  ;;  %14143 = vst [vmem:[#allocation83_spill] sm:$0xff] %v12026_v34  ;;  %9549 = vpow2.f32 %v4342_v15 }
 0x2db   : > { %14138 = vst [vmem:[#allocation78_spill] sm:$0xff] %v11990_v30  ;;  %v11993_v31 = vpop.xlane.xlu1 %3996  ;;  %4592 = vadd.xlane.f32.xlu0 %v11987_v13  ;;  %v11996_v3 = vpop.f32.mrb[185].mxu0  ;;  %9247 = vmatprep.subr.bf16.mxu0 %v9246_v32  ;;  %v10049_v13 = vld [vmem:[%s10335_s21 + $0x50] sm:$0xff]  ;;  %9551 = vpow2.f32 %v4364_v51  ;;  %v4362_v23 = vmul.f32 1.442695, %v4216_v49  ;;  %v10054_v49 = vld [vmem:[%s10335_s21 + $0x78] sm:$0xff] }
 0x2dc   : > { %14139 = vst [vmem:[#allocation79_spill] sm:$0xff] %v11996_v3  ;;  %v12000_v50 = vpop.xlane.xlu0 %4006  ;;  %v10053_v51 = vld [vmem:[%s10335_s21 + $0x70] sm:$0xff] }
 0x2de   : > { %4126 = vmax.xlane.f32.xlu1 %v11902_v40  ;;  %v12009_v39 = vpop.f32.mrb[186].mxu0  ;;  %9249 = vmatpush3.bf16.msra.mxu0 %v9246_v32  ;;  %v10050_v40 = vld [vmem:[%s10335_s21 + $0x58] sm:$0xff] }
 0x2df   : > { %14141 = vst [vmem:[#allocation81_spill] sm:$0xff] %v12009_v39  ;;  %v12013_v42 = vpop.xlane.xlu1 %3994  ;;  %4590 = vadd.xlane.f32.xlu0 %v12006_v7  ;;  %v12016_v5 = vpop.f32.mrb[187].mxu0  ;;  %v9250_v12 = vpack.c.bf16 %v10050_v40, %v10049_v13  ;;  %v4348_v40 = vmul.f32 1.442695, %v4209_v58  ;;  %v4346_v58 = vmul.f32 1.442695, %v4208_v60  ;;  %v4218_v60 = vsub.f32 %v11660_v19, %v11918_v10 }
 0x2e0   : > { %14142 = vst [vmem:[#allocation82_spill] sm:$0xff] %v12016_v5  ;;  %v12020_v1 = vpop.xlane.xlu0 %4012  ;;  %v12044_v11 = vpop.eup %9541  ;;  %v10058_v19 = vld [vmem:[%s10335_s21 + $0x98] sm:$0xff] }
 0x2e1   : > { %9251 = vmatprep.subr.bf16.mxu0 %v9250_v12  ;;  %14146 = vst [vmem:[#allocation86_spill] sm:$0xff] %v12044_v11  ;;  %9553 = vpow2.f32 %v4348_v40 }
 0x2e2   : > { %4132 = vmax.xlane.f32.xlu1 %v11911_v48  ;;  %9253 = vmatpush3.bf16.msra.mxu0 %v9250_v12  ;;  %v4219_v12 = vsub.f32 %v11657_v29, %v11904_v21  ;;  %9555 = vpow2.f32 %v4362_v23  ;;  %v10055_v29 = vld [vmem:[%s10335_s21 + $0x80] sm:$0xff] }
 0x2e3   : > { %v12031_v18 = vpop.xlane.xlu1 %4000  ;;  %4596 = vadd.xlane.f32.xlu0 %v12026_v34  ;;  %v12034_v13 = vpop.f32.mrb[188].mxu0  ;;  %9255 = vmatprep.subr.bf16.mxu0 %v9254_v52  ;;  %9557 = vpow2.f32 %v4346_v58  ;;  %v4213_v58 = vsub.f32 %v11630_v59, %v11935_v47  ;;  %v4220_v47 = vsub.f32 %v11666_v45, %v11942_v0 }
 0x2e4   : > { %14144 = vst [vmem:[#allocation84_spill] sm:$0xff] %v12034_v13  ;;  %v12038_v61 = vpop.xlane.xlu0 %4010  ;;  %v12040_v32 = vpop.f32.mrb[189].mxu0  ;;  %v4368_v28 = vmul.f32 1.442695, %v4219_v12 }
 0x2e5   : > { %14145 = vst [vmem:[#allocation85_spill] sm:$0xff] %v12040_v32  ;;  %v12048_v34 = vpop.eup %9543 }
 0x2e6   : > { %14147 = vst [vmem:[#allocation87_spill] sm:$0xff] %v12048_v34  ;;  %4616 = vadd.xlane.f32.xlu1 %v12044_v11  ;;  %9257 = vmatpush3.bf16.msra.mxu0 %v9254_v52  ;;  %v9258_v11 = vpack.c.bf16 %v10054_v49, %v10053_v51  ;;  %v12070_v40 = vpop.eup %9545  ;;  %v4352_v52 = vmul.f32 1.442695, %v4211_v56  ;;  %v4210_v51 = vsub.f32 %v11623_v4, %v11923_v33  ;;  %9559 = vpow2.f32 %v4368_v28 }
 0x2e7   : > { %v12053_v55 = vpop.xlane.xlu1 %3998  ;;  %4594 = vadd.xlane.f32.xlu0 %v12048_v34  ;;  %v12056_v15 = vpop.f32.mrb[190].mxu0  ;;  %14151 = vst [vmem:[#allocation91_spill] sm:$0xff] %v12070_v40  ;;  %v10056_v34 = vld [vmem:[%s10335_s21 + $0x88] sm:$0xff]  ;;  %v4366_v33 = vmul.f32 1.442695, %v4218_v60 }
 0x2e8   : > { %14148 = vst [vmem:[#allocation88_spill] sm:$0xff] %v12056_v15  ;;  %v12060_v46 = vpop.xlane.xlu0 %4016  ;;  %v12062_v44 = vpop.f32.mrb[191].mxu0  ;;  %9259 = vmatprep.subr.bf16.mxu0 %v9258_v11  ;;  %v9262_v7 = vpack.c.bf16 %v10056_v34, %v10055_v29  ;;  %v4221_v34 = vsub.f32 %v11663_v16, %v11928_v43  ;;  %9561 = vpow2.f32 %v4352_v52  ;;  %v10057_v29 = vld [vmem:[%s10335_s21 + $0x90] sm:$0xff]  ;;  %v4356_v52 = vmul.f32 1.442695, %v4213_v58 }
 0x2e9   : > { %14149 = vst [vmem:[#allocation89_spill] sm:$0xff] %v12062_v44  ;;  %v12068_v21 = vpop.f32.mrb[176].mxu1  ;;  %9563 = vpow2.f32 %v4366_v33  ;;  %v10060_v33 = vld [vmem:[%s10335_s21 + $0xa8] sm:$0xff]  ;;  %v4370_v58 = vmul.f32 1.442695, %v4220_v47 }
 0x2ea   : > { %14150 = vst [vmem:[#allocation90_spill] sm:$0xff] %v12068_v21  ;;  %4130 = vmax.xlane.f32.xlu1 %v11916_v20  ;;  %v12073_v63 = vpop.f32.mrb[177].mxu1  ;;  %9261 = vmatpush3.bf16.msra.mxu0 %v9258_v11  ;;  %v12084_v20 = vpop.eup %9547  ;;  %v4350_v11 = vmul.f32 1.442695, %v4210_v51  ;;  %v4372_v59 = vmul.f32 1.442695, %v4221_v34  ;;  %v4212_v51 = vsub.f32 %v11632_v2, %v11949_v22 }
 0x2eb   : > { %14152 = vst [vmem:[#allocation92_spill] sm:$0xff] %v12073_v63  ;;  %4600 = vadd.xlane.f32.xlu0 %v12070_v40  ;;  %14153 = vst [vmem:[#allocation93_spill] sm:$0xff] %v12084_v20  ;;  %v12086_v23 = vpop.xlane.xlu1 %4004  ;;  %v12092_v12 = vpop.eup %9549  ;;  %9263 = vmatprep.subr.bf16.mxu1 %v9262_v7  ;;  %v10061_v2 = vld [vmem:[%s10335_s21 + $0xb0] sm:$0xff]  ;;  %v10062_v22 = vld [vmem:[%s10335_s21 + $0xb8] sm:$0xff] }
 0x2ec   : > { %v12080_v49 = vpop.xlane.xlu0 %4014  ;;  %14155 = vst [vmem:[#allocation95_spill] sm:$0xff] %v12092_v12  ;;  %9265 = vmatpush3.bf16.msra.mxu1 %v9262_v7  ;;  %v12106_v40 = vpop.eup %9551  ;;  %9565 = vpow2.f32 %v4350_v11  ;;  %v9274_v11 = vpack.c.bf16 %v10062_v22, %v10061_v2  ;;  %v4354_v45 = vmul.f32 1.442695, %v4212_v51  ;;  %v4222_v51 = vsub.f32 %v11672_v57, %v11974_v53 }
 0x2ed   : > { %v12090_v10 = vpop.f32.mrb[178].mxu1  ;;  %14157 = vst [vmem:[#allocation97_spill] sm:$0xff] %v12106_v40  ;;  %v12112_v43 = vpop.eup %9553  ;;  %9567 = vpow2.f32 %v4372_v59 }
 0x2ee   : > { %14154 = vst [vmem:[#allocation94_spill] sm:$0xff] %v12090_v10  ;;  %4614 = vadd.xlane.f32.xlu1 %v12084_v20  ;;  %v12095_v4 = vpop.f32.mrb[179].mxu1  ;;  %v9266_v20 = vpack.c.bf16 %v10058_v19, %v10057_v29  ;;  %14159 = vst [vmem:[#allocation99_spill] sm:$0xff] %v12112_v43  ;;  %v10059_v29 = vld [vmem:[%s10335_s21 + $0xa0] sm:$0xff]  ;;  %v12128_v28 = vpop.eup %9555  ;;  %9569 = vpow2.f32 %v4356_v52 }
 0x2ef   : > { %14156 = vst [vmem:[#allocation96_spill] sm:$0xff] %v12095_v4  ;;  %4598 = vadd.xlane.f32.xlu0 %v12092_v12  ;;  %v12119_v60 = vpop.xlane.xlu1 %4002  ;;  %v9270_v34 = vpack.c.bf16 %v10060_v33, %v10059_v29  ;;  %14161 = vst [vmem:[#allocation101_spill] sm:$0xff] %v12128_v28  ;;  %v4223_v29 = vsub.f32 %v11669_v17, %v11960_v37  ;;  %9571 = vpow2.f32 %v4370_v58  ;;  %v10066_v17 = vld [vmem:[%s10335_s21 + $0xd8] sm:$0xff] }
 0x2f0   : > { %v12102_v56 = vpop.xlane.xlu0 %4020  ;;  %9267 = vmatprep.subr.bf16.mxu1 %v9266_v20  ;;  %9573 = vpow2.f32 %v4354_v45 }
 0x2f1   : > { %v12110_v16 = vpop.f32.mrb[180].mxu1  ;;  %9269 = vmatpush3.bf16.msra.mxu1 %v9266_v20  ;;  %v4376_v52 = vmul.f32 1.442695, %v4223_v29 }
 0x2f2   : > { %14158 = vst [vmem:[#allocation98_spill] sm:$0xff] %v12110_v16  ;;  %4620 = vadd.xlane.f32.xlu1 %v12106_v40  ;;  %v12115_v7 = vpop.f32.mrb[181].mxu1  ;;  %9271 = vmatprep.subr.bf16.mxu1 %v9270_v34 }
 0x2f3   : > { %14160 = vst [vmem:[#allocation100_spill] sm:$0xff] %v12115_v7  ;;  %4604 = vadd.xlane.f32.xlu0 %v12112_v43  ;;  %v12134_v43 = vpop.eup %9557  ;;  %9575 = vpow2.f32 %v4376_v52 }
 0x2f4   : > { %v12124_v19 = vpop.xlane.xlu0 %4018  ;;  %14163 = vst [vmem:[#allocation103_spill] sm:$0xff] %v12134_v43  ;;  %v12150_v2 = vpop.eup %9559 }
 0x2f5   : > { %v12132_v0 = vpop.f32.mrb[182].mxu1  ;;  %9273 = vmatpush3.bf16.msra.mxu1 %v9270_v34  ;;  %14166 = vst [vmem:[#allocation106_spill] sm:$0xff] %v12150_v2  ;;  %v12156_v59 = vpop.eup %9561 }
 0x2f6   : > { %14162 = vst [vmem:[#allocation102_spill] sm:$0xff] %v12132_v0  ;;  %4618 = vadd.xlane.f32.xlu1 %v12128_v28  ;;  %v12137_v20 = vpop.f32.mrb[183].mxu1  ;;  %9275 = vmatprep.subr.bf16.mxu1 %v9274_v11  ;;  %14168 = vst [vmem:[#allocation108_spill] sm:$0xff] %v12156_v59  ;;  %v12172_v29 = vpop.eup %9563 }
 0x2f7   : > { %14164 = vst [vmem:[#allocation104_spill] sm:$0xff] %v12137_v20  ;;  %v12143_v33 = vpop.xlane.xlu1 %4040  ;;  %4602 = vadd.xlane.f32.xlu0 %v12134_v43  ;;  %v10064_v43 = vld [vmem:[%s10335_s21 + $0xc8] sm:$0xff]  ;;  %14173 = vst [vmem:[#allocation112_spill] sm:$0xff] %v12172_v29  ;;  %v12178_v48 = vpop.eup %9565 }
 0x2f8   : > { %v12148_v40 = vpop.xlane.xlu0 %4024  ;;  %14176 = vst [vmem:[#allocation114_spill] sm:$0xff] %v12178_v48  ;;  %v12194_v22 = vpop.eup %9567 }
 0x2f9   : > { %14165 = vst [vmem:[#allocation105_spill] sm:$0xff] %v12148_v40  ;;  %v12154_v37 = vpop.f32.mrb[184].mxu1  ;;  %9277 = vmatpush3.bf16.msra.mxu1 %v9274_v11  ;;  %v10065_v11 = vld [vmem:[%s10335_s21 + $0xd0] sm:$0xff]  ;;  %14182 = vst [vmem:[#allocation117_spill] sm:$0xff] %v12194_v22  ;;  %v12202_v40 = vpop.eup %9569 }
 0x2fa   : > { %14167 = vst [vmem:[#allocation107_spill] sm:$0xff] %v12154_v37  ;;  %4624 = vadd.xlane.f32.xlu1 %v12150_v2  ;;  %v12159_v47 = vpop.f32.mrb[185].mxu1  ;;  %v10063_v2 = vld [vmem:[%s10335_s21 + $0xc0] sm:$0xff]  ;;  %14185 = vst [vmem:[#allocation119_spill] sm:$0xff] %v12202_v40 }
 0x2fb   : > { %14169 = vst [vmem:[#allocation109_spill] sm:$0xff] %v12159_v47  ;;  %v12163_v34 = vpop.xlane.xlu1 %4038  ;;  %4608 = vadd.xlane.f32.xlu0 %v12156_v59  ;;  %v9278_v58 = vpack.c.bf16 %v10064_v43, %v10063_v2  ;;  %v9282_v59 = vpack.c.bf16 %v10066_v17, %v10065_v11  ;;  %v4374_v43 = vmul.f32 1.442695, %v4222_v51  ;;  %v14178_v2 = vld [vmem:[#allocation5_spill] sm:$0xff]  ;;  %v10069_v17 = vld [vmem:[%s10335_s21 + $0xf0] sm:$0xff] }
 0x2fc   : > { %14170 = vst [vmem:[#allocation110_spill] sm:$0xff] %v12163_v34  ;;  %v12168_v28 = vpop.xlane.xlu0 %4022  ;;  %v4225_v34 = vsub.f32 %v14178_v2, %v11993_v31  ;;  %v10067_v11 = vld [vmem:[%s10335_s21 + $0xe0] sm:$0xff]  ;;  %v10068_v31 = vld [vmem:[%s10335_s21 + $0xe8] sm:$0xff] }
 0x2fd   : > { %14172 = vst [vmem:[#allocation111_spill] sm:$0xff] %v12168_v28  ;;  %v12176_v12 = vpop.f32.mrb[186].mxu1  ;;  %9279 = vmatprep.subr.bf16.mxu1 %v9278_v58  ;;  %v9286_v2 = vpack.c.bf16 %v10068_v31, %v10067_v11  ;;  %9577 = vpow2.f32 %v4374_v43 }
 0x2fe   : > { %14175 = vst [vmem:[#allocation113_spill] sm:$0xff] %v12176_v12  ;;  %4622 = vadd.xlane.f32.xlu1 %v12172_v29  ;;  %v12181_v45 = vpop.f32.mrb[187].mxu1  ;;  %9281 = vmatpush3.bf16.msra.mxu1 %v9278_v58  ;;  %v4380_v28 = vmul.f32 1.442695, %v4225_v34 }
 0x2ff   : > { %14177 = vst [vmem:[#allocation115_spill] sm:$0xff] %v12181_v45  ;;  %v12187_v53 = vpop.xlane.xlu1 %4044  ;;  %4606 = vadd.xlane.f32.xlu0 %v12178_v48  ;;  %9283 = vmatprep.subr.bf16.mxu1 %v9282_v59  ;;  %v14187_v48 = vld [vmem:[#allocation6_spill] sm:$0xff] }
 0x300   : > { %14179 = vst [vmem:[#allocation5_spill] sm:$0xff] %v12187_v53  ;;  %v12192_v57 = vpop.xlane.xlu0 %4028  ;;  %v4224_v53 = vsub.f32 %v14187_v48, %v12013_v42  ;;  %v10070_v48 = vld [vmem:[%s10335_s21 + $0xf8] sm:$0xff]  ;;  %9579 = vpow2.f32 %v4380_v28  ;;  %v14207_v28 = vld [vmem:[#allocation15_spill] sm:$0xff] }
 0x301   : > { %14181 = vst [vmem:[#allocation116_spill] sm:$0xff] %v12192_v57  ;;  %v12198_v51 = vpop.f32.mrb[188].mxu1  ;;  %v12216_v57 = vpop.eup %9571  ;;  %v9290_v42 = vpack.c.bf16 %v10070_v48, %v10069_v17 }
 0x302   : > { %14184 = vst [vmem:[#allocation118_spill] sm:$0xff] %v12198_v51  ;;  %4628 = vadd.xlane.f32.xlu1 %v12194_v22  ;;  %v12205_v58 = vpop.f32.mrb[189].mxu1  ;;  %9285 = vmatpush3.bf16.msra.mxu1 %v9282_v59  ;;  %14191 = vst [vmem:[#allocation122_spill] sm:$0xff] %v12216_v57  ;;  %v14192_v22 = vld [vmem:[#allocation13_spill] sm:$0xff]  ;;  %v4378_v31 = vmul.f32 1.442695, %v4224_v53 }
 0x303   : > { %14186 = vst [vmem:[#allocation120_spill] sm:$0xff] %v12205_v58  ;;  %v12209_v29 = vpop.xlane.xlu1 %4042  ;;  %4612 = vadd.xlane.f32.xlu0 %v12202_v40  ;;  %9287 = vmatprep.subr.bf16.mxu1 %v9286_v2  ;;  %v12224_v58 = vpop.eup %9573  ;;  %v14196_v40 = vld [vmem:[#allocation7_spill] sm:$0xff] }
 0x304   : > { %14188 = vst [vmem:[#allocation6_spill] sm:$0xff] %v12209_v29  ;;  %v12214_v52 = vpop.xlane.xlu0 %4026  ;;  %14194 = vst [vmem:[#allocation123_spill] sm:$0xff] %v12224_v58  ;;  %v4227_v29 = vsub.f32 %v14196_v40, %v12031_v18  ;;  %v12238_v48 = vpop.eup %9575  ;;  %9581 = vpow2.f32 %v4378_v31  ;;  %v14201_v40 = vld [vmem:[#allocation8_spill] sm:$0xff] }
 0x305   : > { %14190 = vst [vmem:[#allocation121_spill] sm:$0xff] %v12214_v52  ;;  %v12220_v34 = vpop.f32.mrb[190].mxu1  ;;  %14199 = vst [vmem:[#allocation125_spill] sm:$0xff] %v12238_v48  ;;  %v4226_v53 = vsub.f32 %v14201_v40, %v12053_v55  ;;  %v14208_v55 = vld [vmem:[#allocation9_spill] sm:$0xff] }
 0x306   : > { %14193 = vst [vmem:[#allocation13_spill] sm:$0xff] %v12220_v34  ;;  %4626 = vadd.xlane.f32.xlu1 %v12216_v57  ;;  %v12227_v59 = vpop.f32.mrb[191].mxu1  ;;  %9289 = vmatpush3.bf16.msra.mxu1 %v9286_v2  ;;  %v14200_v57 = vld [vmem:[#allocation14_spill] sm:$0xff]  ;;  %v4384_v18 = vmul.f32 1.442695, %v4227_v29  ;;  %v4229_v31 = vsub.f32 %v14208_v55, %v12086_v23 }
 0x307   : > { %14195 = vst [vmem:[#allocation124_spill] sm:$0xff] %v12227_v59  ;;  %v12231_v11 = vpop.xlane.xlu1 %4048  ;;  %4610 = vadd.xlane.f32.xlu0 %v12224_v58  ;;  %9291 = vmatprep.subr.bf16.mxu1 %v9290_v42  ;;  %v14203_v2 = vld [vmem:[#allocation66_spill] sm:$0xff]  ;;  %v12252_v43 = vpop.eup %9577  ;;  %v4382_v29 = vmul.f32 1.442695, %v4226_v53 }
 0x308   : > { %14197 = vst [vmem:[#allocation7_spill] sm:$0xff] %v12231_v11  ;;  %v12236_v17 = vpop.xlane.xlu0 %4032  ;;  %14206 = vst [vmem:[#allocation126_spill] sm:$0xff] %v12252_v43  ;;  %9583 = vpow2.f32 %v4384_v18  ;;  %v4388_v18 = vmul.f32 1.442695, %v4229_v31  ;;  %v14215_v23 = vld [vmem:[#allocation10_spill] sm:$0xff] }
 0x309   : > { %9585 = vpow2.f32 %v4382_v29  ;;  %v4228_v53 = vsub.f32 %v14215_v23, %v12119_v60 }
 0x30a   : > { %4632 = vadd.xlane.f32.xlu1 %v12238_v48  ;;  %9293 = vmatpush3.bf16.msra.mxu1 %v9290_v42  ;;  %v14210_v42 = vld [vmem:[#allocation67_spill] sm:$0xff]  ;;  %v12266_v52 = vpop.eup %9579  ;;  %v14214_v48 = vld [vmem:[#allocation16_spill] sm:$0xff]  ;;  %9587 = vpow2.f32 %v4388_v18 }
 0x30b   : > { %v12245_v58 = vpop.xlane.xlu1 %4046  ;;  %4136 = vmax.xlane.f32.xlu0 %v14203_v2  ;;  %14213 = vst [vmem:[#allocation127_spill] sm:$0xff] %v12266_v52  ;;  %v14218_v2 = vld [vmem:[#allocation24_spill] sm:$0xff]  ;;  %v4386_v29 = vmul.f32 1.442695, %v4228_v53 }
 0x30c   : > { %14202 = vst [vmem:[#allocation14_spill] sm:$0xff] %v12245_v58  ;;  %v12250_v11 = vpop.xlane.xlu0 %4030  ;;  %v14227_v18 = vld [vmem:[#allocation72_spill] sm:$0xff] }
 0x30d   : > { %14205 = vst [vmem:[#allocation8_spill] sm:$0xff] %v12250_v11  ;;  %v14220_v11 = vld [vmem:[#allocation17_spill] sm:$0xff]  ;;  %9589 = vpow2.f32 %v4386_v29 }
 0x30e   : > { %4630 = vadd.xlane.f32.xlu1 %v12252_v43  ;;  %v12280_v59 = vpop.eup %9581 }
 0x30f   : > { %v12259_v40 = vpop.xlane.xlu1 %4052  ;;  %4134 = vmax.xlane.f32.xlu0 %v14210_v42  ;;  %v14217_v42 = vld [vmem:[#allocation69_spill] sm:$0xff]  ;;  %14219 = vst [vmem:[#allocation10_spill] sm:$0xff] %v12280_v59 }
 0x310   : > { %14209 = vst [vmem:[#allocation15_spill] sm:$0xff] %v12259_v40  ;;  %v12264_v58 = vpop.xlane.xlu0 %4036 }
 0x311   : > { %14212 = vst [vmem:[#allocation9_spill] sm:$0xff] %v12264_v58 }
 0x312   : > { %4636 = vadd.xlane.f32.xlu1 %v12266_v52  ;;  %v12292_v43 = vpop.eup %9583 }
 0x313   : > { %v12273_v55 = vpop.xlane.xlu1 %4050  ;;  %4140 = vmax.xlane.f32.xlu0 %v14217_v42  ;;  %14224 = vst [vmem:[#allocation128_spill] sm:$0xff] %v12292_v43  ;;  %v12304_v23 = vpop.eup %9585 }
 0x314   : > { %14216 = vst [vmem:[#allocation16_spill] sm:$0xff] %v12273_v55  ;;  %v12278_v40 = vpop.xlane.xlu0 %4034  ;;  %14230 = vst [vmem:[#allocation131_spill] sm:$0xff] %v12304_v23  ;;  %v12316_v52 = vpop.eup %9587 }
 0x315   : > { %14235 = vst [vmem:[#allocation132_spill] sm:$0xff] %v12316_v52 }
 0x316   : > { %4634 = vadd.xlane.f32.xlu1 %v12280_v59 }
 0x317   : > { %v12285_v31 = vpop.xlane.xlu1 %4056  ;;  %4138 = vmax.xlane.f32.xlu0 %v11945_v62  ;;  %v14236_v62 = vld [vmem:[#allocation35_spill] sm:$0xff] }
 0x318   : > { %14221 = vst [vmem:[#allocation24_spill] sm:$0xff] %v12285_v31  ;;  %v12290_v42 = vpop.xlane.xlu0 %4072  ;;  %v14231_v31 = vld [vmem:[#allocation34_spill] sm:$0xff] }
 0x319   : > { %14223 = vst [vmem:[#allocation17_spill] sm:$0xff] %v12290_v42  ;;  %v14252_v42 = vld [vmem:[#allocation32_spill] sm:$0xff] }
 0x31a   : > { %4640 = vadd.xlane.f32.xlu1 %v12292_v43  ;;  %v14233_v43 = vld [vmem:[#allocation73_spill] sm:$0xff] }
 0x31b   : > { %v12297_v58 = vpop.xlane.xlu1 %4054  ;;  %4144 = vmax.xlane.f32.xlu0 %v14227_v18 }
 0x31c   : > { %14226 = vst [vmem:[#allocation129_spill] sm:$0xff] %v12297_v58  ;;  %v12302_v59 = vpop.xlane.xlu0 %4070  ;;  %v14242_v58 = vld [vmem:[#allocation29_spill] sm:$0xff] }
 0x31d   : > { %14229 = vst [vmem:[#allocation130_spill] sm:$0xff] %v12302_v59  ;;  %v12328_v59 = vpop.eup %9589 }
 0x31e   : > { %4638 = vadd.xlane.f32.xlu1 %v12304_v23  ;;  %14240 = vst [vmem:[#allocation134_spill] sm:$0xff] %v12328_v59  ;;  %v14254_v23 = vsub.f32 %v11693_v25, %v11981_v8  ;;  %v14260_v8 = vld [vmem:[#allocation42_spill] sm:$0xff] }
 0x31f   : > { %v12309_v55 = vpop.xlane.xlu1 %4060  ;;  %4142 = vmax.xlane.f32.xlu0 %v14233_v43 }
 0x320   : > { %14232 = vst [vmem:[#allocation34_spill] sm:$0xff] %v12309_v55  ;;  %v12314_v18 = vpop.xlane.xlu0 %4076  ;;  %v14245_v55 = vld [vmem:[#allocation30_spill] sm:$0xff] }
 0x322   : > { %4644 = vadd.xlane.f32.xlu1 %v12316_v52 }
 0x323   : > { %v12321_v53 = vpop.xlane.xlu1 %4058  ;;  %4148 = vmax.xlane.f32.xlu0 %v11972_v6 }
 0x324   : > { %14237 = vst [vmem:[#allocation35_spill] sm:$0xff] %v12321_v53  ;;  %v12326_v43 = vpop.xlane.xlu0 %4074  ;;  %v14248_v53 = vld [vmem:[#allocation31_spill] sm:$0xff] }
 0x325   : > { %14239 = vst [vmem:[#allocation133_spill] sm:$0xff] %v12326_v43 }
 0x326   : > { %4642 = vadd.xlane.f32.xlu1 %v12328_v59 }
 0x327   : > { %v12333_v29 = vpop.xlane.xlu1 %4064  ;;  %4146 = vmax.xlane.f32.xlu0 %v11977_v38 }
 0x328   : > { %v12338_v6 = vpop.xlane.xlu0 %4080 }
 0x329   : > { %14243 = vst [vmem:[#allocation29_spill] sm:$0xff] %v12338_v6 }
 0x32a   : > { %4168 = vmax.xlane.f32.xlu1 %v12068_v21 }
 0x32b   : > { %v12343_v60 = vpop.xlane.xlu1 %4062  ;;  %4152 = vmax.xlane.f32.xlu0 %v11990_v30 }
 0x32c   : > { %v12348_v43 = vpop.xlane.xlu0 %4078 }
 0x32d   : > { %14246 = vst [vmem:[#allocation30_spill] sm:$0xff] %v12348_v43 }
 0x32e   : > { %4166 = vmax.xlane.f32.xlu1 %v12073_v63  ;;  %v14257_v63 = vld [vmem:[#allocation41_spill] sm:$0xff] }
 0x32f   : > { %v12353_v52 = vpop.xlane.xlu1 %4068  ;;  %4150 = vmax.xlane.f32.xlu0 %v11996_v3  ;;  %v14253_v3 = vld [vmem:[#allocation40_spill] sm:$0xff] }
 0x330   : > { %v12358_v6 = vpop.xlane.xlu0 %4084 }
 0x331   : > { %14249 = vst [vmem:[#allocation31_spill] sm:$0xff] %v12358_v6 }
 0x332   : > { %4172 = vmax.xlane.f32.xlu1 %v12090_v10  ;;  %v4392_v10 = vmul.f32 1.442695, %v14254_v23 }
 0x333   : > { %v12363_v59 = vpop.xlane.xlu1 %4066  ;;  %4156 = vmax.xlane.f32.xlu0 %v12009_v39  ;;  %v14255_v39 = vld [vmem:[#allocation49_spill] sm:$0xff] }
 0x334   : > { %14251 = vst [vmem:[#allocation135_spill] sm:$0xff] %v12363_v59  ;;  %v12368_v43 = vpop.xlane.xlu0 %4082  ;;  %9591 = vpow2.f32 %v4392_v10  ;;  %v14262_v59 = vsub.f32 %v11696_v54, %v12000_v50  ;;  %v14263_v10 = vld [vmem:[#allocation51_spill] sm:$0xff]  ;;  %v14266_v50 = vld [vmem:[#allocation52_spill] sm:$0xff] }
 0x336   : > { %4170 = vmax.xlane.f32.xlu1 %v12095_v4  ;;  %v14264_v4 = vld [vmem:[#allocation43_spill] sm:$0xff] }
 0x337   : > { %v12373_v21 = vpop.xlane.xlu1 %4104  ;;  %4154 = vmax.xlane.f32.xlu0 %v12016_v5  ;;  %v14259_v5 = vld [vmem:[#allocation50_spill] sm:$0xff] }
 0x338   : > { %v12381_v30 = vpop.xlane.xlu0 %4088 }
 0x339   : > { %14256 = vst [vmem:[#allocation32_spill] sm:$0xff] %v12381_v30 }
 0x33a   : > { %4176 = vmax.xlane.f32.xlu1 %v12110_v16  ;;  %v4390_v16 = vmul.f32 1.442695, %v14262_v59 }
 0x33b   : > { %v12386_v38 = vpop.xlane.xlu1 %4102  ;;  %4160 = vmax.xlane.f32.xlu0 %v12034_v13 }
 0x33c   : > { %14258 = vst [vmem:[#allocation40_spill] sm:$0xff] %v12386_v38  ;;  %v12391_v25 = vpop.xlane.xlu0 %4086  ;;  %9593 = vpow2.f32 %v4390_v16 }
 0x33e   : > { %4174 = vmax.xlane.f32.xlu1 %v12115_v7  ;;  %v14267_v7 = vld [vmem:[#allocation44_spill] sm:$0xff]  ;;  %v12421_v38 = vpop.eup %9591 }
 0x33f   : > { %v12396_v6 = vpop.xlane.xlu1 %4108  ;;  %4158 = vmax.xlane.f32.xlu0 %v12040_v32  ;;  %v14265_v32 = vsub.f32 %v11699_v26, %v12020_v1  ;;  %14268 = vst [vmem:[#allocation41_spill] sm:$0xff] %v12421_v38  ;;  %v14270_v26 = vsub.f32 %v11702_v9, %v12038_v61  ;;  %v14275_v61 = vld [vmem:[#allocation54_spill] sm:$0xff] }
 0x340   : > { %14261 = vst [vmem:[#allocation49_spill] sm:$0xff] %v12396_v6  ;;  %v12404_v30 = vpop.xlane.xlu0 %4092 }
 0x341   : > { %v4396_v54 = vmul.f32 1.442695, %v14265_v32  ;;  %v4394_v1 = vmul.f32 1.442695, %v14270_v26  ;;  %v14271_v32 = vld [vmem:[#allocation53_spill] sm:$0xff]  ;;  %v14285_v26 = vsub.f32 %v11740_v27, %v12143_v33 }
 0x342   : > { %4180 = vmax.xlane.f32.xlu1 %v12132_v0 }
 0x343   : > { %v12409_v23 = vpop.xlane.xlu1 %4106  ;;  %4164 = vmax.xlane.f32.xlu0 %v12056_v15  ;;  %9595 = vpow2.f32 %v4396_v54  ;;  %v14274_v54 = vsub.f32 %v11705_v14, %v12060_v46  ;;  %v10071_v15 = vld [vmem:[%s10335_s21 + $0x100] sm:$0xff]  ;;  %v14278_v14 = vsub.f32 %v11708_v36, %v12080_v49  ;;  %v14282_v36 = vsub.f32 %v11711_v24, %v12102_v56 }
 0x344   : > { %v12417_v13 = vpop.xlane.xlu0 %4090  ;;  %9597 = vpow2.f32 %v4394_v1  ;;  %v14287_v24 = vsub.f32 %v11714_v35, %v12124_v19  ;;  %v14293_v35 = vld [vmem:[#allocation105_spill] sm:$0xff] }
 0x345   : > { %v4400_v9 = vmul.f32 1.442695, %v14274_v54  ;;  %v4398_v46 = vmul.f32 1.442695, %v14278_v14  ;;  %v14279_v54 = vld [vmem:[#allocation55_spill] sm:$0xff]  ;;  %v14294_v19 = vsub.f32 %v11717_v41, %v14293_v35 }
 0x346   : > { %4178 = vmax.xlane.f32.xlu1 %v12137_v20  ;;  %v12453_v6 = vpop.eup %9593  ;;  %v4404_v49 = vmul.f32 1.442695, %v14282_v36  ;;  %v4402_v56 = vmul.f32 1.442695, %v14287_v24  ;;  %v14302_v35 = vld [vmem:[#allocation11_spill] sm:$0xff] }
 0x347   : > { %v12424_v0 = vpop.xlane.xlu1 %4112  ;;  %4648 = vadd.xlane.f32.xlu0 %v12421_v38  ;;  %v14276_v38 = vld [vmem:[#allocation46_spill] sm:$0xff]  ;;  %14277 = vst [vmem:[#allocation51_spill] sm:$0xff] %v12453_v6  ;;  %9599 = vpow2.f32 %v4400_v9  ;;  %v14283_v9 = vld [vmem:[#allocation56_spill] sm:$0xff] }
 0x348   : > { %14269 = vst [vmem:[#allocation50_spill] sm:$0xff] %v12424_v0  ;;  %v12432_v59 = vpop.xlane.xlu0 %4096  ;;  %9601 = vpow2.f32 %v4398_v46 }
 0x349   : > { %14272 = vst [vmem:[#allocation42_spill] sm:$0xff] %v12432_v59  ;;  %v10072_v59 = vld [vmem:[%s10335_s21 + $0x108] sm:$0xff] }
 0x34a   : > { %4184 = vmax.xlane.f32.xlu1 %v12154_v37  ;;  %v12451_v37 = vpack.c.bf16 %v10072_v59, %v10071_v15  ;;  %v14280_v59 = vld [vmem:[#allocation47_spill] sm:$0xff] }
 0x34b   : > { %v12437_v20 = vpop.xlane.xlu1 %4110  ;;  %4162 = vmax.xlane.f32.xlu0 %v12062_v44 }
 0x34c   : > { %v12445_v16 = vpop.xlane.xlu0 %4094  ;;  %9295 = vmatprep.subr.bf16.mxu0 %v12451_v37 }
 0x34e   : > { %4182 = vmax.xlane.f32.xlu1 %v12159_v47  ;;  %v12469_v47 = vpop.eup %9595 }
 0x34f   : > { %v12456_v1 = vpop.xlane.xlu1 %4116  ;;  %4646 = vadd.xlane.f32.xlu0 %v12453_v6  ;;  %14281 = vst [vmem:[#allocation43_spill] sm:$0xff] %v12469_v47  ;;  %v12480_v6 = vpop.eup %9597 }
 0x350   : > { %v12465_v15 = vpop.xlane.xlu0 %4100  ;;  %14284 = vst [vmem:[#allocation52_spill] sm:$0xff] %v12480_v6 }
 0x351   : > { %v12498_v27 = vpop.eup %9599 }
 0x352   : > { %4188 = vmax.xlane.f32.xlu1 %v12176_v12  ;;  %v4424_v12 = vmul.f32 1.442695, %v14285_v26  ;;  %14291 = vst [vmem:[#allocation54_spill] sm:$0xff] %v12498_v27  ;;  %v4408_v26 = vmul.f32 1.442695, %v14294_v19  ;;  %v14303_v19 = vld [vmem:[#allocation111_spill] sm:$0xff] }
 0x353   : > { %v12472_v44 = vpop.xlane.xlu1 %4114  ;;  %4652 = vadd.xlane.f32.xlu0 %v12469_v47  ;;  %v14304_v24 = vsub.f32 %v14302_v35, %v14303_v19 }
 0x354   : > { %v4585_v0 = vpop.xlane.xlu0 %4584 }
 0x355   : > { %9603 = vrcp.f32 %v4585_v0 }
 0x356   : > { %4186 = vmax.xlane.f32.xlu1 %v12181_v45  ;;  %9605 = vpow2.f32 %v4404_v49  ;;  %v12512_v45 = vpop.eup %9601  ;;  %v14329_v49 = vld [vmem:[#allocation124_spill] sm:$0xff] }
 0x357   : > { %v12486_v47 = vpop.xlane.xlu1 %4120  ;;  %4650 = vadd.xlane.f32.xlu0 %v12480_v6  ;;  %9607 = vpow2.f32 %v4424_v12  ;;  %14296 = vst [vmem:[#allocation55_spill] sm:$0xff] %v12512_v45  ;;  %v14298_v12 = vld [vmem:[#allocation18_spill] sm:$0xff] }
 0x358   : > { %14286 = vst [vmem:[#allocation44_spill] sm:$0xff] %v12486_v47  ;;  %v12494_v0 = vpop.xlane.xlu0 %4098  ;;  %9609 = vpow2.f32 %v4402_v56  ;;  %v14299_v6 = vld [vmem:[#allocation110_spill] sm:$0xff] }
 0x359   : > { %14289 = vst [vmem:[#allocation53_spill] sm:$0xff] %v12494_v0  ;;  %v14300_v47 = vsub.f32 %v14298_v12, %v14299_v6  ;;  %v14308_v6 = vld [vmem:[#allocation19_spill] sm:$0xff] }
 0x35a   : > { %4192 = vmax.xlane.f32.xlu1 %v12198_v51  ;;  %v14297_v51 = vld [vmem:[#allocation120_spill] sm:$0xff] }
 0x35b   : > { %v12502_v33 = vpop.xlane.xlu1 %4118  ;;  %4656 = vadd.xlane.f32.xlu0 %v12498_v27  ;;  %v4422_v27 = vmul.f32 1.442695, %v14300_v47  ;;  %v14309_v47 = vld [vmem:[#allocation5_spill] sm:$0xff] }
 0x35c   : > { %14292 = vst [vmem:[#allocation46_spill] sm:$0xff] %v12502_v33  ;;  %v4583_v36 = vpop.xlane.xlu0 %4582  ;;  %v4406_v33 = vmul.f32 1.442695, %v14304_v24  ;;  %v14310_v12 = vsub.f32 %v14308_v6, %v14309_v47  ;;  %v14312_v24 = vld [vmem:[#allocation12_spill] sm:$0xff] }
 0x35d   : > { %9611 = vrcp.f32 %v4583_v36  ;;  %v14318_v47 = vld [vmem:[#allocation20_spill] sm:$0xff] }
 0x35e   : > { %4190 = vmax.xlane.f32.xlu1 %v14297_v51  ;;  %9613 = vpow2.f32 %v4408_v26  ;;  %v14306_v51 = vld [vmem:[#allocation64_spill] sm:$0xff]  ;;  %v4428_v26 = vmul.f32 1.442695, %v14310_v12 }
 0x35f   : > { %v12518_v56 = vpop.xlane.xlu1 %4124  ;;  %4654 = vadd.xlane.f32.xlu0 %v12512_v45  ;;  %v9604_v41 = vpop.eup %9603 }
 0x360   : > { %14301 = vst [vmem:[#allocation47_spill] sm:$0xff] %v12518_v56  ;;  %v4589_v36 = vpop.xlane.xlu0 %4588  ;;  %v4841_v0 = vmul.f32 %v9604_v41, %v14306_v51  ;;  %v12527_v14 = vpop.eup %9605  ;;  %v14313_v51 = vld [vmem:[#allocation116_spill] sm:$0xff] }
 0x361   : > { %9615 = vrcp.f32 %v4589_v36  ;;  %14307 = vst [vmem:[#allocation56_spill] sm:$0xff] %v12527_v14  ;;  %v14314_v41 = vsub.f32 %v14312_v24, %v14313_v51  ;;  %v12544_v46 = vpop.eup %9607 }
 0x362   : > { %4196 = vmax.xlane.f32.xlu1 %v12220_v34  ;;  %9617 = vpow2.f32 %v4422_v27  ;;  %5095 = vst [vmem:[%s12536_s23 + $0x8] sm:$0xff] %v4841_v0  ;;  %14316 = vst [vmem:[#allocation18_spill] sm:$0xff] %v12544_v46  ;;  %v12546_v6 = vpop.eup %9609 }
 0x363   : > { %v12533_v45 = vpop.xlane.xlu1 %4122  ;;  %4660 = vadd.xlane.f32.xlu0 %v12527_v14  ;;  %9619 = vpow2.f32 %v4406_v33  ;;  %v4412_v35 = vmul.f32 1.442695, %v14314_v41  ;;  %14317 = vst [vmem:[#allocation110_spill] sm:$0xff] %v12546_v6  ;;  %v14319_v33 = vld [vmem:[#allocation6_spill] sm:$0xff]  ;;  %v14321_v41 = vld [vmem:[#allocation121_spill] sm:$0xff] }
 0x364   : > { %14311 = vst [vmem:[#allocation105_spill] sm:$0xff] %v12533_v45  ;;  %v4587_v36 = vpop.xlane.xlu0 %4586  ;;  %v14320_v12 = vsub.f32 %v14318_v47, %v14319_v33  ;;  %v14323_v14 = vld [vmem:[#allocation61_spill] sm:$0xff] }
 0x365   : > { %9621 = vrcp.f32 %v4587_v36  ;;  %v14322_v36 = vsub.f32 %v14192_v22, %v14321_v41  ;;  %v14326_v33 = vld [vmem:[#allocation21_spill] sm:$0xff]  ;;  %v10074_v22 = vld [vmem:[%s10335_s21 + $0x118] sm:$0xff] }
 0x366   : > { %4680 = vadd.xlane.f32.xlu1 %v12544_v46  ;;  %9623 = vpow2.f32 %v4428_v26  ;;  %v4426_v34 = vmul.f32 1.442695, %v14320_v12  ;;  %v14324_v26 = vld [vmem:[#allocation68_spill] sm:$0xff]  ;;  %v14327_v12 = vld [vmem:[#allocation7_spill] sm:$0xff] }
 0x367   : > { %v12552_v24 = vpop.xlane.xlu1 %4128  ;;  %4658 = vadd.xlane.f32.xlu0 %v12546_v6  ;;  %v9612_v51 = vpop.eup %9611  ;;  %9625 = vpow2.f32 %v4412_v35  ;;  %v4410_v27 = vmul.f32 1.442695, %v14322_v36  ;;  %v14328_v56 = vsub.f32 %v14326_v33, %v14327_v12  ;;  %v10073_v35 = vld [vmem:[%s10335_s21 + $0x110] sm:$0xff] }
 0x368   : > { %v4593_v45 = vpop.xlane.xlu0 %4592  ;;  %v4839_v19 = vmul.f32 %v9612_v51, %v14324_v26  ;;  %v12561_v47 = vpop.eup %9613  ;;  %v9298_v41 = vpack.c.bf16 %v10074_v22, %v10073_v35  ;;  %v14333_v12 = vld [vmem:[#allocation71_spill] sm:$0xff]  ;;  %v10076_v22 = vld [vmem:[%s10335_s21 + $0x188] sm:$0xff] }
 0x369   : > { %9627 = vrcp.f32 %v4593_v45  ;;  %14325 = vst [vmem:[#allocation11_spill] sm:$0xff] %v12561_v47  ;;  %v4432_v6 = vmul.f32 1.442695, %v14328_v56  ;;  %v14330_v45 = vsub.f32 %v14200_v57, %v12236_v17  ;;  %v14332_v56 = vld [vmem:[#allocation62_spill] sm:$0xff] }
 0x36a   : > { %4194 = vmax.xlane.f32.xlu1 %v14329_v49  ;;  %9629 = vpow2.f32 %v4426_v34  ;;  %5094 = vst [vmem:[%s12536_s23] sm:$0xff] %v4839_v19  ;;  %8558 = vmatprep.mubr.f32.mxu0 %v4839_v19  ;;  %v10075_v34 = vld [vmem:[%s10335_s21 + $0x180] sm:$0xff]  ;;  %v14336_v19 = vld [vmem:[#allocation22_spill] sm:$0xff] }
 0x36b   : > { %v9616_v36 = vpop.eup %9615  ;;  %v4416_v46 = vmul.f32 1.442695, %v14330_v45  ;;  %v12573_v51 = vpop.xlane.xlu1 %4126  ;;  %4664 = vadd.xlane.f32.xlu0 %v12561_v47  ;;  %9631 = vpow2.f32 %v4410_v27  ;;  %8559 = vmatmul.mubr.f32.vlgmr.msra.gmra.mrb[192].mxu0 %v4841_v0  ;;  %v12581_v49 = vpack.c.bf16 %v10076_v22, %v10075_v34  ;;  %v14337_v27 = vld [vmem:[#allocation14_spill] sm:$0xff]  ;;  %v14342_v22 = vld [vmem:[#allocation15_spill] sm:$0xff] }
 0x36c   : > { %14331 = vst [vmem:[#allocation111_spill] sm:$0xff] %v12573_v51  ;;  %v4591_v33 = vpop.xlane.xlu0 %4590  ;;  %v4845_v35 = vmul.f32 %v9616_v36, %v14333_v12  ;;  %v12583_v57 = vpop.eup %9617  ;;  %9297 = vmatpush3.bf16.msra.mxu0 %v12451_v37  ;;  %v14338_v45 = vsub.f32 %v14336_v19, %v14337_v27  ;;  %v14339_v12 = vld [vmem:[#allocation8_spill] sm:$0xff] }
 0x36d   : > { %14334 = vst [vmem:[#allocation64_spill] sm:$0xff] %v12583_v57  ;;  %9633 = vrcp.f32 %v4591_v33  ;;  %v12586_v17 = vpop.eup %9619  ;;  %9299 = vmatprep.subr.bf16.mxu0 %v9298_v41  ;;  %v14340_v33 = vsub.f32 %v14207_v28, %v14339_v12  ;;  %9327 = vmatprep.subr.bf16.mxu1 %v12581_v49  ;;  %v10077_v12 = vld [vmem:[%s10335_s21 + $0x120] sm:$0xff] }
 0x36e   : > { %14335 = vst [vmem:[#allocation19_spill] sm:$0xff] %v12586_v17  ;;  %9635 = vpow2.f32 %v4432_v6  ;;  %v4430_v0 = vmul.f32 1.442695, %v14338_v45  ;;  %4678 = vadd.xlane.f32.xlu1 %v12583_v57  ;;  %5097 = vst [vmem:[%s12536_s23 + $0x18] sm:$0xff] %v4845_v35  ;;  %v14341_v6 = vld [vmem:[#allocation23_spill] sm:$0xff]  ;;  %v14345_v57 = vld [vmem:[#allocation74_spill] sm:$0xff] }
 0x36f   : > { %v9622_v36 = vpop.eup %9621  ;;  %9637 = vpow2.f32 %v4416_v46  ;;  %v4414_v34 = vmul.f32 1.442695, %v14340_v33  ;;  %v12596_v37 = vpop.xlane.xlu1 %4132  ;;  %4662 = vadd.xlane.f32.xlu0 %v12586_v17  ;;  %v14343_v19 = vsub.f32 %v14341_v6, %v14342_v22  ;;  %v14344_v45 = vld [vmem:[#allocation63_spill] sm:$0xff]  ;;  %v10078_v33 = vld [vmem:[%s10335_s21 + $0x128] sm:$0xff]  ;;  %v10080_v22 = vld [vmem:[%s10335_s21 + $0x138] sm:$0xff] }
 0x370   : > { %v4597_v26 = vpop.xlane.xlu0 %4596  ;;  %v4843_v28 = vmul.f32 %v9622_v36, %v14345_v57  ;;  %v9302_v47 = vpack.c.bf16 %v10078_v33, %v10077_v12  ;;  %v12608_v51 = vpop.eup %9623  ;;  %9301 = vmatpush3.bf16.msra.mxu0 %v9298_v41  ;;  %v10079_v6 = vld [vmem:[%s10335_s21 + $0x130] sm:$0xff]  ;;  %v14348_v57 = vld [vmem:[#allocation9_spill] sm:$0xff] }
 0x371   : > { %v4436_v27 = vmul.f32 1.442695, %v14343_v19  ;;  %14346 = vst [vmem:[#allocation5_spill] sm:$0xff] %v12608_v51  ;;  %9639 = vrcp.f32 %v4597_v26  ;;  %v12610_v17 = vpop.eup %9625  ;;  %v9306_v19 = vpack.c.bf16 %v10080_v22, %v10079_v6  ;;  %v14349_v36 = vsub.f32 %v14214_v48, %v14348_v57  ;;  %v14350_v26 = vld [vmem:[#allocation77_spill] sm:$0xff] }
 0x372   : > { %14347 = vst [vmem:[#allocation12_spill] sm:$0xff] %v12610_v17  ;;  %9641 = vpow2.f32 %v4430_v0  ;;  %4684 = vadd.xlane.f32.xlu1 %v12608_v51  ;;  %5096 = vst [vmem:[%s12536_s23 + $0x10] sm:$0xff] %v4843_v28  ;;  %8561 = vmatprep.mubr.f32.mxu0 %v4843_v28  ;;  %v14357_v57 = vld [vmem:[#allocation25_spill] sm:$0xff] }
 0x373   : > { %v9628_v46 = vpop.eup %9627  ;;  %9643 = vpow2.f32 %v4414_v34  ;;  %v4420_v12 = vmul.f32 1.442695, %v14349_v36  ;;  %v4617_v33 = vpop.xlane.xlu1 %4616  ;;  %8562 = vmatmul.mubr.f32.gmra.mrb[194].mxu0 %v4845_v35  ;;  %4668 = vadd.xlane.f32.xlu0 %v12610_v17  ;;  %v14353_v34 = vld [vmem:[#allocation16_spill] sm:$0xff]  ;;  %v14364_v51 = vld [vmem:[#allocation17_spill] sm:$0xff] }
 0x374   : > { %9645 = vpow2.f32 %v4436_v27  ;;  %v4595_v41 = vpop.xlane.xlu0 %4594  ;;  %v4849_v0 = vmul.f32 %v9628_v46, %v14350_v26  ;;  %9303 = vmatprep.subr.bf16.mxu0 %v9302_v47  ;;  %v12621_v28 = vpop.eup %9629  ;;  %v14354_v48 = vsub.f32 %v14218_v2, %v14353_v34  ;;  %v14355_v27 = vsub.f32 %v14220_v11, %v12278_v40  ;;  %v14358_v36 = vld [vmem:[#allocation24_spill] sm:$0xff]  ;;  %v14360_v26 = vld [vmem:[#allocation65_spill] sm:$0xff] }
 0x375   : > { %14351 = vst [vmem:[#allocation116_spill] sm:$0xff] %v12621_v28  ;;  %9647 = vrcp.f32 %v4617_v33  ;;  %9305 = vmatpush3.bf16.msra.mxu0 %v9302_v47  ;;  %v12623_v6 = vpop.eup %9631  ;;  %v14359_v33 = vsub.f32 %v14357_v57, %v14358_v36  ;;  %v10081_v40 = vld [vmem:[%s10335_s21 + $0x140] sm:$0xff]  ;;  %v10083_v57 = vld [vmem:[%s10335_s21 + $0x150] sm:$0xff]  ;;  %v10084_v36 = vld [vmem:[%s10335_s21 + $0x158] sm:$0xff] }
 0x376   : > { %14352 = vst [vmem:[#allocation20_spill] sm:$0xff] %v12623_v6  ;;  %v4434_v22 = vmul.f32 1.442695, %v14354_v48  ;;  %9649 = vrcp.f32 %v4595_v41  ;;  %4682 = vadd.xlane.f32.xlu1 %v12621_v28  ;;  %5099 = vst [vmem:[%s12536_s23 + $0x28] sm:$0xff] %v4849_v0  ;;  %9307 = vmatprep.subr.bf16.mxu0 %v9306_v19  ;;  %v4418_v46 = vmul.f32 1.442695, %v14355_v27 }
 0x377   : > { %v9634_v35 = vpop.eup %9633  ;;  %9651 = vpow2.f32 %v4420_v12  ;;  %v12633_v47 = vpop.xlane.xlu1 %4130  ;;  %4666 = vadd.xlane.f32.xlu0 %v12623_v6  ;;  %v4440_v41 = vmul.f32 1.442695, %v14359_v33  ;;  %v14361_v48 = vld [vmem:[#allocation80_spill] sm:$0xff]  ;;  %v10082_v27 = vld [vmem:[%s10335_s21 + $0x148] sm:$0xff]  ;;  %v9314_v33 = vpack.c.bf16 %v10084_v36, %v10083_v57  ;;  %v14363_v12 = vld [vmem:[#allocation33_spill] sm:$0xff] }
 0x378   : > { %v12636_v2 = vpop.eup %9635  ;;  %v4601_v34 = vpop.xlane.xlu0 %4600  ;;  %v4847_v11 = vmul.f32 %v9634_v35, %v14361_v48  ;;  %v9310_v28 = vpack.c.bf16 %v10082_v27, %v10081_v40  ;;  %v14365_v35 = vsub.f32 %v14363_v12, %v14364_v51  ;;  %v14370_v12 = vld [vmem:[#allocation129_spill] sm:$0xff]  ;;  %v10086_v36 = vld [vmem:[%s10335_s21 + $0x168] sm:$0xff] }
 0x379   : > { %14356 = vst [vmem:[#allocation6_spill] sm:$0xff] %v12636_v2  ;;  %v12646_v17 = vpop.eup %9637  ;;  %9653 = vrcp.f32 %v4601_v34  ;;  %9309 = vmatpush3.bf16.msra.mxu0 %v9306_v19  ;;  %v14367_v34 = vld [vmem:[#allocation83_spill] sm:$0xff] }
 0x37a   : > { %14362 = vst [vmem:[#allocation121_spill] sm:$0xff] %v12646_v17  ;;  %9655 = vpow2.f32 %v4434_v22  ;;  %4688 = vadd.xlane.f32.xlu1 %v12636_v2  ;;  %5098 = vst [vmem:[%s12536_s23 + $0x20] sm:$0xff] %v4847_v11  ;;  %8564 = vmatprep.mubr.f32.mxu0 %v4847_v11  ;;  %v4456_v48 = vmul.f32 1.442695, %v14365_v35 }
 0x37b   : > { %v9640_v6 = vpop.eup %9639  ;;  %9657 = vpow2.f32 %v4418_v46  ;;  %v4615_v40 = vpop.xlane.xlu1 %4614  ;;  %8565 = vmatmul.mubr.f32.gmra.mrb[196].mxu0 %v4849_v0  ;;  %4672 = vadd.xlane.f32.xlu0 %v12646_v17  ;;  %v14369_v46 = vld [vmem:[#allocation26_spill] sm:$0xff] }
 0x37c   : > { %v12656_v19 = vpop.eup %9641  ;;  %9659 = vpow2.f32 %v4440_v41  ;;  %v4599_v22 = vpop.xlane.xlu0 %4598  ;;  %v4853_v11 = vmul.f32 %v9640_v6, %v14367_v34  ;;  %9311 = vmatprep.subr.bf16.mxu0 %v9310_v28  ;;  %v14371_v0 = vsub.f32 %v14369_v46, %v14370_v12  ;;  %v10085_v41 = vld [vmem:[%s10335_s21 + $0x160] sm:$0xff]  ;;  %v14374_v12 = vld [vmem:[#allocation86_spill] sm:$0xff] }
 0x37d   : > { %14366 = vst [vmem:[#allocation61_spill] sm:$0xff] %v12656_v19  ;;  %v12659_v27 = vpop.eup %9643  ;;  %9661 = vrcp.f32 %v4615_v40  ;;  %9313 = vmatpush3.bf16.msra.mxu0 %v9310_v28  ;;  %v9318_v35 = vpack.c.bf16 %v10086_v36, %v10085_v41  ;;  %v14372_v40 = vld [vmem:[#allocation130_spill] sm:$0xff]  ;;  %v14375_v41 = vld [vmem:[#allocation87_spill] sm:$0xff] }
 0x37e   : > { %14368 = vst [vmem:[#allocation68_spill] sm:$0xff] %v12659_v27  ;;  %v12661_v51 = vpop.eup %9645  ;;  %v4438_v57 = vmul.f32 1.442695, %v14371_v0  ;;  %9663 = vrcp.f32 %v4599_v22  ;;  %4686 = vadd.xlane.f32.xlu1 %v12656_v19  ;;  %5101 = vst [vmem:[%s12536_s23 + $0x38] sm:$0xff] %v4853_v11  ;;  %9315 = vmatprep.subr.bf16.mxu0 %v9314_v33  ;;  %v14373_v28 = vsub.f32 %v14231_v31, %v14372_v40  ;;  %v14376_v31 = vld [vmem:[#allocation27_spill] sm:$0xff]  ;;  %v14377_v36 = vld [vmem:[#allocation34_spill] sm:$0xff] }
 0x37f   : > { %v9648_v6 = vpop.eup %9647  ;;  %9665 = vpow2.f32 %v4456_v48  ;;  %v4621_v17 = vpop.xlane.xlu1 %4620  ;;  %4670 = vadd.xlane.f32.xlu0 %v12659_v27  ;;  %v14378_v40 = vsub.f32 %v14376_v31, %v14377_v36  ;;  %v10088_v27 = vld [vmem:[%s10335_s21 + $0x178] sm:$0xff] }
 0x380   : > { %v4454_v34 = vmul.f32 1.442695, %v14373_v28  ;;  %v9650_v22 = vpop.eup %9649  ;;  %9667 = vrcp.f32 %v4621_v17  ;;  %v4605_v46 = vpop.xlane.xlu0 %4604  ;;  %v4873_v0 = vmul.f32 %v9648_v6, %v14374_v12  ;;  %v10087_v17 = vld [vmem:[%s10335_s21 + $0x170] sm:$0xff] }
 0x381   : > { %v12675_v19 = vpop.eup %9651  ;;  %9669 = vrcp.f32 %v4605_v46  ;;  %v4851_v48 = vmul.f32 %v9650_v22, %v14375_v41  ;;  %9317 = vmatpush3.bf16.msra.mxu0 %v9314_v33  ;;  %v4444_v28 = vmul.f32 1.442695, %v14378_v40  ;;  %v9322_v2 = vpack.c.bf16 %v10088_v27, %v10087_v17  ;;  %v14380_v41 = vld [vmem:[#allocation91_spill] sm:$0xff]  ;;  %v14385_v17 = vld [vmem:[#allocation133_spill] sm:$0xff] }
 0x382   : > { %9671 = vpow2.f32 %v4438_v57  ;;  %4692 = vadd.xlane.f32.xlu1 %v12661_v51  ;;  %5111 = vst [vmem:[%s12536_s23 + $0x88] sm:$0xff] %v4873_v0  ;;  %9319 = vmatprep.subr.bf16.mxu0 %v9318_v35  ;;  %v14379_v46 = vsub.f32 %v14236_v62, %v12314_v18  ;;  %v14381_v62 = vld [vmem:[#allocation28_spill] sm:$0xff]  ;;  %v14382_v18 = vld [vmem:[#allocation35_spill] sm:$0xff] }
 0x383   : > { %v9654_v6 = vpop.eup %9653  ;;  %9673 = vpow2.f32 %v4454_v34  ;;  %5100 = vst [vmem:[%s12536_s23 + $0x30] sm:$0xff] %v4851_v48  ;;  %8567 = vmatprep.mubr.f32.mxu0 %v4851_v48  ;;  %v4619_v33 = vpop.xlane.xlu1 %4618  ;;  %4676 = vadd.xlane.f32.xlu0 %v12675_v19  ;;  %v14383_v48 = vsub.f32 %v14381_v62, %v14382_v18  ;;  %v14388_v18 = vld [vmem:[#allocation95_spill] sm:$0xff] }
 0x384   : > { %v4460_v12 = vmul.f32 1.442695, %v14379_v46  ;;  %v12690_v57 = vpop.eup %9655  ;;  %9675 = vrcp.f32 %v4619_v33  ;;  %8568 = vmatmul.mubr.f32.gmra.mrb[198].mxu0 %v4853_v11  ;;  %v4603_v22 = vpop.xlane.xlu0 %4602  ;;  %v4857_v31 = vmul.f32 %v9654_v6, %v14380_v41  ;;  %v14384_v11 = vld [vmem:[#allocation36_spill] sm:$0xff] }
 0x385   : > { %v12693_v27 = vpop.eup %9657  ;;  %9677 = vrcp.f32 %v4603_v22  ;;  %9321 = vmatpush3.bf16.msra.mxu0 %v9318_v35  ;;  %v4442_v36 = vmul.f32 1.442695, %v14383_v48  ;;  %v14386_v6 = vsub.f32 %v14384_v11, %v14385_v17  ;;  %v14387_v22 = vld [vmem:[#allocation93_spill] sm:$0xff]  ;;  %v14389_v11 = vsub.f32 %v14242_v58, %v12333_v29 }
 0x386   : > { %v12695_v34 = vpop.eup %9659  ;;  %9679 = vpow2.f32 %v4444_v28  ;;  %4690 = vadd.xlane.f32.xlu1 %v12690_v57  ;;  %5103 = vst [vmem:[%s12536_s23 + $0x48] sm:$0xff] %v4857_v31  ;;  %9323 = vmatprep.subr.bf16.mxu0 %v9322_v2  ;;  %v14393_v29 = vld [vmem:[#allocation97_spill] sm:$0xff] }
 0x387   : > { %v9662_v40 = vpop.eup %9661  ;;  %9681 = vpow2.f32 %v4460_v12  ;;  %v4458_v46 = vmul.f32 1.442695, %v14386_v6  ;;  %v4625_v33 = vpop.xlane.xlu1 %4624  ;;  %4674 = vadd.xlane.f32.xlu0 %v12693_v27  ;;  %v4448_v17 = vmul.f32 1.442695, %v14389_v11  ;;  %v10089_v6 = vld [vmem:[%s10335_s21 + $0x190] sm:$0xff] }
 0x388   : > { %v9664_v35 = vpop.eup %9663  ;;  %9683 = vrcp.f32 %v4625_v33  ;;  %v4609_v28 = vpop.xlane.xlu0 %4608  ;;  %v4871_v41 = vmul.f32 %v9662_v40, %v14387_v22  ;;  %v10090_v33 = vld [vmem:[%s10335_s21 + $0x198] sm:$0xff] }
 0x389   : > { %v12707_v62 = vpop.eup %9665  ;;  %9685 = vrcp.f32 %v4609_v28  ;;  %v4855_v12 = vmul.f32 %v9664_v35, %v14388_v18  ;;  %9325 = vmatpush3.bf16.msra.mxu0 %v9322_v2  ;;  %v9330_v40 = vpack.c.bf16 %v10090_v33, %v10089_v6  ;;  %v14390_v28 = vld [vmem:[#allocation37_spill] sm:$0xff] }
 0x38a   : > { %v9668_v48 = vpop.eup %9667  ;;  %9687 = vpow2.f32 %v4442_v36  ;;  %5110 = vst [vmem:[%s12536_s23 + $0x80] sm:$0xff] %v4871_v41  ;;  %8614 = vmatprep.mubr.f32.mxu1 %v4871_v41  ;;  %4696 = vadd.xlane.f32.xlu1 %v12695_v34  ;;  %v14391_v35 = vld [vmem:[#allocation29_spill] sm:$0xff] }
 0x38b   : > { %v9670_v22 = vpop.eup %9669  ;;  %9689 = vpow2.f32 %v4458_v46  ;;  %v14392_v2 = vsub.f32 %v14390_v28, %v14391_v35  ;;  %5102 = vst [vmem:[%s12536_s23 + $0x40] sm:$0xff] %v4855_v12  ;;  %8570 = vmatprep.mubr.f32.mxu0 %v4855_v12  ;;  %8615 = vmatmul.mubr.f32.vlgmr.msra.gmra.mrb[192].mxu1 %v4873_v0  ;;  %v4623_v58 = vpop.xlane.xlu1 %4622  ;;  %v4877_v36 = vmul.f32 %v9668_v48, %v14393_v29  ;;  %v14394_v46 = vld [vmem:[#allocation99_spill] sm:$0xff]  ;;  %v10091_v33 = vld [vmem:[%s10335_s21 + $0x200] sm:$0xff]  ;;  %v10092_v28 = vld [vmem:[%s10335_s21 + $0x208] sm:$0xff] }
 0x38c   : > { %v12722_v41 = vpop.eup %9671  ;;  %9691 = vrcp.f32 %v4623_v58  ;;  %8571 = vmatmul.mubr.f32.gmra.mrb[200].mxu0 %v4857_v31  ;;  %4712 = vadd.xlane.f32.xlu0 %v12707_v62  ;;  %v4607_v11 = vpop.xlane.xlu0 %4606  ;;  %v4861_v6 = vmul.f32 %v9670_v22, %v14394_v46  ;;  %v12728_v35 = vpack.c.bf16 %v10092_v28, %v10091_v33  ;;  %v14396_v31 = vsub.f32 %v14245_v55, %v12343_v60  ;;  %v14397_v22 = vld [vmem:[#allocation38_spill] sm:$0xff]  ;;  %v14400_v46 = vld [vmem:[#allocation101_spill] sm:$0xff]  ;;  %v14401_v33 = vld [vmem:[#allocation103_spill] sm:$0xff] }
 0x38d   : > { %v4464_v18 = vmul.f32 1.442695, %v14392_v2  ;;  %v12730_v2 = vpop.eup %9673  ;;  %9693 = vrcp.f32 %v4607_v11  ;;  %5113 = vst [vmem:[%s12536_s23 + $0x98] sm:$0xff] %v4877_v36  ;;  %9329 = vmatpush3.bf16.msra.mxu1 %v12581_v49  ;;  %v14398_v58 = vld [vmem:[#allocation30_spill] sm:$0xff]  ;;  %v10093_v28 = vld [vmem:[%s10335_s21 + $0x1a0] sm:$0xff] }
 0x38e   : > { %14395 = vst [vmem:[#allocation21_spill] sm:$0xff] %v12730_v2  ;;  %v9676_v0 = vpop.eup %9675  ;;  %9695 = vpow2.f32 %v4448_v17  ;;  %v4446_v12 = vmul.f32 1.442695, %v14396_v31  ;;  %4694 = vadd.xlane.f32.xlu1 %v12722_v41  ;;  %5105 = vst [vmem:[%s12536_s23 + $0x58] sm:$0xff] %v4861_v6  ;;  %9331 = vmatprep.subr.bf16.mxu1 %v9330_v40  ;;  %v14399_v29 = vsub.f32 %v14397_v22, %v14398_v58  ;;  %v10094_v31 = vld [vmem:[%s10335_s21 + $0x1a8] sm:$0xff] }
 0x38f   : > { %v9678_v48 = vpop.eup %9677  ;;  %9697 = vpow2.f32 %v4464_v18  ;;  %v4629_v49 = vpop.xlane.xlu1 %4628  ;;  %v4875_v17 = vmul.f32 %v9676_v0, %v14400_v46  ;;  %9359 = vmatprep.subr.bf16.mxu0 %v12728_v35  ;;  %v9334_v22 = vpack.c.bf16 %v10094_v31, %v10093_v28  ;;  %v14405_v28 = vld [vmem:[#allocation108_spill] sm:$0xff] }
 0x390   : > { %v4462_v11 = vmul.f32 1.442695, %v14399_v29  ;;  %v12744_v55 = vpop.eup %9679  ;;  %9699 = vrcp.f32 %v4629_v49  ;;  %4710 = vadd.xlane.f32.xlu0 %v12730_v2  ;;  %v4613_v60 = vpop.xlane.xlu0 %4612  ;;  %v4859_v18 = vmul.f32 %v9678_v48, %v14401_v33  ;;  %v10095_v29 = vld [vmem:[%s10335_s21 + $0x1b0] sm:$0xff]  ;;  %v10096_v49 = vld [vmem:[%s10335_s21 + $0x1b8] sm:$0xff]  ;;  %v14402_v48 = vsub.f32 %v14248_v53, %v12353_v52 }
 0x391   : > { %v12750_v58 = vpop.eup %9681  ;;  %9701 = vrcp.f32 %v4613_v60  ;;  %5112 = vst [vmem:[%s12536_s23 + $0x90] sm:$0xff] %v4875_v17  ;;  %8617 = vmatprep.mubr.f32.mxu1 %v4875_v17  ;;  %9333 = vmatpush3.bf16.msra.mxu1 %v9330_v40  ;;  %v9338_v46 = vpack.c.bf16 %v10096_v49, %v10095_v29  ;;  %v14403_v40 = vld [vmem:[#allocation106_spill] sm:$0xff]  ;;  %v14406_v29 = vld [vmem:[#allocation39_spill] sm:$0xff] }
 0x392   : > { %v9684_v0 = vpop.eup %9683  ;;  %9703 = vpow2.f32 %v4446_v12  ;;  %4700 = vadd.xlane.f32.xlu1 %v12744_v55  ;;  %5104 = vst [vmem:[%s12536_s23 + $0x50] sm:$0xff] %v4859_v18  ;;  %8573 = vmatprep.mubr.f32.mxu0 %v4859_v18  ;;  %v4452_v33 = vmul.f32 1.442695, %v14402_v48  ;;  %v14407_v52 = vld [vmem:[#allocation31_spill] sm:$0xff] }
 0x393   : > { %v9686_v2 = vpop.eup %9685  ;;  %9705 = vpow2.f32 %v4462_v11  ;;  %8618 = vmatmul.mubr.f32.gmra.mrb[194].mxu1 %v4877_v36  ;;  %v4627_v60 = vpop.xlane.xlu1 %4626  ;;  %8574 = vmatmul.mubr.f32.gmra.mrb[202].mxu0 %v4861_v6  ;;  %v4881_v12 = vmul.f32 %v9684_v0, %v14403_v40  ;;  %v14408_v53 = vsub.f32 %v14406_v29, %v14407_v52  ;;  %v14411_v40 = vld [vmem:[#allocation112_spill] sm:$0xff]  ;;  %v14412_v29 = vld [vmem:[#allocation114_spill] sm:$0xff] }
 0x394   : > { %v12761_v17 = vpop.eup %9687  ;;  %9707 = vrcp.f32 %v4627_v60  ;;  %4716 = vadd.xlane.f32.xlu0 %v12750_v58  ;;  %v4611_v18 = vpop.xlane.xlu0 %4610  ;;  %v4865_v31 = vmul.f32 %v9686_v2, %v14405_v28  ;;  %9335 = vmatprep.subr.bf16.mxu1 %v9334_v22  ;;  %v14409_v2 = vld [vmem:[#allocation135_spill] sm:$0xff] }
 0x395   : > { %14404 = vst [vmem:[#allocation7_spill] sm:$0xff] %v12761_v17  ;;  %v12765_v11 = vpop.eup %9689  ;;  %v4468_v36 = vmul.f32 1.442695, %v14408_v53  ;;  %9709 = vrcp.f32 %v4611_v18  ;;  %5115 = vst [vmem:[%s12536_s23 + $0xa8] sm:$0xff] %v4881_v12  ;;  %9337 = vmatpush3.bf16.msra.mxu1 %v9334_v22  ;;  %v14410_v49 = vsub.f32 %v14252_v42, %v14409_v2  ;;  %v10098_v53 = vld [vmem:[%s10335_s21 + $0x1c8] sm:$0xff] }
 0x396   : > { %v9692_v6 = vpop.eup %9691  ;;  %4698 = vadd.xlane.f32.xlu1 %v12761_v17  ;;  %5107 = vst [vmem:[%s12536_s23 + $0x68] sm:$0xff] %v4865_v31  ;;  %9339 = vmatprep.subr.bf16.mxu1 %v9338_v46  ;;  %9711 = vpow2.f32 %v4452_v33  ;;  %v10097_v33 = vld [vmem:[%s10335_s21 + $0x1c0] sm:$0xff] }
 0x397   : > { %v9694_v0 = vpop.eup %9693  ;;  %v4450_v48 = vmul.f32 1.442695, %v14410_v49  ;;  %v4633_v60 = vpop.xlane.xlu1 %4632  ;;  %v4879_v28 = vmul.f32 %v9692_v6, %v14411_v40  ;;  %v9342_v17 = vpack.c.bf16 %v10098_v53, %v10097_v33  ;;  %v14413_v6 = vsub.f32 %v14253_v3, %v12368_v43  ;;  %v14415_v43 = vld [vmem:[#allocation117_spill] sm:$0xff]  ;;  %v14416_v53 = vld [vmem:[#allocation119_spill] sm:$0xff] }
 0x398   : > { %v12777_v18 = vpop.eup %9695  ;;  %9713 = vrcp.f32 %v4633_v60  ;;  %4714 = vadd.xlane.f32.xlu0 %v12765_v11  ;;  %v12780_v22 = vpop.xlane.xlu0 %4136  ;;  %v4863_v52 = vmul.f32 %v9694_v0, %v14412_v29  ;;  %v10099_v60 = vld [vmem:[%s10335_s21 + $0x1d0] sm:$0xff]  ;;  %v10100_v0 = vld [vmem:[%s10335_s21 + $0x1d8] sm:$0xff] }
 0x399   : > { %v12785_v42 = vpop.eup %9697  ;;  %9715 = vpow2.f32 %v4468_v36  ;;  %v4466_v2 = vmul.f32 1.442695, %v14413_v6  ;;  %5114 = vst [vmem:[%s12536_s23 + $0xa0] sm:$0xff] %v4879_v28  ;;  %8620 = vmatprep.mubr.f32.mxu1 %v4879_v28  ;;  %9341 = vmatpush3.bf16.msra.mxu1 %v9338_v46  ;;  %v9346_v40 = vpack.c.bf16 %v10100_v0, %v10099_v60  ;;  %v14414_v36 = vsub.f32 %v14255_v39, %v12373_v21  ;;  %v14417_v39 = vld [vmem:[#allocation32_spill] sm:$0xff] }
 0x39a   : > { %v9700_v49 = vpop.eup %9699  ;;  %4704 = vadd.xlane.f32.xlu1 %v12777_v18  ;;  %5106 = vst [vmem:[%s12536_s23 + $0x60] sm:$0xff] %v4863_v52  ;;  %8576 = vmatprep.mubr.f32.mxu0 %v4863_v52  ;;  %9717 = vpow2.f32 %v4450_v48  ;;  %v14418_v21 = vsub.f32 %v14257_v63, %v14417_v39  ;;  %v14419_v60 = vld [vmem:[#allocation40_spill] sm:$0xff]  ;;  %v10102_v39 = vld [vmem:[%s10335_s21 + $0x1e8] sm:$0xff] }
 0x39b   : > { %v9702_v29 = vpop.eup %9701  ;;  %v4488_v33 = vmul.f32 1.442695, %v14414_v36  ;;  %8621 = vmatmul.mubr.f32.gmra.mrb[196].mxu1 %v4881_v12  ;;  %v4631_v3 = vpop.xlane.xlu1 %4630  ;;  %8577 = vmatmul.mubr.f32.gmra.mrb[204].mxu0 %v4865_v31  ;;  %v4885_v46 = vmul.f32 %v9700_v49, %v14415_v43  ;;  %v14420_v0 = vsub.f32 %v14259_v5, %v14419_v60  ;;  %v14421_v36 = vld [vmem:[#allocation122_spill] sm:$0xff]  ;;  %v14423_v5 = vsub.f32 %v14260_v8, %v12391_v25 }
 0x39c   : > { %v12799_v28 = vpop.eup %9703  ;;  %9719 = vrcp.f32 %v4631_v3  ;;  %4720 = vadd.xlane.f32.xlu0 %v12785_v42  ;;  %v12802_v52 = vpop.xlane.xlu0 %4134  ;;  %v4869_v6 = vmul.f32 %v9702_v29, %v14416_v53  ;;  %9343 = vmatprep.subr.bf16.mxu1 %v9342_v17  ;;  %v4472_v12 = vmul.f32 1.442695, %v14418_v21  ;;  %v14422_v3 = vld [vmem:[#allocation123_spill] sm:$0xff]  ;;  %v10101_v53 = vld [vmem:[%s10335_s21 + $0x1e0] sm:$0xff] }
 0x39d   : > { %v12805_v48 = vpop.eup %9705  ;;  %9721 = vpow2.f32 %v4466_v2  ;;  %5117 = vst [vmem:[%s12536_s23 + $0xb8] sm:$0xff] %v4885_v46  ;;  %9345 = vmatpush3.bf16.msra.mxu1 %v9342_v17  ;;  %v4486_v2 = vmul.f32 1.442695, %v14420_v0  ;;  %v10103_v0 = vld [vmem:[%s10335_s21 + $0x1f0] sm:$0xff] }
 0x39e   : > { %v9708_v31 = vpop.eup %9707  ;;  %4702 = vadd.xlane.f32.xlu1 %v12799_v28  ;;  %5109 = vst [vmem:[%s12536_s23 + $0x78] sm:$0xff] %v4869_v6  ;;  %9347 = vmatprep.subr.bf16.mxu1 %v9346_v40  ;;  %9723 = vpow2.f32 %v4488_v33  ;;  %v9350_v33 = vpack.c.bf16 %v10102_v39, %v10101_v53 }
 0x39f   : > { %v9710_v49 = vpop.eup %9709  ;;  %v4637_v29 = vpop.xlane.xlu1 %4636  ;;  %v4883_v63 = vmul.f32 %v9708_v31, %v14421_v36  ;;  %v4470_v31 = vmul.f32 1.442695, %v14423_v5 }
 0x3a0   : > { %9725 = vrcp.f32 %v4637_v29  ;;  %4718 = vadd.xlane.f32.xlu0 %v12805_v48  ;;  %v12818_v17 = vpop.xlane.xlu0 %4140  ;;  %v4867_v43 = vmul.f32 %v9710_v49, %v14422_v3  ;;  %v12823_v21 = vpop.eup %9711  ;;  %v10104_v49 = vld [vmem:[%s10335_s21 + $0x1f8] sm:$0xff] }
 0x3a1   : > { %9727 = vpow2.f32 %v4472_v12  ;;  %5116 = vst [vmem:[%s12536_s23 + $0xb0] sm:$0xff] %v4883_v63  ;;  %8623 = vmatprep.mubr.f32.mxu1 %v4883_v63  ;;  %9349 = vmatpush3.bf16.msra.mxu1 %v9346_v40  ;;  %v9354_v29 = vpack.c.bf16 %v10104_v49, %v10103_v0  ;;  %v14424_v12 = vld [vmem:[#allocation49_spill] sm:$0xff] }
 0x3a2   : > { %v9714_v60 = vpop.eup %9713  ;;  %4708 = vadd.xlane.f32.xlu1 %v12823_v21  ;;  %5108 = vst [vmem:[%s12536_s23 + $0x70] sm:$0xff] %v4867_v43  ;;  %8579 = vmatprep.mubr.f32.mxu0 %v4867_v43  ;;  %9729 = vpow2.f32 %v4486_v2  ;;  %v14425_v3 = vsub.f32 %v14263_v10, %v14424_v12  ;;  %v14426_v40 = vld [vmem:[#allocation125_spill] sm:$0xff]  ;;  %v14427_v2 = vsub.f32 %v14264_v4, %v12404_v30  ;;  %v14431_v12 = vld [vmem:[#allocation50_spill] sm:$0xff] }
 0x3a3   : > { %v12833_v36 = vpop.eup %9715  ;;  %8624 = vmatmul.mubr.f32.gmra.mrb[198].mxu1 %v4885_v46  ;;  %v4635_v8 = vpop.xlane.xlu1 %4634  ;;  %8580 = vmatmul.mubr.f32.gmra.mrb[206].mxu0 %v4869_v6  ;;  %v4889_v63 = vmul.f32 %v9714_v60, %v14426_v40  ;;  %v14428_v6 = vsub.f32 %v14266_v50, %v12409_v23  ;;  %v14433_v40 = vld [vmem:[#allocation127_spill] sm:$0xff] }
 0x3a4   : > { %v4492_v25 = vmul.f32 1.442695, %v14425_v3  ;;  %9731 = vrcp.f32 %v4635_v8  ;;  %4724 = vadd.xlane.f32.xlu0 %v12833_v36  ;;  %v12840_v43 = vpop.xlane.xlu0 %4138  ;;  %9351 = vmatprep.subr.bf16.mxu1 %v9350_v33  ;;  %v12842_v53 = vpop.eup %9717  ;;  %v4476_v39 = vmul.f32 1.442695, %v14427_v2  ;;  %v14432_v3 = vsub.f32 %v14271_v32, %v14431_v12 }
 0x3a5   : > { %9733 = vpow2.f32 %v4470_v31  ;;  %5119 = vst [vmem:[%s12536_s23 + $0xc8] sm:$0xff] %v4889_v63  ;;  %9353 = vmatpush3.bf16.msra.mxu1 %v9350_v33  ;;  %v4490_v5 = vmul.f32 1.442695, %v14428_v6  ;;  %v14429_v31 = vld [vmem:[#allocation126_spill] sm:$0xff]  ;;  %v14430_v33 = vsub.f32 %v14267_v7, %v12417_v13  ;;  %v10105_v13 = vld [vmem:[%s10335_s21 + $0x280] sm:$0xff] }
 0x3a6   : > { %v9720_v10 = vpop.eup %9719  ;;  %4706 = vadd.xlane.f32.xlu1 %v12842_v53  ;;  %9355 = vmatprep.subr.bf16.mxu1 %v9354_v29  ;;  %9735 = vpow2.f32 %v4492_v25  ;;  %v4496_v25 = vmul.f32 1.442695, %v14432_v3  ;;  %v10106_v7 = vld [vmem:[%s10335_s21 + $0x288] sm:$0xff] }
 0x3a7   : > { %v12849_v46 = vpop.eup %9721  ;;  %v4641_v60 = vpop.xlane.xlu1 %4640  ;;  %v4887_v0 = vmul.f32 %v9720_v10, %v14429_v31  ;;  %v4474_v49 = vmul.f32 1.442695, %v14430_v33  ;;  %v14434_v10 = vld [vmem:[#allocation45_spill] sm:$0xff]  ;;  %v14435_v6 = vld [vmem:[#allocation42_spill] sm:$0xff] }
 0x3a8   : > { %9737 = vrcp.f32 %v4641_v60  ;;  %4722 = vadd.xlane.f32.xlu0 %v12849_v46  ;;  %v12856_v30 = vpop.xlane.xlu0 %4144  ;;  %v12858_v4 = vpop.eup %9723 }
 0x3a9   : > { %9739 = vpow2.f32 %v4476_v39  ;;  %5118 = vst [vmem:[%s12536_s23 + $0xc0] sm:$0xff] %v4887_v0  ;;  %8626 = vmatprep.mubr.f32.mxu1 %v4887_v0  ;;  %9357 = vmatpush3.bf16.msra.mxu1 %v9354_v29  ;;  %v12873_v39 = vpack.c.bf16 %v10106_v7, %v10105_v13  ;;  %v14437_v0 = vsub.f32 %v14275_v61, %v12437_v20 }
 0x3aa   : > { %v9726_v23 = vpop.eup %9725  ;;  %4744 = vadd.xlane.f32.xlu1 %v12858_v4  ;;  %8627 = vmatmul.mubr.f32.gmra.mrb[200].mxu1 %v4889_v63  ;;  %9741 = vpow2.f32 %v4490_v5  ;;  %v14436_v5 = vsub.f32 %v14434_v10, %v14435_v6  ;;  %v14441_v6 = vld [vmem:[#allocation128_spill] sm:$0xff] }
 0x3ab   : > { %v12865_v50 = vpop.eup %9727  ;;  %v4639_v8 = vpop.xlane.xlu1 %4638  ;;  %v4893_v2 = vmul.f32 %v9726_v23, %v14433_v40  ;;  %9391 = vmatprep.subr.bf16.mxu1 %v12873_v39  ;;  %v4494_v33 = vmul.f32 1.442695, %v14437_v0  ;;  %v14439_v40 = vsub.f32 %v14276_v38, %v12445_v16 }
 0x3ac   : > { %9743 = vrcp.f32 %v4639_v8  ;;  %4728 = vadd.xlane.f32.xlu0 %v12865_v50  ;;  %v12876_v29 = vpop.xlane.xlu0 %4142  ;;  %v12878_v63 = vpop.eup %9729  ;;  %v4480_v32 = vmul.f32 1.442695, %v14436_v5 }
 0x3ad   : > { %9745 = vpow2.f32 %v4474_v49  ;;  %5121 = vst [vmem:[%s12536_s23 + $0xd8] sm:$0xff] %v4893_v2  ;;  %v14438_v49 = vld [vmem:[#allocation10_spill] sm:$0xff]  ;;  %v4478_v13 = vmul.f32 1.442695, %v14439_v40  ;;  %v14446_v40 = vld [vmem:[#allocation53_spill] sm:$0xff] }
 0x3ae   : > { %v9732_v60 = vpop.eup %9731  ;;  %4742 = vadd.xlane.f32.xlu1 %v12878_v63  ;;  %9747 = vpow2.f32 %v4496_v25  ;;  %v14440_v25 = vsub.f32 %v14279_v54, %v12456_v1  ;;  %v14443_v54 = vsub.f32 %v14283_v9, %v12472_v44 }
 0x3af   : > { %v12886_v31 = vpop.eup %9733  ;;  %v4645_v23 = vpop.xlane.xlu1 %4644  ;;  %v4891_v12 = vmul.f32 %v9732_v60, %v14438_v49 }
 0x3b0   : > { %9749 = vrcp.f32 %v4645_v23  ;;  %4726 = vadd.xlane.f32.xlu0 %v12886_v31  ;;  %v12893_v3 = vpop.xlane.xlu0 %4148  ;;  %v12895_v8 = vpop.eup %9735  ;;  %v4500_v7 = vmul.f32 1.442695, %v14440_v25  ;;  %v4498_v0 = vmul.f32 1.442695, %v14443_v54  ;;  %v14444_v23 = vld [vmem:[#allocation131_spill] sm:$0xff]  ;;  %v14448_v25 = vld [vmem:[#allocation66_spill] sm:$0xff] }
 0x3b1   : > { %9751 = vpow2.f32 %v4480_v32  ;;  %5120 = vst [vmem:[%s12536_s23 + $0xd0] sm:$0xff] %v4891_v12  ;;  %8629 = vmatprep.mubr.f32.mxu1 %v4891_v12  ;;  %v14445_v12 = vld [vmem:[#allocation48_spill] sm:$0xff] }
 0x3b2   : > { %v9738_v20 = vpop.eup %9737  ;;  %4748 = vadd.xlane.f32.xlu1 %v12895_v8  ;;  %8630 = vmatmul.mubr.f32.gmra.mrb[202].mxu1 %v4893_v2  ;;  %9753 = vpow2.f32 %v4494_v33  ;;  %v14442_v2 = vsub.f32 %v14280_v59, %v12465_v15  ;;  %v14453_v54 = vld [vmem:[#allocation132_spill] sm:$0xff] }
 0x3b3   : > { %v12902_v61 = vpop.eup %9739  ;;  %v4643_v10 = vpop.xlane.xlu1 %4642  ;;  %v4897_v5 = vmul.f32 %v9738_v20, %v14441_v6  ;;  %v14451_v6 = vld [vmem:[#allocation44_spill] sm:$0xff] }
 0x3b4   : > { %9755 = vrcp.f32 %v4643_v10  ;;  %4732 = vadd.xlane.f32.xlu0 %v12902_v61  ;;  %v12909_v38 = vpop.xlane.xlu0 %4146  ;;  %v12911_v16 = vpop.eup %9741  ;;  %v4484_v32 = vmul.f32 1.442695, %v14442_v2  ;;  %v14450_v10 = vld [vmem:[#allocation57_spill] sm:$0xff] }
 0x3b5   : > { %9757 = vpow2.f32 %v4478_v13  ;;  %5123 = vst [vmem:[%s12536_s23 + $0xe8] sm:$0xff] %v4897_v5  ;;  %v14447_v13 = vsub.f32 %v14445_v12, %v14446_v40  ;;  %v14452_v2 = vsub.f32 %v14450_v10, %v14451_v6 }
 0x3b6   : > { %v9744_v60 = vpop.eup %9743  ;;  %4746 = vadd.xlane.f32.xlu1 %v12911_v16  ;;  %9759 = vpow2.f32 %v4500_v7  ;;  %v4295_v7 = vsub.f32 %v14448_v25, %v12780_v22  ;;  %v14456_v25 = vld [vmem:[#allocation58_spill] sm:$0xff] }
 0x3b7   : > { %v12918_v1 = vpop.eup %9745  ;;  %v12923_v33 = vpop.xlane.xlu1 %4168  ;;  %v4895_v49 = vmul.f32 %v9744_v60, %v14444_v23  ;;  %9761 = vpow2.f32 %v4484_v32  ;;  %v4482_v20 = vmul.f32 1.442695, %v14447_v13  ;;  %v4504_v32 = vmul.f32 1.442695, %v14452_v2 }
 0x3b8   : > { %4730 = vadd.xlane.f32.xlu0 %v12918_v1  ;;  %v12927_v15 = vpop.xlane.xlu0 %4152  ;;  %v12929_v59 = vpop.eup %9747  ;;  %9763 = vpow2.f32 %v4498_v0  ;;  %v4520_v12 = vmul.f32 1.442695, %v4295_v7 }
 0x3b9   : > { %5122 = vst [vmem:[%s12536_s23 + $0xe0] sm:$0xff] %v4895_v49  ;;  %8632 = vmatprep.mubr.f32.mxu1 %v4895_v49  ;;  %9765 = vpow2.f32 %v4482_v20 }
 0x3ba   : > { %v9750_v44 = vpop.eup %9749  ;;  %4752 = vadd.xlane.f32.xlu1 %v12929_v59  ;;  %8633 = vmatmul.mubr.f32.gmra.mrb[204].mxu1 %v4897_v5  ;;  %v14455_v5 = vld [vmem:[#allocation67_spill] sm:$0xff]  ;;  %9767 = vpow2.f32 %v4504_v32 }
 0x3bb   : > { %v12938_v9 = vpop.eup %9751  ;;  %v12943_v60 = vpop.xlane.xlu1 %4166  ;;  %v4901_v23 = vmul.f32 %v9750_v44, %v14453_v54  ;;  %v4294_v0 = vsub.f32 %v14455_v5, %v12802_v52  ;;  %v14457_v44 = vld [vmem:[#allocation46_spill] sm:$0xff]  ;;  %9769 = vpow2.f32 %v4520_v12 }
 0x3bc   : > { %14449 = vst [vmem:[#allocation62_spill] sm:$0xff] %v12938_v9  ;;  %4736 = vadd.xlane.f32.xlu0 %v12938_v9  ;;  %v12947_v22 = vpop.xlane.xlu0 %4150  ;;  %v12949_v49 = vpop.eup %9753  ;;  %v14458_v10 = vsub.f32 %v14456_v25, %v14457_v44  ;;  %v14459_v54 = vld [vmem:[#allocation134_spill] sm:$0xff]  ;;  %v14464_v25 = vld [vmem:[#allocation47_spill] sm:$0xff] }
 0x3bd   : > { %14454 = vst [vmem:[#allocation71_spill] sm:$0xff] %v12949_v49  ;;  %5125 = vst [vmem:[%s12536_s23 + $0xf8] sm:$0xff] %v4901_v23  ;;  %v4518_v5 = vmul.f32 1.442695, %v4294_v0 }
 0x3be   : > { %v9756_v40 = vpop.eup %9755  ;;  %4750 = vadd.xlane.f32.xlu1 %v12949_v49  ;;  %v4502_v6 = vmul.f32 1.442695, %v14458_v10  ;;  %v14461_v49 = vld [vmem:[#allocation69_spill] sm:$0xff] }
 0x3bf   : > { %v12955_v13 = vpop.eup %9757  ;;  %v12960_v2 = vpop.xlane.xlu1 %4172  ;;  %v4899_v20 = vmul.f32 %v9756_v40, %v14459_v54  ;;  %v4297_v9 = vsub.f32 %v14461_v49, %v12818_v17  ;;  %v14463_v40 = vld [vmem:[#allocation59_spill] sm:$0xff]  ;;  %v14466_v49 = vld [vmem:[#allocation70_spill] sm:$0xff] }
 0x3c0   : > { %4734 = vadd.xlane.f32.xlu0 %v12955_v13  ;;  %v12964_v7 = vpop.xlane.xlu0 %4156  ;;  %v12966_v52 = vpop.eup %9759  ;;  %9771 = vpow2.f32 %v4502_v6  ;;  %v14465_v44 = vsub.f32 %v14463_v40, %v14464_v25  ;;  %v14469_v40 = vld [vmem:[#allocation105_spill] sm:$0xff] }
 0x3c1   : > { %14460 = vst [vmem:[#allocation22_spill] sm:$0xff] %v12966_v52  ;;  %5124 = vst [vmem:[%s12536_s23 + $0xf0] sm:$0xff] %v4899_v20  ;;  %8635 = vmatprep.mubr.f32.mxu1 %v4899_v20  ;;  %v12972_v32 = vpop.eup %9761  ;;  %9773 = vpow2.f32 %v4518_v5  ;;  %v4524_v17 = vmul.f32 1.442695, %v4297_v9  ;;  %v14468_v20 = vld [vmem:[#allocation60_spill] sm:$0xff] }
 0x3c2   : > { %4756 = vadd.xlane.f32.xlu1 %v12966_v52  ;;  %8636 = vmatmul.mubr.f32.gmra.mrb[206].mxu1 %v4901_v23  ;;  %14462 = vst [vmem:[#allocation14_spill] sm:$0xff] %v12972_v32  ;;  %v4508_v10 = vmul.f32 1.442695, %v14465_v44  ;;  %v12982_v0 = vpop.eup %9763  ;;  %v4296_v23 = vsub.f32 %v14466_v49, %v12840_v43  ;;  %v14470_v25 = vsub.f32 %v14468_v20, %v14469_v40  ;;  %v14472_v43 = vld [vmem:[#allocation72_spill] sm:$0xff] }
 0x3c3   : > { %v12977_v54 = vpop.xlane.xlu1 %4170  ;;  %v12987_v6 = vpop.eup %9765  ;;  %v4299_v49 = vsub.f32 %v14472_v43, %v12856_v30  ;;  %v14474_v20 = vsub.f32 %v14323_v14, %v12552_v24  ;;  %v14476_v30 = vld [vmem:[#allocation73_spill] sm:$0xff]  ;;  %v14478_v14 = vld [vmem:[#allocation111_spill] sm:$0xff] }
 0x3c4   : > { %4740 = vadd.xlane.f32.xlu0 %v12972_v32  ;;  %v12980_v12 = vpop.xlane.xlu0 %4154  ;;  %14467 = vst [vmem:[#allocation8_spill] sm:$0xff] %v12987_v6  ;;  %9775 = vpow2.f32 %v4508_v10  ;;  %v4506_v44 = vmul.f32 1.442695, %v14470_v25  ;;  %v12997_v5 = vpop.eup %9767  ;;  %v4522_v9 = vmul.f32 1.442695, %v4296_v23  ;;  %v4298_v43 = vsub.f32 %v14476_v30, %v12876_v29  ;;  %v14480_v29 = vld [vmem:[#allocation75_spill] sm:$0xff] }
 0x3c5   : > { %14471 = vst [vmem:[#allocation23_spill] sm:$0xff] %v12997_v5  ;;  %9777 = vpow2.f32 %v4524_v17  ;;  %v13002_v10 = vpop.eup %9769  ;;  %v4512_v40 = vmul.f32 1.442695, %v14474_v20  ;;  %v4528_v23 = vmul.f32 1.442695, %v4299_v49  ;;  %v14479_v24 = vsub.f32 %v14332_v56, %v14478_v14 }
 0x3c6   : > { %4754 = vadd.xlane.f32.xlu1 %v12982_v0  ;;  %14473 = vst [vmem:[#allocation15_spill] sm:$0xff] %v13002_v10  ;;  %9779 = vpow2.f32 %v4506_v44  ;;  %v4526_v49 = vmul.f32 1.442695, %v4298_v43  ;;  %v4301_v30 = vsub.f32 %v14480_v29, %v12893_v3  ;;  %v14482_v56 = vsub.f32 %v14344_v45, %v12596_v37  ;;  %v14483_v3 = vld [vmem:[#allocation76_spill] sm:$0xff]  ;;  %v14486_v29 = vld [vmem:[#allocation90_spill] sm:$0xff] }
 0x3c7   : > { %v12992_v52 = vpop.xlane.xlu1 %4176  ;;  %9781 = vpow2.f32 %v4522_v9  ;;  %v4510_v20 = vmul.f32 1.442695, %v14479_v24  ;;  %v4300_v43 = vsub.f32 %v14483_v3, %v12909_v38  ;;  %v14485_v37 = vsub.f32 %v14360_v26, %v12633_v47 }
 0x3c8   : > { %4738 = vadd.xlane.f32.xlu0 %v12987_v6  ;;  %v12995_v32 = vpop.xlane.xlu0 %4160  ;;  %9783 = vpow2.f32 %v4512_v40  ;;  %v4516_v14 = vmul.f32 1.442695, %v14482_v56  ;;  %v4311_v56 = vsub.f32 %v14486_v29, %v12923_v33  ;;  %v14489_v33 = vld [vmem:[#allocation92_spill] sm:$0xff]  ;;  %v14490_v29 = vld [vmem:[#allocation79_spill] sm:$0xff] }
 0x3c9   : > { %9785 = vpow2.f32 %v4528_v23  ;;  %v4532_v23 = vmul.f32 1.442695, %v4301_v30  ;;  %v4514_v45 = vmul.f32 1.442695, %v14485_v37  ;;  %v4310_v3 = vsub.f32 %v14489_v33, %v12943_v60  ;;  %v14493_v60 = vld [vmem:[#allocation94_spill] sm:$0xff] }
 0x3ca   : > { %4760 = vadd.xlane.f32.xlu1 %v12997_v5  ;;  %v13012_v17 = vpop.eup %9771  ;;  %9787 = vpow2.f32 %v4510_v20  ;;  %v4552_v26 = vmul.f32 1.442695, %v4311_v56  ;;  %v4313_v56 = vsub.f32 %v14493_v60, %v12960_v2 }
 0x3cb   : > { %v13007_v25 = vpop.xlane.xlu1 %4174  ;;  %14475 = vst [vmem:[#allocation63_spill] sm:$0xff] %v13012_v17  ;;  %v13017_v44 = vpop.eup %9773  ;;  %9789 = vpow2.f32 %v4526_v49  ;;  %v14487_v49 = vld [vmem:[#allocation78_spill] sm:$0xff] }
 0x3cc   : > { %4776 = vadd.xlane.f32.xlu0 %v13002_v10  ;;  %v13010_v6 = vpop.xlane.xlu0 %4158  ;;  %14477 = vst [vmem:[#allocation74_spill] sm:$0xff] %v13017_v44  ;;  %v4303_v30 = vsub.f32 %v14487_v49, %v12927_v15  ;;  %v4302_v49 = vsub.f32 %v14490_v29, %v12947_v22  ;;  %v14494_v29 = vld [vmem:[#allocation81_spill] sm:$0xff] }
 0x3ce   : > { %4758 = vadd.xlane.f32.xlu1 %v13012_v17  ;;  %v13027_v9 = vpop.eup %9775  ;;  %v4536_v15 = vmul.f32 1.442695, %v4303_v30  ;;  %v4534_v33 = vmul.f32 1.442695, %v4302_v49 }
 0x3cf   : > { %v13022_v5 = vpop.xlane.xlu1 %4180  ;;  %v13032_v40 = vpop.eup %9777 }
 0x3d0   : > { %4774 = vadd.xlane.f32.xlu0 %v13017_v44  ;;  %v13025_v10 = vpop.xlane.xlu0 %4164  ;;  %14481 = vst [vmem:[#allocation9_spill] sm:$0xff] %v13032_v40  ;;  %v13040_v17 = vpop.eup %9779 }
 0x3d1   : > { %v13045_v20 = vpop.eup %9781 }
 0x3d2   : > { %4764 = vadd.xlane.f32.xlu1 %v13027_v9  ;;  %14484 = vst [vmem:[#allocation77_spill] sm:$0xff] %v13045_v20 }
 0x3d3   : > { %v13037_v24 = vpop.xlane.xlu1 %4178 }
 0x3d4   : > { %4780 = vadd.xlane.f32.xlu0 %v13032_v40  ;;  %v4649_v44 = vpop.xlane.xlu0 %4648 }
 0x3d5   : > { %9791 = vrcp.f32 %v4649_v44  ;;  %v13059_v44 = vpop.eup %9783 }
 0x3d6   : > { %4762 = vadd.xlane.f32.xlu1 %v13040_v17  ;;  %9793 = vpow2.f32 %v4516_v14  ;;  %v4530_v14 = vmul.f32 1.442695, %v4300_v43  ;;  %v13062_v47 = vpop.eup %9785 }
 0x3d7   : > { %v13052_v40 = vpop.xlane.xlu1 %4184  ;;  %9795 = vpow2.f32 %v4532_v23  ;;  %14488 = vst [vmem:[#allocation16_spill] sm:$0xff] %v13062_v47  ;;  %v13071_v23 = vpop.eup %9787 }
 0x3d8   : > { %4778 = vadd.xlane.f32.xlu0 %v13045_v20  ;;  %v13057_v38 = vpop.xlane.xlu0 %4162  ;;  %9797 = vpow2.f32 %v4514_v45  ;;  %14491 = vst [vmem:[#allocation25_spill] sm:$0xff] %v13071_v23  ;;  %v13074_v43 = vpop.eup %9789  ;;  %v4550_v45 = vmul.f32 1.442695, %v4310_v3  ;;  %v4556_v3 = vmul.f32 1.442695, %v4313_v56  ;;  %v14502_v56 = vld [vmem:[#allocation98_spill] sm:$0xff] }
 0x3d9   : > { %9799 = vpow2.f32 %v4530_v14  ;;  %14492 = vst [vmem:[#allocation24_spill] sm:$0xff] %v13074_v43 }
 0x3da   : > { %4768 = vadd.xlane.f32.xlu1 %v13059_v44 }
 0x3db   : > { %v13066_v37 = vpop.xlane.xlu1 %4182 }
 0x3dc   : > { %4784 = vadd.xlane.f32.xlu0 %v13062_v47  ;;  %v4647_v20 = vpop.xlane.xlu0 %4646  ;;  %v4305_v47 = vsub.f32 %v14494_v29, %v12964_v7  ;;  %v14499_v29 = vld [vmem:[#allocation82_spill] sm:$0xff] }
 0x3dd   : > { %9801 = vrcp.f32 %v4647_v20 }
 0x3de   : > { %4766 = vadd.xlane.f32.xlu1 %v13071_v23  ;;  %9803 = vpow2.f32 %v4552_v26  ;;  %v14496_v23 = vld [vmem:[#allocation41_spill] sm:$0xff]  ;;  %v4540_v7 = vmul.f32 1.442695, %v4305_v47  ;;  %v4315_v47 = vsub.f32 %v14502_v56, %v12992_v52  ;;  %v10107_v52 = vld [vmem:[%s10335_s21 + $0x210] sm:$0xff]  ;;  %v10108_v56 = vld [vmem:[%s10335_s21 + $0x218] sm:$0xff] }
 0x3df   : > { %v13078_v30 = vpop.xlane.xlu1 %4188  ;;  %v9792_v22 = vpop.eup %9791  ;;  %9805 = vpow2.f32 %v4536_v15  ;;  %v14498_v15 = vld [vmem:[#allocation96_spill] sm:$0xff] }
 0x3e0   : > { %4782 = vadd.xlane.f32.xlu0 %v13074_v43  ;;  %v4653_v20 = vpop.xlane.xlu0 %4652  ;;  %v13083_v14 = vpop.eup %9793  ;;  %v4905_v26 = vmul.f32 %v9792_v22, %v14496_v23  ;;  %v4312_v49 = vsub.f32 %v14498_v15, %v12977_v54  ;;  %v4304_v43 = vsub.f32 %v14499_v29, %v12980_v12  ;;  %v14503_v15 = vld [vmem:[#allocation84_spill] sm:$0xff] }
 0x3e1   : > { %14495 = vst [vmem:[#allocation65_spill] sm:$0xff] %v13083_v14  ;;  %9807 = vrcp.f32 %v4653_v20  ;;  %v13087_v2 = vpop.eup %9795  ;;  %v4307_v29 = vsub.f32 %v14503_v15, %v12995_v32  ;;  %v14506_v32 = vld [vmem:[#allocation100_spill] sm:$0xff] }
 0x3e2   : > { %4772 = vadd.xlane.f32.xlu1 %v13083_v14  ;;  %14497 = vst [vmem:[#allocation80_spill] sm:$0xff] %v13087_v2  ;;  %9809 = vpow2.f32 %v4550_v45  ;;  %5127 = vst [vmem:[%s12536_s23 + $0x108] sm:$0xff] %v4905_v26  ;;  %v13097_v22 = vpop.eup %9797  ;;  %v4554_v54 = vmul.f32 1.442695, %v4312_v49  ;;  %v4538_v20 = vmul.f32 1.442695, %v4304_v43  ;;  %v4314_v15 = vsub.f32 %v14506_v32, %v13007_v25 }
 0x3e3   : > { %v13092_v60 = vpop.xlane.xlu1 %4186  ;;  %9811 = vpow2.f32 %v4534_v33  ;;  %14500 = vst [vmem:[#allocation33_spill] sm:$0xff] %v13097_v22  ;;  %v13100_v45 = vpop.eup %9799  ;;  %v4560_v14 = vmul.f32 1.442695, %v4315_v47  ;;  %v14508_v47 = vld [vmem:[#allocation43_spill] sm:$0xff]  ;;  %v10110_v32 = vld [vmem:[%s10335_s21 + $0x228] sm:$0xff] }
 0x3e4   : > { %4788 = vadd.xlane.f32.xlu0 %v13087_v2  ;;  %v4651_v23 = vpop.xlane.xlu0 %4650  ;;  %14501 = vst [vmem:[#allocation17_spill] sm:$0xff] %v13100_v45 }
 0x3e5   : > { %9813 = vrcp.f32 %v4651_v23 }
 0x3e6   : > { %4770 = vadd.xlane.f32.xlu1 %v13097_v22  ;;  %9815 = vpow2.f32 %v4556_v3  ;;  %v14504_v3 = vld [vmem:[#allocation51_spill] sm:$0xff] }
 0x3e7   : > { %v13104_v33 = vpop.xlane.xlu1 %4192  ;;  %v9802_v12 = vpop.eup %9801  ;;  %9817 = vpow2.f32 %v4540_v7  ;;  %v9362_v7 = vpack.c.bf16 %v10108_v56, %v10107_v52 }
 0x3e8   : > { %4786 = vadd.xlane.f32.xlu0 %v13100_v45  ;;  %v4657_v23 = vpop.xlane.xlu0 %4656  ;;  %v13109_v22 = vpop.eup %9803  ;;  %v4903_v49 = vmul.f32 %v9802_v12, %v14504_v3  ;;  %v4544_v12 = vmul.f32 1.442695, %v4307_v29 }
 0x3e9   : > { %9819 = vrcp.f32 %v4657_v23  ;;  %v13112_v2 = vpop.eup %9805  ;;  %v14507_v23 = vld [vmem:[#allocation85_spill] sm:$0xff] }
 0x3ea   : > { %14505 = vst [vmem:[#allocation83_spill] sm:$0xff] %v13112_v2  ;;  %4808 = vadd.xlane.f32.xlu1 %v13109_v22  ;;  %9821 = vpow2.f32 %v4554_v54  ;;  %5126 = vst [vmem:[%s12536_s23 + $0x100] sm:$0xff] %v4903_v49  ;;  %8670 = vmatprep.mubr.f32.mxu0 %v4903_v49  ;;  %v4306_v3 = vsub.f32 %v14507_v23, %v13010_v6 }
 0x3eb   : > { %v9808_v43 = vpop.eup %9807  ;;  %v13120_v45 = vpop.xlane.xlu1 %4190  ;;  %9823 = vpow2.f32 %v4538_v20  ;;  %8671 = vmatmul.mubr.f32.vlgmr.msra.gmra.mrb[208].mxu0 %v4905_v26  ;;  %v4558_v20 = vmul.f32 1.442695, %v4314_v15  ;;  %v14510_v26 = vld [vmem:[#allocation102_spill] sm:$0xff]  ;;  %v14512_v15 = vld [vmem:[#allocation52_spill] sm:$0xff] }
 0x3ec   : > { %4792 = vadd.xlane.f32.xlu0 %v13112_v2  ;;  %v4655_v54 = vpop.xlane.xlu0 %4654  ;;  %v4909_v52 = vmul.f32 %v9808_v43, %v14508_v47  ;;  %v13126_v56 = vpop.eup %9809  ;;  %9361 = vmatpush3.bf16.msra.mxu0 %v12728_v35  ;;  %v4317_v29 = vsub.f32 %v14510_v26, %v13022_v5  ;;  %v10109_v43 = vld [vmem:[%s10335_s21 + $0x220] sm:$0xff]  ;;  %v4542_v23 = vmul.f32 1.442695, %v4306_v3  ;;  %v10112_v3 = vld [vmem:[%s10335_s21 + $0x238] sm:$0xff] }
 0x3ed   : > { %14509 = vst [vmem:[#allocation26_spill] sm:$0xff] %v13126_v56  ;;  %9825 = vrcp.f32 %v4655_v54  ;;  %v13129_v25 = vpop.eup %9811  ;;  %9363 = vmatprep.subr.bf16.mxu0 %v9362_v7  ;;  %v9366_v35 = vpack.c.bf16 %v10110_v32, %v10109_v43  ;;  %v14511_v54 = vld [vmem:[#allocation89_spill] sm:$0xff]  ;;  %v14513_v32 = vld [vmem:[#allocation104_spill] sm:$0xff] }
 0x3ee   : > { %4806 = vadd.xlane.f32.xlu1 %v13126_v56  ;;  %5129 = vst [vmem:[%s12536_s23 + $0x118] sm:$0xff] %v4909_v52  ;;  %9827 = vpow2.f32 %v4560_v14  ;;  %v4308_v47 = vsub.f32 %v14511_v54, %v13057_v38  ;;  %v4564_v38 = vmul.f32 1.442695, %v4317_v29  ;;  %v4316_v54 = vsub.f32 %v14513_v32, %v13037_v24 }
 0x3ef   : > { %v9814_v6 = vpop.eup %9813  ;;  %v13135_v49 = vpop.xlane.xlu1 %4196  ;;  %9829 = vpow2.f32 %v4544_v12  ;;  %v10111_v12 = vld [vmem:[%s10335_s21 + $0x230] sm:$0xff] }
 0x3f0   : > { %4790 = vadd.xlane.f32.xlu0 %v13129_v25  ;;  %v4661_v14 = vpop.xlane.xlu0 %4660  ;;  %v4907_v56 = vmul.f32 %v9814_v6, %v14512_v15  ;;  %v13143_v2 = vpop.eup %9815  ;;  %9365 = vmatpush3.bf16.msra.mxu0 %v9362_v7  ;;  %v9370_v26 = vpack.c.bf16 %v10112_v3, %v10111_v12  ;;  %v14514_v7 = vld [vmem:[#allocation88_spill] sm:$0xff]  ;;  %v4546_v15 = vmul.f32 1.442695, %v4308_v47  ;;  %v14515_v12 = vld [vmem:[#allocation54_spill] sm:$0xff] }
 0x3f1   : > { %9831 = vrcp.f32 %v4661_v14  ;;  %v13145_v5 = vpop.eup %9817  ;;  %9367 = vmatprep.subr.bf16.mxu0 %v9366_v35  ;;  %v4309_v14 = vsub.f32 %v14514_v7, %v13025_v10 }
 0x3f2   : > { %4812 = vadd.xlane.f32.xlu1 %v13143_v2  ;;  %5128 = vst [vmem:[%s12536_s23 + $0x110] sm:$0xff] %v4907_v56  ;;  %8673 = vmatprep.mubr.f32.mxu0 %v4907_v56  ;;  %9833 = vpow2.f32 %v4558_v20 }
 0x3f3   : > { %v9820_v43 = vpop.eup %9819  ;;  %v4681_v6 = vpop.xlane.xlu1 %4680  ;;  %8674 = vmatmul.mubr.f32.gmra.mrb[210].mxu0 %v4909_v52  ;;  %9835 = vpow2.f32 %v4542_v23  ;;  %v4562_v52 = vmul.f32 1.442695, %v4316_v54  ;;  %v14516_v23 = vld [vmem:[#allocation107_spill] sm:$0xff] }
 0x3f4   : > { %4796 = vadd.xlane.f32.xlu0 %v13145_v5  ;;  %v4659_v56 = vpop.xlane.xlu0 %4658  ;;  %v4913_v20 = vmul.f32 %v9820_v43, %v14515_v12  ;;  %v13157_v29 = vpop.eup %9821  ;;  %9837 = vrcp.f32 %v4681_v6  ;;  %9369 = vmatpush3.bf16.msra.mxu0 %v9366_v35  ;;  %v4319_v47 = vsub.f32 %v14516_v23, %v13052_v40  ;;  %v10113_v43 = vld [vmem:[%s10335_s21 + $0x240] sm:$0xff]  ;;  %v10114_v35 = vld [vmem:[%s10335_s21 + $0x248] sm:$0xff]  ;;  %v4548_v6 = vmul.f32 1.442695, %v4309_v14  ;;  %v10115_v40 = vld [vmem:[%s10335_s21 + $0x250] sm:$0xff] }
 0x3f5   : > { %v13159_v24 = vpop.eup %9823  ;;  %9839 = vrcp.f32 %v4659_v56  ;;  %9371 = vmatprep.subr.bf16.mxu0 %v9370_v26  ;;  %v9374_v32 = vpack.c.bf16 %v10114_v35, %v10113_v43  ;;  %v14517_v56 = vld [vmem:[#allocation55_spill] sm:$0xff]  ;;  %v10116_v23 = vld [vmem:[%s10335_s21 + $0x258] sm:$0xff]  ;;  %v14519_v35 = vld [vmem:[#allocation109_spill] sm:$0xff] }
 0x3f6   : > { %4810 = vadd.xlane.f32.xlu1 %v13157_v29  ;;  %5131 = vst [vmem:[%s12536_s23 + $0x128] sm:$0xff] %v4913_v20  ;;  %9841 = vpow2.f32 %v4564_v38  ;;  %v9378_v43 = vpack.c.bf16 %v10116_v23, %v10115_v40  ;;  %v14523_v23 = vld [vmem:[#allocation113_spill] sm:$0xff] }
 0x3f7   : > { %v9826_v10 = vpop.eup %9825  ;;  %v13165_v3 = vpop.xlane.xlu1 %4194  ;;  %9843 = vpow2.f32 %v4546_v15  ;;  %v4568_v15 = vmul.f32 1.442695, %v4319_v47 }
 0x3f8   : > { %4794 = vadd.xlane.f32.xlu0 %v13159_v24  ;;  %v4665_v7 = vpop.xlane.xlu0 %4664  ;;  %v4911_v12 = vmul.f32 %v9826_v10, %v14517_v56  ;;  %v13171_v38 = vpop.eup %9827  ;;  %9373 = vmatpush3.bf16.msra.mxu0 %v9370_v26  ;;  %v4318_v10 = vsub.f32 %v14519_v35, %v13066_v37  ;;  %v10117_v37 = vld [vmem:[%s10335_s21 + $0x260] sm:$0xff] }
 0x3f9   : > { %14518 = vst [vmem:[#allocation129_spill] sm:$0xff] %v13171_v38  ;;  %9845 = vrcp.f32 %v4665_v7  ;;  %v13173_v54 = vpop.eup %9829  ;;  %9375 = vmatprep.subr.bf16.mxu0 %v9374_v32  ;;  %v14520_v7 = vld [vmem:[#allocation56_spill] sm:$0xff] }
 0x3fa   : > { %4816 = vadd.xlane.f32.xlu1 %v13171_v38  ;;  %5130 = vst [vmem:[%s12536_s23 + $0x120] sm:$0xff] %v4911_v12  ;;  %8676 = vmatprep.mubr.f32.mxu0 %v4911_v12  ;;  %9847 = vpow2.f32 %v4562_v52  ;;  %v4566_v40 = vmul.f32 1.442695, %v4318_v10 }
 0x3fb   : > { %v9832_v14 = vpop.eup %9831  ;;  %v4679_v56 = vpop.xlane.xlu1 %4678  ;;  %8677 = vmatmul.mubr.f32.gmra.mrb[212].mxu0 %v4913_v20  ;;  %9849 = vpow2.f32 %v4548_v6  ;;  %v10118_v20 = vld [vmem:[%s10335_s21 + $0x268] sm:$0xff] }
 0x3fc   : > { %4800 = vadd.xlane.f32.xlu0 %v13173_v54  ;;  %v4663_v26 = vpop.xlane.xlu0 %4662  ;;  %v4917_v12 = vmul.f32 %v9832_v14, %v14520_v7  ;;  %v13183_v38 = vpop.eup %9833  ;;  %9851 = vrcp.f32 %v4679_v56  ;;  %9377 = vmatpush3.bf16.msra.mxu0 %v9374_v32  ;;  %v9382_v47 = vpack.c.bf16 %v10118_v20, %v10117_v37  ;;  %v4321_v14 = vsub.f32 %v14523_v23, %v13078_v30  ;;  %v14524_v56 = vld [vmem:[#allocation18_spill] sm:$0xff]  ;;  %v10119_v30 = vld [vmem:[%s10335_s21 + $0x270] sm:$0xff] }
 0x3fd   : > { %14521 = vst [vmem:[#allocation130_spill] sm:$0xff] %v13183_v38  ;;  %v13185_v52 = vpop.eup %9835  ;;  %9853 = vrcp.f32 %v4663_v26  ;;  %9379 = vmatprep.subr.bf16.mxu0 %v9378_v43 }
 0x3fe   : > { %14522 = vst [vmem:[#allocation86_spill] sm:$0xff] %v13185_v52  ;;  %4814 = vadd.xlane.f32.xlu1 %v13183_v38  ;;  %5133 = vst [vmem:[%s12536_s23 + $0x138] sm:$0xff] %v4917_v12  ;;  %v9838_v6 = vpop.eup %9837  ;;  %9855 = vpow2.f32 %v4568_v15  ;;  %v14526_v15 = vld [vmem:[#allocation110_spill] sm:$0xff] }
 0x3ff   : > { %v4685_v32 = vpop.xlane.xlu1 %4684  ;;  %v9840_v35 = vpop.eup %9839  ;;  %v13194_v26 = vmul.f32 %v9838_v6, %v14524_v56  ;;  %v10120_v6 = vld [vmem:[%s10335_s21 + $0x278] sm:$0xff]  ;;  %v4572_v56 = vmul.f32 1.442695, %v4321_v14 }
 0x400   : > { %9857 = vrcp.f32 %v4685_v32  ;;  %4798 = vadd.xlane.f32.xlu0 %v13185_v52  ;;  %v4669_v7 = vpop.xlane.xlu0 %4668  ;;  %v13197_v37 = vpop.eup %9841  ;;  %v4915_v10 = vmul.f32 %v9840_v35, %v14526_v15  ;;  %9381 = vmatpush3.bf16.msra.mxu0 %v9378_v43  ;;  %v9386_v23 = vpack.c.bf16 %v10120_v6, %v10119_v30  ;;  %v14528_v52 = vld [vmem:[#allocation115_spill] sm:$0xff]  ;;  %v14532_v6 = vld [vmem:[#allocation64_spill] sm:$0xff] }
 0x401   : > { %14525 = vst [vmem:[#allocation87_spill] sm:$0xff] %v13197_v37  ;;  %9859 = vrcp.f32 %v4669_v7  ;;  %v13200_v20 = vpop.eup %9843  ;;  %5143 = vst [vmem:[%s12536_s23 + $0x188] sm:$0xff] %v13194_v26  ;;  %9383 = vmatprep.subr.bf16.mxu0 %v9382_v47  ;;  %v4320_v7 = vsub.f32 %v14528_v52, %v13092_v60  ;;  %v14529_v15 = vld [vmem:[#allocation11_spill] sm:$0xff] }
 0x402   : > { %14527 = vst [vmem:[#allocation27_spill] sm:$0xff] %v13200_v20  ;;  %4820 = vadd.xlane.f32.xlu1 %v13197_v37  ;;  %9861 = vpow2.f32 %v4566_v40  ;;  %5132 = vst [vmem:[%s12536_s23 + $0x130] sm:$0xff] %v4915_v10  ;;  %8679 = vmatprep.mubr.f32.mxu0 %v4915_v10 }
 0x403   : > { %v9846_v32 = vpop.eup %9845  ;;  %v4683_v43 = vpop.xlane.xlu1 %4682  ;;  %8680 = vmatmul.mubr.f32.gmra.mrb[214].mxu0 %v4917_v12  ;;  %v4570_v52 = vmul.f32 1.442695, %v4320_v7  ;;  %v14531_v12 = vld [vmem:[#allocation118_spill] sm:$0xff]  ;;  %v10121_v7 = vld [vmem:[%s10335_s21 + $0x290] sm:$0xff] }
 0x404   : > { %9863 = vrcp.f32 %v4683_v43  ;;  %4802 = vadd.xlane.f32.xlu0 %v13200_v20  ;;  %v4667_v35 = vpop.xlane.xlu0 %4666  ;;  %v4921_v37 = vmul.f32 %v9846_v32, %v14529_v15  ;;  %v13212_v38 = vpop.eup %9847  ;;  %9385 = vmatpush3.bf16.msra.mxu0 %v9382_v47  ;;  %v4323_v14 = vsub.f32 %v14531_v12, %v13104_v33  ;;  %v10122_v15 = vld [vmem:[%s10335_s21 + $0x298] sm:$0xff]  ;;  %v10123_v33 = vld [vmem:[%s10335_s21 + $0x300] sm:$0xff]  ;;  %v10124_v12 = vld [vmem:[%s10335_s21 + $0x308] sm:$0xff] }
 0x405   : > { %14530 = vst [vmem:[#allocation34_spill] sm:$0xff] %v13212_v38  ;;  %9865 = vrcp.f32 %v4667_v35  ;;  %v13214_v40 = vpop.eup %9849  ;;  %9387 = vmatprep.subr.bf16.mxu0 %v9386_v23  ;;  %v14533_v35 = vld [vmem:[#allocation19_spill] sm:$0xff]  ;;  %v13229_v20 = vpack.c.bf16 %v10124_v12, %v10123_v33  ;;  %v14538_v12 = vld [vmem:[#allocation124_spill] sm:$0xff] }
 0x406   : > { %4818 = vadd.xlane.f32.xlu1 %v13212_v38  ;;  %5135 = vst [vmem:[%s12536_s23 + $0x148] sm:$0xff] %v4921_v37  ;;  %v9852_v60 = vpop.eup %9851  ;;  %9867 = vpow2.f32 %v4572_v56  ;;  %v9394_v38 = vpack.c.bf16 %v10122_v15, %v10121_v7  ;;  %v14536_v15 = vld [vmem:[#allocation12_spill] sm:$0xff] }
 0x407   : > { %v4689_v10 = vpop.xlane.xlu1 %4688  ;;  %v9854_v30 = vpop.eup %9853  ;;  %v4935_v32 = vmul.f32 %v9852_v60, %v14532_v6 }
 0x408   : > { %9869 = vrcp.f32 %v4689_v10  ;;  %4804 = vadd.xlane.f32.xlu0 %v13214_v40  ;;  %v4673_v47 = vpop.xlane.xlu0 %4672  ;;  %v13222_v43 = vpop.eup %9855  ;;  %v4919_v56 = vmul.f32 %v9854_v30, %v14533_v35  ;;  %9389 = vmatpush3.bf16.msra.mxu0 %v9386_v23  ;;  %v14534_v30 = vld [vmem:[#allocation120_spill] sm:$0xff]  ;;  %v14535_v35 = vld [vmem:[#allocation5_spill] sm:$0xff] }
 0x409   : > { %9871 = vrcp.f32 %v4673_v47  ;;  %5142 = vst [vmem:[%s12536_s23 + $0x180] sm:$0xff] %v4935_v32  ;;  %8726 = vmatprep.mubr.f32.mxu1 %v4935_v32  ;;  %v4576_v47 = vmul.f32 1.442695, %v4323_v14  ;;  %v4322_v23 = vsub.f32 %v14534_v30, %v13120_v45  ;;  %v10125_v45 = vld [vmem:[%s10335_s21 + $0x2a0] sm:$0xff]  ;;  %v10126_v14 = vld [vmem:[%s10335_s21 + $0x2a8] sm:$0xff]  ;;  %9423 = vmatprep.subr.bf16.mxu0 %v13229_v20  ;;  %v14539_v30 = vld [vmem:[#allocation116_spill] sm:$0xff] }
 0x40a   : > { %v9858_v10 = vpop.eup %9857  ;;  %4824 = vadd.xlane.f32.xlu1 %v13222_v43  ;;  %9873 = vpow2.f32 %v4570_v52  ;;  %5134 = vst [vmem:[%s12536_s23 + $0x140] sm:$0xff] %v4919_v56  ;;  %8682 = vmatprep.mubr.f32.mxu0 %v4919_v56  ;;  %v9398_v56 = vpack.c.bf16 %v10126_v14, %v10125_v45 }
 0x40b   : > { %v9860_v60 = vpop.eup %9859  ;;  %8727 = vmatmul.mubr.f32.vlgmr.msra.gmra.mrb[208].mxu1 %v13194_v26  ;;  %v4687_v6 = vpop.xlane.xlu1 %4686  ;;  %v4941_v7 = vmul.f32 %v9858_v10, %v14535_v35  ;;  %8683 = vmatmul.mubr.f32.gmra.mrb[216].mxu0 %v4921_v37  ;;  %v4324_v10 = vsub.f32 %v14538_v12, %v13165_v3 }
 0x40c   : > { %9875 = vrcp.f32 %v4687_v6  ;;  %v4671_v32 = vpop.xlane.xlu0 %4670  ;;  %v4925_v33 = vmul.f32 %v9860_v60, %v14536_v15  ;;  %9393 = vmatpush3.bf16.msra.mxu1 %v12873_v39  ;;  %v13240_v52 = vpop.eup %9861  ;;  %v4574_v39 = vmul.f32 1.442695, %v4322_v23  ;;  %v10128_v23 = vld [vmem:[%s10335_s21 + $0x2b8] sm:$0xff] }
 0x40d   : > { %14537 = vst [vmem:[#allocation91_spill] sm:$0xff] %v13240_v52  ;;  %9877 = vrcp.f32 %v4671_v32  ;;  %5145 = vst [vmem:[%s12536_s23 + $0x198] sm:$0xff] %v4941_v7  ;;  %9395 = vmatprep.subr.bf16.mxu1 %v9394_v38  ;;  %v14540_v32 = vld [vmem:[#allocation20_spill] sm:$0xff] }
 0x40e   : > { %v9864_v26 = vpop.eup %9863  ;;  %4822 = vadd.xlane.f32.xlu1 %v13240_v52  ;;  %5137 = vst [vmem:[%s12536_s23 + $0x158] sm:$0xff] %v4925_v33  ;;  %9879 = vpow2.f32 %v4576_v47  ;;  %v10127_v47 = vld [vmem:[%s10335_s21 + $0x2b0] sm:$0xff] }
 0x40f   : > { %v9866_v37 = vpop.eup %9865  ;;  %v4693_v60 = vpop.xlane.xlu1 %4692  ;;  %v4939_v6 = vmul.f32 %v9864_v26, %v14539_v30  ;;  %v9402_v14 = vpack.c.bf16 %v10128_v23, %v10127_v47 }
 0x410   : > { %9881 = vrcp.f32 %v4693_v60  ;;  %v4677_v35 = vpop.xlane.xlu0 %4676  ;;  %v4923_v15 = vmul.f32 %v9866_v37, %v14540_v32  ;;  %9397 = vmatpush3.bf16.msra.mxu1 %v9394_v38  ;;  %v13252_v45 = vpop.eup %9867  ;;  %v14541_v38 = vld [vmem:[#allocation13_spill] sm:$0xff]  ;;  %v4578_v37 = vmul.f32 1.442695, %v4324_v10  ;;  %v14542_v60 = vld [vmem:[#allocation6_spill] sm:$0xff] }
 0x411   : > { %9883 = vrcp.f32 %v4677_v35  ;;  %5144 = vst [vmem:[%s12536_s23 + $0x190] sm:$0xff] %v4939_v6  ;;  %8729 = vmatprep.mubr.f32.mxu1 %v4939_v6  ;;  %9399 = vmatprep.subr.bf16.mxu1 %v9398_v56  ;;  %v4325_v26 = vsub.f32 %v14541_v38, %v13135_v49  ;;  %v14543_v35 = vld [vmem:[#allocation121_spill] sm:$0xff]  ;;  %v10130_v49 = vld [vmem:[%s10335_s21 + $0x2c8] sm:$0xff] }
 0x412   : > { %v9870_v52 = vpop.eup %9869  ;;  %4828 = vadd.xlane.f32.xlu1 %v13252_v45  ;;  %5136 = vst [vmem:[%s12536_s23 + $0x150] sm:$0xff] %v4923_v15  ;;  %8685 = vmatprep.mubr.f32.mxu0 %v4923_v15  ;;  %9885 = vpow2.f32 %v4574_v39  ;;  %v10129_v39 = vld [vmem:[%s10335_s21 + $0x2c0] sm:$0xff] }
 0x413   : > { %v9872_v3 = vpop.eup %9871  ;;  %8730 = vmatmul.mubr.f32.gmra.mrb[210].mxu1 %v4941_v7  ;;  %v4691_v12 = vpop.xlane.xlu1 %4690  ;;  %8686 = vmatmul.mubr.f32.gmra.mrb[218].mxu0 %v4925_v33  ;;  %v4945_v30 = vmul.f32 %v9870_v52, %v14542_v60  ;;  %v9406_v10 = vpack.c.bf16 %v10130_v49, %v10129_v39  ;;  %v4580_v52 = vmul.f32 1.442695, %v4325_v26 }
 0x414   : > { %9887 = vrcp.f32 %v4691_v12  ;;  %v4675_v6 = vpop.xlane.xlu0 %4674  ;;  %v4929_v32 = vmul.f32 %v9872_v3, %v14543_v35  ;;  %9401 = vmatpush3.bf16.msra.mxu1 %v9398_v56  ;;  %v13263_v15 = vpop.eup %9873  ;;  %v14544_v56 = vld [vmem:[#allocation61_spill] sm:$0xff]  ;;  %v14545_v3 = vld [vmem:[#allocation68_spill] sm:$0xff] }
 0x415   : > { %9889 = vrcp.f32 %v4675_v6  ;;  %5147 = vst [vmem:[%s12536_s23 + $0x1a8] sm:$0xff] %v4945_v30  ;;  %9403 = vmatprep.subr.bf16.mxu1 %v9402_v14  ;;  %v10131_v6 = vld [vmem:[%s10335_s21 + $0x2d0] sm:$0xff]  ;;  %v10132_v35 = vld [vmem:[%s10335_s21 + $0x2d8] sm:$0xff] }
 0x416   : > { %v9876_v7 = vpop.eup %9875  ;;  %4826 = vadd.xlane.f32.xlu1 %v13263_v15  ;;  %5139 = vst [vmem:[%s12536_s23 + $0x168] sm:$0xff] %v4929_v32  ;;  %9891 = vpow2.f32 %v4578_v37  ;;  %v9410_v39 = vpack.c.bf16 %v10132_v35, %v10131_v6  ;;  %v10136_v6 = vld [vmem:[%s10335_s21 + $0x2f8] sm:$0xff] }
 0x417   : > { %v9878_v33 = vpop.eup %9877  ;;  %v4697_v47 = vpop.xlane.xlu1 %4696  ;;  %v4943_v23 = vmul.f32 %v9876_v7, %v14544_v56  ;;  %v10133_v56 = vld [vmem:[%s10335_s21 + $0x2e0] sm:$0xff] }
 0x418   : > { %9893 = vrcp.f32 %v4697_v47  ;;  %v4927_v38 = vmul.f32 %v9878_v33, %v14545_v3  ;;  %9405 = vmatpush3.bf16.msra.mxu1 %v9402_v14  ;;  %v13272_v12 = vpop.eup %9879 }
 0x419   : > { %v4713_v60 = vpop.xlane.xlu0 %4712  ;;  %5146 = vst [vmem:[%s12536_s23 + $0x1a0] sm:$0xff] %v4943_v23  ;;  %8732 = vmatprep.mubr.f32.mxu1 %v4943_v23  ;;  %9407 = vmatprep.subr.bf16.mxu1 %v9406_v10  ;;  %v10134_v23 = vld [vmem:[%s10335_s21 + $0x2e8] sm:$0xff] }
 0x41a   : > { %v9882_v49 = vpop.eup %9881  ;;  %9895 = vrcp.f32 %v4713_v60  ;;  %4832 = vadd.xlane.f32.xlu1 %v13272_v12  ;;  %5138 = vst [vmem:[%s12536_s23 + $0x160] sm:$0xff] %v4927_v38  ;;  %8688 = vmatprep.mubr.f32.mxu0 %v4927_v38  ;;  %v9414_v3 = vpack.c.bf16 %v10134_v23, %v10133_v56  ;;  %v10135_v60 = vld [vmem:[%s10335_s21 + $0x2f0] sm:$0xff]  ;;  %v10137_v56 = vld [vmem:[%s10335_s21 + $0x380] sm:$0xff]  ;;  %v10138_v23 = vld [vmem:[%s10335_s21 + $0x388] sm:$0xff] }
 0x41b   : > { %v9884_v26 = vpop.eup %9883  ;;  %9897 = vpow2.f32 %v4580_v52  ;;  %8733 = vmatmul.mubr.f32.gmra.mrb[212].mxu1 %v4945_v30  ;;  %v4695_v14 = vpop.xlane.xlu1 %4694  ;;  %8689 = vmatmul.mubr.f32.gmra.mrb[220].mxu0 %v4929_v32  ;;  %v4949_v37 = vmul.f32 %v9882_v49, %v12661_v51  ;;  %v9418_v35 = vpack.c.bf16 %v10136_v6, %v10135_v60 }
 0x41c   : > { %9899 = vrcp.f32 %v4695_v14  ;;  %v4933_v7 = vmul.f32 %v9884_v26, %v12675_v19  ;;  %9409 = vmatpush3.bf16.msra.mxu1 %v9406_v10  ;;  %v13281_v33 = vpop.eup %9885 }
 0x41d   : > { %v4711_v47 = vpop.xlane.xlu0 %4710  ;;  %5149 = vst [vmem:[%s12536_s23 + $0x1b8] sm:$0xff] %v4949_v37  ;;  %9411 = vmatprep.subr.bf16.mxu1 %v9410_v39 }
 0x41e   : > { %v9888_v30 = vpop.eup %9887  ;;  %9901 = vrcp.f32 %v4711_v47  ;;  %4830 = vadd.xlane.f32.xlu1 %v13281_v33  ;;  %5141 = vst [vmem:[%s12536_s23 + $0x178] sm:$0xff] %v4933_v7 }
 0x41f   : > { %v9890_v51 = vpop.eup %9889  ;;  %v4701_v32 = vpop.xlane.xlu1 %4700  ;;  %v4947_v19 = vmul.f32 %v9888_v30, %v12690_v57  ;;  %v13304_v30 = vpack.c.bf16 %v10138_v23, %v10137_v56  ;;  %v14547_v23 = vld [vmem:[#allocation7_spill] sm:$0xff] }
 0x420   : > { %9903 = vrcp.f32 %v4701_v32  ;;  %v4931_v10 = vmul.f32 %v9890_v51, %v12693_v27  ;;  %9413 = vmatpush3.bf16.msra.mxu1 %v9410_v39  ;;  %v13290_v52 = vpop.eup %9891  ;;  %v14546_v51 = vld [vmem:[#allocation21_spill] sm:$0xff] }
 0x421   : > { %v4717_v38 = vpop.xlane.xlu0 %4716  ;;  %5148 = vst [vmem:[%s12536_s23 + $0x1b0] sm:$0xff] %v4947_v19  ;;  %8735 = vmatprep.mubr.f32.mxu1 %v4947_v19  ;;  %9415 = vmatprep.subr.bf16.mxu1 %v9414_v3 }
 0x422   : > { %v9894_v49 = vpop.eup %9893  ;;  %9905 = vrcp.f32 %v4717_v38  ;;  %4834 = vadd.xlane.f32.xlu1 %v13290_v52  ;;  %5140 = vst [vmem:[%s12536_s23 + $0x170] sm:$0xff] %v4931_v10  ;;  %8691 = vmatprep.mubr.f32.mxu0 %v4931_v10  ;;  %v10139_v10 = vld [vmem:[%s10335_s21 + $0x310] sm:$0xff]  ;;  %v10140_v38 = vld [vmem:[%s10335_s21 + $0x318] sm:$0xff] }
 0x423   : > { %8736 = vmatmul.mubr.f32.gmra.mrb[214].mxu1 %v4949_v37  ;;  %v4699_v57 = vpop.xlane.xlu1 %4698  ;;  %8692 = vmatmul.mubr.f32.gmra.mrb[222].mxu0 %v4933_v7  ;;  %v4953_v27 = vmul.f32 %v9894_v49, %v12695_v34  ;;  %v9426_v60 = vpack.c.bf16 %v10140_v38, %v10139_v10 }
 0x424   : > { %v9896_v39 = vpop.eup %9895  ;;  %9907 = vrcp.f32 %v4699_v57  ;;  %9417 = vmatpush3.bf16.msra.mxu1 %v9414_v3 }
 0x425   : > { %v13298_v26 = vpop.eup %9897  ;;  %v4969_v14 = vmul.f32 %v9896_v39, %v12707_v62  ;;  %v4715_v47 = vpop.xlane.xlu0 %4714  ;;  %5151 = vst [vmem:[%s12536_s23 + $0x1c8] sm:$0xff] %v4953_v27  ;;  %9419 = vmatprep.subr.bf16.mxu1 %v9418_v35  ;;  %v10141_v39 = vld [vmem:[%s10335_s21 + $0x320] sm:$0xff] }
 0x426   : > { %v9900_v37 = vpop.eup %9899  ;;  %9909 = vrcp.f32 %v4715_v47  ;;  %4836 = vadd.xlane.f32.xlu1 %v13298_v26  ;;  %v10142_v47 = vld [vmem:[%s10335_s21 + $0x328] sm:$0xff] }
 0x427   : > { %5159 = vst [vmem:[%s12536_s23 + $0x208] sm:$0xff] %v4969_v14  ;;  %v4705_v34 = vpop.xlane.xlu1 %4704  ;;  %v4951_v7 = vmul.f32 %v9900_v37, %v12722_v41  ;;  %v9430_v56 = vpack.c.bf16 %v10142_v47, %v10141_v39  ;;  %v10147_v39 = vld [vmem:[%s10335_s21 + $0x350] sm:$0xff]  ;;  %v10148_v47 = vld [vmem:[%s10335_s21 + $0x358] sm:$0xff] }
 0x428   : > { %v9902_v62 = vpop.eup %9901  ;;  %9911 = vrcp.f32 %v4705_v34  ;;  %9421 = vmatpush3.bf16.msra.mxu1 %v9418_v35 }
 0x429   : > { %v4721_v3 = vpop.xlane.xlu0 %4720  ;;  %5150 = vst [vmem:[%s12536_s23 + $0x1c0] sm:$0xff] %v4951_v7  ;;  %8738 = vmatprep.mubr.f32.mxu1 %v4951_v7  ;;  %v4967_v32 = vmul.f32 %v9902_v62, %v14546_v51  ;;  %9455 = vmatprep.subr.bf16.mxu1 %v13304_v30  ;;  %v10143_v7 = vld [vmem:[%s10335_s21 + $0x330] sm:$0xff]  ;;  %v10144_v62 = vld [vmem:[%s10335_s21 + $0x338] sm:$0xff] }
 0x42a   : > { %v9904_v19 = vpop.eup %9903  ;;  %9913 = vrcp.f32 %v4721_v3  ;;  %8739 = vmatmul.mubr.f32.gmra.mrb[216].mxu1 %v4953_v27  ;;  %v9434_v3 = vpack.c.bf16 %v10144_v62, %v10143_v7 }
 0x42b   : > { %5158 = vst [vmem:[%s12536_s23 + $0x200] sm:$0xff] %v4967_v32  ;;  %8782 = vmatprep.mubr.f32.mxu0 %v4967_v32  ;;  %v4703_v41 = vpop.xlane.xlu1 %4702  ;;  %v4957_v6 = vmul.f32 %v9904_v19, %v12744_v55 }
 0x42c   : > { %v9906_v35 = vpop.eup %9905  ;;  %9915 = vrcp.f32 %v4703_v41  ;;  %8783 = vmatmul.mubr.f32.vlgmr.msra.gmra.mrb[224].mxu0 %v4969_v14  ;;  %v10146_v41 = vld [vmem:[%s10335_s21 + $0x348] sm:$0xff] }
 0x42d   : > { %v4719_v49 = vpop.xlane.xlu0 %4718  ;;  %5153 = vst [vmem:[%s12536_s23 + $0x1d8] sm:$0xff] %v4957_v6  ;;  %v4973_v57 = vmul.f32 %v9906_v35, %v12750_v58  ;;  %9425 = vmatpush3.bf16.msra.mxu0 %v13229_v20 }
 0x42e   : > { %v9908_v27 = vpop.eup %9907  ;;  %9917 = vrcp.f32 %v4719_v49  ;;  %9427 = vmatprep.subr.bf16.mxu0 %v9426_v60 }
 0x42f   : > { %v4709_v55 = vpop.xlane.xlu1 %4708  ;;  %v4955_v37 = vmul.f32 %v9908_v27, %v14547_v23  ;;  %5161 = vst [vmem:[%s12536_s23 + $0x218] sm:$0xff] %v4973_v57 }
 0x430   : > { %v9910_v14 = vpop.eup %9909  ;;  %9919 = vrcp.f32 %v4709_v55 }
 0x431   : > { %v4725_v34 = vpop.xlane.xlu0 %4724  ;;  %5152 = vst [vmem:[%s12536_s23 + $0x1d0] sm:$0xff] %v4955_v37  ;;  %8741 = vmatprep.mubr.f32.mxu1 %v4955_v37  ;;  %v4971_v58 = vmul.f32 %v9910_v14, %v12765_v11  ;;  %9429 = vmatpush3.bf16.msra.mxu0 %v9426_v60  ;;  %v10145_v60 = vld [vmem:[%s10335_s21 + $0x340] sm:$0xff] }
 0x432   : > { %v9912_v20 = vpop.eup %9911  ;;  %9921 = vrcp.f32 %v4725_v34  ;;  %8742 = vmatmul.mubr.f32.gmra.mrb[218].mxu1 %v4957_v6  ;;  %9431 = vmatprep.subr.bf16.mxu0 %v9430_v56  ;;  %v9438_v6 = vpack.c.bf16 %v10146_v41, %v10145_v60  ;;  %v10150_v34 = vld [vmem:[%s10335_s21 + $0x368] sm:$0xff] }
 0x433   : > { %5160 = vst [vmem:[%s12536_s23 + $0x210] sm:$0xff] %v4971_v58  ;;  %8785 = vmatprep.mubr.f32.mxu0 %v4971_v58  ;;  %v4707_v51 = vpop.xlane.xlu1 %4706  ;;  %v4961_v32 = vmul.f32 %v9912_v20, %v12777_v18 }
 0x434   : > { %v9914_v19 = vpop.eup %9913  ;;  %9923 = vrcp.f32 %v4707_v51  ;;  %8786 = vmatmul.mubr.f32.gmra.mrb[226].mxu0 %v4973_v57 }
 0x435   : > { %v4723_v11 = vpop.xlane.xlu0 %4722  ;;  %5155 = vst [vmem:[%s12536_s23 + $0x1e8] sm:$0xff] %v4961_v32  ;;  %v4977_v10 = vmul.f32 %v9914_v19, %v12785_v42  ;;  %9433 = vmatpush3.bf16.msra.mxu0 %v9430_v56  ;;  %v9442_v56 = vpack.c.bf16 %v10148_v47, %v10147_v39 }
 0x436   : > { %v9916_v38 = vpop.eup %9915  ;;  %9925 = vrcp.f32 %v4723_v11  ;;  %9435 = vmatprep.subr.bf16.mxu0 %v9434_v3  ;;  %v10152_v11 = vld [vmem:[%s10335_s21 + $0x378] sm:$0xff] }
 0x437   : > { %v4745_v35 = vpop.xlane.xlu1 %4744  ;;  %v4959_v18 = vmul.f32 %v9916_v38, %v12799_v28  ;;  %5163 = vst [vmem:[%s12536_s23 + $0x228] sm:$0xff] %v4977_v10 }
 0x438   : > { %v9918_v49 = vpop.eup %9917  ;;  %9927 = vrcp.f32 %v4745_v35 }
 0x439   : > { %v4729_v57 = vpop.xlane.xlu0 %4728  ;;  %5154 = vst [vmem:[%s12536_s23 + $0x1e0] sm:$0xff] %v4959_v18  ;;  %8744 = vmatprep.mubr.f32.mxu1 %v4959_v18  ;;  %v4975_v42 = vmul.f32 %v9918_v49, %v12805_v48  ;;  %9437 = vmatpush3.bf16.msra.mxu0 %v9434_v3 }
 0x43a   : > { %v9920_v27 = vpop.eup %9919  ;;  %9929 = vrcp.f32 %v4729_v57  ;;  %8745 = vmatmul.mubr.f32.gmra.mrb[220].mxu1 %v4961_v32  ;;  %9439 = vmatprep.subr.bf16.mxu0 %v9438_v6 }
 0x43b   : > { %5162 = vst [vmem:[%s12536_s23 + $0x220] sm:$0xff] %v4975_v42  ;;  %8788 = vmatprep.mubr.f32.mxu0 %v4975_v42  ;;  %v4743_v28 = vpop.xlane.xlu1 %4742  ;;  %v4965_v55 = vmul.f32 %v9920_v27, %v12823_v21  ;;  %v10149_v21 = vld [vmem:[%s10335_s21 + $0x360] sm:$0xff]  ;;  %v10153_v27 = vld [vmem:[%s10335_s21 + $0x390] sm:$0xff] }
 0x43c   : > { %v9922_v23 = vpop.eup %9921  ;;  %9931 = vrcp.f32 %v4743_v28  ;;  %8789 = vmatmul.mubr.f32.gmra.mrb[228].mxu0 %v4977_v10  ;;  %v9446_v58 = vpack.c.bf16 %v10150_v34, %v10149_v21 }
 0x43d   : > { %v4727_v48 = vpop.xlane.xlu0 %4726  ;;  %5157 = vst [vmem:[%s12536_s23 + $0x1f8] sm:$0xff] %v4965_v55  ;;  %v4981_v37 = vmul.f32 %v9922_v23, %v12833_v36  ;;  %9441 = vmatpush3.bf16.msra.mxu0 %v9438_v6 }
 0x43e   : > { %v9924_v14 = vpop.eup %9923  ;;  %9933 = vrcp.f32 %v4727_v48  ;;  %9443 = vmatprep.subr.bf16.mxu0 %v9442_v56  ;;  %v8560_v20 = vpop.f32.mrb[192].mxu0  ;;  %v10155_v48 = vld [vmem:[%s10335_s21 + $0x3a0] sm:$0xff] }
 0x43f   : > { %v4749_v7 = vpop.xlane.xlu1 %4748  ;;  %v4963_v62 = vmul.f32 %v9924_v14, %v12842_v53  ;;  %5165 = vst [vmem:[%s12536_s23 + $0x238] sm:$0xff] %v4981_v37  ;;  %6383 = vst.msk [vmem:[%s13345_s9 + $0x8] sm:$0xff] %vm588_vm1, %v8560_v20  ;;  %v5288_v36 = vpop.f32.mrb[193].mxu0  ;;  %v10151_v53 = vld [vmem:[%s10335_s21 + $0x370] sm:$0xff] }
 0x440   : > { %v9926_v3 = vpop.eup %9925  ;;  %9935 = vrcp.f32 %v4749_v7  ;;  %6382 = vst.msk [vmem:[%s13345_s9] sm:$0xff] %vm588_vm1, %v5288_v36  ;;  %v9450_v10 = vpack.c.bf16 %v10152_v11, %v10151_v53  ;;  %v10159_v11 = vld [vmem:[%s10335_s21 + $0x3c0] sm:$0xff] }
 0x441   : > { %v4733_v51 = vpop.xlane.xlu0 %4732  ;;  %5156 = vst [vmem:[%s12536_s23 + $0x1f0] sm:$0xff] %v4963_v62  ;;  %8747 = vmatprep.mubr.f32.mxu1 %v4963_v62  ;;  %v4979_v32 = vmul.f32 %v9926_v3, %v12849_v46  ;;  %9445 = vmatpush3.bf16.msra.mxu0 %v9442_v56  ;;  %v10157_v62 = vld [vmem:[%s10335_s21 + $0x3b0] sm:$0xff] }
 0x442   : > { %v9928_v19 = vpop.eup %9927  ;;  %9937 = vrcp.f32 %v4733_v51  ;;  %8748 = vmatmul.mubr.f32.gmra.mrb[222].mxu1 %v4965_v55  ;;  %9447 = vmatprep.subr.bf16.mxu0 %v9446_v58 }
 0x443   : > { %v5001_v38 = vmul.f32 %v9928_v19, %v12858_v4  ;;  %5164 = vst [vmem:[%s12536_s23 + $0x230] sm:$0xff] %v4979_v32  ;;  %8791 = vmatprep.mubr.f32.mxu0 %v4979_v32  ;;  %v4747_v60 = vpop.xlane.xlu1 %4746 }
 0x444   : > { %v9930_v41 = vpop.eup %9929  ;;  %9939 = vrcp.f32 %v4747_v60  ;;  %8792 = vmatmul.mubr.f32.gmra.mrb[230].mxu0 %v4981_v37  ;;  %v14548_v60 = vld [vmem:[#allocation62_spill] sm:$0xff] }
 0x445   : > { %5175 = vst [vmem:[%s12536_s23 + $0x288] sm:$0xff] %v5001_v38  ;;  %v4731_v46 = vpop.xlane.xlu0 %4730  ;;  %v4985_v6 = vmul.f32 %v9930_v41, %v12865_v50  ;;  %9449 = vmatpush3.bf16.msra.mxu0 %v9446_v58  ;;  %v10154_v50 = vld [vmem:[%s10335_s21 + $0x398] sm:$0xff] }
 0x446   : > { %v9932_v35 = vpop.eup %9931  ;;  %9941 = vrcp.f32 %v4731_v46  ;;  %v8563_v18 = vpop.f32.mrb[194].mxu0  ;;  %9451 = vmatprep.subr.bf16.mxu0 %v9450_v10  ;;  %v9458_v39 = vpack.c.bf16 %v10154_v50, %v10153_v27 }
 0x447   : > { %6385 = vst.msk [vmem:[%s13345_s9 + $0x18] sm:$0xff] %vm588_vm1, %v8563_v18  ;;  %v4753_v4 = vpop.xlane.xlu1 %4752  ;;  %v5298_v49 = vpop.f32.mrb[195].mxu0  ;;  %v4999_v57 = vmul.f32 %v9932_v35, %v12878_v63  ;;  %5167 = vst [vmem:[%s12536_s23 + $0x248] sm:$0xff] %v4985_v6  ;;  %v14549_v35 = vld [vmem:[#allocation71_spill] sm:$0xff] }
 0x448   : > { %v9934_v42 = vpop.eup %9933  ;;  %9943 = vrcp.f32 %v4753_v4  ;;  %6384 = vst.msk [vmem:[%s13345_s9 + $0x10] sm:$0xff] %vm588_vm1, %v5298_v49 }
 0x449   : > { %v4737_v47 = vpop.xlane.xlu0 %4736  ;;  %5174 = vst [vmem:[%s12536_s23 + $0x280] sm:$0xff] %v4999_v57  ;;  %8838 = vmatprep.mubr.f32.mxu1 %v4999_v57  ;;  %v4983_v56 = vmul.f32 %v9934_v42, %v12886_v31  ;;  %9453 = vmatpush3.bf16.msra.mxu0 %v9450_v10  ;;  %v10156_v31 = vld [vmem:[%s10335_s21 + $0x3a8] sm:$0xff]  ;;  %v10161_v57 = vld [vmem:[%s10335_s21 + $0x3d0] sm:$0xff]  ;;  %v10162_v42 = vld [vmem:[%s10335_s21 + $0x3d8] sm:$0xff] }
 0x44a   : > { %v9936_v28 = vpop.eup %9935  ;;  %9945 = vrcp.f32 %v4737_v47  ;;  %8839 = vmatmul.mubr.f32.vlgmr.msra.gmra.mrb[224].mxu1 %v5001_v38  ;;  %v9462_v37 = vpack.c.bf16 %v10156_v31, %v10155_v48  ;;  %v10160_v10 = vld [vmem:[%s10335_s21 + $0x3c8] sm:$0xff]  ;;  %v9474_v27 = vpack.c.bf16 %v10162_v42, %v10161_v57 }
 0x44b   : > { %5166 = vst [vmem:[%s12536_s23 + $0x240] sm:$0xff] %v4983_v56  ;;  %8794 = vmatprep.mubr.f32.mxu0 %v4983_v56  ;;  %v4751_v63 = vpop.xlane.xlu1 %4750  ;;  %v5005_v55 = vmul.f32 %v9936_v28, %v12895_v8  ;;  %9457 = vmatpush3.bf16.msra.mxu1 %v13304_v30  ;;  %v9470_v38 = vpack.c.bf16 %v10160_v10, %v10159_v11  ;;  %v14550_v28 = vld [vmem:[#allocation22_spill] sm:$0xff] }
 0x44c   : > { %v9938_v23 = vpop.eup %9937  ;;  %9947 = vrcp.f32 %v4751_v63  ;;  %8795 = vmatmul.mubr.f32.gmra.mrb[232].mxu0 %v4985_v6  ;;  %9459 = vmatprep.subr.bf16.mxu1 %v9458_v39  ;;  %v10164_v48 = vld [vmem:[%s10335_s21 + $0x3e8] sm:$0xff] }
 0x44d   : > { %v4735_v14 = vpop.xlane.xlu0 %4734  ;;  %5177 = vst [vmem:[%s12536_s23 + $0x298] sm:$0xff] %v5005_v55  ;;  %v4989_v21 = vmul.f32 %v9938_v23, %v12902_v61  ;;  %v10158_v61 = vld [vmem:[%s10335_s21 + $0x3b8] sm:$0xff]  ;;  %v10163_v23 = vld [vmem:[%s10335_s21 + $0x3e0] sm:$0xff] }
 0x44e   : > { %v9940_v34 = vpop.eup %9939  ;;  %9949 = vrcp.f32 %v4735_v14  ;;  %v8566_v8 = vpop.f32.mrb[196].mxu0  ;;  %v9466_v3 = vpack.c.bf16 %v10158_v61, %v10157_v62  ;;  %v10165_v61 = vld [vmem:[%s10335_s21 + $0x3f0] sm:$0xff] }
 0x44f   : > { %6387 = vst.msk [vmem:[%s13345_s9 + $0x28] sm:$0xff] %vm588_vm1, %v8566_v8  ;;  %v4757_v30 = vpop.xlane.xlu1 %4756  ;;  %v5308_v58 = vpop.f32.mrb[197].mxu0  ;;  %v5003_v20 = vmul.f32 %v9940_v34, %v12911_v16  ;;  %5169 = vst [vmem:[%s12536_s23 + $0x258] sm:$0xff] %v4989_v21  ;;  %9461 = vmatpush3.bf16.msra.mxu1 %v9458_v39 }
 0x450   : > { %v9942_v7 = vpop.eup %9941  ;;  %9951 = vrcp.f32 %v4757_v30  ;;  %6386 = vst.msk [vmem:[%s13345_s9 + $0x20] sm:$0xff] %vm588_vm1, %v5308_v58  ;;  %9463 = vmatprep.subr.bf16.mxu1 %v9462_v37 }
 0x451   : > { %v4741_v36 = vpop.xlane.xlu0 %4740  ;;  %5176 = vst [vmem:[%s12536_s23 + $0x290] sm:$0xff] %v5003_v20  ;;  %8841 = vmatprep.mubr.f32.mxu1 %v5003_v20  ;;  %v4987_v51 = vmul.f32 %v9942_v7, %v12918_v1 }
 0x452   : > { %v9944_v32 = vpop.eup %9943  ;;  %9953 = vrcp.f32 %v4741_v36  ;;  %8842 = vmatmul.mubr.f32.gmra.mrb[226].mxu1 %v5005_v55 }
 0x453   : > { %5168 = vst [vmem:[%s12536_s23 + $0x250] sm:$0xff] %v4987_v51  ;;  %8797 = vmatprep.mubr.f32.mxu0 %v4987_v51  ;;  %v4755_v16 = vpop.xlane.xlu1 %4754  ;;  %v5009_v19 = vmul.f32 %v9944_v32, %v12929_v59  ;;  %9465 = vmatpush3.bf16.msra.mxu1 %v9462_v37  ;;  %v14551_v37 = vld [vmem:[#allocation14_spill] sm:$0xff] }
 0x454   : > { %v9946_v53 = vpop.eup %9945  ;;  %9955 = vrcp.f32 %v4755_v16  ;;  %8798 = vmatmul.mubr.f32.gmra.mrb[234].mxu0 %v4989_v21  ;;  %9467 = vmatprep.subr.bf16.mxu1 %v9466_v3 }
 0x455   : > { %v4739_v1 = vpop.xlane.xlu0 %4738  ;;  %5179 = vst [vmem:[%s12536_s23 + $0x2a8] sm:$0xff] %v5009_v19  ;;  %v4993_v41 = vmul.f32 %v9946_v53, %v14548_v60 }
 0x456   : > { %v9948_v46 = vpop.eup %9947  ;;  %9957 = vrcp.f32 %v4739_v1 }
 0x457   : > { %v8569_v59 = vpop.f32.mrb[198].mxu0  ;;  %v4761_v6 = vpop.xlane.xlu1 %4760  ;;  %v5007_v18 = vmul.f32 %v9948_v46, %v14549_v35  ;;  %5171 = vst [vmem:[%s12536_s23 + $0x268] sm:$0xff] %v4993_v41  ;;  %9469 = vmatpush3.bf16.msra.mxu1 %v9466_v3  ;;  %v10166_v3 = vld [vmem:[%s10335_s21 + $0x3f8] sm:$0xff] }
 0x458   : > { %v9950_v4 = vpop.eup %9949  ;;  %6389 = vst.msk [vmem:[%s13345_s9 + $0x38] sm:$0xff] %vm588_vm1, %v8569_v59  ;;  %9959 = vrcp.f32 %v4761_v6  ;;  %v5318_v49 = vpop.f32.mrb[199].mxu0  ;;  %9471 = vmatprep.subr.bf16.mxu1 %v9470_v38  ;;  %v9482_v36 = vpack.c.bf16 %v10166_v3, %v10165_v61  ;;  %v14559_v3 = vld [vmem:[#allocation16_spill] sm:$0xff] }
 0x459   : > { %6388 = vst.msk [vmem:[%s13345_s9 + $0x30] sm:$0xff] %vm588_vm1, %v5318_v49  ;;  %v4777_v50 = vpop.xlane.xlu0 %4776  ;;  %5178 = vst [vmem:[%s12536_s23 + $0x2a0] sm:$0xff] %v5007_v18  ;;  %8844 = vmatprep.mubr.f32.mxu1 %v5007_v18  ;;  %v4991_v39 = vmul.f32 %v9950_v4, %v12955_v13  ;;  %v9478_v13 = vpack.c.bf16 %v10164_v48, %v10163_v23  ;;  %v14555_v18 = vld [vmem:[#allocation63_spill] sm:$0xff] }
 0x45a   : > { %v9952_v47 = vpop.eup %9951  ;;  %9961 = vrcp.f32 %v4777_v50  ;;  %8845 = vmatmul.mubr.f32.gmra.mrb[228].mxu1 %v5009_v19  ;;  %v14553_v19 = vld [vmem:[#allocation23_spill] sm:$0xff] }
 0x45b   : > { %5170 = vst [vmem:[%s12536_s23 + $0x260] sm:$0xff] %v4991_v39  ;;  %8800 = vmatprep.mubr.f32.mxu0 %v4991_v39  ;;  %v4759_v56 = vpop.xlane.xlu1 %4758  ;;  %v5013_v63 = vmul.f32 %v9952_v47, %v14550_v28  ;;  %9473 = vmatpush3.bf16.msra.mxu1 %v9470_v38  ;;  %v14554_v38 = vld [vmem:[#allocation15_spill] sm:$0xff] }
 0x45c   : > { %v9954_v55 = vpop.eup %9953  ;;  %9963 = vrcp.f32 %v4759_v56  ;;  %8801 = vmatmul.mubr.f32.gmra.mrb[236].mxu0 %v4993_v41  ;;  %9475 = vmatprep.subr.bf16.mxu1 %v9474_v27 }
 0x45d   : > { %v4775_v31 = vpop.xlane.xlu0 %4774  ;;  %5181 = vst [vmem:[%s12536_s23 + $0x2b8] sm:$0xff] %v5013_v63  ;;  %v4997_v14 = vmul.f32 %v9954_v55, %v14551_v37  ;;  %v14557_v55 = vld [vmem:[#allocation9_spill] sm:$0xff] }
 0x45e   : > { %v9956_v21 = vpop.eup %9955  ;;  %9965 = vrcp.f32 %v4775_v31  ;;  %v8616_v34 = vpop.f32.mrb[192].mxu1 }
 0x45f   : > { %6399 = vst.msk [vmem:[%s13345_s9 + $0x88] sm:$0xff] %vm588_vm1, %v8616_v34  ;;  %v8572_v8 = vpop.f32.mrb[200].mxu0  ;;  %v5433_v30 = vpop.f32.mrb[193].mxu1  ;;  %v5011_v58 = vmul.f32 %v9956_v21, %v12982_v0  ;;  %5173 = vst [vmem:[%s12536_s23 + $0x278] sm:$0xff] %v4997_v14  ;;  %9477 = vmatpush3.bf16.msra.mxu1 %v9474_v27  ;;  %v14552_v0 = vld [vmem:[#allocation8_spill] sm:$0xff]  ;;  %v14556_v27 = vld [vmem:[#allocation74_spill] sm:$0xff] }
 0x460   : > { %v9958_v20 = vpop.eup %9957  ;;  %6391 = vst.msk [vmem:[%s13345_s9 + $0x48] sm:$0xff] %vm588_vm1, %v8572_v8  ;;  %6398 = vst.msk [vmem:[%s13345_s9 + $0x80] sm:$0xff] %vm588_vm1, %v5433_v30  ;;  %v4765_v7 = vpop.xlane.xlu1 %4764  ;;  %9479 = vmatprep.subr.bf16.mxu1 %v9478_v13  ;;  %v14558_v30 = vld [vmem:[#allocation77_spill] sm:$0xff] }
 0x461   : > { %v5328_v62 = vpop.f32.mrb[201].mxu0  ;;  %9967 = vrcp.f32 %v4765_v7  ;;  %v4781_v51 = vpop.xlane.xlu0 %4780  ;;  %5180 = vst [vmem:[%s12536_s23 + $0x2b0] sm:$0xff] %v5011_v58  ;;  %8847 = vmatprep.mubr.f32.mxu1 %v5011_v58  ;;  %v4995_v32 = vmul.f32 %v9958_v20, %v14552_v0 }
 0x462   : > { %6390 = vst.msk [vmem:[%s13345_s9 + $0x40] sm:$0xff] %vm588_vm1, %v5328_v62  ;;  %v9960_v16 = vpop.eup %9959  ;;  %9969 = vrcp.f32 %v4781_v51  ;;  %8848 = vmatmul.mubr.f32.gmra.mrb[230].mxu1 %v5013_v63 }
 0x463   : > { %5172 = vst [vmem:[%s12536_s23 + $0x270] sm:$0xff] %v4995_v32  ;;  %8803 = vmatprep.mubr.f32.mxu0 %v4995_v32  ;;  %v5017_v53 = vmul.f32 %v9960_v16, %v14553_v19  ;;  %9481 = vmatpush3.bf16.msra.mxu1 %v9478_v13 }
 0x464   : > { %v9962_v11 = vpop.eup %9961  ;;  %v4763_v10 = vpop.xlane.xlu1 %4762  ;;  %8804 = vmatmul.mubr.f32.gmra.mrb[238].mxu0 %v4997_v14  ;;  %9483 = vmatprep.subr.bf16.mxu1 %v9482_v36 }
 0x465   : > { %v5033_v1 = vmul.f32 %v9962_v11, %v14554_v38  ;;  %9971 = vrcp.f32 %v4763_v10  ;;  %v4779_v60 = vpop.xlane.xlu0 %4778  ;;  %5183 = vst [vmem:[%s12536_s23 + $0x2c8] sm:$0xff] %v5017_v53  ;;  %v14560_v11 = vld [vmem:[#allocation25_spill] sm:$0xff] }
 0x466   : > { %v9964_v41 = vpop.eup %9963  ;;  %9973 = vrcp.f32 %v4779_v60  ;;  %v8619_v46 = vpop.f32.mrb[194].mxu1 }
 0x467   : > { %v8575_v59 = vpop.f32.mrb[202].mxu0  ;;  %5191 = vst [vmem:[%s12536_s23 + $0x308] sm:$0xff] %v5033_v1  ;;  %6401 = vst.msk [vmem:[%s13345_s9 + $0x98] sm:$0xff] %vm588_vm1, %v8619_v46  ;;  %v5443_v6 = vpop.f32.mrb[195].mxu1  ;;  %v5015_v4 = vmul.f32 %v9964_v41, %v14555_v18  ;;  %9485 = vmatpush3.bf16.msra.mxu1 %v9482_v36 }
 0x468   : > { %6393 = vst.msk [vmem:[%s13345_s9 + $0x58] sm:$0xff] %vm588_vm1, %v8575_v59  ;;  %v5338_v35 = vpop.f32.mrb[203].mxu0  ;;  %v9966_v49 = vpop.eup %9965  ;;  %6400 = vst.msk [vmem:[%s13345_s9 + $0x90] sm:$0xff] %vm588_vm1, %v5443_v6  ;;  %v14562_v6 = vld [vmem:[#allocation65_spill] sm:$0xff] }
 0x469   : > { %v4769_v57 = vpop.xlane.xlu1 %4768  ;;  %6392 = vst.msk [vmem:[%s13345_s9 + $0x50] sm:$0xff] %vm588_vm1, %v5338_v35  ;;  %v4785_v42 = vpop.xlane.xlu0 %4784  ;;  %5182 = vst [vmem:[%s12536_s23 + $0x2c0] sm:$0xff] %v5015_v4  ;;  %8850 = vmatprep.mubr.f32.mxu1 %v5015_v4  ;;  %v5031_v50 = vmul.f32 %v9966_v49, %v14556_v27  ;;  %v14563_v49 = vld [vmem:[#allocation80_spill] sm:$0xff] }
 0x46a   : > { %9975 = vrcp.f32 %v4769_v57  ;;  %8851 = vmatmul.mubr.f32.gmra.mrb[232].mxu1 %v5017_v53 }
 0x46b   : > { %9977 = vrcp.f32 %v4785_v42  ;;  %v9968_v39 = vpop.eup %9967  ;;  %5190 = vst [vmem:[%s12536_s23 + $0x300] sm:$0xff] %v5031_v50  ;;  %8894 = vmatprep.mubr.f32.mxu0 %v5031_v50 }
 0x46c   : > { %v9970_v47 = vpop.eup %9969  ;;  %8895 = vmatmul.mubr.f32.vlgmr.msra.gmra.mrb[240].mxu0 %v5033_v1  ;;  %v5021_v28 = vmul.f32 %v9968_v39, %v13027_v9  ;;  %v14561_v1 = vld [vmem:[#allocation24_spill] sm:$0xff] }
 0x46d   : > { %v4767_v56 = vpop.xlane.xlu1 %4766  ;;  %v4783_v63 = vpop.xlane.xlu0 %4782  ;;  %v5037_v23 = vmul.f32 %v9970_v47, %v14557_v55  ;;  %v14564_v47 = vld [vmem:[#allocation33_spill] sm:$0xff] }
 0x46e   : > { %9979 = vrcp.f32 %v4767_v56  ;;  %v8622_v48 = vpop.f32.mrb[196].mxu1  ;;  %v8578_v13 = vpop.f32.mrb[204].mxu0  ;;  %5185 = vst [vmem:[%s12536_s23 + $0x2d8] sm:$0xff] %v5021_v28 }
 0x46f   : > { %9981 = vrcp.f32 %v4783_v63  ;;  %v9972_v31 = vpop.eup %9971  ;;  %6403 = vst.msk [vmem:[%s13345_s9 + $0xa8] sm:$0xff] %vm588_vm1, %v8622_v48  ;;  %6395 = vst.msk [vmem:[%s13345_s9 + $0x68] sm:$0xff] %vm588_vm1, %v8578_v13  ;;  %v5453_v37 = vpop.f32.mrb[197].mxu1  ;;  %v14565_v63 = vld [vmem:[#allocation17_spill] sm:$0xff] }
 0x470   : > { %v5348_v14 = vpop.f32.mrb[205].mxu0  ;;  %5193 = vst [vmem:[%s12536_s23 + $0x318] sm:$0xff] %v5037_v23  ;;  %v9974_v9 = vpop.eup %9973  ;;  %6402 = vst.msk [vmem:[%s13345_s9 + $0xa0] sm:$0xff] %vm588_vm1, %v5453_v37  ;;  %v5019_v34 = vmul.f32 %v9972_v31, %v13040_v17 }
 0x471   : > { %v4773_v21 = vpop.xlane.xlu1 %4772  ;;  %6394 = vst.msk [vmem:[%s13345_s9 + $0x60] sm:$0xff] %vm588_vm1, %v5348_v14  ;;  %v4789_v8 = vpop.xlane.xlu0 %4788  ;;  %v5035_v58 = vmul.f32 %v9974_v9, %v14558_v30  ;;  %v14566_v9 = vld [vmem:[#allocation83_spill] sm:$0xff] }
 0x472   : > { %9983 = vrcp.f32 %v4773_v21  ;;  %5184 = vst [vmem:[%s12536_s23 + $0x2d0] sm:$0xff] %v5019_v34  ;;  %8853 = vmatprep.mubr.f32.mxu1 %v5019_v34 }
 0x473   : > { %9985 = vrcp.f32 %v4789_v8  ;;  %8854 = vmatmul.mubr.f32.gmra.mrb[234].mxu1 %v5021_v28  ;;  %5192 = vst [vmem:[%s12536_s23 + $0x310] sm:$0xff] %v5035_v58  ;;  %8897 = vmatprep.mubr.f32.mxu0 %v5035_v58  ;;  %v14567_v58 = vld [vmem:[#allocation26_spill] sm:$0xff] }
 0x474   : > { %v9976_v20 = vpop.eup %9975  ;;  %8898 = vmatmul.mubr.f32.gmra.mrb[242].mxu0 %v5037_v23 }
 0x475   : > { %v9978_v7 = vpop.eup %9977  ;;  %v4771_v62 = vpop.xlane.xlu1 %4770  ;;  %v5025_v17 = vmul.f32 %v9976_v20, %v13059_v44 }
 0x476   : > { %9987 = vrcp.f32 %v4771_v62  ;;  %v4787_v61 = vpop.xlane.xlu0 %4786  ;;  %v5041_v36 = vmul.f32 %v9978_v7, %v14559_v3  ;;  %v8625_v51 = vpop.f32.mrb[198].mxu1 }
 0x477   : > { %9989 = vrcp.f32 %v4787_v61  ;;  %v8581_v0 = vpop.f32.mrb[206].mxu0  ;;  %5187 = vst [vmem:[%s12536_s23 + $0x2e8] sm:$0xff] %v5025_v17  ;;  %6405 = vst.msk [vmem:[%s13345_s9 + $0xb8] sm:$0xff] %vm588_vm1, %v8625_v51  ;;  %v5463_v16 = vpop.f32.mrb[199].mxu1 }
 0x478   : > { %v9980_v32 = vpop.eup %9979  ;;  %6397 = vst.msk [vmem:[%s13345_s9 + $0x78] sm:$0xff] %vm588_vm1, %v8581_v0  ;;  %v5358_v19 = vpop.f32.mrb[207].mxu0  ;;  %5195 = vst [vmem:[%s12536_s23 + $0x328] sm:$0xff] %v5041_v36 }
 0x479   : > { %v9982_v44 = vpop.eup %9981  ;;  %6404 = vst.msk [vmem:[%s13345_s9 + $0xb0] sm:$0xff] %vm588_vm1, %v5463_v16  ;;  %v4809_v53 = vpop.xlane.xlu1 %4808  ;;  %6396 = vst.msk [vmem:[%s13345_s9 + $0x70] sm:$0xff] %vm588_vm1, %v5358_v19  ;;  %v5023_v10 = vmul.f32 %v9980_v32, %v14560_v11 }
 0x47a   : > { %9991 = vrcp.f32 %v4809_v53  ;;  %v4793_v38 = vpop.xlane.xlu0 %4792  ;;  %v5039_v60 = vmul.f32 %v9982_v44, %v14561_v1  ;;  %v14568_v1 = vld [vmem:[#allocation129_spill] sm:$0xff] }
 0x47b   : > { %9993 = vrcp.f32 %v4793_v38  ;;  %5186 = vst [vmem:[%s12536_s23 + $0x2e0] sm:$0xff] %v5023_v10  ;;  %8856 = vmatprep.mubr.f32.mxu1 %v5023_v10 }
 0x47c   : > { %v9984_v41 = vpop.eup %9983  ;;  %8857 = vmatmul.mubr.f32.gmra.mrb[236].mxu1 %v5025_v17  ;;  %5194 = vst [vmem:[%s12536_s23 + $0x320] sm:$0xff] %v5039_v60  ;;  %8900 = vmatprep.mubr.f32.mxu0 %v5039_v60 }
 0x47d   : > { %v9986_v46 = vpop.eup %9985  ;;  %v4807_v59 = vpop.xlane.xlu1 %4806  ;;  %8901 = vmatmul.mubr.f32.gmra.mrb[244].mxu0 %v5041_v36  ;;  %v5029_v35 = vmul.f32 %v9984_v41, %v14562_v6 }
 0x47e   : > { %9995 = vrcp.f32 %v4807_v59  ;;  %v4791_v18 = vpop.xlane.xlu0 %4790  ;;  %v8628_v4 = vpop.f32.mrb[200].mxu1  ;;  %v5045_v57 = vmul.f32 %v9986_v46, %v14563_v49  ;;  %v14570_v49 = vld [vmem:[#allocation86_spill] sm:$0xff] }
 0x47f   : > { %9997 = vrcp.f32 %v4791_v18  ;;  %6407 = vst.msk [vmem:[%s13345_s9 + $0xc8] sm:$0xff] %vm588_vm1, %v8628_v4  ;;  %v5473_v42 = vpop.f32.mrb[201].mxu1  ;;  %5189 = vst [vmem:[%s12536_s23 + $0x2f8] sm:$0xff] %v5029_v35  ;;  %v14569_v18 = vld [vmem:[#allocation130_spill] sm:$0xff] }
 0x480   : > { %v9988_v27 = vpop.eup %9987  ;;  %6406 = vst.msk [vmem:[%s13345_s9 + $0xc0] sm:$0xff] %vm588_vm1, %v5473_v42  ;;  %5197 = vst [vmem:[%s12536_s23 + $0x338] sm:$0xff] %v5045_v57 }
 0x481   : > { %v9990_v50 = vpop.eup %9989  ;;  %v4813_v39 = vpop.xlane.xlu1 %4812  ;;  %v5027_v56 = vmul.f32 %v9988_v27, %v14564_v47  ;;  %v14572_v47 = vld [vmem:[#allocation27_spill] sm:$0xff] }
 0x482   : > { %9999 = vrcp.f32 %v4813_v39  ;;  %v4797_v28 = vpop.xlane.xlu0 %4796  ;;  %v5043_v55 = vmul.f32 %v9990_v50, %v14565_v63  ;;  %v14571_v50 = vld [vmem:[#allocation87_spill] sm:$0xff] }
 0x483   : > { %10001 = vrcp.f32 %v4797_v28  ;;  %5188 = vst [vmem:[%s12536_s23 + $0x2f0] sm:$0xff] %v5027_v56  ;;  %8859 = vmatprep.mubr.f32.mxu1 %v5027_v56 }
 0x484   : > { %v9992_v23 = vpop.eup %9991  ;;  %8860 = vmatmul.mubr.f32.gmra.mrb[238].mxu1 %v5029_v35  ;;  %5196 = vst [vmem:[%s12536_s23 + $0x330] sm:$0xff] %v5043_v55  ;;  %8903 = vmatprep.mubr.f32.mxu0 %v5043_v55 }
 0x485   : > { %v9994_v48 = vpop.eup %9993  ;;  %v5065_v13 = vmul.f32 %v9992_v23, %v13109_v22  ;;  %v4811_v31 = vpop.xlane.xlu1 %4810  ;;  %8904 = vmatmul.mubr.f32.gmra.mrb[246].mxu0 %v5045_v57  ;;  %v14573_v23 = vld [vmem:[#allocation34_spill] sm:$0xff] }
 0x486   : > { %10003 = vrcp.f32 %v4811_v31  ;;  %v4795_v37 = vpop.xlane.xlu0 %4794  ;;  %v8631_v14 = vpop.f32.mrb[202].mxu1  ;;  %v5049_v21 = vmul.f32 %v9994_v48, %v14566_v9 }
 0x487   : > { %5207 = vst [vmem:[%s12536_s23 + $0x388] sm:$0xff] %v5065_v13  ;;  %10005 = vrcp.f32 %v4795_v37  ;;  %6409 = vst.msk [vmem:[%s13345_s9 + $0xd8] sm:$0xff] %vm588_vm1, %v8631_v14  ;;  %v5483_v34 = vpop.f32.mrb[203].mxu1 }
 0x488   : > { %v9996_v8 = vpop.eup %9995  ;;  %6408 = vst.msk [vmem:[%s13345_s9 + $0xd0] sm:$0xff] %vm588_vm1, %v5483_v34  ;;  %5199 = vst [vmem:[%s12536_s23 + $0x348] sm:$0xff] %v5049_v21  ;;  %v14574_v34 = vld [vmem:[#allocation91_spill] sm:$0xff] }
 0x489   : > { %v9998_v30 = vpop.eup %9997  ;;  %v4817_v22 = vpop.xlane.xlu1 %4816  ;;  %v5063_v20 = vmul.f32 %v9996_v8, %v14567_v58 }
 0x48a   : > { %10007 = vrcp.f32 %v4817_v22  ;;  %v4801_v7 = vpop.xlane.xlu0 %4800  ;;  %v5047_v62 = vmul.f32 %v9998_v30, %v13129_v25 }
 0x48b   : > { %10009 = vrcp.f32 %v4801_v7  ;;  %5206 = vst [vmem:[%s12536_s23 + $0x380] sm:$0xff] %v5063_v20  ;;  %8950 = vmatprep.mubr.f32.mxu1 %v5063_v20 }
 0x48c   : > { %v10000_v17 = vpop.eup %9999  ;;  %5198 = vst [vmem:[%s12536_s23 + $0x340] sm:$0xff] %v5047_v62  ;;  %8906 = vmatprep.mubr.f32.mxu0 %v5047_v62  ;;  %8951 = vmatmul.mubr.f32.vlgmr.msra.gmra.mrb[240].mxu1 %v5065_v13 }
 0x48d   : > { %v10002_v61 = vpop.eup %10001  ;;  %v4815_v3 = vpop.xlane.xlu1 %4814  ;;  %8907 = vmatmul.mubr.f32.gmra.mrb[248].mxu0 %v5049_v21  ;;  %v5069_v36 = vmul.f32 %v10000_v17, %v13143_v2 }
 0x48e   : > { %10011 = vrcp.f32 %v4815_v3  ;;  %v4799_v51 = vpop.xlane.xlu0 %4798  ;;  %v8634_v0 = vpop.f32.mrb[204].mxu1  ;;  %v5053_v25 = vmul.f32 %v10002_v61, %v13145_v5 }
 0x48f   : > { %10013 = vrcp.f32 %v4799_v51  ;;  %6411 = vst.msk [vmem:[%s13345_s9 + $0xe8] sm:$0xff] %vm588_vm1, %v8634_v0  ;;  %v5493_v32 = vpop.f32.mrb[205].mxu1  ;;  %5209 = vst [vmem:[%s12536_s23 + $0x398] sm:$0xff] %v5069_v36 }
 0x490   : > { %v10004_v16 = vpop.eup %10003  ;;  %6410 = vst.msk [vmem:[%s13345_s9 + $0xe0] sm:$0xff] %vm588_vm1, %v5493_v32  ;;  %5201 = vst [vmem:[%s12536_s23 + $0x358] sm:$0xff] %v5053_v25 }
 0x491   : > { %v10006_v19 = vpop.eup %10005  ;;  %v4821_v44 = vpop.xlane.xlu1 %4820  ;;  %v5067_v2 = vmul.f32 %v10004_v16, %v13157_v29 }
 0x492   : > { %10015 = vrcp.f32 %v4821_v44  ;;  %v4803_v53 = vpop.xlane.xlu0 %4802  ;;  %v5051_v11 = vmul.f32 %v10006_v19, %v13159_v24 }
 0x493   : > { %10017 = vrcp.f32 %v4803_v53  ;;  %5208 = vst [vmem:[%s12536_s23 + $0x390] sm:$0xff] %v5067_v2  ;;  %8953 = vmatprep.mubr.f32.mxu1 %v5067_v2 }
 0x494   : > { %v10008_v5 = vpop.eup %10007  ;;  %5200 = vst [vmem:[%s12536_s23 + $0x350] sm:$0xff] %v5051_v11  ;;  %8909 = vmatprep.mubr.f32.mxu0 %v5051_v11  ;;  %8954 = vmatmul.mubr.f32.gmra.mrb[242].mxu1 %v5069_v36 }
 0x495   : > { %v10010_v10 = vpop.eup %10009  ;;  %v4819_v38 = vpop.xlane.xlu1 %4818  ;;  %8910 = vmatmul.mubr.f32.gmra.mrb[250].mxu0 %v5053_v25  ;;  %v5073_v29 = vmul.f32 %v10008_v5, %v14568_v1 }
 0x496   : > { %10019 = vrcp.f32 %v4819_v38  ;;  %v4805_v60 = vpop.xlane.xlu0 %4804  ;;  %v8637_v24 = vpop.f32.mrb[206].mxu1  ;;  %v5057_v41 = vmul.f32 %v10010_v10, %v13173_v54 }
 0x497   : > { %10021 = vrcp.f32 %v4805_v60  ;;  %6413 = vst.msk [vmem:[%s13345_s9 + $0xf8] sm:$0xff] %vm588_vm1, %v8637_v24  ;;  %v5503_v46 = vpop.f32.mrb[207].mxu1  ;;  %5211 = vst [vmem:[%s12536_s23 + $0x3a8] sm:$0xff] %v5073_v29 }
 0x498   : > { %v10012_v59 = vpop.eup %10011  ;;  %6412 = vst.msk [vmem:[%s13345_s9 + $0xf0] sm:$0xff] %vm588_vm1, %v5503_v46  ;;  %5203 = vst [vmem:[%s12536_s23 + $0x368] sm:$0xff] %v5057_v41 }
 0x499   : > { %v10014_v6 = vpop.eup %10013  ;;  %v4825_v35 = vpop.xlane.xlu1 %4824  ;;  %v5071_v4 = vmul.f32 %v10012_v59, %v14569_v18 }
 0x49a   : > { %10023 = vrcp.f32 %v4825_v35  ;;  %v5055_v57 = vmul.f32 %v10014_v6, %v14570_v49 }
 0x49b   : > { %5210 = vst [vmem:[%s12536_s23 + $0x3a0] sm:$0xff] %v5071_v4  ;;  %8956 = vmatprep.mubr.f32.mxu1 %v5071_v4 }
 0x49c   : > { %v10016_v54 = vpop.eup %10015  ;;  %5202 = vst [vmem:[%s12536_s23 + $0x360] sm:$0xff] %v5055_v57  ;;  %8912 = vmatprep.mubr.f32.mxu0 %v5055_v57  ;;  %8957 = vmatmul.mubr.f32.gmra.mrb[244].mxu1 %v5073_v29 }
 0x49d   : > { %v10018_v42 = vpop.eup %10017  ;;  %v4823_v27 = vpop.xlane.xlu1 %4822  ;;  %8913 = vmatmul.mubr.f32.gmra.mrb[252].mxu0 %v5057_v41  ;;  %v5077_v39 = vmul.f32 %v10016_v54, %v14571_v50 }
 0x49e   : > { %10025 = vrcp.f32 %v4823_v27  ;;  %v5059_v56 = vmul.f32 %v10018_v42, %v14572_v47 }
 0x49f   : > { %5213 = vst [vmem:[%s12536_s23 + $0x3b8] sm:$0xff] %v5077_v39 }
 0x4a0   : > { %v10020_v28 = vpop.eup %10019  ;;  %5204 = vst [vmem:[%s12536_s23 + $0x370] sm:$0xff] %v5059_v56  ;;  %8915 = vmatprep.mubr.f32.mxu0 %v5059_v56 }
 0x4a1   : > { %v10022_v63 = vpop.eup %10021  ;;  %v4829_v55 = vpop.xlane.xlu1 %4828  ;;  %v5075_v48 = vmul.f32 %v10020_v28, %v14573_v23 }
 0x4a2   : > { %10027 = vrcp.f32 %v4829_v55  ;;  %v5061_v13 = vmul.f32 %v10022_v63, %v13214_v40 }
 0x4a3   : > { %5212 = vst [vmem:[%s12536_s23 + $0x3b0] sm:$0xff] %v5075_v48  ;;  %8959 = vmatprep.mubr.f32.mxu1 %v5075_v48 }
 0x4a4   : > { %v10024_v31 = vpop.eup %10023  ;;  %5205 = vst [vmem:[%s12536_s23 + $0x378] sm:$0xff] %v5061_v13  ;;  %8916 = vmatmul.mubr.f32.gmra.mrb[254].mxu0 %v5061_v13  ;;  %8960 = vmatmul.mubr.f32.gmra.mrb[246].mxu1 %v5077_v39 }
 0x4a5   : > { %v4827_v37 = vpop.xlane.xlu1 %4826  ;;  %v5081_v14 = vmul.f32 %v10024_v31, %v13222_v43 }
 0x4a6   : > { %10029 = vrcp.f32 %v4827_v37 }
 0x4a7   : > { %5215 = vst [vmem:[%s12536_s23 + $0x3c8] sm:$0xff] %v5081_v14 }
 0x4a8   : > { %v10026_v9 = vpop.eup %10025 }
 0x4a9   : > { %v4833_v21 = vpop.xlane.xlu1 %4832  ;;  %v5079_v8 = vmul.f32 %v10026_v9, %v14574_v34 }
 0x4aa   : > { %10031 = vrcp.f32 %v4833_v21 }
 0x4ab   : > { %5214 = vst [vmem:[%s12536_s23 + $0x3c0] sm:$0xff] %v5079_v8  ;;  %8962 = vmatprep.mubr.f32.mxu1 %v5079_v8 }
 0x4ac   : > { %v10028_v40 = vpop.eup %10027  ;;  %8963 = vmatmul.mubr.f32.gmra.mrb[248].mxu1 %v5081_v14 }
 0x4ad   : > { %v4831_v30 = vpop.xlane.xlu1 %4830  ;;  %v5085_v22 = vmul.f32 %v10028_v40, %v13252_v45 }
 0x4ae   : > { %10033 = vrcp.f32 %v4831_v30 }
 0x4af   : > { %5217 = vst [vmem:[%s12536_s23 + $0x3d8] sm:$0xff] %v5085_v22 }
 0x4b0   : > { %v10030_v43 = vpop.eup %10029 }
 0x4b1   : > { %v4835_v58 = vpop.xlane.xlu1 %4834  ;;  %v5083_v20 = vmul.f32 %v10030_v43, %v13263_v15 }
 0x4b2   : > { %10035 = vrcp.f32 %v4835_v58 }
 0x4b3   : > { %5216 = vst [vmem:[%s12536_s23 + $0x3d0] sm:$0xff] %v5083_v20  ;;  %8965 = vmatprep.mubr.f32.mxu1 %v5083_v20 }
 0x4b4   : > { %v10032_v7 = vpop.eup %10031  ;;  %8966 = vmatmul.mubr.f32.gmra.mrb[250].mxu1 %v5085_v22 }
 0x4b5   : > { %v4837_v62 = vpop.xlane.xlu1 %4836  ;;  %v5089_v17 = vmul.f32 %v10032_v7, %v13272_v12 }
 0x4b6   : > { %10037 = vrcp.f32 %v4837_v62 }
 0x4b7   : > { %5219 = vst [vmem:[%s12536_s23 + $0x3e8] sm:$0xff] %v5089_v17 }
 0x4b8   : > { %v10034_v45 = vpop.eup %10033 }
 0x4b9   : > { %v5087_v61 = vmul.f32 %v10034_v45, %v13281_v33 }
 0x4bb   : > { %5218 = vst [vmem:[%s12536_s23 + $0x3e0] sm:$0xff] %v5087_v61  ;;  %8968 = vmatprep.mubr.f32.mxu1 %v5087_v61 }
 0x4bc   : > { %v10036_v15 = vpop.eup %10035  ;;  %8969 = vmatmul.mubr.f32.gmra.mrb[252].mxu1 %v5089_v17 }
 0x4bd   : > { %v5091_v3 = vmul.f32 %v10036_v15, %v13290_v52 }
 0x4be   : > { %v8672_v36 = vpop.f32.mrb[208].mxu0 }
 0x4bf   : > { %5220 = vst [vmem:[%s12536_s23 + $0x3f0] sm:$0xff] %v5091_v3  ;;  %8971 = vmatprep.mubr.f32.mxu1 %v5091_v3  ;;  %6415 = vst.msk [vmem:[%s13345_s9 + $0x108] sm:$0xff] %vm588_vm1, %v8672_v36  ;;  %v5578_v51 = vpop.f32.mrb[209].mxu0 }
 0x4c0   : > { %v10038_v12 = vpop.eup %10037  ;;  %6414 = vst.msk [vmem:[%s13345_s9 + $0x100] sm:$0xff] %vm588_vm1, %v5578_v51 }
 0x4c1   : > { %v5093_v33 = vmul.f32 %v10038_v12, %v13298_v26 }
 0x4c3   : > { %5221 = vst [vmem:[%s12536_s23 + $0x3f8] sm:$0xff] %v5093_v33  ;;  %8972 = vmatmul.mubr.f32.gmra.mrb[254].mxu1 %v5093_v33 }
 0x4c6   : > { %v8675_v0 = vpop.f32.mrb[210].mxu0 }
 0x4c7   : > { %6417 = vst.msk [vmem:[%s13345_s9 + $0x118] sm:$0xff] %vm588_vm1, %v8675_v0  ;;  %v5588_v52 = vpop.f32.mrb[211].mxu0 }
 0x4c8   : > { %6416 = vst.msk [vmem:[%s13345_s9 + $0x110] sm:$0xff] %vm588_vm1, %v5588_v52 }
 0x4ce   : > { %v8678_v25 = vpop.f32.mrb[212].mxu0 }
 0x4cf   : > { %6419 = vst.msk [vmem:[%s13345_s9 + $0x128] sm:$0xff] %vm588_vm1, %v8678_v25  ;;  %v5598_v32 = vpop.f32.mrb[213].mxu0 }
 0x4d0   : > { %6418 = vst.msk [vmem:[%s13345_s9 + $0x120] sm:$0xff] %vm588_vm1, %v5598_v32 }
 0x4d6   : > { %v8681_v26 = vpop.f32.mrb[214].mxu0 }
 0x4d7   : > { %6421 = vst.msk [vmem:[%s13345_s9 + $0x138] sm:$0xff] %vm588_vm1, %v8681_v26  ;;  %v5608_v16 = vpop.f32.mrb[215].mxu0 }
 0x4d8   : > { %6420 = vst.msk [vmem:[%s13345_s9 + $0x130] sm:$0xff] %vm588_vm1, %v5608_v16 }
 0x4de   : > { %v8728_v19 = vpop.f32.mrb[208].mxu1  ;;  %v8684_v44 = vpop.f32.mrb[216].mxu0 }
 0x4df   : > { %6431 = vst.msk [vmem:[%s13345_s9 + $0x188] sm:$0xff] %vm588_vm1, %v8728_v19  ;;  %v5723_v2 = vpop.f32.mrb[209].mxu1  ;;  %6423 = vst.msk [vmem:[%s13345_s9 + $0x148] sm:$0xff] %vm588_vm1, %v8684_v44  ;;  %v5618_v53 = vpop.f32.mrb[217].mxu0 }
 0x4e0   : > { %6430 = vst.msk [vmem:[%s13345_s9 + $0x180] sm:$0xff] %vm588_vm1, %v5723_v2  ;;  %6422 = vst.msk [vmem:[%s13345_s9 + $0x140] sm:$0xff] %vm588_vm1, %v5618_v53 }
 0x4e6   : > { %v8731_v11 = vpop.f32.mrb[210].mxu1  ;;  %v8687_v5 = vpop.f32.mrb[218].mxu0 }
 0x4e7   : > { %6433 = vst.msk [vmem:[%s13345_s9 + $0x198] sm:$0xff] %vm588_vm1, %v8731_v11  ;;  %6425 = vst.msk [vmem:[%s13345_s9 + $0x158] sm:$0xff] %vm588_vm1, %v8687_v5  ;;  %v5733_v10 = vpop.f32.mrb[211].mxu1  ;;  %v5628_v38 = vpop.f32.mrb[219].mxu0 }
 0x4e8   : > { %6432 = vst.msk [vmem:[%s13345_s9 + $0x190] sm:$0xff] %vm588_vm1, %v5733_v10  ;;  %6424 = vst.msk [vmem:[%s13345_s9 + $0x150] sm:$0xff] %vm588_vm1, %v5628_v38 }
 0x4ee   : > { %v8734_v1 = vpop.f32.mrb[212].mxu1  ;;  %v8690_v29 = vpop.f32.mrb[220].mxu0 }
 0x4ef   : > { %6435 = vst.msk [vmem:[%s13345_s9 + $0x1a8] sm:$0xff] %vm588_vm1, %v8734_v1  ;;  %6427 = vst.msk [vmem:[%s13345_s9 + $0x168] sm:$0xff] %vm588_vm1, %v8690_v29  ;;  %v5743_v60 = vpop.f32.mrb[213].mxu1  ;;  %v5638_v24 = vpop.f32.mrb[221].mxu0 }
 0x4f0   : > { %6434 = vst.msk [vmem:[%s13345_s9 + $0x1a0] sm:$0xff] %vm588_vm1, %v5743_v60  ;;  %6426 = vst.msk [vmem:[%s13345_s9 + $0x160] sm:$0xff] %vm588_vm1, %v5638_v24 }
 0x4f6   : > { %v8737_v41 = vpop.f32.mrb[214].mxu1  ;;  %v8693_v46 = vpop.f32.mrb[222].mxu0 }
 0x4f7   : > { %6437 = vst.msk [vmem:[%s13345_s9 + $0x1b8] sm:$0xff] %vm588_vm1, %v8737_v41  ;;  %6429 = vst.msk [vmem:[%s13345_s9 + $0x178] sm:$0xff] %vm588_vm1, %v8693_v46  ;;  %v5753_v59 = vpop.f32.mrb[215].mxu1  ;;  %v5648_v6 = vpop.f32.mrb[223].mxu0 }
 0x4f8   : > { %6436 = vst.msk [vmem:[%s13345_s9 + $0x1b0] sm:$0xff] %vm588_vm1, %v5753_v59  ;;  %6428 = vst.msk [vmem:[%s13345_s9 + $0x170] sm:$0xff] %vm588_vm1, %v5648_v6 }
 0x4fd   : > { %v8740_v35 = vpop.f32.mrb[216].mxu1 }
 0x4fe   : > { %6439 = vst.msk [vmem:[%s13345_s9 + $0x1c8] sm:$0xff] %vm588_vm1, %v8740_v35  ;;  %v5763_v18 = vpop.f32.mrb[217].mxu1 }
 0x4ff   : > { %6438 = vst.msk [vmem:[%s13345_s9 + $0x1c0] sm:$0xff] %vm588_vm1, %v5763_v18  ;;  %v8784_v4 = vpop.f32.mrb[224].mxu0 }
 0x500   : > { %6447 = vst.msk [vmem:[%s13345_s9 + $0x208] sm:$0xff] %vm588_vm1, %v8784_v4  ;;  %v5868_v49 = vpop.f32.mrb[225].mxu0 }
 0x501   : > { %6446 = vst.msk [vmem:[%s13345_s9 + $0x200] sm:$0xff] %vm588_vm1, %v5868_v49 }
 0x505   : > { %v8743_v57 = vpop.f32.mrb[218].mxu1 }
 0x506   : > { %6441 = vst.msk [vmem:[%s13345_s9 + $0x1d8] sm:$0xff] %vm588_vm1, %v8743_v57  ;;  %v5773_v54 = vpop.f32.mrb[219].mxu1 }
 0x507   : > { %6440 = vst.msk [vmem:[%s13345_s9 + $0x1d0] sm:$0xff] %vm588_vm1, %v5773_v54  ;;  %v8787_v42 = vpop.f32.mrb[226].mxu0 }
 0x508   : > { %6449 = vst.msk [vmem:[%s13345_s9 + $0x218] sm:$0xff] %vm588_vm1, %v8787_v42  ;;  %v5878_v27 = vpop.f32.mrb[227].mxu0 }
 0x509   : > { %6448 = vst.msk [vmem:[%s13345_s9 + $0x210] sm:$0xff] %vm588_vm1, %v5878_v27 }
 0x50d   : > { %v8746_v50 = vpop.f32.mrb[220].mxu1 }
 0x50e   : > { %6443 = vst.msk [vmem:[%s13345_s9 + $0x1e8] sm:$0xff] %vm588_vm1, %v8746_v50  ;;  %v5783_v39 = vpop.f32.mrb[221].mxu1 }
 0x50f   : > { %6442 = vst.msk [vmem:[%s13345_s9 + $0x1e0] sm:$0xff] %vm588_vm1, %v5783_v39  ;;  %v8790_v47 = vpop.f32.mrb[228].mxu0 }
 0x510   : > { %6451 = vst.msk [vmem:[%s13345_s9 + $0x228] sm:$0xff] %vm588_vm1, %v8790_v47  ;;  %v5888_v56 = vpop.f32.mrb[229].mxu0 }
 0x511   : > { %6450 = vst.msk [vmem:[%s13345_s9 + $0x220] sm:$0xff] %vm588_vm1, %v5888_v56 }
 0x515   : > { %v8749_v28 = vpop.f32.mrb[222].mxu1 }
 0x516   : > { %6445 = vst.msk [vmem:[%s13345_s9 + $0x1f8] sm:$0xff] %vm588_vm1, %v8749_v28  ;;  %v5793_v63 = vpop.f32.mrb[223].mxu1 }
 0x517   : > { %6444 = vst.msk [vmem:[%s13345_s9 + $0x1f0] sm:$0xff] %vm588_vm1, %v5793_v63  ;;  %v8793_v55 = vpop.f32.mrb[230].mxu0 }
 0x518   : > { %6453 = vst.msk [vmem:[%s13345_s9 + $0x238] sm:$0xff] %vm588_vm1, %v8793_v55  ;;  %v5898_v23 = vpop.f32.mrb[231].mxu0 }
 0x519   : > { %6452 = vst.msk [vmem:[%s13345_s9 + $0x230] sm:$0xff] %vm588_vm1, %v5898_v23 }
 0x51a   : > { %10180 = shalt.err (!%p10177_p3)
}
 0x51b   : > { %s10181_s20 = scalar_lea.hbm %s13631_s14, 16384  ;;  %s10185_s8 = scalar_lea.hbm %s13800_s7, 32768 }
 0x51c   : > { %p10182_p4 = scmp.ne.s32.totalorder %s13631_s14, %s10181_s20  ;;  %p10186_p9 = scmp.lt.u32.totalorder %s13631_s14, %s13800_s7 }
 0x51d   : > { %p10187_p10 = scmp.lt.u32.totalorder %s10185_s8, %s10181_s20  ;;  %p10189_p12 = scmp.lt.u32.totalorder %s10181_s20, %s13631_s14 }
 0x51e   : > { %p10183_p7 = pnand %p10182_p4, %p10312_p5 }
 0x51f   : > { %p10188_p11 = por %p10187_p10, %p10186_p9 }
 0x520   : > { %p10184_p8 = pneg %p10183_p7 }
 0x521   : > { %p10190_p13 = por %p10189_p12, %p10188_p11 }
 0x523   : > { %p10191_p0 = pnand %p10190_p13, %p10184_p8 }
 0x525   : > { %10194 = shalt.err (!%p10191_p0)
}
 0x526   : > { %s10232_s13 = smov 128   ;;  %s10233_s28 = smov 8   ;;  %v8840_v48 = vpop.f32.mrb[224].mxu1  ;;  %v8796_v31 = vpop.f32.mrb[232].mxu0 }
 0x527   : > { %9486 = dma.vmem_to_hbm [thread:$0]  (%p10312_p5), %s13636_s15, 16384, %s13631_s14, %s13640_s16, %s10232_s13, %s10232_s13, %s10233_s28   ;;  %v6013_v13 = vpop.f32.mrb[225].mxu1  ;;  %v5908_v37 = vpop.f32.mrb[233].mxu0 }
 0x528   : > { %6463 = vst.msk [vmem:[%s13345_s9 + $0x288] sm:$0xff] %vm588_vm1, %v8840_v48  ;;  %6462 = vst.msk [vmem:[%s13345_s9 + $0x280] sm:$0xff] %vm588_vm1, %v6013_v13  ;;  %v8843_v14 = vpop.f32.mrb[226].mxu1  ;;  %v8799_v21 = vpop.f32.mrb[234].mxu0 }
 0x529   : > { %6455 = vst.msk [vmem:[%s13345_s9 + $0x248] sm:$0xff] %vm588_vm1, %v8796_v31  ;;  %6454 = vst.msk [vmem:[%s13345_s9 + $0x240] sm:$0xff] %vm588_vm1, %v5908_v37  ;;  %v6023_v9 = vpop.f32.mrb[227].mxu1  ;;  %v5918_v34 = vpop.f32.mrb[235].mxu0 }
 0x52a   : > { %6465 = vst.msk [vmem:[%s13345_s9 + $0x298] sm:$0xff] %vm588_vm1, %v8843_v14  ;;  %6464 = vst.msk [vmem:[%s13345_s9 + $0x290] sm:$0xff] %vm588_vm1, %v6023_v9 }
 0x52b   : > { %6457 = vst.msk [vmem:[%s13345_s9 + $0x258] sm:$0xff] %vm588_vm1, %v8799_v21  ;;  %6456 = vst.msk [vmem:[%s13345_s9 + $0x250] sm:$0xff] %vm588_vm1, %v5918_v34 }
 0x52d   : > { %v8846_v8 = vpop.f32.mrb[228].mxu1 }
 0x52e   : > { %6467 = vst.msk [vmem:[%s13345_s9 + $0x2a8] sm:$0xff] %vm588_vm1, %v8846_v8  ;;  %v6033_v40 = vpop.f32.mrb[229].mxu1 }
 0x52f   : > { %v8802_v30 = vpop.f32.mrb[236].mxu0  ;;  %6466 = vst.msk [vmem:[%s13345_s9 + $0x2a0] sm:$0xff] %vm588_vm1, %v6033_v40 }
 0x530   : > { %6459 = vst.msk [vmem:[%s13345_s9 + $0x268] sm:$0xff] %vm588_vm1, %v8802_v30  ;;  %v5928_v22 = vpop.f32.mrb[237].mxu0 }
 0x531   : > { %6458 = vst.msk [vmem:[%s13345_s9 + $0x260] sm:$0xff] %vm588_vm1, %v5928_v22 }
 0x535   : > { %v8849_v43 = vpop.f32.mrb[230].mxu1 }
 0x536   : > { %6469 = vst.msk [vmem:[%s13345_s9 + $0x2b8] sm:$0xff] %vm588_vm1, %v8849_v43  ;;  %v6043_v58 = vpop.f32.mrb[231].mxu1 }
 0x537   : > { %v8805_v20 = vpop.f32.mrb[238].mxu0  ;;  %6468 = vst.msk [vmem:[%s13345_s9 + $0x2b0] sm:$0xff] %vm588_vm1, %v6043_v58 }
 0x538   : > { %6461 = vst.msk [vmem:[%s13345_s9 + $0x278] sm:$0xff] %vm588_vm1, %v8805_v20  ;;  %v5938_v7 = vpop.f32.mrb[239].mxu0 }
 0x539   : > { %6460 = vst.msk [vmem:[%s13345_s9 + $0x270] sm:$0xff] %vm588_vm1, %v5938_v7 }
 0x53d   : > { %v8852_v62 = vpop.f32.mrb[232].mxu1 }
 0x53e   : > { %6471 = vst.msk [vmem:[%s13345_s9 + $0x2c8] sm:$0xff] %vm588_vm1, %v8852_v62  ;;  %v6053_v17 = vpop.f32.mrb[233].mxu1 }
 0x53f   : > { %6470 = vst.msk [vmem:[%s13345_s9 + $0x2c0] sm:$0xff] %vm588_vm1, %v6053_v17  ;;  %v8896_v45 = vpop.f32.mrb[240].mxu0 }
 0x540   : > { %6479 = vst.msk [vmem:[%s13345_s9 + $0x308] sm:$0xff] %vm588_vm1, %v8896_v45  ;;  %v6158_v61 = vpop.f32.mrb[241].mxu0 }
 0x541   : > { %6478 = vst.msk [vmem:[%s13345_s9 + $0x300] sm:$0xff] %vm588_vm1, %v6158_v61 }
 0x546   : > { %v8855_v15 = vpop.f32.mrb[234].mxu1 }
 0x547   : > { %6473 = vst.msk [vmem:[%s13345_s9 + $0x2d8] sm:$0xff] %vm588_vm1, %v8855_v15  ;;  %v6063_v3 = vpop.f32.mrb[235].mxu1  ;;  %v8899_v12 = vpop.f32.mrb[242].mxu0 }
 0x548   : > { %6472 = vst.msk [vmem:[%s13345_s9 + $0x2d0] sm:$0xff] %vm588_vm1, %v6063_v3  ;;  %6481 = vst.msk [vmem:[%s13345_s9 + $0x318] sm:$0xff] %vm588_vm1, %v8899_v12  ;;  %v6168_v36 = vpop.f32.mrb[243].mxu0 }
 0x549   : > { %6480 = vst.msk [vmem:[%s13345_s9 + $0x310] sm:$0xff] %vm588_vm1, %v6168_v36 }
 0x54f   : > { %v8858_v51 = vpop.f32.mrb[236].mxu1 }
 0x550   : > { %6475 = vst.msk [vmem:[%s13345_s9 + $0x2e8] sm:$0xff] %vm588_vm1, %v8858_v51  ;;  %v6073_v33 = vpop.f32.mrb[237].mxu1  ;;  %v8902_v0 = vpop.f32.mrb[244].mxu0 }
 0x551   : > { %6474 = vst.msk [vmem:[%s13345_s9 + $0x2e0] sm:$0xff] %vm588_vm1, %v6073_v33  ;;  %6483 = vst.msk [vmem:[%s13345_s9 + $0x328] sm:$0xff] %vm588_vm1, %v8902_v0  ;;  %v6178_v52 = vpop.f32.mrb[245].mxu0 }
 0x552   : > { %6482 = vst.msk [vmem:[%s13345_s9 + $0x320] sm:$0xff] %vm588_vm1, %v6178_v52 }
 0x557   : > { %v8861_v25 = vpop.f32.mrb[238].mxu1 }
 0x558   : > { %6477 = vst.msk [vmem:[%s13345_s9 + $0x2f8] sm:$0xff] %vm588_vm1, %v8861_v25  ;;  %v6083_v32 = vpop.f32.mrb[239].mxu1  ;;  %v8905_v26 = vpop.f32.mrb[246].mxu0 }
 0x559   : > { %6476 = vst.msk [vmem:[%s13345_s9 + $0x2f0] sm:$0xff] %vm588_vm1, %v6083_v32  ;;  %6485 = vst.msk [vmem:[%s13345_s9 + $0x338] sm:$0xff] %vm588_vm1, %v8905_v26  ;;  %v6188_v16 = vpop.f32.mrb[247].mxu0 }
 0x55a   : > { %6484 = vst.msk [vmem:[%s13345_s9 + $0x330] sm:$0xff] %vm588_vm1, %v6188_v16 }
 0x55f   : > { %v8952_v19 = vpop.f32.mrb[240].mxu1 }
 0x560   : > { %6495 = vst.msk [vmem:[%s13345_s9 + $0x388] sm:$0xff] %vm588_vm1, %v8952_v19  ;;  %v8908_v44 = vpop.f32.mrb[248].mxu0  ;;  %v6303_v2 = vpop.f32.mrb[241].mxu1 }
 0x561   : > { %6487 = vst.msk [vmem:[%s13345_s9 + $0x348] sm:$0xff] %vm588_vm1, %v8908_v44  ;;  %6494 = vst.msk [vmem:[%s13345_s9 + $0x380] sm:$0xff] %vm588_vm1, %v6303_v2  ;;  %v6198_v53 = vpop.f32.mrb[249].mxu0 }
 0x562   : > { %6486 = vst.msk [vmem:[%s13345_s9 + $0x340] sm:$0xff] %vm588_vm1, %v6198_v53 }
 0x567   : > { %v8955_v11 = vpop.f32.mrb[242].mxu1 }
 0x568   : > { %6497 = vst.msk [vmem:[%s13345_s9 + $0x398] sm:$0xff] %vm588_vm1, %v8955_v11  ;;  %v8911_v5 = vpop.f32.mrb[250].mxu0  ;;  %v6313_v10 = vpop.f32.mrb[243].mxu1 }
 0x569   : > { %6489 = vst.msk [vmem:[%s13345_s9 + $0x358] sm:$0xff] %vm588_vm1, %v8911_v5  ;;  %6496 = vst.msk [vmem:[%s13345_s9 + $0x390] sm:$0xff] %vm588_vm1, %v6313_v10  ;;  %v6208_v38 = vpop.f32.mrb[251].mxu0 }
 0x56a   : > { %6488 = vst.msk [vmem:[%s13345_s9 + $0x350] sm:$0xff] %vm588_vm1, %v6208_v38 }
 0x56f   : > { %v8958_v1 = vpop.f32.mrb[244].mxu1 }
 0x570   : > { %6499 = vst.msk [vmem:[%s13345_s9 + $0x3a8] sm:$0xff] %vm588_vm1, %v8958_v1  ;;  %v8914_v29 = vpop.f32.mrb[252].mxu0  ;;  %v6323_v60 = vpop.f32.mrb[245].mxu1 }
 0x571   : > { %6491 = vst.msk [vmem:[%s13345_s9 + $0x368] sm:$0xff] %vm588_vm1, %v8914_v29  ;;  %6498 = vst.msk [vmem:[%s13345_s9 + $0x3a0] sm:$0xff] %vm588_vm1, %v6323_v60  ;;  %v6218_v24 = vpop.f32.mrb[253].mxu0 }
 0x572   : > { %6490 = vst.msk [vmem:[%s13345_s9 + $0x360] sm:$0xff] %vm588_vm1, %v6218_v24 }
 0x577   : > { %v8917_v41 = vpop.f32.mrb[254].mxu0  ;;  %v8961_v46 = vpop.f32.mrb[246].mxu1 }
 0x578   : > { %6493 = vst.msk [vmem:[%s13345_s9 + $0x378] sm:$0xff] %vm588_vm1, %v8917_v41  ;;  %6501 = vst.msk [vmem:[%s13345_s9 + $0x3b8] sm:$0xff] %vm588_vm1, %v8961_v46  ;;  %v6228_v59 = vpop.f32.mrb[255].mxu0  ;;  %v6333_v6 = vpop.f32.mrb[247].mxu1 }
 0x579   : > { %6492 = vst.msk [vmem:[%s13345_s9 + $0x370] sm:$0xff] %vm588_vm1, %v6228_v59  ;;  %6500 = vst.msk [vmem:[%s13345_s9 + $0x3b0] sm:$0xff] %vm588_vm1, %v6333_v6 }
 0x57f   : > { %v8964_v35 = vpop.f32.mrb[248].mxu1 }
 0x580   : > { %6503 = vst.msk [vmem:[%s13345_s9 + $0x3c8] sm:$0xff] %vm588_vm1, %v8964_v35  ;;  %v6343_v18 = vpop.f32.mrb[249].mxu1 }
 0x581   : > { %6502 = vst.msk [vmem:[%s13345_s9 + $0x3c0] sm:$0xff] %vm588_vm1, %v6343_v18 }
 0x587   : > { %v8967_v4 = vpop.f32.mrb[250].mxu1 }
 0x588   : > { %6505 = vst.msk [vmem:[%s13345_s9 + $0x3d8] sm:$0xff] %vm588_vm1, %v8967_v4  ;;  %v6353_v49 = vpop.f32.mrb[251].mxu1 }
 0x589   : > { %6504 = vst.msk [vmem:[%s13345_s9 + $0x3d0] sm:$0xff] %vm588_vm1, %v6353_v49 }
 0x58f   : > { %v8970_v57 = vpop.f32.mrb[252].mxu1 }
 0x590   : > { %6507 = vst.msk [vmem:[%s13345_s9 + $0x3e8] sm:$0xff] %vm588_vm1, %v8970_v57  ;;  %v6363_v54 = vpop.f32.mrb[253].mxu1 }
 0x591   : > { %6506 = vst.msk [vmem:[%s13345_s9 + $0x3e0] sm:$0xff] %vm588_vm1, %v6363_v54 }
 0x596   : > { %v8973_v42 = vpop.f32.mrb[254].mxu1 }
 0x597   : > { %6509 = vst.msk [vmem:[%s13345_s9 + $0x3f8] sm:$0xff] %vm588_vm1, %v8973_v42  ;;  %v6373_v27 = vpop.f32.mrb[255].mxu1 }
 0x598   : > { %6508 = vst.msk [vmem:[%s13345_s9 + $0x3f0] sm:$0xff] %vm588_vm1, %v6373_v27 }
 0x599 PF: > { %p9492_p5 = scmp.ge.s32.totalorder %s10229_s27, 2  ;;  %s6559_s11 = sand.u32 1, %s10217_s24  }
 0x59a   : > { %s6560_s14 = scalar_lea.sflag [#allocation3], %s6559_s11 }
 0x59b   : > { %p9489_p1 = pnand %p9492_p5, %p10316_p6 }
 0x59d   : > { %10212 = dma.done.wait (!%p9489_p1), %s6560_s14, 16384  }
 0x59e   : > { %10214 = vsyncadd (!%p9489_p1), %s6560_s14, 4294950912  ;;  %p18_p2 = scmp.ge.s32.totalorder %s10299_s30, 4   ;;  %s14575_s24 = smov %s10221_s25 }
 0x59f   : > { %s14576_s25 = smov %s10225_s26  ;;  %s14577_s26 = smov %s10310_s10 }
 0x5a0   : > { %s14578_s27 = smov %s10299_s30  ;;  %20 = sbr.rel (!%p18_p2) target bundleno = 3 (0x3), region = 94 }
 0x5a7   :  { %6565 = vsyncpa [#allocation3], 1 }
 0x5a8   :  { %6567 = vsyncpa [#allocation3 + $0x1], 1 }

</bundles_post_ra>
